<compile_context>
chip_gen: v7x
topology: tpu7x:2x2x1
jax: 0.10.0
libtpu: 0.0.40
codegen_flags: <defaults>
</compile_context>

<pallas_src>
import functools
import math

import jax
import jax.numpy as jnp
from jax.experimental import pallas as pl
from jax.experimental.pallas import tpu as pltpu

# bert-base-cased configuration
VOCAB = 28996
HIDDEN = 768
LAYERS = 12
HEADS = 12
HEAD_DIM = HIDDEN // HEADS
INTER = 3072
MAX_POS = 512
TYPE_VOCAB = 2
LN_EPS = 1e-12
NUM_LABELS = 22
FC_PAD = 128  # lane-dense padded classifier width

VMEM_LIMIT = 48 * 1024 * 1024  # fits v7x's 64 MiB physical VMEM with headroom


def _pick_tile(dim, target, mult=8):
    """Largest divisor of `dim` that is <= target and a multiple of `mult`."""
    if dim <= target:
        return dim
    for t in range(target - (target % mult) if target % mult else target, 0, -mult):
        if dim % t == 0:
            return t
    return dim


# --------------------------------------------------------------------------
# Pallas kernels
# --------------------------------------------------------------------------
def _linear_kernel(x_ref, w_ref, b_ref, o_ref, acc_ref, *, act):
    """Tiled y = act(x @ w + b). K is the innermost (reduction) grid axis."""
    @pl.when(pl.program_id(2) == 0)
    def _():
        acc_ref[...] = jnp.zeros_like(acc_ref)

    acc_ref[...] += jnp.dot(
        x_ref[...], w_ref[...], preferred_element_type=jnp.float32
    )

    @pl.when(pl.program_id(2) == pl.num_programs(2) - 1)
    def _():
        y = acc_ref[...] + b_ref[...].astype(jnp.float32)
        if act == "gelu":
            # TODO(synk): HF 'gelu' is the exact erf form; tanh approximation
            # used here (erf has no guaranteed Mosaic lowering).
            c = math.sqrt(2.0 / math.pi)
            y = 0.5 * y * (1.0 + jnp.tanh(c * (y + 0.044715 * y * y * y)))
        o_ref[...] = y.astype(o_ref.dtype)


def linear(x, w, b, act="none", out_dtype=jnp.bfloat16):
    """y = act(x @ w + b). x:(M,K) bf16, w:(K,N) bf16, b:(N,) f32 -> (M,N)."""
    M, K = x.shape
    N = w.shape[1]
    tm = _pick_tile(M, 256, 8)
    tn = _pick_tile(N, 768, 128)
    tk = _pick_tile(K, 768, 128)
    grid = (M // tm, N // tn, K // tk)
    return pl.pallas_call(
        functools.partial(_linear_kernel, act=act),
        grid=grid,
        in_specs=[
            pl.BlockSpec((tm, tk), lambda i, j, k: (i, k)),
            pl.BlockSpec((tk, tn), lambda i, j, k: (k, j)),
            pl.BlockSpec((1, tn), lambda i, j, k: (0, j)),
        ],
        out_specs=pl.BlockSpec((tm, tn), lambda i, j, k: (i, j)),
        out_shape=jax.ShapeDtypeStruct((M, N), out_dtype),
        scratch_shapes=[pltpu.VMEM((tm, tn), jnp.float32)],
        compiler_params=pltpu.CompilerParams(
            dimension_semantics=("parallel", "parallel", "arbitrary"),
            vmem_limit_bytes=VMEM_LIMIT,
        ),
    )(x, w, b.reshape(1, N))


def _ln_kernel(x_ref, *rest, has_res):
    if has_res:
        r_ref, g_ref, b_ref, o_ref = rest
        x = x_ref[...].astype(jnp.float32) + r_ref[...].astype(jnp.float32)
    else:
        g_ref, b_ref, o_ref = rest
        x = x_ref[...].astype(jnp.float32)
    mean = jnp.mean(x, axis=-1, keepdims=True)
    xc = x - mean
    var = jnp.mean(xc * xc, axis=-1, keepdims=True)
    inv = jax.lax.rsqrt(var + LN_EPS)
    o_ref[...] = (xc * inv * g_ref[...] + b_ref[...]).astype(o_ref.dtype)


def layernorm(x, gamma, beta, residual=None):
    """LayerNorm(x [+ residual]); row-tiled, f32 math, bf16 output."""
    M, H = x.shape
    tm = _pick_tile(M, 512, 8)
    grid = (M // tm,)
    args = [x]
    in_specs = [pl.BlockSpec((tm, H), lambda i: (i, 0))]
    if residual is not None:
        args.append(residual)
        in_specs.append(pl.BlockSpec((tm, H), lambda i: (i, 0)))
    args += [gamma.reshape(1, H), beta.reshape(1, H)]
    in_specs += [
        pl.BlockSpec((1, H), lambda i: (0, 0)),
        pl.BlockSpec((1, H), lambda i: (0, 0)),
    ]
    return pl.pallas_call(
        functools.partial(_ln_kernel, has_res=residual is not None),
        grid=grid,
        in_specs=in_specs,
        out_specs=pl.BlockSpec((tm, H), lambda i: (i, 0)),
        out_shape=jax.ShapeDtypeStruct((M, H), jnp.bfloat16),
        compiler_params=pltpu.CompilerParams(
            dimension_semantics=("parallel",),
            vmem_limit_bytes=VMEM_LIMIT,
        ),
    )(*args)


def _attention_kernel(q_ref, k_ref, v_ref, m_ref, o_ref, *, scale):
    q = q_ref[...]  # (G, S, D) bf16
    k = k_ref[...]
    v = v_ref[...]
    s = jnp.einsum("bqd,bkd->bqk", q, k, preferred_element_type=jnp.float32)
    s = s * scale + m_ref[...][:, None, :]  # additive mask (G, S) over keys
    s = s - jnp.max(s, axis=-1, keepdims=True)
    p = jnp.exp(s)
    denom = jnp.sum(p, axis=-1, keepdims=True)
    p = p * pl.reciprocal(denom, approx=True)
    o_ref[...] = jnp.einsum(
        "bqk,bkd->bqd", p.astype(v.dtype), v, preferred_element_type=jnp.float32
    ).astype(o_ref.dtype)


def attention(q, k, v, add_mask):
    """q,k,v: (B*H, S, D) bf16; add_mask: (B*H, S) f32 additive key mask."""
    # TODO(synk): for long sequences (S >= 256) switch to flash-style kv tiling
    # with online softmax; full (G,S,S) scores are fine at the sizes used here.
    BH, S, D = q.shape
    g = _pick_tile(BH, 8, 1)
    grid = (BH // g,)
    return pl.pallas_call(
        functools.partial(_attention_kernel, scale=1.0 / math.sqrt(HEAD_DIM)),
        grid=grid,
        in_specs=[
            pl.BlockSpec((g, S, D), lambda b: (b, 0, 0)),
            pl.BlockSpec((g, S, D), lambda b: (b, 0, 0)),
            pl.BlockSpec((g, S, D), lambda b: (b, 0, 0)),
            pl.BlockSpec((g, S), lambda b: (b, 0)),
        ],
        out_specs=pl.BlockSpec((g, S, D), lambda b: (b, 0, 0)),
        out_shape=jax.ShapeDtypeStruct((BH, S, D), jnp.bfloat16),
        compiler_params=pltpu.CompilerParams(
            dimension_semantics=("parallel",),
            vmem_limit_bytes=VMEM_LIMIT,
        ),
    )(q, k, v, add_mask)


# --------------------------------------------------------------------------
# Model (glue in plain JAX, compute in Pallas kernels above)
# --------------------------------------------------------------------------
def bert_encoder(params, input_ids, attention_mask):
    B, S = input_ids.shape
    M = B * S

    emb = (
        jnp.take(params["word_emb"], input_ids, axis=0).astype(jnp.float32)
        + params["pos_emb"][:S][None, :, :].astype(jnp.float32)
        + params["type_emb"][0][None, None, :].astype(jnp.float32)  # token_type 0
    )
    x = layernorm(emb.reshape(M, HIDDEN), params["emb_ln_g"], params["emb_ln_b"])
    # embedding dropout p=0.1 -> identity in eval mode

    ext_mask = (1.0 - attention_mask.astype(jnp.float32)) * -10000.0  # (B, S)
    mask = jnp.broadcast_to(ext_mask[:, None, :], (B, HEADS, S)).reshape(B * HEADS, S)

    for layer in params["layers"]:
        # fused Q/K/V projection: (M, 768) @ (768, 2304)
        qkv = linear(x, layer["wqkv"], layer["bqkv"])
        qkv = (
            qkv.reshape(B, S, 3, HEADS, HEAD_DIM)
            .transpose(2, 0, 3, 1, 4)
            .reshape(3, B * HEADS, S, HEAD_DIM)
        )
        ctx = attention(qkv[0], qkv[1], qkv[2], mask)
        ctx = (
            ctx.reshape(B, HEADS, S, HEAD_DIM)
            .transpose(0, 2, 1, 3)
            .reshape(M, HIDDEN)
        )
        attn_out = linear(ctx, layer["wo"], layer["bo"])  # attn dropout: identity
        x = layernorm(attn_out, layer["ln1_g"], layer["ln1_b"], residual=x)
        h = linear(x, layer["wi"], layer["bi"], act="gelu")
        h = linear(h, layer["wd"], layer["bd"])  # ffn dropout: identity
        x = layernorm(h, layer["ln2_g"], layer["ln2_b"], residual=x)
    return x  # (B*S, HIDDEN) bf16 == last_hidden_state flattened


def model_forward(params, input_ids, attention_mask):
    B, S = input_ids.shape
    h = bert_encoder(params, input_ids, attention_mask)
    # nn.Dropout(p=0.1) -> identity in eval mode
    # classifier: pad 22 -> 128 output lanes (lane-dense stores), slice in JAX
    fcw = jnp.pad(
        params["fc_w"].astype(jnp.float32), ((0, 0), (0, FC_PAD - NUM_LABELS))
    ).astype(jnp.bfloat16)
    fcb = jnp.pad(params["fc_b"], (0, FC_PAD - NUM_LABELS))
    logits = linear(h, fcw, fcb, out_dtype=jnp.float32)[:, :NUM_LABELS]
    return logits.reshape(B, S, NUM_LABELS)


# --------------------------------------------------------------------------
# Deterministic parameter init (shapes match bert-base-cased + Linear(768, 22))
# Weights stored in bf16 (MXU dtype); biases / LN params in f32.
# --------------------------------------------------------------------------
def init_params(key):
    keys = iter(jax.random.split(key, 128))

    def nrm(shape):
        return (0.02 * jax.random.normal(next(keys), shape, jnp.float32)).astype(
            jnp.bfloat16
        )

    ones = lambda n: jnp.ones((n,), jnp.float32)
    zeros = lambda n: jnp.zeros((n,), jnp.float32)

    params = {
        "word_emb": nrm((VOCAB, HIDDEN)),
        "pos_emb": nrm((MAX_POS, HIDDEN)),
        "type_emb": nrm((TYPE_VOCAB, HIDDEN)),
        "emb_ln_g": ones(HIDDEN),
        "emb_ln_b": zeros(HIDDEN),
        "fc_w": nrm((HIDDEN, NUM_LABELS)),
        "fc_b": zeros(NUM_LABELS),
        "layers": [],
    }
    for _ in range(LAYERS):
        params["layers"].append(
            {
                # fused q|k|v weight (768, 2304) and bias (2304,)
                "wqkv": nrm((HIDDEN, 3 * HIDDEN)),
                "bqkv": zeros(3 * HIDDEN),
                "wo": nrm((HIDDEN, HIDDEN)), "bo": zeros(HIDDEN),
                "ln1_g": ones(HIDDEN), "ln1_b": zeros(HIDDEN),
                "wi": nrm((HIDDEN, INTER)), "bi": zeros(INTER),
                "wd": nrm((INTER, HIDDEN)), "bd": zeros(HIDDEN),
                "ln2_g": ones(HIDDEN), "ln2_b": zeros(HIDDEN),
            }
        )
    return params


if __name__ == "__main__":
    key = jax.random.PRNGKey(0)
    pkey, ikey = jax.random.split(key)
    params = init_params(pkey)

    B, S = 2, 8
    input_ids = jax.random.randint(ikey, (B, S), 0, VOCAB, dtype=jnp.int32)
    attention_mask = jnp.ones((B, S), dtype=jnp.int32).at[1, 6:].set(0)  # pad tail

    out = jax.jit(model_forward)(params, input_ids, attention_mask)
    out = jax.block_until_ready(out)
    assert out.shape == (B, S, NUM_LABELS) and out.dtype == jnp.float32
    print("KERNEL_OK")
</pallas_src>

<mosaic_0001>
module attributes {stable_mosaic.version = 11 : i64} {
  func.func @_ln_kernel(%arg0: i32, %arg1: memref<16x768xf32, #tpu.memory_space<vmem>>, %arg2: memref<1x768xf32, #tpu.memory_space<vmem>>, %arg3: memref<1x768xf32, #tpu.memory_space<vmem>>, %arg4: memref<16x768xbf16, #tpu.memory_space<vmem>>) attributes {dimension_semantics = [#tpu.dimension_semantics<parallel>], iteration_bounds = array<i64: 1>, scalar_prefetch = 0 : i64, scratch_operands = 0 : i64, tpu.core_type = #tpu.core_type<tc>, window_params = [{transform_indices = @transform_0, window_bounds = array<i64: 16, 768>}, {pipeline_mode = #tpu.pipeline_mode<synchronous>, transform_indices = @transform_1, window_bounds = array<i64: 1, 768>}, {pipeline_mode = #tpu.pipeline_mode<synchronous>, transform_indices = @transform_2, window_bounds = array<i64: 1, 768>}, {transform_indices = @transform_3, window_bounds = array<i64: 16, 768>}]} {
    %c0 = arith.constant 0 : index
    %c0_0 = arith.constant 0 : index
    %0 = vector.load %arg1[%c0, %c0_0] : memref<16x768xf32, #tpu.memory_space<vmem>>, vector<16x768xf32>
    %cst = arith.constant dense<0.000000e+00> : vector<16xf32>
    %1 = vector.multi_reduction <add>, %0, %cst [1] : vector<16x768xf32> to vector<16xf32>
    %2 = vector.shape_cast %1 : vector<16xf32> to vector<16x1xf32>
    %cst_1 = arith.constant 7.680000e+02 : f32
    %3 = vector.broadcast %cst_1 : f32 to vector<16x1xf32>
    %4 = arith.divf %2, %3 : vector<16x1xf32>
    %5 = vector.broadcast %4 : vector<16x1xf32> to vector<16x768xf32>
    %6 = arith.subf %0, %5 : vector<16x768xf32>
    %7 = arith.mulf %6, %6 : vector<16x768xf32>
    %cst_2 = arith.constant dense<0.000000e+00> : vector<16xf32>
    %8 = vector.multi_reduction <add>, %7, %cst_2 [1] : vector<16x768xf32> to vector<16xf32>
    %9 = vector.shape_cast %8 : vector<16xf32> to vector<16x1xf32>
    %cst_3 = arith.constant 7.680000e+02 : f32
    %10 = vector.broadcast %cst_3 : f32 to vector<16x1xf32>
    %11 = arith.divf %9, %10 : vector<16x1xf32>
    %cst_4 = arith.constant 9.99999996E-13 : f32
    %12 = vector.broadcast %cst_4 : f32 to vector<16x1xf32>
    %13 = arith.addf %11, %12 : vector<16x1xf32>
    %14 = math.rsqrt %13 : vector<16x1xf32>
    %15 = vector.broadcast %14 : vector<16x1xf32> to vector<16x768xf32>
    %16 = arith.mulf %6, %15 : vector<16x768xf32>
    %c0_5 = arith.constant 0 : index
    %c0_6 = arith.constant 0 : index
    %17 = vector.load %arg2[%c0_5, %c0_6] : memref<1x768xf32, #tpu.memory_space<vmem>>, vector<1x768xf32>
    %18 = vector.broadcast %17 : vector<1x768xf32> to vector<16x768xf32>
    %19 = arith.mulf %16, %18 : vector<16x768xf32>
    %c0_7 = arith.constant 0 : index
    %c0_8 = arith.constant 0 : index
    %20 = vector.load %arg3[%c0_7, %c0_8] : memref<1x768xf32, #tpu.memory_space<vmem>>, vector<1x768xf32>
    %21 = vector.broadcast %20 : vector<1x768xf32> to vector<16x768xf32>
    %22 = arith.addf %19, %21 : vector<16x768xf32>
    %23 = arith.truncf %22 : vector<16x768xf32> to vector<16x768xbf16>
    %c0_9 = arith.constant 0 : index
    %c0_10 = arith.constant 0 : index
    %24 = vector.load %arg4[%c0_9, %c0_10] : memref<16x768xbf16, #tpu.memory_space<vmem>>, vector<16x768xbf16>
    tpu.vector_store %arg4[%c0_9, %c0_10], %23 {strides = array<i32>} : memref<16x768xbf16, #tpu.memory_space<vmem>>, vector<16x768xbf16>,
    return
  }
  func.func @transform_0(%arg0: i32) -> (i32, i32) {
    %c0_i32 = arith.constant 0 : i32
    %c0_i32_0 = arith.constant 0 : i32
    return %arg0, %c0_i32 : i32, i32
  }
  func.func @transform_1(%arg0: i32) -> (i32, i32) {
    %c0_i32 = arith.constant 0 : i32
    %c0_i32_0 = arith.constant 0 : i32
    %c0_i32_1 = arith.constant 0 : i32
    return %c0_i32, %c0_i32_0 : i32, i32
  }
  func.func @transform_2(%arg0: i32) -> (i32, i32) {
    %c0_i32 = arith.constant 0 : i32
    %c0_i32_0 = arith.constant 0 : i32
    %c0_i32_1 = arith.constant 0 : i32
    return %c0_i32, %c0_i32_0 : i32, i32
  }
  func.func @transform_3(%arg0: i32) -> (i32, i32) {
    %c0_i32 = arith.constant 0 : i32
    %c0_i32_0 = arith.constant 0 : i32
    return %arg0, %c0_i32 : i32, i32
  }
}

module attributes {stable_mosaic.version = 11 : i64} {
  func.func @_linear_kernel(%arg0: i32, %arg1: i32, %arg2: i32, %arg3: memref<16x768xbf16, #tpu.memory_space<vmem>>, %arg4: memref<768x768xbf16, #tpu.memory_space<vmem>>, %arg5: memref<1x768xf32, #tpu.memory_space<vmem>>, %arg6: memref<16x768xbf16, #tpu.memory_space<vmem>>, %arg7: memref<16x768xf32, #tpu.memory_space<vmem>>) attributes {dimension_semantics = [#tpu.dimension_semantics<parallel>, #tpu.dimension_semantics<parallel>, #tpu.dimension_semantics<arbitrary>], iteration_bounds = array<i64: 1, 3, 1>, scalar_prefetch = 0 : i64, scratch_operands = 1 : i64, tpu.core_type = #tpu.core_type<tc>, window_params = [{transform_indices = @transform_0, window_bounds = array<i64: 16, 768>}, {transform_indices = @transform_1, window_bounds = array<i64: 768, 768>}, {transform_indices = @transform_2, window_bounds = array<i64: 1, 768>}, {transform_indices = @transform_3, window_bounds = array<i64: 16, 768>}]} {
    %c0_i32 = arith.constant 0 : i32
    %0 = arith.cmpi eq, %arg2, %c0_i32 : i32
    %1 = arith.extui %0 : i1 to i32
    %c0_i32_0 = arith.constant 0 : i32
    %2 = arith.cmpi ne, %1, %c0_i32_0 : i32
    scf.if %2 {
      %cst_10 = arith.constant 0.000000e+00 : f32
      %12 = vector.broadcast %cst_10 : f32 to vector<16x768xf32>
      %c0_11 = arith.constant 0 : index
      %c0_12 = arith.constant 0 : index
      %13 = vector.load %arg7[%c0_11, %c0_12] : memref<16x768xf32, #tpu.memory_space<vmem>>, vector<16x768xf32>
      tpu.vector_store %arg7[%c0_11, %c0_12], %12 {strides = array<i32>} : memref<16x768xf32, #tpu.memory_space<vmem>>, vector<16x768xf32>,
    } else {
    }
    %c0 = arith.constant 0 : index
    %c0_1 = arith.constant 0 : index
    %3 = vector.load %arg7[%c0, %c0_1] : memref<16x768xf32, #tpu.memory_space<vmem>>, vector<16x768xf32>
    %c0_2 = arith.constant 0 : index
    %c0_3 = arith.constant 0 : index
    %4 = vector.load %arg3[%c0_2, %c0_3] : memref<16x768xbf16, #tpu.memory_space<vmem>>, vector<16x768xbf16>
    %c0_4 = arith.constant 0 : index
    %c0_5 = arith.constant 0 : index
    %5 = vector.load %arg4[%c0_4, %c0_5] : memref<768x768xbf16, #tpu.memory_space<vmem>>, vector<768x768xbf16>
    %cst = arith.constant dense<0.000000e+00> : vector<16x768xf32>
    %6 = tpu.matmul %4, %5, %cst {dimension_numbers = #tpu.dot_dimension_numbers<[1], [0], [0], [1], [0, 0, 1, 1], [], []>} : vector<16x768xbf16>, vector<768x768xbf16>, vector<16x768xf32> -> vector<16x768xf32>
    %7 = arith.addf %3, %6 : vector<16x768xf32>
    %c0_6 = arith.constant 0 : index
    %c0_7 = arith.constant 0 : index
    %8 = vector.load %arg7[%c0_6, %c0_7] : memref<16x768xf32, #tpu.memory_space<vmem>>, vector<16x768xf32>
    tpu.vector_store %arg7[%c0_6, %c0_7], %7 {strides = array<i32>} : memref<16x768xf32, #tpu.memory_space<vmem>>, vector<16x768xf32>,
    %c0_i32_8 = arith.constant 0 : i32
    %9 = arith.cmpi eq, %arg2, %c0_i32_8 : i32
    %10 = arith.extui %9 : i1 to i32
    %c0_i32_9 = arith.constant 0 : i32
    %11 = arith.cmpi ne, %10, %c0_i32_9 : i32
    scf.if %11 {
      %c0_10 = arith.constant 0 : index
      %c0_11 = arith.constant 0 : index
      %12 = vector.load %arg7[%c0_10, %c0_11] : memref<16x768xf32, #tpu.memory_space<vmem>>, vector<16x768xf32>
      %c0_12 = arith.constant 0 : index
      %c0_13 = arith.constant 0 : index
      %13 = vector.load %arg5[%c0_12, %c0_13] : memref<1x768xf32, #tpu.memory_space<vmem>>, vector<1x768xf32>
      %14 = vector.broadcast %13 : vector<1x768xf32> to vector<16x768xf32>
      %15 = arith.addf %12, %14 : vector<16x768xf32>
      %16 = arith.truncf %15 : vector<16x768xf32> to vector<16x768xbf16>
      %c0_14 = arith.constant 0 : index
      %c0_15 = arith.constant 0 : index
      %17 = vector.load %arg6[%c0_14, %c0_15] : memref<16x768xbf16, #tpu.memory_space<vmem>>, vector<16x768xbf16>
      tpu.vector_store %arg6[%c0_14, %c0_15], %16 {strides = array<i32>} : memref<16x768xbf16, #tpu.memory_space<vmem>>, vector<16x768xbf16>,
    } else {
    }
    return
  }
  func.func @transform_0(%arg0: i32, %arg1: i32, %arg2: i32) -> (i32, i32) {
    %c0_i32 = arith.constant 0 : i32
    return %arg0, %arg2 : i32, i32
  }
  func.func @transform_1(%arg0: i32, %arg1: i32, %arg2: i32) -> (i32, i32) {
    %c0_i32 = arith.constant 0 : i32
    return %arg2, %arg1 : i32, i32
  }
  func.func @transform_2(%arg0: i32, %arg1: i32, %arg2: i32) -> (i32, i32) {
    %c0_i32 = arith.constant 0 : i32
    %c0_i32_0 = arith.constant 0 : i32
    return %c0_i32, %arg1 : i32, i32
  }
  func.func @transform_3(%arg0: i32, %arg1: i32, %arg2: i32) -> (i32, i32) {
    %c0_i32 = arith.constant 0 : i32
    return %arg0, %arg1 : i32, i32
  }
}

module attributes {stable_mosaic.version = 11 : i64} {
  func.func @_attention_kernel(%arg0: i32, %arg1: memref<8x8x64xbf16, #tpu.memory_space<vmem>>, %arg2: memref<8x8x64xbf16, #tpu.memory_space<vmem>>, %arg3: memref<8x8x64xbf16, #tpu.memory_space<vmem>>, %arg4: memref<8x8xf32, #tpu.memory_space<vmem>>, %arg5: memref<8x8x64xbf16, #tpu.memory_space<vmem>>) attributes {dimension_semantics = [#tpu.dimension_semantics<parallel>], iteration_bounds = array<i64: 3>, scalar_prefetch = 0 : i64, scratch_operands = 0 : i64, tpu.core_type = #tpu.core_type<tc>, window_params = [{transform_indices = @transform_0, window_bounds = array<i64: 8, 8, 64>}, {transform_indices = @transform_1, window_bounds = array<i64: 8, 8, 64>}, {transform_indices = @transform_2, window_bounds = array<i64: 8, 8, 64>}, {transform_indices = @transform_3, window_bounds = array<i64: 8, 8>}, {transform_indices = @transform_4, window_bounds = array<i64: 8, 8, 64>}]} {
    %c0 = arith.constant 0 : index
    %c0_0 = arith.constant 0 : index
    %c0_1 = arith.constant 0 : index
    %0 = vector.load %arg1[%c0, %c0_0, %c0_1] : memref<8x8x64xbf16, #tpu.memory_space<vmem>>, vector<8x8x64xbf16>
    %c0_2 = arith.constant 0 : index
    %c0_3 = arith.constant 0 : index
    %c0_4 = arith.constant 0 : index
    %1 = vector.load %arg2[%c0_2, %c0_3, %c0_4] : memref<8x8x64xbf16, #tpu.memory_space<vmem>>, vector<8x8x64xbf16>
    %c0_5 = arith.constant 0 : index
    %c0_6 = arith.constant 0 : index
    %c0_7 = arith.constant 0 : index
    %2 = vector.load %arg3[%c0_5, %c0_6, %c0_7] : memref<8x8x64xbf16, #tpu.memory_space<vmem>>, vector<8x8x64xbf16>
    "tpu.trace_start"() <{level = 10 : i32, message = "bqd,bkd->bqk"}> : () -> ()
    %cst = arith.constant dense<0.000000e+00> : vector<8x8x8xf32>
    %3 = tpu.matmul %0, %1, %cst {dimension_numbers = #tpu.dot_dimension_numbers<[2], [2], [1], [1], [0, 0, 0, 1, 1, 1], [0], [0]>} : vector<8x8x64xbf16>, vector<8x8x64xbf16>, vector<8x8x8xf32> -> vector<8x8x8xf32>
    "tpu.trace_stop"() : () -> ()
    %cst_8 = arith.constant 1.250000e-01 : f32
    %4 = vector.broadcast %cst_8 : f32 to vector<8x8x8xf32>
    %5 = arith.mulf %3, %4 : vector<8x8x8xf32>
    %c0_9 = arith.constant 0 : index
    %c0_10 = arith.constant 0 : index
    %6 = vector.load %arg4[%c0_9, %c0_10] : memref<8x8xf32, #tpu.memory_space<vmem>>, vector<8x8xf32>
    %7 = vector.shape_cast %6 : vector<8x8xf32> to vector<8x1x8xf32>
    %8 = vector.broadcast %7 : vector<8x1x8xf32> to vector<8x8x8xf32>
    %9 = arith.addf %5, %8 : vector<8x8x8xf32>
    %cst_11 = arith.constant dense<0xFF800000> : vector<8x8xf32>
    %10 = vector.multi_reduction <maximumf>, %9, %cst_11 [2] : vector<8x8x8xf32> to vector<8x8xf32>
    %11 = vector.shape_cast %10 : vector<8x8xf32> to vector<8x8x1xf32>
    %12 = vector.broadcast %11 : vector<8x8x1xf32> to vector<8x8x8xf32>
    %13 = arith.subf %9, %12 : vector<8x8x8xf32>
    %14 = math.exp %13 : vector<8x8x8xf32>
    %cst_12 = arith.constant dense<0.000000e+00> : vector<8x8xf32>
    %15 = vector.multi_reduction <add>, %14, %cst_12 [2] : vector<8x8x8xf32> to vector<8x8xf32>
    %16 = vector.shape_cast %15 : vector<8x8xf32> to vector<8x8x1xf32>
    %17 = tpu.reciprocal %16 {approx = true} : vector<8x8x1xf32> -> vector<8x8x1xf32>
    %18 = vector.broadcast %17 : vector<8x8x1xf32> to vector<8x8x8xf32>
    %19 = arith.mulf %14, %18 : vector<8x8x8xf32>
    %20 = arith.truncf %19 : vector<8x8x8xf32> to vector<8x8x8xbf16>
    "tpu.trace_start"() <{level = 10 : i32, message = "bqk,bkd->bqd"}> : () -> ()
    %cst_13 = arith.constant dense<0.000000e+00> : vector<8x8x64xf32>
    %21 = tpu.matmul %20, %2, %cst_13 {dimension_numbers = #tpu.dot_dimension_numbers<[2], [1], [1], [2], [0, 0, 0, 1, 1, 2], [0], [0]>} : vector<8x8x8xbf16>, vector<8x8x64xbf16>, vector<8x8x64xf32> -> vector<8x8x64xf32>
    "tpu.trace_stop"() : () -> ()
    %22 = arith.truncf %21 : vector<8x8x64xf32> to vector<8x8x64xbf16>
    %c0_14 = arith.constant 0 : index
    %c0_15 = arith.constant 0 : index
    %c0_16 = arith.constant 0 : index
    %23 = vector.load %arg5[%c0_14, %c0_15, %c0_16] : memref<8x8x64xbf16, #tpu.memory_space<vmem>>, vector<8x8x64xbf16>
    tpu.vector_store %arg5[%c0_14, %c0_15, %c0_16], %22 {strides = array<i32>} : memref<8x8x64xbf16, #tpu.memory_space<vmem>>, vector<8x8x64xbf16>,
    return
  }
  func.func @transform_0(%arg0: i32) -> (i32, i32, i32) {
    %c0_i32 = arith.constant 0 : i32
    %c0_i32_0 = arith.constant 0 : i32
    %c0_i32_1 = arith.constant 0 : i32
    return %arg0, %c0_i32, %c0_i32_0 : i32, i32, i32
  }
  func.func @transform_1(%arg0: i32) -> (i32, i32, i32) {
    %c0_i32 = arith.constant 0 : i32
    %c0_i32_0 = arith.constant 0 : i32
    %c0_i32_1 = arith.constant 0 : i32
    return %arg0, %c0_i32, %c0_i32_0 : i32, i32, i32
  }
  func.func @transform_2(%arg0: i32) -> (i32, i32, i32) {
    %c0_i32 = arith.constant 0 : i32
    %c0_i32_0 = arith.constant 0 : i32
    %c0_i32_1 = arith.constant 0 : i32
    return %arg0, %c0_i32, %c0_i32_0 : i32, i32, i32
  }
  func.func @transform_3(%arg0: i32) -> (i32, i32) {
    %c0_i32 = arith.constant 0 : i32
    %c0_i32_0 = arith.constant 0 : i32
    return %arg0, %c0_i32 : i32, i32
  }
  func.func @transform_4(%arg0: i32) -> (i32, i32, i32) {
    %c0_i32 = arith.constant 0 : i32
    %c0_i32_0 = arith.constant 0 : i32
    %c0_i32_1 = arith.constant 0 : i32
    return %arg0, %c0_i32, %c0_i32_0 : i32, i32, i32
  }
}

module attributes {stable_mosaic.version = 11 : i64} {
  func.func @_linear_kernel(%arg0: i32, %arg1: i32, %arg2: i32, %arg3: memref<16x768xbf16, #tpu.memory_space<vmem>>, %arg4: memref<768x768xbf16, #tpu.memory_space<vmem>>, %arg5: memref<1x768xf32, #tpu.memory_space<vmem>>, %arg6: memref<16x768xbf16, #tpu.memory_space<vmem>>, %arg7: memref<16x768xf32, #tpu.memory_space<vmem>>) attributes {dimension_semantics = [#tpu.dimension_semantics<parallel>, #tpu.dimension_semantics<parallel>, #tpu.dimension_semantics<arbitrary>], iteration_bounds = array<i64: 1, 1, 1>, scalar_prefetch = 0 : i64, scratch_operands = 1 : i64, tpu.core_type = #tpu.core_type<tc>, window_params = [{transform_indices = @transform_0, window_bounds = array<i64: 16, 768>}, {transform_indices = @transform_1, window_bounds = array<i64: 768, 768>}, {transform_indices = @transform_2, window_bounds = array<i64: 1, 768>}, {transform_indices = @transform_3, window_bounds = array<i64: 16, 768>}]} {
    %c0_i32 = arith.constant 0 : i32
    %0 = arith.cmpi eq, %arg2, %c0_i32 : i32
    %1 = arith.extui %0 : i1 to i32
    %c0_i32_0 = arith.constant 0 : i32
    %2 = arith.cmpi ne, %1, %c0_i32_0 : i32
    scf.if %2 {
      %cst_10 = arith.constant 0.000000e+00 : f32
      %12 = vector.broadcast %cst_10 : f32 to vector<16x768xf32>
      %c0_11 = arith.constant 0 : index
      %c0_12 = arith.constant 0 : index
      %13 = vector.load %arg7[%c0_11, %c0_12] : memref<16x768xf32, #tpu.memory_space<vmem>>, vector<16x768xf32>
      tpu.vector_store %arg7[%c0_11, %c0_12], %12 {strides = array<i32>} : memref<16x768xf32, #tpu.memory_space<vmem>>, vector<16x768xf32>,
    } else {
    }
    %c0 = arith.constant 0 : index
    %c0_1 = arith.constant 0 : index
    %3 = vector.load %arg7[%c0, %c0_1] : memref<16x768xf32, #tpu.memory_space<vmem>>, vector<16x768xf32>
    %c0_2 = arith.constant 0 : index
    %c0_3 = arith.constant 0 : index
    %4 = vector.load %arg3[%c0_2, %c0_3] : memref<16x768xbf16, #tpu.memory_space<vmem>>, vector<16x768xbf16>
    %c0_4 = arith.constant 0 : index
    %c0_5 = arith.constant 0 : index
    %5 = vector.load %arg4[%c0_4, %c0_5] : memref<768x768xbf16, #tpu.memory_space<vmem>>, vector<768x768xbf16>
    %cst = arith.constant dense<0.000000e+00> : vector<16x768xf32>
    %6 = tpu.matmul %4, %5, %cst {dimension_numbers = #tpu.dot_dimension_numbers<[1], [0], [0], [1], [0, 0, 1, 1], [], []>} : vector<16x768xbf16>, vector<768x768xbf16>, vector<16x768xf32> -> vector<16x768xf32>
    %7 = arith.addf %3, %6 : vector<16x768xf32>
    %c0_6 = arith.constant 0 : index
    %c0_7 = arith.constant 0 : index
    %8 = vector.load %arg7[%c0_6, %c0_7] : memref<16x768xf32, #tpu.memory_space<vmem>>, vector<16x768xf32>
    tpu.vector_store %arg7[%c0_6, %c0_7], %7 {strides = array<i32>} : memref<16x768xf32, #tpu.memory_space<vmem>>, vector<16x768xf32>,
    %c0_i32_8 = arith.constant 0 : i32
    %9 = arith.cmpi eq, %arg2, %c0_i32_8 : i32
    %10 = arith.extui %9 : i1 to i32
    %c0_i32_9 = arith.constant 0 : i32
    %11 = arith.cmpi ne, %10, %c0_i32_9 : i32
    scf.if %11 {
      %c0_10 = arith.constant 0 : index
      %c0_11 = arith.constant 0 : index
      %12 = vector.load %arg7[%c0_10, %c0_11] : memref<16x768xf32, #tpu.memory_space<vmem>>, vector<16x768xf32>
      %c0_12 = arith.constant 0 : index
      %c0_13 = arith.constant 0 : index
      %13 = vector.load %arg5[%c0_12, %c0_13] : memref<1x768xf32, #tpu.memory_space<vmem>>, vector<1x768xf32>
      %14 = vector.broadcast %13 : vector<1x768xf32> to vector<16x768xf32>
      %15 = arith.addf %12, %14 : vector<16x768xf32>
      %16 = arith.truncf %15 : vector<16x768xf32> to vector<16x768xbf16>
      %c0_14 = arith.constant 0 : index
      %c0_15 = arith.constant 0 : index
      %17 = vector.load %arg6[%c0_14, %c0_15] : memref<16x768xbf16, #tpu.memory_space<vmem>>, vector<16x768xbf16>
      tpu.vector_store %arg6[%c0_14, %c0_15], %16 {strides = array<i32>} : memref<16x768xbf16, #tpu.memory_space<vmem>>, vector<16x768xbf16>,
    } else {
    }
    return
  }
  func.func @transform_0(%arg0: i32, %arg1: i32, %arg2: i32) -> (i32, i32) {
    %c0_i32 = arith.constant 0 : i32
    return %arg0, %arg2 : i32, i32
  }
  func.func @transform_1(%arg0: i32, %arg1: i32, %arg2: i32) -> (i32, i32) {
    %c0_i32 = arith.constant 0 : i32
    return %arg2, %arg1 : i32, i32
  }
  func.func @transform_2(%arg0: i32, %arg1: i32, %arg2: i32) -> (i32, i32) {
    %c0_i32 = arith.constant 0 : i32
    %c0_i32_0 = arith.constant 0 : i32
    return %c0_i32, %arg1 : i32, i32
  }
  func.func @transform_3(%arg0: i32, %arg1: i32, %arg2: i32) -> (i32, i32) {
    %c0_i32 = arith.constant 0 : i32
    return %arg0, %arg1 : i32, i32
  }
}

module attributes {stable_mosaic.version = 11 : i64} {
  func.func @_ln_kernel(%arg0: i32, %arg1: memref<16x768xbf16, #tpu.memory_space<vmem>>, %arg2: memref<16x768xbf16, #tpu.memory_space<vmem>>, %arg3: memref<1x768xf32, #tpu.memory_space<vmem>>, %arg4: memref<1x768xf32, #tpu.memory_space<vmem>>, %arg5: memref<16x768xbf16, #tpu.memory_space<vmem>>) attributes {dimension_semantics = [#tpu.dimension_semantics<parallel>], iteration_bounds = array<i64: 1>, scalar_prefetch = 0 : i64, scratch_operands = 0 : i64, tpu.core_type = #tpu.core_type<tc>, window_params = [{transform_indices = @transform_0, window_bounds = array<i64: 16, 768>}, {transform_indices = @transform_1, window_bounds = array<i64: 16, 768>}, {pipeline_mode = #tpu.pipeline_mode<synchronous>, transform_indices = @transform_2, window_bounds = array<i64: 1, 768>}, {pipeline_mode = #tpu.pipeline_mode<synchronous>, transform_indices = @transform_3, window_bounds = array<i64: 1, 768>}, {transform_indices = @transform_4, window_bounds = array<i64: 16, 768>}]} {
    %c0 = arith.constant 0 : index
    %c0_0 = arith.constant 0 : index
    %0 = vector.load %arg1[%c0, %c0_0] : memref<16x768xbf16, #tpu.memory_space<vmem>>, vector<16x768xbf16>
    %1 = arith.extf %0 : vector<16x768xbf16> to vector<16x768xf32>
    %c0_1 = arith.constant 0 : index
    %c0_2 = arith.constant 0 : index
    %2 = vector.load %arg2[%c0_1, %c0_2] : memref<16x768xbf16, #tpu.memory_space<vmem>>, vector<16x768xbf16>
    %3 = arith.extf %2 : vector<16x768xbf16> to vector<16x768xf32>
    %4 = arith.addf %1, %3 : vector<16x768xf32>
    %cst = arith.constant dense<0.000000e+00> : vector<16xf32>
    %5 = vector.multi_reduction <add>, %4, %cst [1] : vector<16x768xf32> to vector<16xf32>
    %6 = vector.shape_cast %5 : vector<16xf32> to vector<16x1xf32>
    %cst_3 = arith.constant 7.680000e+02 : f32
    %7 = vector.broadcast %cst_3 : f32 to vector<16x1xf32>
    %8 = arith.divf %6, %7 : vector<16x1xf32>
    %9 = vector.broadcast %8 : vector<16x1xf32> to vector<16x768xf32>
    %10 = arith.subf %4, %9 : vector<16x768xf32>
    %11 = arith.mulf %10, %10 : vector<16x768xf32>
    %cst_4 = arith.constant dense<0.000000e+00> : vector<16xf32>
    %12 = vector.multi_reduction <add>, %11, %cst_4 [1] : vector<16x768xf32> to vector<16xf32>
    %13 = vector.shape_cast %12 : vector<16xf32> to vector<16x1xf32>
    %cst_5 = arith.constant 7.680000e+02 : f32
    %14 = vector.broadcast %cst_5 : f32 to vector<16x1xf32>
    %15 = arith.divf %13, %14 : vector<16x1xf32>
    %cst_6 = arith.constant 9.99999996E-13 : f32
    %16 = vector.broadcast %cst_6 : f32 to vector<16x1xf32>
    %17 = arith.addf %15, %16 : vector<16x1xf32>
    %18 = math.rsqrt %17 : vector<16x1xf32>
    %19 = vector.broadcast %18 : vector<16x1xf32> to vector<16x768xf32>
    %20 = arith.mulf %10, %19 : vector<16x768xf32>
    %c0_7 = arith.constant 0 : index
    %c0_8 = arith.constant 0 : index
    %21 = vector.load %arg3[%c0_7, %c0_8] : memref<1x768xf32, #tpu.memory_space<vmem>>, vector<1x768xf32>
    %22 = vector.broadcast %21 : vector<1x768xf32> to vector<16x768xf32>
    %23 = arith.mulf %20, %22 : vector<16x768xf32>
    %c0_9 = arith.constant 0 : index
    %c0_10 = arith.constant 0 : index
    %24 = vector.load %arg4[%c0_9, %c0_10] : memref<1x768xf32, #tpu.memory_space<vmem>>, vector<1x768xf32>
    %25 = vector.broadcast %24 : vector<1x768xf32> to vector<16x768xf32>
    %26 = arith.addf %23, %25 : vector<16x768xf32>
    %27 = arith.truncf %26 : vector<16x768xf32> to vector<16x768xbf16>
    %c0_11 = arith.constant 0 : index
    %c0_12 = arith.constant 0 : index
    %28 = vector.load %arg5[%c0_11, %c0_12] : memref<16x768xbf16, #tpu.memory_space<vmem>>, vector<16x768xbf16>
    tpu.vector_store %arg5[%c0_11, %c0_12], %27 {strides = array<i32>} : memref<16x768xbf16, #tpu.memory_space<vmem>>, vector<16x768xbf16>,
    return
  }
  func.func @transform_0(%arg0: i32) -> (i32, i32) {
    %c0_i32 = arith.constant 0 : i32
    %c0_i32_0 = arith.constant 0 : i32
    return %arg0, %c0_i32 : i32, i32
  }
  func.func @transform_1(%arg0: i32) -> (i32, i32) {
    %c0_i32 = arith.constant 0 : i32
    %c0_i32_0 = arith.constant 0 : i32
    return %arg0, %c0_i32 : i32, i32
  }
  func.func @transform_2(%arg0: i32) -> (i32, i32) {
    %c0_i32 = arith.constant 0 : i32
    %c0_i32_0 = arith.constant 0 : i32
    %c0_i32_1 = arith.constant 0 : i32
    return %c0_i32, %c0_i32_0 : i32, i32
  }
  func.func @transform_3(%arg0: i32) -> (i32, i32) {
    %c0_i32 = arith.constant 0 : i32
    %c0_i32_0 = arith.constant 0 : i32
    %c0_i32_1 = arith.constant 0 : i32
    return %c0_i32, %c0_i32_0 : i32, i32
  }
  func.func @transform_4(%arg0: i32) -> (i32, i32) {
    %c0_i32 = arith.constant 0 : i32
    %c0_i32_0 = arith.constant 0 : i32
    return %arg0, %c0_i32 : i32, i32
  }
}

module attributes {stable_mosaic.version = 11 : i64} {
  func.func @_linear_kernel(%arg0: i32, %arg1: i32, %arg2: i32, %arg3: memref<16x768xbf16, #tpu.memory_space<vmem>>, %arg4: memref<768x768xbf16, #tpu.memory_space<vmem>>, %arg5: memref<1x768xf32, #tpu.memory_space<vmem>>, %arg6: memref<16x768xbf16, #tpu.memory_space<vmem>>, %arg7: memref<16x768xf32, #tpu.memory_space<vmem>>) attributes {dimension_semantics = [#tpu.dimension_semantics<parallel>, #tpu.dimension_semantics<parallel>, #tpu.dimension_semantics<arbitrary>], iteration_bounds = array<i64: 1, 4, 1>, scalar_prefetch = 0 : i64, scratch_operands = 1 : i64, tpu.core_type = #tpu.core_type<tc>, window_params = [{transform_indices = @transform_0, window_bounds = array<i64: 16, 768>}, {transform_indices = @transform_1, window_bounds = array<i64: 768, 768>}, {transform_indices = @transform_2, window_bounds = array<i64: 1, 768>}, {transform_indices = @transform_3, window_bounds = array<i64: 16, 768>}]} {
    %c0_i32 = arith.constant 0 : i32
    %0 = arith.cmpi eq, %arg2, %c0_i32 : i32
    %1 = arith.extui %0 : i1 to i32
    %c0_i32_0 = arith.constant 0 : i32
    %2 = arith.cmpi ne, %1, %c0_i32_0 : i32
    scf.if %2 {
      %cst_10 = arith.constant 0.000000e+00 : f32
      %12 = vector.broadcast %cst_10 : f32 to vector<16x768xf32>
      %c0_11 = arith.constant 0 : index
      %c0_12 = arith.constant 0 : index
      %13 = vector.load %arg7[%c0_11, %c0_12] : memref<16x768xf32, #tpu.memory_space<vmem>>, vector<16x768xf32>
      tpu.vector_store %arg7[%c0_11, %c0_12], %12 {strides = array<i32>} : memref<16x768xf32, #tpu.memory_space<vmem>>, vector<16x768xf32>,
    } else {
    }
    %c0 = arith.constant 0 : index
    %c0_1 = arith.constant 0 : index
    %3 = vector.load %arg7[%c0, %c0_1] : memref<16x768xf32, #tpu.memory_space<vmem>>, vector<16x768xf32>
    %c0_2 = arith.constant 0 : index
    %c0_3 = arith.constant 0 : index
    %4 = vector.load %arg3[%c0_2, %c0_3] : memref<16x768xbf16, #tpu.memory_space<vmem>>, vector<16x768xbf16>
    %c0_4 = arith.constant 0 : index
    %c0_5 = arith.constant 0 : index
    %5 = vector.load %arg4[%c0_4, %c0_5] : memref<768x768xbf16, #tpu.memory_space<vmem>>, vector<768x768xbf16>
    %cst = arith.constant dense<0.000000e+00> : vector<16x768xf32>
    %6 = tpu.matmul %4, %5, %cst {dimension_numbers = #tpu.dot_dimension_numbers<[1], [0], [0], [1], [0, 0, 1, 1], [], []>} : vector<16x768xbf16>, vector<768x768xbf16>, vector<16x768xf32> -> vector<16x768xf32>
    %7 = arith.addf %3, %6 : vector<16x768xf32>
    %c0_6 = arith.constant 0 : index
    %c0_7 = arith.constant 0 : index
    %8 = vector.load %arg7[%c0_6, %c0_7] : memref<16x768xf32, #tpu.memory_space<vmem>>, vector<16x768xf32>
    tpu.vector_store %arg7[%c0_6, %c0_7], %7 {strides = array<i32>} : memref<16x768xf32, #tpu.memory_space<vmem>>, vector<16x768xf32>,
    %c0_i32_8 = arith.constant 0 : i32
    %9 = arith.cmpi eq, %arg2, %c0_i32_8 : i32
    %10 = arith.extui %9 : i1 to i32
    %c0_i32_9 = arith.constant 0 : i32
    %11 = arith.cmpi ne, %10, %c0_i32_9 : i32
    scf.if %11 {
      %c0_10 = arith.constant 0 : index
      %c0_11 = arith.constant 0 : index
      %12 = vector.load %arg7[%c0_10, %c0_11] : memref<16x768xf32, #tpu.memory_space<vmem>>, vector<16x768xf32>
      %c0_12 = arith.constant 0 : index
      %c0_13 = arith.constant 0 : index
      %13 = vector.load %arg5[%c0_12, %c0_13] : memref<1x768xf32, #tpu.memory_space<vmem>>, vector<1x768xf32>
      %14 = vector.broadcast %13 : vector<1x768xf32> to vector<16x768xf32>
      %15 = arith.addf %12, %14 : vector<16x768xf32>
      %cst_14 = arith.constant 5.000000e-01 : f32
      %16 = vector.broadcast %cst_14 : f32 to vector<16x768xf32>
      %17 = arith.mulf %16, %15 : vector<16x768xf32>
      %cst_15 = arith.constant 4.471500e-02 : f32
      %18 = vector.broadcast %cst_15 : f32 to vector<16x768xf32>
      %19 = arith.mulf %18, %15 : vector<16x768xf32>
      %20 = arith.mulf %19, %15 : vector<16x768xf32>
      %21 = arith.mulf %20, %15 : vector<16x768xf32>
      %22 = arith.addf %15, %21 : vector<16x768xf32>
      %cst_16 = arith.constant 0.797884583 : f32
      %23 = vector.broadcast %cst_16 : f32 to vector<16x768xf32>
      %24 = arith.mulf %23, %22 : vector<16x768xf32>
      %25 = math.tanh %24 : vector<16x768xf32>
      %cst_17 = arith.constant 1.000000e+00 : f32
      %26 = vector.broadcast %cst_17 : f32 to vector<16x768xf32>
      %27 = arith.addf %26, %25 : vector<16x768xf32>
      %28 = arith.mulf %17, %27 : vector<16x768xf32>
      %29 = arith.truncf %28 : vector<16x768xf32> to vector<16x768xbf16>
      %c0_18 = arith.constant 0 : index
      %c0_19 = arith.constant 0 : index
      %30 = vector.load %arg6[%c0_18, %c0_19] : memref<16x768xbf16, #tpu.memory_space<vmem>>, vector<16x768xbf16>
      tpu.vector_store %arg6[%c0_18, %c0_19], %29 {strides = array<i32>} : memref<16x768xbf16, #tpu.memory_space<vmem>>, vector<16x768xbf16>,
    } else {
    }
    return
  }
  func.func @transform_0(%arg0: i32, %arg1: i32, %arg2: i32) -> (i32, i32) {
    %c0_i32 = arith.constant 0 : i32
    return %arg0, %arg2 : i32, i32
  }
  func.func @transform_1(%arg0: i32, %arg1: i32, %arg2: i32) -> (i32, i32) {
    %c0_i32 = arith.constant 0 : i32
    return %arg2, %arg1 : i32, i32
  }
  func.func @transform_2(%arg0: i32, %arg1: i32, %arg2: i32) -> (i32, i32) {
    %c0_i32 = arith.constant 0 : i32
    %c0_i32_0 = arith.constant 0 : i32
    return %c0_i32, %arg1 : i32, i32
  }
  func.func @transform_3(%arg0: i32, %arg1: i32, %arg2: i32) -> (i32, i32) {
    %c0_i32 = arith.constant 0 : i32
    return %arg0, %arg1 : i32, i32
  }
}

module attributes {stable_mosaic.version = 11 : i64} {
  func.func @_linear_kernel(%arg0: i32, %arg1: i32, %arg2: i32, %arg3: memref<16x768xbf16, #tpu.memory_space<vmem>>, %arg4: memref<768x768xbf16, #tpu.memory_space<vmem>>, %arg5: memref<1x768xf32, #tpu.memory_space<vmem>>, %arg6: memref<16x768xbf16, #tpu.memory_space<vmem>>, %arg7: memref<16x768xf32, #tpu.memory_space<vmem>>) attributes {dimension_semantics = [#tpu.dimension_semantics<parallel>, #tpu.dimension_semantics<parallel>, #tpu.dimension_semantics<arbitrary>], iteration_bounds = array<i64: 1, 1, 4>, scalar_prefetch = 0 : i64, scratch_operands = 1 : i64, tpu.core_type = #tpu.core_type<tc>, window_params = [{transform_indices = @transform_0, window_bounds = array<i64: 16, 768>}, {transform_indices = @transform_1, window_bounds = array<i64: 768, 768>}, {transform_indices = @transform_2, window_bounds = array<i64: 1, 768>}, {transform_indices = @transform_3, window_bounds = array<i64: 16, 768>}]} {
    %c0_i32 = arith.constant 0 : i32
    %0 = arith.cmpi eq, %arg2, %c0_i32 : i32
    %1 = arith.extui %0 : i1 to i32
    %c0_i32_0 = arith.constant 0 : i32
    %2 = arith.cmpi ne, %1, %c0_i32_0 : i32
    scf.if %2 {
      %cst_9 = arith.constant 0.000000e+00 : f32
      %12 = vector.broadcast %cst_9 : f32 to vector<16x768xf32>
      %c0_10 = arith.constant 0 : index
      %c0_11 = arith.constant 0 : index
      %13 = vector.load %arg7[%c0_10, %c0_11] : memref<16x768xf32, #tpu.memory_space<vmem>>, vector<16x768xf32>
      tpu.vector_store %arg7[%c0_10, %c0_11], %12 {strides = array<i32>} : memref<16x768xf32, #tpu.memory_space<vmem>>, vector<16x768xf32>,
    } else {
    }
    %c0 = arith.constant 0 : index
    %c0_1 = arith.constant 0 : index
    %3 = vector.load %arg7[%c0, %c0_1] : memref<16x768xf32, #tpu.memory_space<vmem>>, vector<16x768xf32>
    %c0_2 = arith.constant 0 : index
    %c0_3 = arith.constant 0 : index
    %4 = vector.load %arg3[%c0_2, %c0_3] : memref<16x768xbf16, #tpu.memory_space<vmem>>, vector<16x768xbf16>
    %c0_4 = arith.constant 0 : index
    %c0_5 = arith.constant 0 : index
    %5 = vector.load %arg4[%c0_4, %c0_5] : memref<768x768xbf16, #tpu.memory_space<vmem>>, vector<768x768xbf16>
    %cst = arith.constant dense<0.000000e+00> : vector<16x768xf32>
    %6 = tpu.matmul %4, %5, %cst {dimension_numbers = #tpu.dot_dimension_numbers<[1], [0], [0], [1], [0, 0, 1, 1], [], []>} : vector<16x768xbf16>, vector<768x768xbf16>, vector<16x768xf32> -> vector<16x768xf32>
    %7 = arith.addf %3, %6 : vector<16x768xf32>
    %c0_6 = arith.constant 0 : index
    %c0_7 = arith.constant 0 : index
    %8 = vector.load %arg7[%c0_6, %c0_7] : memref<16x768xf32, #tpu.memory_space<vmem>>, vector<16x768xf32>
    tpu.vector_store %arg7[%c0_6, %c0_7], %7 {strides = array<i32>} : memref<16x768xf32, #tpu.memory_space<vmem>>, vector<16x768xf32>,
    %c3_i32 = arith.constant 3 : i32
    %9 = arith.cmpi eq, %arg2, %c3_i32 : i32
    %10 = arith.extui %9 : i1 to i32
    %c0_i32_8 = arith.constant 0 : i32
    %11 = arith.cmpi ne, %10, %c0_i32_8 : i32
    scf.if %11 {
      %c0_9 = arith.constant 0 : index
      %c0_10 = arith.constant 0 : index
      %12 = vector.load %arg7[%c0_9, %c0_10] : memref<16x768xf32, #tpu.memory_space<vmem>>, vector<16x768xf32>
      %c0_11 = arith.constant 0 : index
      %c0_12 = arith.constant 0 : index
      %13 = vector.load %arg5[%c0_11, %c0_12] : memref<1x768xf32, #tpu.memory_space<vmem>>, vector<1x768xf32>
      %14 = vector.broadcast %13 : vector<1x768xf32> to vector<16x768xf32>
      %15 = arith.addf %12, %14 : vector<16x768xf32>
      %16 = arith.truncf %15 : vector<16x768xf32> to vector<16x768xbf16>
      %c0_13 = arith.constant 0 : index
      %c0_14 = arith.constant 0 : index
      %17 = vector.load %arg6[%c0_13, %c0_14] : memref<16x768xbf16, #tpu.memory_space<vmem>>, vector<16x768xbf16>
      tpu.vector_store %arg6[%c0_13, %c0_14], %16 {strides = array<i32>} : memref<16x768xbf16, #tpu.memory_space<vmem>>, vector<16x768xbf16>,
    } else {
    }
    return
  }
  func.func @transform_0(%arg0: i32, %arg1: i32, %arg2: i32) -> (i32, i32) {
    %c0_i32 = arith.constant 0 : i32
    return %arg0, %arg2 : i32, i32
  }
  func.func @transform_1(%arg0: i32, %arg1: i32, %arg2: i32) -> (i32, i32) {
    %c0_i32 = arith.constant 0 : i32
    return %arg2, %arg1 : i32, i32
  }
  func.func @transform_2(%arg0: i32, %arg1: i32, %arg2: i32) -> (i32, i32) {
    %c0_i32 = arith.constant 0 : i32
    %c0_i32_0 = arith.constant 0 : i32
    return %c0_i32, %arg1 : i32, i32
  }
  func.func @transform_3(%arg0: i32, %arg1: i32, %arg2: i32) -> (i32, i32) {
    %c0_i32 = arith.constant 0 : i32
    return %arg0, %arg1 : i32, i32
  }
}

module attributes {stable_mosaic.version = 11 : i64} {
  func.func @_linear_kernel(%arg0: i32, %arg1: i32, %arg2: i32, %arg3: memref<16x768xbf16, #tpu.memory_space<vmem>>, %arg4: memref<768x768xbf16, #tpu.memory_space<vmem>>, %arg5: memref<1x768xf32, #tpu.memory_space<vmem>>, %arg6: memref<16x768xbf16, #tpu.memory_space<vmem>>, %arg7: memref<16x768xf32, #tpu.memory_space<vmem>>) attributes {dimension_semantics = [#tpu.dimension_semantics<parallel>, #tpu.dimension_semantics<parallel>, #tpu.dimension_semantics<arbitrary>], iteration_bounds = array<i64: 1, 3, 1>, scalar_prefetch = 0 : i64, scratch_operands = 1 : i64, tpu.core_type = #tpu.core_type<tc>, window_params = [{transform_indices = @transform_0, window_bounds = array<i64: 16, 768>}, {transform_indices = @transform_1, window_bounds = array<i64: 768, 768>}, {transform_indices = @transform_2, window_bounds = array<i64: 1, 768>}, {transform_indices = @transform_3, window_bounds = array<i64: 16, 768>}]} {
    %c0_i32 = arith.constant 0 : i32
    %0 = arith.cmpi eq, %arg2, %c0_i32 : i32
    %1 = arith.extui %0 : i1 to i32
    %c0_i32_0 = arith.constant 0 : i32
    %2 = arith.cmpi ne, %1, %c0_i32_0 : i32
    scf.if %2 {
      %cst_10 = arith.constant 0.000000e+00 : f32
      %12 = vector.broadcast %cst_10 : f32 to vector<16x768xf32>
      %c0_11 = arith.constant 0 : index
      %c0_12 = arith.constant 0 : index
      %13 = vector.load %arg7[%c0_11, %c0_12] : memref<16x768xf32, #tpu.memory_space<vmem>>, vector<16x768xf32>
      tpu.vector_store %arg7[%c0_11, %c0_12], %12 {strides = array<i32>} : memref<16x768xf32, #tpu.memory_space<vmem>>, vector<16x768xf32>,
    } else {
    }
    %c0 = arith.constant 0 : index
    %c0_1 = arith.constant 0 : index
    %3 = vector.load %arg7[%c0, %c0_1] : memref<16x768xf32, #tpu.memory_space<vmem>>, vector<16x768xf32>
    %c0_2 = arith.constant 0 : index
    %c0_3 = arith.constant 0 : index
    %4 = vector.load %arg3[%c0_2, %c0_3] : memref<16x768xbf16, #tpu.memory_space<vmem>>, vector<16x768xbf16>
    %c0_4 = arith.constant 0 : index
    %c0_5 = arith.constant 0 : index
    %5 = vector.load %arg4[%c0_4, %c0_5] : memref<768x768xbf16, #tpu.memory_space<vmem>>, vector<768x768xbf16>
    %cst = arith.constant dense<0.000000e+00> : vector<16x768xf32>
    %6 = tpu.matmul %4, %5, %cst {dimension_numbers = #tpu.dot_dimension_numbers<[1], [0], [0], [1], [0, 0, 1, 1], [], []>} : vector<16x768xbf16>, vector<768x768xbf16>, vector<16x768xf32> -> vector<16x768xf32>
    %7 = arith.addf %3, %6 : vector<16x768xf32>
    %c0_6 = arith.constant 0 : index
    %c0_7 = arith.constant 0 : index
    %8 = vector.load %arg7[%c0_6, %c0_7] : memref<16x768xf32, #tpu.memory_space<vmem>>, vector<16x768xf32>
    tpu.vector_store %arg7[%c0_6, %c0_7], %7 {strides = array<i32>} : memref<16x768xf32, #tpu.memory_space<vmem>>, vector<16x768xf32>,
    %c0_i32_8 = arith.constant 0 : i32
    %9 = arith.cmpi eq, %arg2, %c0_i32_8 : i32
    %10 = arith.extui %9 : i1 to i32
    %c0_i32_9 = arith.constant 0 : i32
    %11 = arith.cmpi ne, %10, %c0_i32_9 : i32
    scf.if %11 {
      %c0_10 = arith.constant 0 : index
      %c0_11 = arith.constant 0 : index
      %12 = vector.load %arg7[%c0_10, %c0_11] : memref<16x768xf32, #tpu.memory_space<vmem>>, vector<16x768xf32>
      %c0_12 = arith.constant 0 : index
      %c0_13 = arith.constant 0 : index
      %13 = vector.load %arg5[%c0_12, %c0_13] : memref<1x768xf32, #tpu.memory_space<vmem>>, vector<1x768xf32>
      %14 = vector.broadcast %13 : vector<1x768xf32> to vector<16x768xf32>
      %15 = arith.addf %12, %14 : vector<16x768xf32>
      %16 = arith.truncf %15 : vector<16x768xf32> to vector<16x768xbf16>
      %c0_14 = arith.constant 0 : index
      %c0_15 = arith.constant 0 : index
      %17 = vector.load %arg6[%c0_14, %c0_15] : memref<16x768xbf16, #tpu.memory_space<vmem>>, vector<16x768xbf16>
      tpu.vector_store %arg6[%c0_14, %c0_15], %16 {strides = array<i32>} : memref<16x768xbf16, #tpu.memory_space<vmem>>, vector<16x768xbf16>,
    } else {
    }
    return
  }
  func.func @transform_0(%arg0: i32, %arg1: i32, %arg2: i32) -> (i32, i32) {
    %c0_i32 = arith.constant 0 : i32
    return %arg0, %arg2 : i32, i32
  }
  func.func @transform_1(%arg0: i32, %arg1: i32, %arg2: i32) -> (i32, i32) {
    %c0_i32 = arith.constant 0 : i32
    return %arg2, %arg1 : i32, i32
  }
  func.func @transform_2(%arg0: i32, %arg1: i32, %arg2: i32) -> (i32, i32) {
    %c0_i32 = arith.constant 0 : i32
    %c0_i32_0 = arith.constant 0 : i32
    return %c0_i32, %arg1 : i32, i32
  }
  func.func @transform_3(%arg0: i32, %arg1: i32, %arg2: i32) -> (i32, i32) {
    %c0_i32 = arith.constant 0 : i32
    return %arg0, %arg1 : i32, i32
  }
}

module attributes {stable_mosaic.version = 11 : i64} {
  func.func @_linear_kernel(%arg0: i32, %arg1: i32, %arg2: i32, %arg3: memref<16x768xbf16, #tpu.memory_space<vmem>>, %arg4: memref<768x128xbf16, #tpu.memory_space<vmem>>, %arg5: memref<1x128xf32, #tpu.memory_space<vmem>>, %arg6: memref<16x128xf32, #tpu.memory_space<vmem>>, %arg7: memref<16x128xf32, #tpu.memory_space<vmem>>) attributes {dimension_semantics = [#tpu.dimension_semantics<parallel>, #tpu.dimension_semantics<parallel>, #tpu.dimension_semantics<arbitrary>], iteration_bounds = array<i64: 1, 1, 1>, scalar_prefetch = 0 : i64, scratch_operands = 1 : i64, tpu.core_type = #tpu.core_type<tc>, window_params = [{transform_indices = @transform_0, window_bounds = array<i64: 16, 768>}, {transform_indices = @transform_1, window_bounds = array<i64: 768, 128>}, {transform_indices = @transform_2, window_bounds = array<i64: 1, 128>}, {transform_indices = @transform_3, window_bounds = array<i64: 16, 128>}]} {
    %c0_i32 = arith.constant 0 : i32
    %0 = arith.cmpi eq, %arg2, %c0_i32 : i32
    %1 = arith.extui %0 : i1 to i32
    %c0_i32_0 = arith.constant 0 : i32
    %2 = arith.cmpi ne, %1, %c0_i32_0 : i32
    scf.if %2 {
      %cst_10 = arith.constant 0.000000e+00 : f32
      %12 = vector.broadcast %cst_10 : f32 to vector<16x128xf32>
      %c0_11 = arith.constant 0 : index
      %c0_12 = arith.constant 0 : index
      %13 = vector.load %arg7[%c0_11, %c0_12] : memref<16x128xf32, #tpu.memory_space<vmem>>, vector<16x128xf32>
      tpu.vector_store %arg7[%c0_11, %c0_12], %12 {strides = array<i32>} : memref<16x128xf32, #tpu.memory_space<vmem>>, vector<16x128xf32>,
    } else {
    }
    %c0 = arith.constant 0 : index
    %c0_1 = arith.constant 0 : index
    %3 = vector.load %arg7[%c0, %c0_1] : memref<16x128xf32, #tpu.memory_space<vmem>>, vector<16x128xf32>
    %c0_2 = arith.constant 0 : index
    %c0_3 = arith.constant 0 : index
    %4 = vector.load %arg3[%c0_2, %c0_3] : memref<16x768xbf16, #tpu.memory_space<vmem>>, vector<16x768xbf16>
    %c0_4 = arith.constant 0 : index
    %c0_5 = arith.constant 0 : index
    %5 = vector.load %arg4[%c0_4, %c0_5] : memref<768x128xbf16, #tpu.memory_space<vmem>>, vector<768x128xbf16>
    %cst = arith.constant dense<0.000000e+00> : vector<16x128xf32>
    %6 = tpu.matmul %4, %5, %cst {dimension_numbers = #tpu.dot_dimension_numbers<[1], [0], [0], [1], [0, 0, 1, 1], [], []>} : vector<16x768xbf16>, vector<768x128xbf16>, vector<16x128xf32> -> vector<16x128xf32>
    %7 = arith.addf %3, %6 : vector<16x128xf32>
    %c0_6 = arith.constant 0 : index
    %c0_7 = arith.constant 0 : index
    %8 = vector.load %arg7[%c0_6, %c0_7] : memref<16x128xf32, #tpu.memory_space<vmem>>, vector<16x128xf32>
    tpu.vector_store %arg7[%c0_6, %c0_7], %7 {strides = array<i32>} : memref<16x128xf32, #tpu.memory_space<vmem>>, vector<16x128xf32>,
    %c0_i32_8 = arith.constant 0 : i32
    %9 = arith.cmpi eq, %arg2, %c0_i32_8 : i32
    %10 = arith.extui %9 : i1 to i32
    %c0_i32_9 = arith.constant 0 : i32
    %11 = arith.cmpi ne, %10, %c0_i32_9 : i32
    scf.if %11 {
      %c0_10 = arith.constant 0 : index
      %c0_11 = arith.constant 0 : index
      %12 = vector.load %arg7[%c0_10, %c0_11] : memref<16x128xf32, #tpu.memory_space<vmem>>, vector<16x128xf32>
      %c0_12 = arith.constant 0 : index
      %c0_13 = arith.constant 0 : index
      %13 = vector.load %arg5[%c0_12, %c0_13] : memref<1x128xf32, #tpu.memory_space<vmem>>, vector<1x128xf32>
      %14 = vector.broadcast %13 : vector<1x128xf32> to vector<16x128xf32>
      %15 = arith.addf %12, %14 : vector<16x128xf32>
      %c0_14 = arith.constant 0 : index
      %c0_15 = arith.constant 0 : index
      %16 = vector.load %arg6[%c0_14, %c0_15] : memref<16x128xf32, #tpu.memory_space<vmem>>, vector<16x128xf32>
      tpu.vector_store %arg6[%c0_14, %c0_15], %15 {strides = array<i32>} : memref<16x128xf32, #tpu.memory_space<vmem>>, vector<16x128xf32>,
    } else {
    }
    return
  }
  func.func @transform_0(%arg0: i32, %arg1: i32, %arg2: i32) -> (i32, i32) {
    %c0_i32 = arith.constant 0 : i32
    return %arg0, %arg2 : i32, i32
  }
  func.func @transform_1(%arg0: i32, %arg1: i32, %arg2: i32) -> (i32, i32) {
    %c0_i32 = arith.constant 0 : i32
    return %arg2, %arg1 : i32, i32
  }
  func.func @transform_2(%arg0: i32, %arg1: i32, %arg2: i32) -> (i32, i32) {
    %c0_i32 = arith.constant 0 : i32
    %c0_i32_0 = arith.constant 0 : i32
    return %c0_i32, %arg1 : i32, i32
  }
  func.func @transform_3(%arg0: i32, %arg1: i32, %arg2: i32) -> (i32, i32) {
    %c0_i32 = arith.constant 0 : i32
    return %arg0, %arg1 : i32, i32
  }
}

</mosaic_0001>

<bundles_post_ra>
// kernel: model_forward.86
= control target key start
LH: loop header
LB: loop body
LE: loop exit
PB: predicated region body
PF: predicated region fallthrough
CT: control target
= control target key end

     0   :  { %v101_v61 = vlaneseq  ;;  %s384_s0 = inlined_call_operand.vmem [shape: f32[16,768], index: 0, kind: input, shape index: {}]   ;;  %s385_s1 = inlined_call_operand.vmem [shape: f32[1,768], index: 1, kind: input, shape index: {}]   ;;  %s386_s2 = inlined_call_operand.vmem [shape: f32[1,768], index: 2, kind: input, shape index: {}]   ;;  %s387_s3 = inlined_call_operand.vmem [shape: bf16[16,768], index: 3, kind: output, shape index: {}]  }
   0x1   :  { %v14_v0 = vld [vmem:[%s384_s0] sm:$0xff]  ;;  %v15_v1 = vld [vmem:[%s384_s0 + $0x8] sm:$0xff]  ;;  %v16_v2 = vld [vmem:[%s384_s0 + $0x10] sm:$0xff] }
   0x2   :  { %v17_v3 = vld [vmem:[%s384_s0 + $0x18] sm:$0xff]  ;;  %v26_v4 = vadd.f32 %v15_v1, %v14_v0  ;;  %v20_v5 = vld [vmem:[%s384_s0 + $0x30] sm:$0xff]  ;;  %v22_v7 = vld [vmem:[%s384_s0 + $0x40] sm:$0xff] }
   0x3   :  { %v21_v6 = vld [vmem:[%s384_s0 + $0x38] sm:$0xff]  ;;  %v18_v10 = vld [vmem:[%s384_s0 + $0x20] sm:$0xff]  ;;  %v23_v11 = vld [vmem:[%s384_s0 + $0x48] sm:$0xff] }
   0x4   :  { %v27_v8 = vadd.f32 %v26_v4, %v16_v2  ;;  %v33_v9 = vadd.f32 %v21_v6, %v20_v5  ;;  %v19_v14 = vld [vmem:[%s384_s0 + $0x28] sm:$0xff]  ;;  %v24_v15 = vld [vmem:[%s384_s0 + $0x50] sm:$0xff]  ;;  %v25_v18 = vld [vmem:[%s384_s0 + $0x58] sm:$0xff] }
   0x6   :  { %v28_v12 = vadd.f32 %v27_v8, %v17_v3  ;;  %v34_v13 = vadd.f32 %v33_v9, %v22_v7 }
   0x8   :  { %v29_v16 = vadd.f32 %v28_v12, %v18_v10  ;;  %v35_v17 = vadd.f32 %v34_v13, %v23_v11 }
   0xa   :  { %v30_v19 = vadd.f32 %v29_v16, %v19_v14  ;;  %v36_v20 = vadd.f32 %v35_v17, %v24_v15 }
   0xc   :  { %31 = vadd.xlane.f32.xlu0 %v30_v19  ;;  %v37_v21 = vadd.f32 %v36_v20, %v25_v18 }
  0x10   :  { %38 = vadd.xlane.f32.xlu0 %v37_v21 }
  0x99   :  { %v32_v22 = vpop.xlane.xlu0 %31 }
  0x9a   :  { %v41_v23 = vmul.f32 0.0013020834, %v32_v22 }
  0x9c   :  { %v305_v24 = vsub.f32 %v14_v0, %v41_v23  ;;  %v307_v25 = vsub.f32 %v15_v1, %v41_v23  ;;  %v309_v26 = vsub.f32 %v16_v2, %v41_v23  ;;  %v311_v28 = vsub.f32 %v17_v3, %v41_v23 }
  0x9d   :  { %v39_v27 = vpop.xlane.xlu0 %38  ;;  %v317_v32 = vsub.f32 %v18_v10, %v41_v23  ;;  %v48_v38 = vsub.f32 %v19_v14, %v41_v23  ;;  %v102_v1 = vshrl.u32 %v101_v61, 7 }
  0x9e   :  { %v42_v29 = vmul.f32 0.0013020834, %v39_v27  ;;  %v55_v30 = vmul.f32 %v305_v24, %v305_v24  ;;  %v56_v31 = vmul.f32 %v307_v25, %v307_v25  ;;  %v57_v33 = vmul.f32 %v309_v26, %v309_v26 }
  0x9f   :  { %v58_v39 = vmul.f32 %v311_v28, %v311_v28  ;;  %v59_v44 = vmul.f32 %v317_v32, %v317_v32  ;;  %v60_v49 = vmul.f32 %v48_v38, %v48_v38  ;;  %v103_v4 = vsub.s32 0, %v102_v1 }
  0xa0   :  { %v67_v34 = vadd.f32 %v56_v31, %v55_v30  ;;  %v321_v35 = vsub.f32 %v20_v5, %v42_v29  ;;  %v323_v36 = vsub.f32 %v21_v6, %v42_v29  ;;  %v325_v37 = vsub.f32 %v22_v7, %v42_v29  ;;  %v99_v6 = vld [vmem:[%s385_s1] sm:$0x3f] }
  0xa1   :  { %v329_v41 = vsub.f32 %v23_v11, %v42_v29  ;;  %v337_v46 = vsub.f32 %v24_v15, %v42_v29  ;;  %v341_v51 = vsub.f32 %v25_v18, %v42_v29  ;;  %v107_v5 = vsub.s32 1, %v102_v1  ;;  %v143_v11 = vld [vmem:[%s386_s2] sm:$0x3f] }
  0xa2   :  { %v68_v40 = vadd.f32 %v67_v34, %v57_v33  ;;  %v61_v42 = vmul.f32 %v321_v35, %v321_v35  ;;  %v62_v43 = vmul.f32 %v323_v36, %v323_v36  ;;  %v63_v47 = vmul.f32 %v325_v37, %v325_v37 }
  0xa3   :  { %v64_v52 = vmul.f32 %v329_v41, %v329_v41  ;;  %v65_v55 = vmul.f32 %v337_v46, %v337_v46  ;;  %v66_v57 = vmul.f32 %v341_v51, %v341_v51  ;;  %v111_v7 = vsub.s32 2, %v102_v1 }
  0xa4   :  { %v69_v45 = vadd.f32 %v68_v40, %v58_v39  ;;  %v74_v48 = vadd.f32 %v62_v43, %v61_v42  ;;  %v115_v8 = vsub.s32 3, %v102_v1  ;;  %v119_v9 = vsub.s32 4, %v102_v1 }
  0xa5   :  { %v123_v10 = vsub.s32 5, %v102_v1  ;;  %v104_v12 = vrot.slane %v99_v6, %v103_v4  ;;  %v108_v13 = vrot.slane %v99_v6, %v107_v5  ;;  %v112_v14 = vrot.slane %v99_v6, %v111_v7 }
  0xa6   :  { %v70_v50 = vadd.f32 %v69_v45, %v59_v44  ;;  %v75_v53 = vadd.f32 %v74_v48, %v63_v47  ;;  %v116_v15 = vrot.slane %v99_v6, %v115_v8  ;;  %v120_v16 = vrot.slane %v99_v6, %v119_v9 }
  0xa7   :  { %v124_v17 = vrot.slane %v99_v6, %v123_v10  ;;  %v148_v19 = vrot.slane %v143_v11, %v103_v4  ;;  %v152_v20 = vrot.slane %v143_v11, %v107_v5  ;;  %v156_v21 = vrot.slane %v143_v11, %v111_v7 }
  0xa8   :  { %v71_v54 = vadd.f32 %v70_v50, %v60_v49  ;;  %v76_v56 = vadd.f32 %v75_v53, %v64_v52  ;;  %v160_v22 = vrot.slane %v143_v11, %v115_v8  ;;  %v164_v31 = vrot.slane %v143_v11, %v119_v9 }
  0xa9   :  { %v168_v33 = vrot.slane %v143_v11, %v123_v10 }
  0xaa   :  { %72 = vadd.xlane.f32.xlu1 %v71_v54  ;;  %v77_v58 = vadd.f32 %v76_v56, %v65_v55 }
  0xac   :  { %v78_v59 = vadd.f32 %v77_v58, %v66_v57 }
  0xae   :  { %79 = vadd.xlane.f32.xlu1 %v78_v59 }
 0x137   :  { %v73_v60 = vpop.xlane.xlu1 %72 }
 0x138   :  { %v81_v62 = vmul.f32 0.0013020834, %v73_v60 }
 0x13a   :  { %v83_v63 = vadd.f32 1e-12, %v81_v62 }
 0x13b   :  { %v80_v0 = vpop.xlane.xlu1 %79 }
 0x13c   :  { %245 = vrsqrt.f32 %v83_v63  ;;  %v82_v2 = vmul.f32 0.0013020834, %v80_v0 }
 0x13e   :  { %v84_v3 = vadd.f32 1e-12, %v82_v2 }
 0x140   :  { %247 = vrsqrt.f32 %v84_v3 }
 0x146   :  { %v246_v18 = vpop.eup %245 }
 0x147   :  { %v87_v23 = vmul.f32 %v246_v18, %v305_v24  ;;  %v88_v27 = vmul.f32 %v246_v18, %v307_v25  ;;  %v89_v29 = vmul.f32 %v246_v18, %v309_v26  ;;  %v90_v30 = vmul.f32 %v246_v18, %v311_v28 }
 0x148   :  { %v91_v34 = vmul.f32 %v246_v18, %v317_v32  ;;  %v92_v39 = vmul.f32 %v246_v18, %v48_v38 }
 0x149   :  { %v131_v40 = vmul.f32 %v104_v12, %v87_v23  ;;  %v132_v42 = vmul.f32 %v108_v13, %v88_v27  ;;  %v133_v43 = vmul.f32 %v112_v14, %v89_v29  ;;  %v134_v44 = vmul.f32 %v116_v15, %v90_v30 }
 0x14a   :  { %v248_v45 = vpop.eup %247  ;;  %v135_v47 = vmul.f32 %v120_v16, %v91_v34  ;;  %v136_v48 = vmul.f32 %v124_v17, %v92_v39 }
 0x14b   :  { %v175_v49 = vadd.f32 %v148_v19, %v131_v40  ;;  %v176_v24 = vadd.f32 %v152_v20, %v132_v42  ;;  %v177_v50 = vadd.f32 %v156_v21, %v133_v43  ;;  %v178_v25 = vadd.f32 %v160_v22, %v134_v44 }
 0x14c   :  { %v179_v52 = vadd.f32 %v164_v31, %v135_v47  ;;  %v180_v26 = vadd.f32 %v168_v33, %v136_v48  ;;  %v93_v28 = vmul.f32 %v248_v45, %v321_v35  ;;  %v94_v53 = vmul.f32 %v248_v45, %v323_v36 }
 0x14d   :  { %v239_v54 = vpack.c.bf16 %v176_v24, %v175_v49  ;;  %v240_v32 = vpack.c.bf16 %v178_v25, %v177_v50  ;;  %v95_v38 = vmul.f32 %v248_v45, %v325_v37  ;;  %v96_v55 = vmul.f32 %v248_v45, %v329_v41 }
 0x14e   :  { %v241_v56 = vpack.c.bf16 %v180_v26, %v179_v52  ;;  %v97_v57 = vmul.f32 %v248_v45, %v337_v46  ;;  %v98_v58 = vmul.f32 %v248_v45, %v341_v51  ;;  %v137_v59 = vmul.f32 %v104_v12, %v93_v28 }
 0x14f   :  { %223 = vst [vmem:[%s387_s3] sm:$0xff] %v239_v54  ;;  %224 = vst [vmem:[%s387_s3 + $0x8] sm:$0xff] %v240_v32  ;;  %v138_v35 = vmul.f32 %v108_v13, %v94_v53  ;;  %v139_v36 = vmul.f32 %v112_v14, %v95_v38  ;;  %v140_v60 = vmul.f32 %v116_v15, %v96_v55 }
 0x150   :  { %225 = vst [vmem:[%s387_s3 + $0x10] sm:$0xff] %v241_v56  ;;  %v141_v37 = vmul.f32 %v120_v16, %v97_v57  ;;  %v142_v41 = vmul.f32 %v124_v17, %v98_v58  ;;  %v181_v46 = vadd.f32 %v148_v19, %v137_v59 }
 0x151   :  { %v182_v51 = vadd.f32 %v152_v20, %v138_v35  ;;  %v183_v61 = vadd.f32 %v156_v21, %v139_v36  ;;  %v184_v62 = vadd.f32 %v160_v22, %v140_v60 }
 0x152   :  { %v185_v63 = vadd.f32 %v164_v31, %v141_v37  ;;  %v186_v0 = vadd.f32 %v168_v33, %v142_v41 }
 0x153   :  { %v242_v1 = vpack.c.bf16 %v182_v51, %v181_v46  ;;  %v243_v2 = vpack.c.bf16 %v184_v62, %v183_v61 }
 0x154   :  { %v244_v3 = vpack.c.bf16 %v186_v0, %v185_v63 }
 0x155   :  { %226 = vst [vmem:[%s387_s3 + $0x18] sm:$0xff] %v242_v1  ;;  %227 = vst [vmem:[%s387_s3 + $0x20] sm:$0xff] %v243_v2 }
 0x156   :  { %228 = vst [vmem:[%s387_s3 + $0x28] sm:$0xff] %v244_v3 }

// kernel: model_forward.88
= control target key start
LH: loop header
LB: loop body
LE: loop exit
PB: predicated region body
PF: predicated region fallthrough
CT: control target
= control target key end

     0   :  { %s1578_s15 = smov 0   ;;  %s1799_s0 = inlined_call_operand.vmem [shape: bf16[24,8,64], index: 0, kind: input, shape index: {}]   ;;  %s1800_s1 = inlined_call_operand.vmem [shape: bf16[24,8,64], index: 1, kind: input, shape index: {}]   ;;  %s1801_s2 = inlined_call_operand.vmem [shape: bf16[24,8,64], index: 2, kind: input, shape index: {}]   ;;  %s1802_s3 = inlined_call_operand.vmem [shape: f32[24,8], index: 3, kind: input, shape index: {}]   ;;  %s1803_s4 = inlined_call_operand.vmem [shape: bf16[24,8,64], index: 4, kind: output, shape index: {}]  }
   0x1 LB: > { %s1584_s16 = sadd.s32 4294967295, %s1548_s15   ;;  %p1342_p0 = scmp.ge.s32.totalorder %s1548_s15, 1  ;;  %s1548_s15 = sphi %s1578_s15, %s14_s15  }
   0x2   : > { %p194_p1 = scmp.lt.s32.totalorder %s1548_s15, 4 }
   0x4   : > { %p195_p2 = pnand %p1342_p0, %p194_p1 }
   0x5   : > { %s1343_s17 = sshll.u32 (!%p195_p2), %s1584_s16, 3  ;;  %v1550_v0 = vmov (!%p195_p2), 0.0   ;;  %vm1551_vm0 = vmmov (!%p195_p2), 0   ;;  %vm287_vm1 = vcmask (!%p195_p2), 523264   ;;  %p252_p4 = scmp.lt.s32.totalorder (!%p195_p2), %s1584_s16, 2  ;;  %v670_v27 = vlaneseq (!%p195_p2) }
   0x6   : > { %198 = sbr.rel (%p195_p2) target bundleno = 800 (0x320), region = 36  ;;  %1402 = vmatprep.subr.bf16.mxu0 (!%p195_p2), %v1550_v0  ;;  %1408 = vmatprep.subr.bf16.mxu1 (!%p195_p2), %v1550_v0  ;;  %p235_p3 = scmp.lt.s32.totalorder (!%p195_p2), %s1343_s17, 23  ;;  %v1552_v25 = vmov (!%p195_p2), 1966171168   ;;  %vm763_vm2 = vcmask (!%p195_p2), 64512   ;;  %vm863_vm3 = vcmask (!%p195_p2), 1043456  }
   0x7   : > { %1404 = vmatprep.mubr.msk.bf16.mxu0 (!%p195_p2), %vm1551_vm0, %v1550_v0  ;;  %1410 = vmatprep.mubr.msk.bf16.mxu1 (!%p195_p2), %vm1551_vm0, %v1550_v0  ;;  %v668_v26 = vunpack.c.l.s4 (!%p195_p2), %v1552_v25  ;;  %v671_v29 = vshrl.u32 (!%p195_p2), %v670_v27, 7  ;;  %vm1237_vm4 = vcmask (!%p195_p2), 519168  }
   0x9   : > { %v669_v28 = vunpack.c.0.s8 (!%p195_p2), %v668_v26  ;;  %v1670_v35 = vsub.s32 (!%p195_p2), 0, %v671_v29 }
   0xb   : > { %v672_v30 = vsub.s32 (!%p195_p2), %v669_v28, %v671_v29 }
   0xd   : > { %s1805_s17 = smov (!%p235_p3, %s1343_s17), 23  ;;  %s1807_s16 = smov (!%p252_p4, %s1584_s16), 2 }
   0xe   : > { %s1595_s18 = sshll.u32 %s1805_s17, 2  ;;  %s1349_s25 = sshll.u32 %s1807_s16, 3 }
   0xf   : > { %s1601_s21 = scalar_lea.vmem %s1800_s1, %s1595_s18  ;;  %s1611_s24 = scalar_lea.vmem %s1799_s0, %s1595_s18 }
  0x10   : > { %v271_v1 = vld [vmem:[%s1601_s21] sm:$0xf]  ;;  %v272_v2 = vld [vmem:[%s1601_s21 + $0x4] sm:$0xf]  ;;  %v273_v5 = vld [vmem:[%s1601_s21 + $0x8] sm:$0xf]  ;;  %s255_s28 = scalar_lea.vmem %s1802_s3, %s1349_s25  ;;  %s250_s5 = scalar_lea.vmem %s1801_s2, %s1595_s18 }
  0x11   : > { %v292_v3 = vsel %vm287_vm1, %v271_v1, 0  ;;  %v338_v4 = vsel %vm287_vm1, %v272_v2, 0  ;;  %v274_v6 = vld [vmem:[%s1601_s21 + $0xc] sm:$0xf]  ;;  %v263_v7 = vld [vmem:[%s1611_s24] sm:$0xf]  ;;  %s1778_s8 = scalar_lea.vmem %s1803_s4, %s1595_s18 }
  0x12   : > { %1403 = vmatpush3.bf16.xpose.msra.mxu0 %v292_v3  ;;  %1409 = vmatpush3.bf16.xpose.msra.mxu1 %v338_v4  ;;  %v264_v8 = vld [vmem:[%s1611_s24 + $0x4] sm:$0xf]  ;;  %v384_v9 = vsel %vm287_vm1, %v273_v5, 0  ;;  %v430_v10 = vsel %vm287_vm1, %v274_v6, 0  ;;  %v275_v11 = vld [vmem:[%s1601_s21 + $0x10] sm:$0xf] }
  0x13   : > { %1414 = vmatprep.subr.bf16.mxu0 %v1550_v0  ;;  %1420 = vmatprep.subr.bf16.mxu1 %v1550_v0  ;;  %v276_v12 = vld [vmem:[%s1601_s21 + $0x14] sm:$0xf]  ;;  %v265_v13 = vld [vmem:[%s1611_s24 + $0x8] sm:$0xf]  ;;  %v266_v14 = vld [vmem:[%s1611_s24 + $0xc] sm:$0xf] }
  0x14   : > { %v476_v15 = vsel %vm287_vm1, %v275_v11, 0  ;;  %v522_v16 = vsel %vm287_vm1, %v276_v12, 0  ;;  %v277_v17 = vld [vmem:[%s1601_s21 + $0x18] sm:$0xf]  ;;  %v278_v18 = vld [vmem:[%s1601_s21 + $0x1c] sm:$0xf] }
  0x15   : > { %v267_v19 = vld [vmem:[%s1611_s24 + $0x10] sm:$0xf]  ;;  %v268_v20 = vld [vmem:[%s1611_s24 + $0x14] sm:$0xf]  ;;  %v568_v21 = vsel %vm287_vm1, %v277_v17, 0  ;;  %v614_v22 = vsel %vm287_vm1, %v278_v18, 0 }
  0x16   : > { %v269_v23 = vld [vmem:[%s1611_s24 + $0x18] sm:$0xf]  ;;  %v270_v24 = vld [vmem:[%s1611_s24 + $0x1c] sm:$0xf]  ;;  %v664_v31 = vld [vmem:[%s255_s28] sm:$0xff] }
  0x17   : > { %v673_v32 = vrot.slane %v664_v31, %v672_v30  ;;  %v666_v37 = vcombine.high %v664_v31, %v664_v31 }
  0x19   : > { %1405 = vmatmul.mubr.msk.bf16.vlgmr.msra.gmra.mrb[0].mxu0 %vm287_vm1, %v263_v7  ;;  %1411 = vmatmul.mubr.msk.bf16.vlgmr.msra.gmra.mrb[0].mxu1 %vm287_vm1, %v264_v8  ;;  %v681_v33 = vcombine.high %v673_v32, %v673_v32  ;;  %v689_v34 = vrot.slane %v673_v32, %v672_v30  ;;  %v680_v54 = vrot.slane %v666_v37, %v672_v30 }
  0x1a   : > { %1415 = vmatpush3.bf16.xpose.msra.mxu0 %v384_v9  ;;  %1421 = vmatpush3.bf16.xpose.msra.mxu1 %v430_v10 }
  0x1b   : > { %1416 = vmatprep.mubr.msk.bf16.mxu0 %vm1551_vm0, %v1550_v0  ;;  %1422 = vmatprep.mubr.msk.bf16.mxu1 %vm1551_vm0, %v1550_v0  ;;  %v703_v36 = vrot.slane %v681_v33, %v672_v30  ;;  %v718_v38 = vrot.slane %v689_v34, %v1670_v35  ;;  %v711_v48 = vcombine.high %v689_v34, %v689_v34 }
  0x1c   : > { %1426 = vmatprep.subr.bf16.mxu0 %v1550_v0  ;;  %1432 = vmatprep.subr.bf16.mxu1 %v1550_v0  ;;  %v682_v59 = vcombine.high %v680_v54, %v680_v54  ;;  %v696_v10 = vrot.slane %v680_v54, %v672_v30 }
  0x1d   : > { %v722_v39 = vrot.slane %v703_v36, %v1670_v35  ;;  %v713_v53 = vcombine.high %v703_v36, %v703_v36  ;;  %v726_v57 = vrot.slane %v711_v48, %v1670_v35 }
  0x1e   : > { %v710_v9 = vrot.slane %v682_v59, %v672_v30  ;;  %v712_v28 = vcombine.high %v696_v10, %v696_v10 }
  0x1f   : > { %v730_v58 = vrot.slane %v713_v53, %v1670_v35 }
  0x20   : > { %v714_v27 = vcombine.high %v710_v9, %v710_v9  ;;  %v742_v32 = vrot.slane %v712_v28, %v1670_v35  ;;  %v281_v28 = vld [vmem:[%s250_s5 + $0x8] sm:$0xf] }
  0x21   : > { %1417 = vmatmul.mubr.msk.bf16.vlgmr.msra.gmra.mrb[4].mxu0 %vm287_vm1, %v265_v13  ;;  %1423 = vmatmul.mubr.msk.bf16.vlgmr.msra.gmra.mrb[4].mxu1 %vm287_vm1, %v266_v14  ;;  %v738_v13 = vrot.slane %v710_v9, %v1670_v35  ;;  %v734_v14 = vrot.slane %v696_v10, %v1670_v35 }
  0x22   : > { %1427 = vmatpush3.bf16.xpose.msra.mxu0 %v476_v15  ;;  %1433 = vmatpush3.bf16.xpose.msra.mxu1 %v522_v16  ;;  %v746_v31 = vrot.slane %v714_v27, %v1670_v35 }
  0x23   : > { %1428 = vmatprep.mubr.msk.bf16.mxu0 %vm1551_vm0, %v1550_v0  ;;  %1434 = vmatprep.mubr.msk.bf16.mxu1 %vm1551_vm0, %v1550_v0 }
  0x24   : > { %1438 = vmatprep.subr.bf16.mxu0 %v1550_v0  ;;  %1444 = vmatprep.subr.bf16.mxu1 %v1550_v0 }
  0x29   : > { %1429 = vmatmul.mubr.msk.bf16.vlgmr.msra.gmra.mrb[8].mxu0 %vm287_vm1, %v267_v19  ;;  %1435 = vmatmul.mubr.msk.bf16.vlgmr.msra.gmra.mrb[8].mxu1 %vm287_vm1, %v268_v20 }
  0x2a   : > { %1439 = vmatpush3.bf16.xpose.msra.mxu0 %v568_v21  ;;  %1445 = vmatpush3.bf16.xpose.msra.mxu1 %v614_v22 }
  0x2b   : > { %1440 = vmatprep.mubr.msk.bf16.mxu0 %vm1551_vm0, %v1550_v0  ;;  %1446 = vmatprep.mubr.msk.bf16.mxu1 %vm1551_vm0, %v1550_v0 }
  0x2c   : > { %1450 = vmatprep.subr.bf16.mxu0 %v1550_v0  ;;  %1456 = vmatprep.subr.bf16.mxu1 %v1550_v0 }
  0x31   : > { %1441 = vmatmul.mubr.msk.bf16.vlgmr.msra.gmra.mrb[12].mxu0 %vm287_vm1, %v269_v23  ;;  %1447 = vmatmul.mubr.msk.bf16.vlgmr.msra.gmra.mrb[12].mxu1 %vm287_vm1, %v270_v24 }
  0x32   : > { %1452 = vmatprep.mubr.msk.bf16.mxu0 %vm1551_vm0, %v1550_v0  ;;  %1458 = vmatprep.mubr.msk.bf16.mxu1 %vm1551_vm0, %v1550_v0 }
  0xec   : > { %v328_v40 = vpop.f32.mrb[0].mxu0  ;;  %v374_v41 = vpop.f32.mrb[0].mxu1 }
  0xed   : > { %v656_v42 = vmul.f32 0.125, %v328_v40  ;;  %v1406_v43 = vpop.f32.mrb[1].mxu0  ;;  %v657_v44 = vmul.f32 0.125, %v374_v41  ;;  %v1412_v45 = vpop.f32.mrb[1].mxu1 }
  0xee   : > { %v331_v46 = vpop.f32.mrb[2].mxu0  ;;  %v377_v47 = vpop.f32.mrb[2].mxu1 }
  0xef   : > { %v1407_v49 = vpop.f32.mrb[3].mxu0  ;;  %v1413_v50 = vpop.f32.mrb[3].mxu1  ;;  %v1674_v51 = vadd.f32 %v718_v38, %v656_v42  ;;  %v1676_v52 = vadd.f32 %v722_v39, %v657_v44 }
  0xf1   : > { %v764_v55 = vsel %vm763_vm2, %v1674_v51, -inf  ;;  %v767_v56 = vsel %vm763_vm2, %v1676_v52, -inf }
  0xf2   : > { %765 = vmax.xlane.f32.xlu0 %v764_v55 }
  0xf4   : > { %v420_v60 = vpop.f32.mrb[4].mxu0  ;;  %v466_v61 = vpop.f32.mrb[4].mxu1 }
  0xf5   : > { %v658_v62 = vmul.f32 0.125, %v420_v60  ;;  %v1418_v63 = vpop.f32.mrb[5].mxu0  ;;  %v659_v1 = vmul.f32 0.125, %v466_v61  ;;  %v1424_v2 = vpop.f32.mrb[5].mxu1 }
  0xf6   : > { %768 = vmax.xlane.f32.xlu0 %v767_v56  ;;  %v423_v3 = vpop.f32.mrb[6].mxu0  ;;  %v469_v4 = vpop.f32.mrb[6].mxu1 }
  0xf7   : > { %v1419_v5 = vpop.f32.mrb[7].mxu0  ;;  %v1425_v6 = vpop.f32.mrb[7].mxu1  ;;  %v757_v7 = vadd.f32 %v726_v57, %v658_v62  ;;  %v758_v8 = vadd.f32 %v730_v58, %v659_v1 }
  0xf9   : > { %v770_v11 = vsel %vm763_vm2, %v757_v7, -inf  ;;  %v773_v12 = vsel %vm763_vm2, %v758_v8, -inf }
  0xfa   : > { %771 = vmax.xlane.f32.xlu1 %v770_v11 }
  0xfc   : > { %v512_v15 = vpop.f32.mrb[8].mxu0  ;;  %v558_v16 = vpop.f32.mrb[8].mxu1 }
  0xfd   : > { %v660_v17 = vmul.f32 0.125, %v512_v15  ;;  %v661_v18 = vmul.f32 0.125, %v558_v16  ;;  %v1430_v19 = vpop.f32.mrb[9].mxu0  ;;  %v1436_v20 = vpop.f32.mrb[9].mxu1 }
  0xfe   : > { %774 = vmax.xlane.f32.xlu1 %v773_v12  ;;  %v515_v21 = vpop.f32.mrb[10].mxu0  ;;  %v561_v22 = vpop.f32.mrb[10].mxu1 }
  0xff   : > { %v1431_v23 = vpop.f32.mrb[11].mxu0  ;;  %v1437_v24 = vpop.f32.mrb[11].mxu1  ;;  %v760_v25 = vadd.f32 %v738_v13, %v661_v18  ;;  %v759_v26 = vadd.f32 %v734_v14, %v660_v17 }
 0x100   : > { %v279_v24 = vld [vmem:[%s250_s5] sm:$0xf] }
 0x101   : > { %v779_v29 = vsel %vm763_vm2, %v760_v25, -inf  ;;  %v776_v30 = vsel %vm763_vm2, %v759_v26, -inf }
 0x102   : > { %780 = vmax.xlane.f32.xlu1 %v779_v29  ;;  %777 = vmax.xlane.f32.xlu0 %v776_v30  ;;  %v957_v29 = vsel %vm863_vm3, %v281_v28, 0  ;;  %v282_v30 = vld [vmem:[%s250_s5 + $0xc] sm:$0xf] }
 0x104   : > { %v604_v33 = vpop.f32.mrb[12].mxu0  ;;  %v650_v34 = vpop.f32.mrb[12].mxu1 }
 0x105   : > { %v662_v36 = vmul.f32 0.125, %v604_v33  ;;  %v663_v37 = vmul.f32 0.125, %v650_v34  ;;  %v1442_v38 = vpop.f32.mrb[13].mxu0  ;;  %v1448_v39 = vpop.f32.mrb[13].mxu1  ;;  %v284_v34 = vld [vmem:[%s250_s5 + $0x14] sm:$0xf] }
 0x106   : > { %v607_v40 = vpop.f32.mrb[14].mxu0  ;;  %v653_v41 = vpop.f32.mrb[14].mxu1  ;;  %v286_v39 = vld [vmem:[%s250_s5 + $0x1c] sm:$0xf] }
 0x107   : > { %v1443_v42 = vpop.f32.mrb[15].mxu0  ;;  %v1449_v43 = vpop.f32.mrb[15].mxu1  ;;  %v762_v44 = vadd.f32 %v746_v31, %v663_v37  ;;  %v761_v45 = vadd.f32 %v742_v32, %v662_v36  ;;  %v1003_v31 = vsel %vm863_vm3, %v282_v30, 0  ;;  %v283_v32 = vld [vmem:[%s250_s5 + $0x10] sm:$0xf]  ;;  %v1095_v36 = vsel %vm863_vm3, %v284_v34, 0 }
 0x108   : > { %v1049_v33 = vsel %vm863_vm3, %v283_v32, 0  ;;  %v285_v37 = vld [vmem:[%s250_s5 + $0x18] sm:$0xf]  ;;  %v1187_v40 = vsel %vm863_vm3, %v286_v39, 0 }
 0x109   : > { %v785_v46 = vsel %vm763_vm2, %v762_v44, -inf  ;;  %v782_v47 = vsel %vm763_vm2, %v761_v45, -inf  ;;  %v1141_v38 = vsel %vm863_vm3, %v285_v37, 0 }
 0x10a   : > { %786 = vmax.xlane.f32.xlu1 %v785_v46  ;;  %783 = vmax.xlane.f32.xlu0 %v782_v47 }
 0x17f   : > { %v766_v48 = vpop.xlane.xlu0 %765 }
 0x180   : > { %v788_v35 = vsub.f32 %v1674_v51, %v766_v48 }
 0x182   : > { %v796_v49 = vmul.f32 1.442695, %v788_v35 }
 0x183   : > { %v769_v50 = vpop.xlane.xlu0 %768 }
 0x184   : > { %1510 = vpow2.f32 %v796_v49  ;;  %v789_v53 = vsub.f32 %v1676_v52, %v769_v50 }
 0x186   : > { %v798_v54 = vmul.f32 1.442695, %v789_v53 }
 0x187   : > { %v772_v55 = vpop.xlane.xlu1 %771 }
 0x188   : > { %1512 = vpow2.f32 %v798_v54  ;;  %v790_v56 = vsub.f32 %v757_v7, %v772_v55 }
 0x18a   : > { %v800_v57 = vmul.f32 1.442695, %v790_v56 }
 0x18b   : > { %v775_v58 = vpop.xlane.xlu1 %774 }
 0x18c   : > { %1514 = vpow2.f32 %v800_v57  ;;  %v791_v59 = vsub.f32 %v758_v8, %v775_v58 }
 0x18e   : > { %v1696_v60 = vpop.eup %1510  ;;  %v802_v61 = vmul.f32 1.442695, %v791_v59 }
 0x18f   : > { %v781_v62 = vpop.xlane.xlu1 %780  ;;  %v778_v63 = vpop.xlane.xlu0 %777  ;;  %v812_v51 = vsel %vm763_vm2, %v1696_v60, 0.0 }
 0x190   : > { %1516 = vpow2.f32 %v802_v61  ;;  %v793_v1 = vsub.f32 %v760_v25, %v781_v62  ;;  %v792_v2 = vsub.f32 %v759_v26, %v778_v63  ;;  %813 = vadd.xlane.f32.xlu0 %v812_v51  ;;  %v865_v25 = vsel %vm863_vm3, %v279_v24, 0  ;;  %v280_v26 = vld [vmem:[%s250_s5 + $0x4] sm:$0xf] }
 0x191   : > { %1451 = vmatpush3.bf16.msra.mxu0 %v865_v25  ;;  %v911_v27 = vsel %vm863_vm3, %v280_v26, 0 }
 0x192   : > { %v1700_v52 = vpop.eup %1512  ;;  %v806_v3 = vmul.f32 1.442695, %v793_v1  ;;  %v804_v4 = vmul.f32 1.442695, %v792_v2  ;;  %1462 = vmatprep.subr.bf16.mxu0 %v1550_v0  ;;  %1457 = vmatpush3.bf16.msra.mxu1 %v911_v27 }
 0x193   : > { %v815_v5 = vsel %vm763_vm2, %v1700_v52, 0.0  ;;  %1468 = vmatprep.subr.bf16.mxu1 %v1550_v0 }
 0x194   : > { %1518 = vpow2.f32 %v806_v3  ;;  %816 = vadd.xlane.f32.xlu1 %v815_v5 }
 0x195   : > { %1520 = vpow2.f32 %v804_v4 }
 0x196   : > { %v1704_v6 = vpop.eup %1514 }
 0x197   : > { %v787_v7 = vpop.xlane.xlu1 %786  ;;  %v784_v8 = vpop.xlane.xlu0 %783  ;;  %v818_v9 = vsel %vm763_vm2, %v1704_v6, 0.0 }
 0x198   : > { %v795_v10 = vsub.f32 %v762_v44, %v787_v7  ;;  %v794_v11 = vsub.f32 %v761_v45, %v784_v8  ;;  %819 = vadd.xlane.f32.xlu0 %v818_v9 }
 0x19a   : > { %v1708_v12 = vpop.eup %1516  ;;  %v810_v13 = vmul.f32 1.442695, %v795_v10  ;;  %v808_v14 = vmul.f32 1.442695, %v794_v11 }
 0x19b   : > { %v821_v15 = vsel %vm763_vm2, %v1708_v12, 0.0 }
 0x19c   : > { %1522 = vpow2.f32 %v810_v13  ;;  %822 = vadd.xlane.f32.xlu1 %v821_v15 }
 0x19d   : > { %1524 = vpow2.f32 %v808_v14 }
 0x19e   : > { %v1712_v16 = vpop.eup %1518 }
 0x19f   : > { %v1714_v17 = vpop.eup %1520  ;;  %v827_v18 = vsel %vm763_vm2, %v1712_v16, 0.0 }
 0x1a0   : > { %828 = vadd.xlane.f32.xlu1 %v827_v18  ;;  %v824_v19 = vsel %vm763_vm2, %v1714_v17, 0.0 }
 0x1a1   : > { %825 = vadd.xlane.f32.xlu0 %v824_v19 }
 0x1a6   : > { %v1720_v20 = vpop.eup %1522 }
 0x1a7   : > { %v1722_v21 = vpop.eup %1524  ;;  %v833_v22 = vsel %vm763_vm2, %v1720_v20, 0.0 }
 0x1a8   : > { %834 = vadd.xlane.f32.xlu1 %v833_v22  ;;  %v830_v23 = vsel %vm763_vm2, %v1722_v21, 0.0 }
 0x1a9   : > { %831 = vadd.xlane.f32.xlu0 %v830_v23 }
 0x21d   : > { %v814_v41 = vpop.xlane.xlu0 %813 }
 0x21e   : > { %1526 = vrcp.f32 %v814_v41 }
 0x221   : > { %v817_v42 = vpop.xlane.xlu1 %816 }
 0x222   : > { %1528 = vrcp.f32 %v817_v42 }
 0x225   : > { %v820_v43 = vpop.xlane.xlu0 %819 }
 0x226   : > { %1530 = vrcp.f32 %v820_v43 }
 0x228   : > { %v1527_v44 = vpop.eup %1526 }
 0x229   : > { %v844_v45 = vmul.f32 %v1527_v44, %v1696_v60  ;;  %v823_v46 = vpop.xlane.xlu1 %822 }
 0x22a   : > { %1532 = vrcp.f32 %v823_v46 }
 0x22b   : > { %v852_v47 = vpack.c.bf16 %v844_v45, %v844_v45 }
 0x22c   : > { %v1529_v48 = vpop.eup %1528 }
 0x22d   : > { %v845_v35 = vmul.f32 %v1529_v48, %v1700_v52  ;;  %v829_v49 = vpop.xlane.xlu1 %828  ;;  %1453 = vmatmul.mubr.msk.bf16.vlgmr.msra.gmra.mrb[16].mxu0 %vm763_vm2, %v852_v47 }
 0x22e   : > { %1534 = vrcp.f32 %v829_v49  ;;  %v826_v50 = vpop.xlane.xlu0 %825  ;;  %1463 = vmatpush3.bf16.msra.mxu0 %v957_v29  ;;  %1464 = vmatprep.mubr.msk.bf16.mxu0 %vm1551_vm0, %v1550_v0 }
 0x22f   : > { %1536 = vrcp.f32 %v826_v50  ;;  %v853_v53 = vpack.c.bf16 %v845_v35, %v845_v35  ;;  %1474 = vmatprep.subr.bf16.mxu0 %v1550_v0 }
 0x230   : > { %v1531_v54 = vpop.eup %1530 }
 0x231   : > { %v846_v55 = vmul.f32 %v1531_v54, %v1704_v6  ;;  %1459 = vmatmul.mubr.msk.bf16.vlgmr.msra.gmra.mrb[16].mxu1 %vm763_vm2, %v853_v53 }
 0x232   : > { %1469 = vmatpush3.bf16.msra.mxu1 %v1003_v31  ;;  %1470 = vmatprep.mubr.msk.bf16.mxu1 %vm1551_vm0, %v1550_v0 }
 0x233   : > { %v854_v56 = vpack.c.bf16 %v846_v55, %v846_v55  ;;  %1480 = vmatprep.subr.bf16.mxu1 %v1550_v0 }
 0x234   : > { %v1533_v57 = vpop.eup %1532 }
 0x235   : > { %v847_v58 = vmul.f32 %v1533_v57, %v1708_v12  ;;  %v835_v59 = vpop.xlane.xlu1 %834  ;;  %1465 = vmatmul.mubr.msk.bf16.vlgmr.msra.gmra.mrb[20].mxu0 %vm763_vm2, %v854_v56 }
 0x236   : > { %1538 = vrcp.f32 %v835_v59  ;;  %v832_v60 = vpop.xlane.xlu0 %831  ;;  %1475 = vmatpush3.bf16.msra.mxu0 %v1049_v33  ;;  %1476 = vmatprep.mubr.msk.bf16.mxu0 %vm1551_vm0, %v1550_v0 }
 0x237   : > { %1540 = vrcp.f32 %v832_v60  ;;  %v855_v61 = vpack.c.bf16 %v847_v58, %v847_v58  ;;  %1486 = vmatprep.subr.bf16.mxu0 %v1550_v0 }
 0x238   : > { %v1535_v62 = vpop.eup %1534 }
 0x239   : > { %v1537_v63 = vpop.eup %1536  ;;  %1471 = vmatmul.mubr.msk.bf16.vlgmr.msra.gmra.mrb[20].mxu1 %vm763_vm2, %v855_v61  ;;  %v849_v1 = vmul.f32 %v1535_v62, %v1712_v16 }
 0x23a   : > { %v848_v51 = vmul.f32 %v1537_v63, %v1714_v17  ;;  %1481 = vmatpush3.bf16.msra.mxu1 %v1095_v36  ;;  %1482 = vmatprep.mubr.msk.bf16.mxu1 %vm1551_vm0, %v1550_v0 }
 0x23b   : > { %1492 = vmatprep.subr.bf16.mxu1 %v1550_v0  ;;  %v857_v52 = vpack.c.bf16 %v849_v1, %v849_v1 }
 0x23c   : > { %v856_v2 = vpack.c.bf16 %v848_v51, %v848_v51 }
 0x23e   : > { %1477 = vmatmul.mubr.msk.bf16.vlgmr.msra.gmra.mrb[24].mxu0 %vm763_vm2, %v856_v2 }
 0x23f   : > { %1487 = vmatpush3.bf16.msra.mxu0 %v1141_v38  ;;  %1488 = vmatprep.mubr.msk.bf16.mxu0 %vm1551_vm0, %v1550_v0 }
 0x240   : > { %v1539_v3 = vpop.eup %1538 }
 0x241   : > { %v1541_v4 = vpop.eup %1540  ;;  %1483 = vmatmul.mubr.msk.bf16.vlgmr.msra.gmra.mrb[24].mxu1 %vm763_vm2, %v857_v52  ;;  %v851_v6 = vmul.f32 %v1539_v3, %v1720_v20 }
 0x242   : > { %v850_v5 = vmul.f32 %v1541_v4, %v1722_v21  ;;  %1493 = vmatpush3.bf16.msra.mxu1 %v1187_v40  ;;  %1494 = vmatprep.mubr.msk.bf16.mxu1 %vm1551_vm0, %v1550_v0 }
 0x243   : > { %v859_v8 = vpack.c.bf16 %v851_v6, %v851_v6 }
 0x244   : > { %v858_v7 = vpack.c.bf16 %v850_v5, %v850_v5 }
 0x246   : > { %1489 = vmatmul.mubr.msk.bf16.vlgmr.msra.gmra.mrb[28].mxu0 %vm763_vm2, %v858_v7 }
 0x249   : > { %1495 = vmatmul.mubr.msk.bf16.vlgmr.msra.gmra.mrb[28].mxu1 %vm763_vm2, %v859_v8 }
 0x300   : > { %v901_v9 = vpop.f32.mrb[16].mxu0 }
 0x301   : > { %v1229_v10 = vpack.c.bf16 %v901_v9, %v901_v9  ;;  %v1454_v0 = vpop.f32.mrb[17].mxu0 }
 0x302   : > { %v904_v11 = vpop.f32.mrb[18].mxu0 }
 0x303   : > { %1238 = vst.msk [vmem:[%s1778_s8] sm:$0xf] %vm1237_vm4, %v1229_v10  ;;  %v1455_v12 = vpop.f32.mrb[19].mxu0 }
 0x304   : > { %v947_v13 = vpop.f32.mrb[16].mxu1 }
 0x305   : > { %v1230_v14 = vpack.c.bf16 %v947_v13, %v947_v13  ;;  %v1460_v15 = vpop.f32.mrb[17].mxu1 }
 0x306   : > { %v950_v16 = vpop.f32.mrb[18].mxu1 }
 0x307   : > { %1239 = vst.msk [vmem:[%s1778_s8 + $0x4] sm:$0xf] %vm1237_vm4, %v1230_v14  ;;  %v1461_v17 = vpop.f32.mrb[19].mxu1 }
 0x308   : > { %v993_v18 = vpop.f32.mrb[20].mxu0 }
 0x309   : > { %v1231_v19 = vpack.c.bf16 %v993_v18, %v993_v18  ;;  %v1466_v20 = vpop.f32.mrb[21].mxu0 }
 0x30a   : > { %v996_v21 = vpop.f32.mrb[22].mxu0 }
 0x30b   : > { %1240 = vst.msk [vmem:[%s1778_s8 + $0x8] sm:$0xf] %vm1237_vm4, %v1231_v19  ;;  %v1467_v22 = vpop.f32.mrb[23].mxu0 }
 0x30c   : > { %v1039_v23 = vpop.f32.mrb[20].mxu1 }
 0x30d   : > { %v1232_v24 = vpack.c.bf16 %v1039_v23, %v1039_v23  ;;  %v1472_v25 = vpop.f32.mrb[21].mxu1 }
 0x30e   : > { %v1042_v26 = vpop.f32.mrb[22].mxu1 }
 0x30f   : > { %1241 = vst.msk [vmem:[%s1778_s8 + $0xc] sm:$0xf] %vm1237_vm4, %v1232_v24  ;;  %v1473_v27 = vpop.f32.mrb[23].mxu1 }
 0x311   : > { %v1085_v28 = vpop.f32.mrb[24].mxu0 }
 0x312   : > { %v1233_v29 = vpack.c.bf16 %v1085_v28, %v1085_v28  ;;  %v1478_v30 = vpop.f32.mrb[25].mxu0 }
 0x313   : > { %v1088_v31 = vpop.f32.mrb[26].mxu0 }
 0x314   : > { %1242 = vst.msk [vmem:[%s1778_s8 + $0x10] sm:$0xf] %vm1237_vm4, %v1233_v29  ;;  %v1479_v32 = vpop.f32.mrb[27].mxu0  ;;  %v1131_v33 = vpop.f32.mrb[24].mxu1 }
 0x315   : > { %v1234_v34 = vpack.c.bf16 %v1131_v33, %v1131_v33  ;;  %v1484_v36 = vpop.f32.mrb[25].mxu1 }
 0x316   : > { %v1134_v37 = vpop.f32.mrb[26].mxu1 }
 0x317   : > { %1243 = vst.msk [vmem:[%s1778_s8 + $0x14] sm:$0xf] %vm1237_vm4, %v1234_v34  ;;  %v1485_v38 = vpop.f32.mrb[27].mxu1 }
 0x319   : > { %v1177_v39 = vpop.f32.mrb[28].mxu0 }
 0x31a   : > { %v1235_v40 = vpack.c.bf16 %v1177_v39, %v1177_v39  ;;  %v1490_v41 = vpop.f32.mrb[29].mxu0 }
 0x31b   : > { %v1180_v42 = vpop.f32.mrb[30].mxu0 }
 0x31c   : > { %1244 = vst.msk [vmem:[%s1778_s8 + $0x18] sm:$0xf] %vm1237_vm4, %v1235_v40  ;;  %v1491_v43 = vpop.f32.mrb[31].mxu0  ;;  %v1223_v44 = vpop.f32.mrb[28].mxu1 }
 0x31d   : > { %v1236_v45 = vpack.c.bf16 %v1223_v44, %v1223_v44  ;;  %v1496_v46 = vpop.f32.mrb[29].mxu1 }
 0x31e   : > { %v1226_v47 = vpop.f32.mrb[30].mxu1 }
 0x31f   : > { %1245 = vst.msk [vmem:[%s1778_s8 + $0x1c] sm:$0xf] %vm1237_vm4, %v1236_v45  ;;  %v1497_v48 = vpop.f32.mrb[31].mxu1 }
 0x320 PF: > { %s14_s15 = sadd.s32 1, %s1548_s15  }
 0x321   : > { %p11_p5 = scmp.ge.s32.totalorder %s14_s15, 5  }
 0x323   :  { %13 = sbr.rel (!%p11_p5) target bundleno = 1 (0x1), region = 75 }

// kernel: model_forward.90
= control target key start
LH: loop header
LB: loop body
LE: loop exit
PB: predicated region body
PF: predicated region fallthrough
CT: control target
= control target key end

     0   :  { %s428_s0 = inlined_call_operand.vmem [shape: bf16[16,768], index: 0, kind: input, shape index: {}]   ;;  %s429_s1 = inlined_call_operand.vmem [shape: bf16[16,768], index: 1, kind: input, shape index: {}]   ;;  %s430_s2 = inlined_call_operand.vmem [shape: f32[1,768], index: 2, kind: input, shape index: {}]   ;;  %s431_s3 = inlined_call_operand.vmem [shape: f32[1,768], index: 3, kind: input, shape index: {}]   ;;  %s432_s4 = inlined_call_operand.vmem [shape: bf16[16,768], index: 4, kind: output, shape index: {}]  }
   0x1   :  { %v17_v0 = vld [vmem:[%s428_s0] sm:$0xff]  ;;  %v18_v1 = vld [vmem:[%s428_s0 + $0x8] sm:$0xff]  ;;  %v19_v2 = vld [vmem:[%s428_s0 + $0x10] sm:$0xff] }
   0x2   :  { %v23_v3 = vunpack.c.l.bf16 %v17_v0  ;;  %v24_v4 = vunpack.c.h.bf16 %v17_v0  ;;  %v25_v5 = vunpack.c.l.bf16 %v18_v1  ;;  %v35_v6 = vld [vmem:[%s429_s1] sm:$0xff]  ;;  %v36_v7 = vld [vmem:[%s429_s1 + $0x8] sm:$0xff]  ;;  %v37_v8 = vld [vmem:[%s429_s1 + $0x10] sm:$0xff]  ;;  %v26_v9 = vunpack.c.h.bf16 %v18_v1 }
   0x3   :  { %v41_v10 = vunpack.c.l.bf16 %v35_v6  ;;  %v42_v11 = vunpack.c.h.bf16 %v35_v6  ;;  %v20_v12 = vld [vmem:[%s428_s0 + $0x18] sm:$0xff]  ;;  %v43_v13 = vunpack.c.l.bf16 %v36_v7  ;;  %v44_v14 = vunpack.c.h.bf16 %v36_v7  ;;  %v21_v15 = vld [vmem:[%s428_s0 + $0x20] sm:$0xff]  ;;  %v22_v24 = vld [vmem:[%s428_s0 + $0x28] sm:$0xff] }
   0x4   :  { %v27_v16 = vunpack.c.l.bf16 %v19_v2  ;;  %v45_v17 = vunpack.c.l.bf16 %v37_v8  ;;  %v38_v20 = vld [vmem:[%s429_s1 + $0x18] sm:$0xff]  ;;  %v39_v21 = vld [vmem:[%s429_s1 + $0x20] sm:$0xff]  ;;  %v28_v22 = vunpack.c.h.bf16 %v19_v2  ;;  %v29_v25 = vunpack.c.l.bf16 %v20_v12  ;;  %v40_v31 = vld [vmem:[%s429_s1 + $0x28] sm:$0xff] }
   0x5   :  { %v53_v18 = vadd.f32 %v41_v10, %v23_v3  ;;  %v54_v19 = vadd.f32 %v42_v11, %v24_v4  ;;  %v55_v23 = vadd.f32 %v43_v13, %v25_v5  ;;  %v30_v26 = vunpack.c.h.bf16 %v20_v12 }
   0x6   :  { %v46_v27 = vunpack.c.h.bf16 %v37_v8  ;;  %v56_v28 = vadd.f32 %v44_v14, %v26_v9  ;;  %v31_v30 = vunpack.c.l.bf16 %v21_v15  ;;  %v32_v32 = vunpack.c.h.bf16 %v21_v15 }
   0x7   :  { %v65_v29 = vadd.f32 %v54_v19, %v53_v18  ;;  %v47_v33 = vunpack.c.l.bf16 %v38_v20  ;;  %v48_v34 = vunpack.c.h.bf16 %v38_v20  ;;  %v49_v35 = vunpack.c.l.bf16 %v39_v21 }
   0x8   :  { %v57_v36 = vadd.f32 %v45_v17, %v27_v16  ;;  %v33_v38 = vunpack.c.l.bf16 %v22_v24  ;;  %v50_v39 = vunpack.c.h.bf16 %v39_v21  ;;  %v51_v40 = vunpack.c.l.bf16 %v40_v31 }
   0x9   :  { %v66_v37 = vadd.f32 %v65_v29, %v55_v23  ;;  %v59_v41 = vadd.f32 %v47_v33, %v29_v25  ;;  %v60_v42 = vadd.f32 %v48_v34, %v30_v26  ;;  %v61_v43 = vadd.f32 %v49_v35, %v31_v30 }
   0xa   :  { %v58_v44 = vadd.f32 %v46_v27, %v28_v22  ;;  %v34_v46 = vunpack.c.h.bf16 %v22_v24  ;;  %v52_v47 = vunpack.c.h.bf16 %v40_v31  ;;  %v62_v48 = vadd.f32 %v50_v39, %v32_v32 }
   0xb   :  { %v67_v45 = vadd.f32 %v66_v37, %v56_v28  ;;  %v72_v49 = vadd.f32 %v60_v42, %v59_v41  ;;  %v63_v51 = vadd.f32 %v51_v40, %v33_v38  ;;  %v140_v33 = vlaneseq }
   0xc   :  { %v64_v54 = vadd.f32 %v52_v47, %v34_v46  ;;  %v182_v47 = vld [vmem:[%s431_s3] sm:$0x3f] }
   0xd   :  { %v68_v50 = vadd.f32 %v67_v45, %v57_v36  ;;  %v73_v52 = vadd.f32 %v72_v49, %v61_v43 }
   0xf   :  { %v69_v53 = vadd.f32 %v68_v50, %v58_v44  ;;  %v74_v55 = vadd.f32 %v73_v52, %v62_v48 }
  0x11   :  { %70 = vadd.xlane.f32.xlu0 %v69_v53  ;;  %v75_v56 = vadd.f32 %v74_v55, %v63_v51 }
  0x13   :  { %v76_v57 = vadd.f32 %v75_v56, %v64_v54 }
  0x15   :  { %77 = vadd.xlane.f32.xlu0 %v76_v57 }
  0x9e   :  { %v71_v58 = vpop.xlane.xlu0 %70 }
  0x9f   :  { %v80_v59 = vmul.f32 0.0013020834, %v71_v58 }
  0xa1   :  { %v349_v60 = vsub.f32 %v53_v18, %v80_v59  ;;  %v351_v61 = vsub.f32 %v54_v19, %v80_v59  ;;  %v353_v62 = vsub.f32 %v55_v23, %v80_v59  ;;  %v355_v0 = vsub.f32 %v56_v28, %v80_v59 }
  0xa2   :  { %v78_v63 = vpop.xlane.xlu0 %77  ;;  %v361_v4 = vsub.f32 %v57_v36, %v80_v59  ;;  %v87_v10 = vsub.f32 %v58_v44, %v80_v59  ;;  %v141_v36 = vshrl.u32 %v140_v33, 7 }
  0xa3   :  { %v94_v1 = vmul.f32 %v349_v60, %v349_v60  ;;  %v95_v2 = vmul.f32 %v351_v61, %v351_v61  ;;  %v81_v3 = vmul.f32 0.0013020834, %v78_v63  ;;  %v96_v5 = vmul.f32 %v353_v62, %v353_v62 }
  0xa4   :  { %v97_v11 = vmul.f32 %v355_v0, %v355_v0  ;;  %v98_v16 = vmul.f32 %v361_v4, %v361_v4  ;;  %v99_v21 = vmul.f32 %v87_v10, %v87_v10  ;;  %v142_v40 = vsub.s32 0, %v141_v36 }
  0xa5   :  { %v106_v6 = vadd.f32 %v95_v2, %v94_v1  ;;  %v365_v7 = vsub.f32 %v59_v41, %v81_v3  ;;  %v367_v8 = vsub.f32 %v60_v42, %v81_v3  ;;  %v369_v9 = vsub.f32 %v61_v43, %v81_v3  ;;  %v138_v43 = vld [vmem:[%s430_s2] sm:$0x3f] }
  0xa6   :  { %v373_v13 = vsub.f32 %v62_v48, %v81_v3  ;;  %v381_v18 = vsub.f32 %v63_v51, %v81_v3  ;;  %v385_v23 = vsub.f32 %v64_v54, %v81_v3  ;;  %v146_v41 = vsub.s32 1, %v141_v36 }
  0xa7   :  { %v107_v12 = vadd.f32 %v106_v6, %v96_v5  ;;  %v100_v14 = vmul.f32 %v365_v7, %v365_v7  ;;  %v101_v15 = vmul.f32 %v367_v8, %v367_v8  ;;  %v102_v19 = vmul.f32 %v369_v9, %v369_v9 }
  0xa8   :  { %v103_v24 = vmul.f32 %v373_v13, %v373_v13  ;;  %v104_v27 = vmul.f32 %v381_v18, %v381_v18  ;;  %v105_v29 = vmul.f32 %v385_v23, %v385_v23  ;;  %v150_v42 = vsub.s32 2, %v141_v36 }
  0xa9   :  { %v108_v17 = vadd.f32 %v107_v12, %v97_v11  ;;  %v113_v20 = vadd.f32 %v101_v15, %v100_v14  ;;  %v154_v44 = vsub.s32 3, %v141_v36  ;;  %v158_v45 = vsub.s32 4, %v141_v36 }
  0xaa   :  { %v162_v46 = vsub.s32 5, %v141_v36  ;;  %v143_v48 = vrot.slane %v138_v43, %v142_v40  ;;  %v147_v49 = vrot.slane %v138_v43, %v146_v41  ;;  %v151_v50 = vrot.slane %v138_v43, %v150_v42 }
  0xab   :  { %v109_v22 = vadd.f32 %v108_v17, %v98_v16  ;;  %v114_v25 = vadd.f32 %v113_v20, %v102_v19  ;;  %v155_v51 = vrot.slane %v138_v43, %v154_v44  ;;  %v159_v52 = vrot.slane %v138_v43, %v158_v45 }
  0xac   :  { %v163_v53 = vrot.slane %v138_v43, %v162_v46  ;;  %v187_v55 = vrot.slane %v182_v47, %v142_v40  ;;  %v191_v56 = vrot.slane %v182_v47, %v146_v41  ;;  %v195_v57 = vrot.slane %v182_v47, %v150_v42 }
  0xad   :  { %v110_v26 = vadd.f32 %v109_v22, %v99_v21  ;;  %v115_v28 = vadd.f32 %v114_v25, %v103_v24  ;;  %v199_v58 = vrot.slane %v182_v47, %v154_v44  ;;  %v203_v3 = vrot.slane %v182_v47, %v158_v45 }
  0xae   :  { %v207_v5 = vrot.slane %v182_v47, %v162_v46 }
  0xaf   :  { %111 = vadd.xlane.f32.xlu1 %v110_v26  ;;  %v116_v30 = vadd.f32 %v115_v28, %v104_v27 }
  0xb1   :  { %v117_v31 = vadd.f32 %v116_v30, %v105_v29 }
  0xb3   :  { %118 = vadd.xlane.f32.xlu1 %v117_v31 }
 0x13c   :  { %v112_v32 = vpop.xlane.xlu1 %111 }
 0x13d   :  { %v120_v34 = vmul.f32 0.0013020834, %v112_v32 }
 0x13f   :  { %v122_v35 = vadd.f32 1e-12, %v120_v34 }
 0x140   :  { %v119_v37 = vpop.xlane.xlu1 %118 }
 0x141   :  { %284 = vrsqrt.f32 %v122_v35  ;;  %v121_v38 = vmul.f32 0.0013020834, %v119_v37 }
 0x143   :  { %v123_v39 = vadd.f32 1e-12, %v121_v38 }
 0x145   :  { %286 = vrsqrt.f32 %v123_v39 }
 0x14b   :  { %v285_v54 = vpop.eup %284 }
 0x14c   :  { %v126_v59 = vmul.f32 %v285_v54, %v349_v60  ;;  %v127_v63 = vmul.f32 %v285_v54, %v351_v61  ;;  %v128_v1 = vmul.f32 %v285_v54, %v353_v62  ;;  %v129_v2 = vmul.f32 %v285_v54, %v355_v0 }
 0x14d   :  { %v130_v6 = vmul.f32 %v285_v54, %v361_v4  ;;  %v131_v11 = vmul.f32 %v285_v54, %v87_v10 }
 0x14e   :  { %v170_v12 = vmul.f32 %v143_v48, %v126_v59  ;;  %v171_v14 = vmul.f32 %v147_v49, %v127_v63  ;;  %v172_v15 = vmul.f32 %v151_v50, %v128_v1  ;;  %v173_v16 = vmul.f32 %v155_v51, %v129_v2 }
 0x14f   :  { %v174_v17 = vmul.f32 %v159_v52, %v130_v6  ;;  %v175_v19 = vmul.f32 %v163_v53, %v131_v11  ;;  %v287_v20 = vpop.eup %286 }
 0x150   :  { %v214_v21 = vadd.f32 %v187_v55, %v170_v12  ;;  %v215_v60 = vadd.f32 %v191_v56, %v171_v14  ;;  %v216_v22 = vadd.f32 %v195_v57, %v172_v15  ;;  %v217_v61 = vadd.f32 %v199_v58, %v173_v16 }
 0x151   :  { %v218_v24 = vadd.f32 %v203_v3, %v174_v17  ;;  %v219_v62 = vadd.f32 %v207_v5, %v175_v19  ;;  %v132_v0 = vmul.f32 %v287_v20, %v365_v7  ;;  %v133_v25 = vmul.f32 %v287_v20, %v367_v8 }
 0x152   :  { %v278_v26 = vpack.c.bf16 %v215_v60, %v214_v21  ;;  %v279_v4 = vpack.c.bf16 %v217_v61, %v216_v22  ;;  %v134_v10 = vmul.f32 %v287_v20, %v369_v9  ;;  %v135_v27 = vmul.f32 %v287_v20, %v373_v13 }
 0x153   :  { %v280_v28 = vpack.c.bf16 %v219_v62, %v218_v24  ;;  %v136_v29 = vmul.f32 %v287_v20, %v381_v18  ;;  %v137_v30 = vmul.f32 %v287_v20, %v385_v23  ;;  %v176_v31 = vmul.f32 %v143_v48, %v132_v0 }
 0x154   :  { %262 = vst [vmem:[%s432_s4] sm:$0xff] %v278_v26  ;;  %263 = vst [vmem:[%s432_s4 + $0x8] sm:$0xff] %v279_v4  ;;  %v177_v7 = vmul.f32 %v147_v49, %v133_v25  ;;  %v178_v8 = vmul.f32 %v151_v50, %v134_v10  ;;  %v179_v32 = vmul.f32 %v155_v51, %v135_v27 }
 0x155   :  { %264 = vst [vmem:[%s432_s4 + $0x10] sm:$0xff] %v280_v28  ;;  %v180_v9 = vmul.f32 %v159_v52, %v136_v29  ;;  %v181_v13 = vmul.f32 %v163_v53, %v137_v30  ;;  %v220_v18 = vadd.f32 %v187_v55, %v176_v31 }
 0x156   :  { %v221_v23 = vadd.f32 %v191_v56, %v177_v7  ;;  %v222_v33 = vadd.f32 %v195_v57, %v178_v8  ;;  %v223_v34 = vadd.f32 %v199_v58, %v179_v32 }
 0x157   :  { %v224_v35 = vadd.f32 %v203_v3, %v180_v9  ;;  %v225_v36 = vadd.f32 %v207_v5, %v181_v13 }
 0x158   :  { %v281_v37 = vpack.c.bf16 %v221_v23, %v220_v18  ;;  %v282_v38 = vpack.c.bf16 %v223_v34, %v222_v33 }
 0x159   :  { %v283_v39 = vpack.c.bf16 %v225_v36, %v224_v35 }
 0x15a   :  { %265 = vst [vmem:[%s432_s4 + $0x18] sm:$0xff] %v281_v37  ;;  %266 = vst [vmem:[%s432_s4 + $0x20] sm:$0xff] %v282_v38 }
 0x15b   :  { %267 = vst [vmem:[%s432_s4 + $0x28] sm:$0xff] %v283_v39 }

// kernel: model_forward.87
= control target key start
LH: loop header
LB: loop body
LE: loop exit
PB: predicated region body
PF: predicated region fallthrough
CT: control target
= control target key end

     0   :  { %8 = vsyncpa [#allocation4], 0  ;;  %s4176_s0 = inlined_call_operand.vmem [shape: bf16[16,768], index: 0, kind: input, shape index: {}]   ;;  %s4177_s1 = inlined_call_operand.hbm [shape: bf16[768,2304], index: 1, kind: input, shape index: {}]   ;;  %s4178_s2 = inlined_call_operand.vmem [shape: f32[1,2304], index: 2, kind: input, shape index: {}]   ;;  %s4179_s3 = inlined_call_operand.vmem [shape: bf16[16,2304], index: 3, kind: output, shape index: {}]  }
   0x1   :  { %10 = vsyncpa [#allocation4 + $0x1], 0  ;;  %s3680_s12 = smov 0   ;;  %s3682_s13 = smov 0  }
   0x2   :  { %s3684_s14 = smov 0   ;;  %s3686_s15 = smov 0  }
   0x3   :  { %s3688_s16 = smov 0   ;;  %s3690_s17 = smov 0  }
   0x4 LB: > { %s2728_s18 = sadd.s32 4294967295, %s3654_s17   ;;  %s31_s19 = sadd.s32 1, %s3650_s16  ;;  %s3654_s17 = sphi %s3690_s17, %s16_s17   ;;  %s3650_s16 = sphi %s3688_s16, %s4190_s16   ;;  %s3646_s15 = sphi %s3686_s15, %s4189_s15   ;;  %s3642_s14 = sphi %s3684_s14, %s4188_s14   ;;  %s3638_s13 = sphi %s3682_s13, %s4187_s13   ;;  %s3634_s12 = sphi %s3680_s12, %s4186_s12  }
   0x5   : > { %p33_p0 = scmp.ge.s32.totalorder %s31_s19, 3  ;;  %s72_s20 = sadd.s32 1, %s3642_s14 }
   0x6   : > { %p79_p1 = scmp.ne.s32.totalorder %s3642_s14, %s3638_s13  ;;  %p80_p2 = scmp.eq.s32.totalorder %s3654_s17, 0 }
   0x7   : > { %s4192_s19 = smov (%p33_p0, %s31_s19), 0  ;;  %p85_p4 = scmp.ne.s32.totalorder %s3638_s13, %s3634_s12 }
   0x8   : > { %p3716_p3 = por %p80_p2, %p79_p1  ;;  %s68_s22 = ssub.s32 %s3650_s16, %s4192_s19 }
   0x9   : > { %p86_p5 = scmp.eq.s32.totalorder %s2728_s18, 0  ;;  %p70_p6 = scmp.eq.s32.totalorder %s68_s22, 0 }
   0xa   : > { %p137_p7 = scmp.eq.s32.totalorder %s2728_s18, 2  ;;  %p3079_p10 = scmp.lt.s32.totalorder %s3654_s17, 3 }
   0xb   : > { %p3723_p8 = por %p86_p5, %p85_p4  ;;  %s178_s26 = sand.u32 1, %s3642_s14  }
   0xc   : > { %s3728_s24 = scalar_select %p70_p6, %s3642_s14, %s72_s20  }
   0xd   : > { %p3730_p9 = por %p137_p7, %p79_p1  ;;  %s3038_s27 = smul.u32 384, %s3650_s16 }
   0xe   : > { %s3070_s28 = smul.u32 2304, %s178_s26  ;;  %p3744_p11 = pnand %p3079_p10, %p3716_p3 }
   0xf   : > { %s4182_s25 = scalar_select %p3730_p9, 1, 0 }
  0x10   : > { %s3740_s4 = scalar_lea.hbm %s4177_s1, %s3038_s27  ;;  %s182_s6 = scalar_lea.vmem [#allocation3], %s3070_s28 }
  0x11   : > { %s192_s7 = sshll.u32 %s182_s6, 4  ;;  %s3751_s8 = scalar_lea.sflag [#allocation4], %s178_s26  ;;  %s3748_s7 = int_to_ptr.vmem [resolvable:$true] %s192_s7 }
  0x12   : > { %s3574_s9 = scalar_lea.hbm %s3740_s4, 36864  ;;  %p3576_p0 = pneg %p3744_p11 }
  0x13   : > { %p3575_p13 = scmp.ne.s32.totalorder %s3740_s4, %s3574_s9  ;;  %s3579_s12 = scalar_lea.hbm %s4177_s1, 110592 }
  0x14   : > { %p3580_p3 = scmp.lt.u32.totalorder %s3740_s4, %s4177_s1  ;;  %p3581_p4 = scmp.lt.u32.totalorder %s3579_s12, %s3574_s9 }
  0x15   : > { %p3577_p1 = pnand %p3576_p0, %p3575_p13  ;;  %p3583_p6 = scmp.lt.u32.totalorder %s3574_s9, %s3740_s4 }
  0x16   : > { %p3582_p5 = por %p3581_p4, %p3580_p3 }
  0x17   : > { %p3578_p2 = pneg %p3577_p1 }
  0x18   : > { %p3584_p7 = por %p3583_p6, %p3582_p5 }
  0x1a   : > { %p3585_p10 = pnand %p3584_p7, %p3578_p2 }
  0x1c   : > { %3588 = shalt.err (!%p3585_p10)
}
  0x1d   : > { %s3589_s21 = scalar_lea.vmem %s3748_s7, 36864  ;;  %s3656_s22 = smov [#allocation3]  }
  0x1e   : > { %p3590_p13 = scmp.ne.s32.totalorder %s3748_s7, %s3589_s21  ;;  %s3594_s26 = sshll.u32 %s3656_s22, 4  ;;  %s3595_s26 = int_to_ptr.vmem [resolvable:$false] %s3594_s26 }
  0x1f   : > { %s3596_s27 = scalar_lea.vmem %s3595_s26, 73728  ;;  %p3597_p9 = scmp.lt.s32.totalorder %s3748_s7, %s3595_s26 }
  0x20   : > { %p3592_p1 = pnand %p3590_p13, %p3576_p0  ;;  %p3598_p3 = scmp.lt.s32.totalorder %s3596_s27, %s3589_s21 }
  0x22   : > { %p3593_p12 = pneg %p3592_p1  ;;  %p3599_p4 = por %p3598_p3, %p3597_p9 }
  0x24   : > { %p3600_p5 = pnand %p3599_p4, %p3593_p12 }
  0x26   : > { %3603 = shalt.err (!%p3600_p5)
}
  0x27   : > { %s3657_s28 = smov 1152   ;;  %s3658_s29 = smov 384  }
  0x28   : > { %s3659_s30 = smov 24   ;;  %p208_p0 = scmp.lt.s32.totalorder %s3654_s17, 4 }
  0x29   : > { %3078 = dma.hbm_to_vmem [thread:$0]  (!%p3744_p11), %s3740_s4, 36864, %s3748_s7, %s3751_s8, %s3657_s28, %s3658_s29, %s3659_s30  }
  0x2a   : > { %p4184_p2 = scmp.ge.s32.totalorder %s3654_s17, 1 }
  0x2c   : > { %p209_p6 = pnand %p4184_p2, %p208_p0 }
  0x2d   : > { %s3783_s6 = sand.u32 (!%p209_p6), 1, %s3638_s13  }
  0x2e   : > { %212 = sbr.rel (%p209_p6) target bundleno = 604 (0x25c), region = 32  ;;  %s215_s10 = scalar_lea.sflag (!%p209_p6), [#allocation4], %s3783_s6 }
  0x2f   : > { %s3071_s9 = smul.u32 (!%p209_p6), 2304, %s3783_s6 }
  0x31   : > { %s3787_s11 = scalar_lea.vmem (!%p209_p6), [#allocation3], %s3071_s9 }
  0x35   : > { %3629 = dma.done.wait (%p3723_p8), %s215_s10, 36864  }
  0x36   : > { %3631 = vsyncadd (%p3723_p8), %s215_s10, 4294930432  ;;  %v3131_v0 = vld [vmem:[%s3787_s11 + $0x4] ss:$24 sps:$4 sm:$0xff]   ;;  %v3135_v2 = vld [vmem:[%s3787_s11] ss:$24 sps:$4 sm:$0xff]   ;;  %s268_s10 = smul.u32 6, %s3646_s15 }
  0x37   : > { %v3133_v1 = vld [vmem:[%s3787_s11 + $0x304] ss:$24 sps:$4 sm:$0xff]   ;;  %2067 = vmatprep.subr.bf16.mxu1 %v3131_v0  ;;  %v3136_v3 = vld [vmem:[%s3787_s11 + $0x300] ss:$24 sps:$4 sm:$0xff]   ;;  %v3137_v4 = vld [vmem:[%s3787_s11 + $0x34] ss:$24 sps:$4 sm:$0xff]  }
  0x38   : > { %2110 = vmatprep.subr.bf16.mxu0 %v3133_v1  ;;  %2068 = vmatpush1.bf16.msra.mxu1 %v3135_v2  ;;  %v3139_v5 = vld [vmem:[%s3787_s11 + $0x334] ss:$24 sps:$4 sm:$0xff]   ;;  %v3141_v6 = vld [vmem:[%s3787_s11 + $0x30] ss:$24 sps:$4 sm:$0xff]   ;;  %v3143_v8 = vld [vmem:[%s3787_s11 + $0x64] ss:$24 sps:$4 sm:$0xff]  }
  0x39   : > { %2111 = vmatpush1.bf16.msra.mxu0 %v3136_v3  ;;  %2069 = vmatprep.subr.bf16.mxu1 %v3137_v4  ;;  %v3142_v7 = vld [vmem:[%s3787_s11 + $0x330] ss:$24 sps:$4 sm:$0xff]   ;;  %v3145_v9 = vld [vmem:[%s3787_s11 + $0x364] ss:$24 sps:$4 sm:$0xff]   ;;  %v3147_v10 = vld [vmem:[%s3787_s11 + $0x60] ss:$24 sps:$4 sm:$0xff]  }
  0x3a   : > { %2112 = vmatprep.subr.bf16.mxu0 %v3139_v5  ;;  %v3148_v11 = vld [vmem:[%s3787_s11 + $0x360] ss:$24 sps:$4 sm:$0xff]   ;;  %v3149_v12 = vld [vmem:[%s3787_s11 + $0x94] ss:$24 sps:$4 sm:$0xff]   ;;  %v3153_v14 = vld [vmem:[%s3787_s11 + $0x90] ss:$24 sps:$4 sm:$0xff]  }
  0x3b   : > { %v3151_v13 = vld [vmem:[%s3787_s11 + $0x394] ss:$24 sps:$4 sm:$0xff]   ;;  %v3154_v15 = vld [vmem:[%s3787_s11 + $0x390] ss:$24 sps:$4 sm:$0xff]   ;;  %v3155_v16 = vld [vmem:[%s3787_s11 + $0xc4] ss:$24 sps:$4 sm:$0xff]  }
  0x3c   : > { %2070 = vmatpush1.bf16.msra.mxu1 %v3141_v6  ;;  %v3157_v17 = vld [vmem:[%s3787_s11 + $0x3c4] ss:$24 sps:$4 sm:$0xff]   ;;  %v3159_v18 = vld [vmem:[%s3787_s11 + $0xc0] ss:$24 sps:$4 sm:$0xff]   ;;  %v3161_v20 = vld [vmem:[%s3787_s11 + $0xf4] ss:$24 sps:$4 sm:$0xff]  }
  0x3d   : > { %2113 = vmatpush1.bf16.msra.mxu0 %v3142_v7  ;;  %2071 = vmatprep.subr.bf16.mxu1 %v3143_v8  ;;  %v3160_v19 = vld [vmem:[%s3787_s11 + $0x3c0] ss:$24 sps:$4 sm:$0xff]   ;;  %v3163_v21 = vld [vmem:[%s3787_s11 + $0x3f4] ss:$24 sps:$4 sm:$0xff]   ;;  %v3165_v22 = vld [vmem:[%s3787_s11 + $0xf0] ss:$24 sps:$4 sm:$0xff]  }
  0x3e   : > { %2114 = vmatprep.subr.bf16.mxu0 %v3145_v9  ;;  %v3166_v23 = vld [vmem:[%s3787_s11 + $0x3f0] ss:$24 sps:$4 sm:$0xff]   ;;  %v3167_v24 = vld [vmem:[%s3787_s11 + $0x124] ss:$24 sps:$4 sm:$0xff]   ;;  %v3171_v26 = vld [vmem:[%s3787_s11 + $0x120] ss:$24 sps:$4 sm:$0xff]  }
  0x3f   : > { %v3169_v25 = vld [vmem:[%s3787_s11 + $0x424] ss:$24 sps:$4 sm:$0xff]   ;;  %v3172_v27 = vld [vmem:[%s3787_s11 + $0x420] ss:$24 sps:$4 sm:$0xff]   ;;  %v3173_v28 = vld [vmem:[%s3787_s11 + $0x154] ss:$24 sps:$4 sm:$0xff]  }
  0x40   : > { %2072 = vmatpush1.bf16.msra.mxu1 %v3147_v10  ;;  %v3175_v29 = vld [vmem:[%s3787_s11 + $0x454] ss:$24 sps:$4 sm:$0xff]   ;;  %v3177_v30 = vld [vmem:[%s3787_s11 + $0x150] ss:$24 sps:$4 sm:$0xff]   ;;  %v3179_v32 = vld [vmem:[%s3787_s11 + $0x184] ss:$24 sps:$4 sm:$0xff]  }
  0x41   : > { %2115 = vmatpush1.bf16.msra.mxu0 %v3148_v11  ;;  %2073 = vmatprep.subr.bf16.mxu1 %v3149_v12  ;;  %v3178_v31 = vld [vmem:[%s3787_s11 + $0x450] ss:$24 sps:$4 sm:$0xff]   ;;  %v3181_v33 = vld [vmem:[%s3787_s11 + $0x484] ss:$24 sps:$4 sm:$0xff]   ;;  %v3183_v34 = vld [vmem:[%s3787_s11 + $0x180] ss:$24 sps:$4 sm:$0xff]  }
  0x42   : > { %2116 = vmatprep.subr.bf16.mxu0 %v3151_v13  ;;  %v3184_v35 = vld [vmem:[%s3787_s11 + $0x480] ss:$24 sps:$4 sm:$0xff]   ;;  %v3185_v36 = vld [vmem:[%s3787_s11 + $0x1b4] ss:$24 sps:$4 sm:$0xff]   ;;  %v3189_v38 = vld [vmem:[%s3787_s11 + $0x1b0] ss:$24 sps:$4 sm:$0xff]  }
  0x43   : > { %v3187_v37 = vld [vmem:[%s3787_s11 + $0x4b4] ss:$24 sps:$4 sm:$0xff]   ;;  %v3190_v39 = vld [vmem:[%s3787_s11 + $0x4b0] ss:$24 sps:$4 sm:$0xff]   ;;  %v3191_v40 = vld [vmem:[%s3787_s11 + $0x1e4] ss:$24 sps:$4 sm:$0xff]  }
  0x44   : > { %2074 = vmatpush1.bf16.msra.mxu1 %v3153_v14  ;;  %v3193_v41 = vld [vmem:[%s3787_s11 + $0x4e4] ss:$24 sps:$4 sm:$0xff]   ;;  %v3195_v42 = vld [vmem:[%s3787_s11 + $0x1e0] ss:$24 sps:$4 sm:$0xff]   ;;  %v3197_v44 = vld [vmem:[%s3787_s11 + $0x214] ss:$24 sps:$4 sm:$0xff]  }
  0x45   : > { %2117 = vmatpush1.bf16.msra.mxu0 %v3154_v15  ;;  %2075 = vmatprep.subr.bf16.mxu1 %v3155_v16  ;;  %v3196_v43 = vld [vmem:[%s3787_s11 + $0x4e0] ss:$24 sps:$4 sm:$0xff]   ;;  %v3199_v45 = vld [vmem:[%s3787_s11 + $0x514] ss:$24 sps:$4 sm:$0xff]   ;;  %v3201_v46 = vld [vmem:[%s3787_s11 + $0x210] ss:$24 sps:$4 sm:$0xff]  }
  0x46   : > { %2118 = vmatprep.subr.bf16.mxu0 %v3157_v17  ;;  %v3202_v47 = vld [vmem:[%s3787_s11 + $0x510] ss:$24 sps:$4 sm:$0xff]   ;;  %v3844_v48 = vld [vmem:[%s4176_s0 + $0x4] ss:$24 sps:$4 sm:$0xff]   ;;  %v3207_v52 = vld [vmem:[%s3787_s11 + $0x240] ss:$24 sps:$4 sm:$0xff]  }
  0x47   : > { %v3849_v49 = vld [vmem:[%s4176_s0 + $0xc] ss:$24 sps:$4 sm:$0xff]   ;;  %v3203_v50 = vld [vmem:[%s3787_s11 + $0x244] ss:$24 sps:$4 sm:$0xff]   ;;  %2099 = vmatprep.mubr.bf16.mxu1 %v3844_v48  ;;  %v3208_v53 = vld [vmem:[%s3787_s11 + $0x540] ss:$24 sps:$4 sm:$0xff]  }
  0x48   : > { %2076 = vmatpush1.bf16.msra.mxu1 %v3159_v18  ;;  %v3205_v51 = vld [vmem:[%s3787_s11 + $0x544] ss:$24 sps:$4 sm:$0xff]   ;;  %2142 = vmatprep.mubr.bf16.mxu0 %v3849_v49  ;;  %v3209_v54 = vld [vmem:[%s3787_s11 + $0x274] ss:$24 sps:$4 sm:$0xff]   ;;  %v3213_v56 = vld [vmem:[%s3787_s11 + $0x270] ss:$24 sps:$4 sm:$0xff]  }
  0x49   : > { %2119 = vmatpush1.bf16.msra.mxu0 %v3160_v19  ;;  %2077 = vmatprep.subr.bf16.mxu1 %v3161_v20  ;;  %v3211_v55 = vld [vmem:[%s3787_s11 + $0x574] ss:$24 sps:$4 sm:$0xff]   ;;  %v3214_v57 = vld [vmem:[%s3787_s11 + $0x570] ss:$24 sps:$4 sm:$0xff]   ;;  %v3215_v58 = vld [vmem:[%s3787_s11 + $0x2a4] ss:$24 sps:$4 sm:$0xff]  }
  0x4a   : > { %2120 = vmatprep.subr.bf16.mxu0 %v3163_v21  ;;  %v3217_v59 = vld [vmem:[%s3787_s11 + $0x5a4] ss:$24 sps:$4 sm:$0xff]   ;;  %v3219_v60 = vld [vmem:[%s3787_s11 + $0x2a0] ss:$24 sps:$4 sm:$0xff]   ;;  %v3221_v62 = vld [vmem:[%s3787_s11 + $0x2d4] ss:$24 sps:$4 sm:$0xff]  }
  0x4b   : > { %v3220_v61 = vld [vmem:[%s3787_s11 + $0x5a0] ss:$24 sps:$4 sm:$0xff]   ;;  %v3223_v63 = vld [vmem:[%s3787_s11 + $0x5d4] ss:$24 sps:$4 sm:$0xff]   ;;  %v3225_v0 = vld [vmem:[%s3787_s11 + $0x2d0] ss:$24 sps:$4 sm:$0xff]  }
  0x4c   : > { %2078 = vmatpush1.bf16.msra.mxu1 %v3165_v22  ;;  %v3226_v1 = vld [vmem:[%s3787_s11 + $0x5d0] ss:$24 sps:$4 sm:$0xff]   ;;  %v3233_v2 = vld [vmem:[%s3787_s11 + $0x604] ss:$24 sps:$4 sm:$0xff]   ;;  %v3231_v4 = vld [vmem:[%s3787_s11 + $0x600] ss:$24 sps:$4 sm:$0xff]  }
  0x4d   : > { %2121 = vmatpush1.bf16.msra.mxu0 %v3166_v23  ;;  %2079 = vmatprep.subr.bf16.mxu1 %v3167_v24  ;;  %v3236_v3 = vld [vmem:[%s3787_s11 + $0xc] ss:$24 sps:$4 sm:$0xff]   ;;  %v3234_v5 = vld [vmem:[%s3787_s11 + $0x8] ss:$24 sps:$4 sm:$0xff]   ;;  %v3244_v9 = vld [vmem:[%s3787_s11 + $0x3c] ss:$24 sps:$4 sm:$0xff]  }
  0x4e   : > { %2122 = vmatprep.subr.bf16.mxu0 %v3169_v25  ;;  %v3876_v6 = vld [vmem:[%s4176_s0] ss:$24 sps:$4 sm:$0xff]   ;;  %v3241_v8 = vld [vmem:[%s3787_s11 + $0x634] ss:$24 sps:$4 sm:$0xff]   ;;  %v3242_v11 = vld [vmem:[%s3787_s11 + $0x38] ss:$24 sps:$4 sm:$0xff]  }
  0x4f   : > { %v3881_v7 = vld [vmem:[%s4176_s0 + $0x8] ss:$24 sps:$4 sm:$0xff]   ;;  %v3247_v12 = vld [vmem:[%s3787_s11 + $0x664] ss:$24 sps:$4 sm:$0xff]   ;;  %v3245_v14 = vld [vmem:[%s3787_s11 + $0x660] ss:$24 sps:$4 sm:$0xff]  }
  0x50   : > { %2080 = vmatpush1.bf16.msra.mxu1 %v3171_v26  ;;  %v3239_v10 = vld [vmem:[%s3787_s11 + $0x630] ss:$24 sps:$4 sm:$0xff]   ;;  %v3250_v13 = vld [vmem:[%s3787_s11 + $0x6c] ss:$24 sps:$4 sm:$0xff]   ;;  %v3256_v17 = vld [vmem:[%s3787_s11 + $0x9c] ss:$24 sps:$4 sm:$0xff]  }
  0x51   : > { %2123 = vmatpush1.bf16.msra.mxu0 %v3172_v27  ;;  %2081 = vmatprep.subr.bf16.mxu1 %v3173_v28  ;;  %v3248_v15 = vld [vmem:[%s3787_s11 + $0x68] ss:$24 sps:$4 sm:$0xff]   ;;  %v3253_v16 = vld [vmem:[%s3787_s11 + $0x694] ss:$24 sps:$4 sm:$0xff]   ;;  %v3254_v19 = vld [vmem:[%s3787_s11 + $0x98] ss:$24 sps:$4 sm:$0xff]  }
  0x52   : > { %2124 = vmatprep.subr.bf16.mxu0 %v3175_v29  ;;  %v3251_v18 = vld [vmem:[%s3787_s11 + $0x690] ss:$24 sps:$4 sm:$0xff]   ;;  %v3259_v20 = vld [vmem:[%s3787_s11 + $0x6c4] ss:$24 sps:$4 sm:$0xff]   ;;  %v3257_v22 = vld [vmem:[%s3787_s11 + $0x6c0] ss:$24 sps:$4 sm:$0xff]  }
  0x53   : > { %v3262_v21 = vld [vmem:[%s3787_s11 + $0xcc] ss:$24 sps:$4 sm:$0xff]   ;;  %v3260_v23 = vld [vmem:[%s3787_s11 + $0xc8] ss:$24 sps:$4 sm:$0xff]   ;;  %v3268_v25 = vld [vmem:[%s3787_s11 + $0xfc] ss:$24 sps:$4 sm:$0xff]  }
  0x54   : > { %2082 = vmatpush1.bf16.msra.mxu1 %v3177_v30  ;;  %v3265_v24 = vld [vmem:[%s3787_s11 + $0x6f4] ss:$24 sps:$4 sm:$0xff]   ;;  %v3263_v26 = vld [vmem:[%s3787_s11 + $0x6f0] ss:$24 sps:$4 sm:$0xff]   ;;  %v3271_v28 = vld [vmem:[%s3787_s11 + $0x724] ss:$24 sps:$4 sm:$0xff]  }
  0x55   : > { %2125 = vmatpush1.bf16.msra.mxu0 %v3178_v31  ;;  %2083 = vmatprep.subr.bf16.mxu1 %v3179_v32  ;;  %v3266_v27 = vld [vmem:[%s3787_s11 + $0xf8] ss:$24 sps:$4 sm:$0xff]   ;;  %v3274_v29 = vld [vmem:[%s3787_s11 + $0x12c] ss:$24 sps:$4 sm:$0xff]   ;;  %v3272_v31 = vld [vmem:[%s3787_s11 + $0x128] ss:$24 sps:$4 sm:$0xff]  }
  0x56   : > { %2126 = vmatprep.subr.bf16.mxu0 %v3181_v33  ;;  %v3269_v30 = vld [vmem:[%s3787_s11 + $0x720] ss:$24 sps:$4 sm:$0xff]   ;;  %v3277_v32 = vld [vmem:[%s3787_s11 + $0x754] ss:$24 sps:$4 sm:$0xff]   ;;  %p269_p8 = scmp.lt.s32.totalorder %s268_s10, 17  ;;  %p4185_p9 = scmp.ne.s32.totalorder %s4182_s25, 0 }
  0x57   : > { %v3280_v33 = vld [vmem:[%s3787_s11 + $0x15c] ss:$24 sps:$4 sm:$0xff]  }
  0x58   : > { %2084 = vmatpush1.bf16.msra.mxu1 %v3183_v34  ;;  %v3915_v34 = vld [vmem:[%s4176_s0 + $0x14] ss:$24 sps:$4 sm:$0xff]   ;;  %s4194_s10 = smov (!%p269_p8, %s268_s10), 17 }
  0x59   : > { %2127 = vmatpush1.bf16.msra.mxu0 %v3184_v35  ;;  %2085 = vmatprep.subr.bf16.mxu1 %v3185_v36  ;;  %v3275_v35 = vld [vmem:[%s3787_s11 + $0x750] ss:$24 sps:$4 sm:$0xff]   ;;  %s271_s5 = scalar_lea.vmem %s4178_s2, %s4194_s10 }
  0x5a   : > { %2128 = vmatprep.subr.bf16.mxu0 %v3187_v37  ;;  %v3278_v36 = vld [vmem:[%s3787_s11 + $0x158] ss:$24 sps:$4 sm:$0xff]   ;;  %v3283_v37 = vld [vmem:[%s3787_s11 + $0x784] ss:$24 sps:$4 sm:$0xff]  }
  0x5c   : > { %2086 = vmatpush1.bf16.msra.mxu1 %v3189_v38  ;;  %v3286_v38 = vld [vmem:[%s3787_s11 + $0x18c] ss:$24 sps:$4 sm:$0xff]  }
  0x5d   : > { %2129 = vmatpush1.bf16.msra.mxu0 %v3190_v39  ;;  %2087 = vmatprep.subr.bf16.mxu1 %v3191_v40  ;;  %v3281_v39 = vld [vmem:[%s3787_s11 + $0x780] ss:$24 sps:$4 sm:$0xff]  }
  0x5e   : > { %2130 = vmatprep.subr.bf16.mxu0 %v3193_v41  ;;  %v3284_v40 = vld [vmem:[%s3787_s11 + $0x188] ss:$24 sps:$4 sm:$0xff]   ;;  %v3289_v41 = vld [vmem:[%s3787_s11 + $0x7b4] ss:$24 sps:$4 sm:$0xff]  }
  0x60   : > { %2088 = vmatpush1.bf16.msra.mxu1 %v3195_v42  ;;  %v3292_v42 = vld [vmem:[%s3787_s11 + $0x1bc] ss:$24 sps:$4 sm:$0xff]  }
  0x61   : > { %2131 = vmatpush1.bf16.msra.mxu0 %v3196_v43  ;;  %2089 = vmatprep.subr.bf16.mxu1 %v3197_v44  ;;  %v3287_v43 = vld [vmem:[%s3787_s11 + $0x7b0] ss:$24 sps:$4 sm:$0xff]  }
  0x62   : > { %2132 = vmatprep.subr.bf16.mxu0 %v3199_v45  ;;  %v3290_v44 = vld [vmem:[%s3787_s11 + $0x1b8] ss:$24 sps:$4 sm:$0xff]   ;;  %v3295_v45 = vld [vmem:[%s3787_s11 + $0x7e4] ss:$24 sps:$4 sm:$0xff]  }
  0x64   : > { %2090 = vmatpush1.bf16.msra.mxu1 %v3201_v46  ;;  %v3298_v46 = vld [vmem:[%s3787_s11 + $0x1ec] ss:$24 sps:$4 sm:$0xff]  }
  0x65   : > { %2133 = vmatpush1.bf16.msra.mxu0 %v3202_v47  ;;  %2091 = vmatprep.subr.bf16.mxu1 %v3203_v50  ;;  %v3293_v47 = vld [vmem:[%s3787_s11 + $0x7e0] ss:$24 sps:$4 sm:$0xff]  }
  0x66   : > { %2134 = vmatprep.subr.bf16.mxu0 %v3205_v51  ;;  %v3296_v50 = vld [vmem:[%s3787_s11 + $0x1e8] ss:$24 sps:$4 sm:$0xff]   ;;  %v3301_v51 = vld [vmem:[%s3787_s11 + $0x814] ss:$24 sps:$4 sm:$0xff]  }
  0x68   : > { %2092 = vmatpush1.bf16.msra.mxu1 %v3207_v52  ;;  %v3304_v52 = vld [vmem:[%s3787_s11 + $0x21c] ss:$24 sps:$4 sm:$0xff]  }
  0x69   : > { %2135 = vmatpush1.bf16.msra.mxu0 %v3208_v53  ;;  %2093 = vmatprep.subr.bf16.mxu1 %v3209_v54  ;;  %v3299_v53 = vld [vmem:[%s3787_s11 + $0x810] ss:$24 sps:$4 sm:$0xff]  }
  0x6a   : > { %2136 = vmatprep.subr.bf16.mxu0 %v3211_v55  ;;  %v3302_v54 = vld [vmem:[%s3787_s11 + $0x218] ss:$24 sps:$4 sm:$0xff]   ;;  %v3307_v55 = vld [vmem:[%s3787_s11 + $0x844] ss:$24 sps:$4 sm:$0xff]  }
  0x6c   : > { %2094 = vmatpush1.bf16.msra.mxu1 %v3213_v56  ;;  %v3310_v56 = vld [vmem:[%s3787_s11 + $0x24c] ss:$24 sps:$4 sm:$0xff]  }
  0x6d   : > { %2137 = vmatpush1.bf16.msra.mxu0 %v3214_v57  ;;  %2095 = vmatprep.subr.bf16.mxu1 %v3215_v58  ;;  %v3305_v57 = vld [vmem:[%s3787_s11 + $0x840] ss:$24 sps:$4 sm:$0xff]  }
  0x6e   : > { %2138 = vmatprep.subr.bf16.mxu0 %v3217_v59  ;;  %v3308_v58 = vld [vmem:[%s3787_s11 + $0x248] ss:$24 sps:$4 sm:$0xff]   ;;  %v3313_v59 = vld [vmem:[%s3787_s11 + $0x874] ss:$24 sps:$4 sm:$0xff]  }
  0x70   : > { %2096 = vmatpush1.bf16.msra.mxu1 %v3219_v60  ;;  %v3316_v60 = vld [vmem:[%s3787_s11 + $0x27c] ss:$24 sps:$4 sm:$0xff]  }
  0x71   : > { %2139 = vmatpush1.bf16.msra.mxu0 %v3220_v61  ;;  %2097 = vmatprep.subr.bf16.mxu1 %v3221_v62  ;;  %v3311_v61 = vld [vmem:[%s3787_s11 + $0x870] ss:$24 sps:$4 sm:$0xff]  }
  0x72   : > { %2140 = vmatprep.subr.bf16.mxu0 %v3223_v63  ;;  %v3314_v62 = vld [vmem:[%s3787_s11 + $0x278] ss:$24 sps:$4 sm:$0xff]   ;;  %v3319_v63 = vld [vmem:[%s3787_s11 + $0x8a4] ss:$24 sps:$4 sm:$0xff]  }
  0x74   : > { %2098 = vmatpush1.bf16.msra.mxu1 %v3225_v0  ;;  %v3322_v0 = vld [vmem:[%s3787_s11 + $0x2ac] ss:$24 sps:$4 sm:$0xff]  }
  0x75   : > { %2141 = vmatpush1.bf16.msra.mxu0 %v3226_v1  ;;  %2196 = vmatprep.subr.bf16.mxu1 %v3236_v3  ;;  %v3317_v1 = vld [vmem:[%s3787_s11 + $0x8a0] ss:$24 sps:$4 sm:$0xff]   ;;  %v3325_v3 = vld [vmem:[%s3787_s11 + $0x8d4] ss:$24 sps:$4 sm:$0xff]  }
  0x76   : > { %2153 = vmatprep.subr.bf16.mxu0 %v3233_v2  ;;  %v3320_v2 = vld [vmem:[%s3787_s11 + $0x2a8] ss:$24 sps:$4 sm:$0xff]  }
  0x77   : > { %2100 = vmatmul.mubr.bf16.vlgmr.msra.gmra.mrb[0].mxu1 %v3876_v6 }
  0x78   : > { %2143 = vmatmul.mubr.bf16.vlgmr.msra.gmra.mrb[0].mxu0 %v3881_v7  ;;  %2197 = vmatpush1.bf16.msra.mxu1 %v3234_v5  ;;  %v3323_v5 = vld [vmem:[%s3787_s11 + $0x8d0] ss:$24 sps:$4 sm:$0xff]  }
  0x79   : > { %2154 = vmatpush1.bf16.msra.mxu0 %v3231_v4  ;;  %2198 = vmatprep.subr.bf16.mxu1 %v3244_v9  ;;  %v3328_v4 = vld [vmem:[%s3787_s11 + $0x2dc] ss:$24 sps:$4 sm:$0xff]   ;;  %v3334_v9 = vld [vmem:[%s3787_s11 + $0x30c] ss:$24 sps:$4 sm:$0xff]  }
  0x7a   : > { %2155 = vmatprep.subr.bf16.mxu0 %v3241_v8  ;;  %2228 = vmatprep.mubr.bf16.mxu1 %v3844_v48  ;;  %v3326_v8 = vld [vmem:[%s3787_s11 + $0x2d8] ss:$24 sps:$4 sm:$0xff]  }
  0x7b   : > { %2185 = vmatprep.mubr.bf16.mxu0 %v3915_v34 }
  0x7c   : > { %2199 = vmatpush1.bf16.msra.mxu1 %v3242_v11  ;;  %v3957_v11 = vld [vmem:[%s4176_s0 + $0x10] ss:$24 sps:$4 sm:$0xff]  }
  0x7d   : > { %2156 = vmatpush1.bf16.msra.mxu0 %v3239_v10  ;;  %2200 = vmatprep.subr.bf16.mxu1 %v3250_v13  ;;  %v3337_v10 = vld [vmem:[%s3787_s11 + $0x14] ss:$24 sps:$4 sm:$0xff]   ;;  %v3335_v13 = vld [vmem:[%s3787_s11 + $0x10] ss:$24 sps:$4 sm:$0xff]  }
  0x7e   : > { %2157 = vmatprep.subr.bf16.mxu0 %v3247_v12  ;;  %v3332_v12 = vld [vmem:[%s3787_s11 + $0x308] ss:$24 sps:$4 sm:$0xff]  }
  0x80   : > { %2201 = vmatpush1.bf16.msra.mxu1 %v3248_v15  ;;  %v3343_v15 = vld [vmem:[%s3787_s11 + $0x44] ss:$24 sps:$4 sm:$0xff]  }
  0x81   : > { %2158 = vmatpush1.bf16.msra.mxu0 %v3245_v14  ;;  %2202 = vmatprep.subr.bf16.mxu1 %v3256_v17  ;;  %v3340_v14 = vld [vmem:[%s3787_s11 + $0x33c] ss:$24 sps:$4 sm:$0xff]   ;;  %v3341_v17 = vld [vmem:[%s3787_s11 + $0x40] ss:$24 sps:$4 sm:$0xff]  }
  0x82   : > { %2159 = vmatprep.subr.bf16.mxu0 %v3253_v16  ;;  %v3338_v16 = vld [vmem:[%s3787_s11 + $0x338] ss:$24 sps:$4 sm:$0xff]  }
  0x84   : > { %2203 = vmatpush1.bf16.msra.mxu1 %v3254_v19  ;;  %v3349_v19 = vld [vmem:[%s3787_s11 + $0x74] ss:$24 sps:$4 sm:$0xff]  }
  0x85   : > { %2160 = vmatpush1.bf16.msra.mxu0 %v3251_v18  ;;  %2204 = vmatprep.subr.bf16.mxu1 %v3262_v21  ;;  %v3346_v18 = vld [vmem:[%s3787_s11 + $0x36c] ss:$24 sps:$4 sm:$0xff]   ;;  %v3347_v21 = vld [vmem:[%s3787_s11 + $0x70] ss:$24 sps:$4 sm:$0xff]  }
  0x86   : > { %2161 = vmatprep.subr.bf16.mxu0 %v3259_v20  ;;  %v3344_v20 = vld [vmem:[%s3787_s11 + $0x368] ss:$24 sps:$4 sm:$0xff]  }
  0x88   : > { %2205 = vmatpush1.bf16.msra.mxu1 %v3260_v23  ;;  %v3355_v23 = vld [vmem:[%s3787_s11 + $0xa4] ss:$24 sps:$4 sm:$0xff]  }
  0x89   : > { %2162 = vmatpush1.bf16.msra.mxu0 %v3257_v22  ;;  %2206 = vmatprep.subr.bf16.mxu1 %v3268_v25  ;;  %v3352_v22 = vld [vmem:[%s3787_s11 + $0x39c] ss:$24 sps:$4 sm:$0xff]   ;;  %v3353_v25 = vld [vmem:[%s3787_s11 + $0xa0] ss:$24 sps:$4 sm:$0xff]  }
  0x8a   : > { %2163 = vmatprep.subr.bf16.mxu0 %v3265_v24  ;;  %v3350_v24 = vld [vmem:[%s3787_s11 + $0x398] ss:$24 sps:$4 sm:$0xff]  }
  0x8c   : > { %2207 = vmatpush1.bf16.msra.mxu1 %v3266_v27  ;;  %v3359_v27 = vld [vmem:[%s3787_s11 + $0xd0] ss:$24 sps:$4 sm:$0xff]  }
  0x8d   : > { %2164 = vmatpush1.bf16.msra.mxu0 %v3263_v26  ;;  %2208 = vmatprep.subr.bf16.mxu1 %v3274_v29  ;;  %v3356_v26 = vld [vmem:[%s3787_s11 + $0x3c8] ss:$24 sps:$4 sm:$0xff]   ;;  %v3367_v29 = vld [vmem:[%s3787_s11 + $0x104] ss:$24 sps:$4 sm:$0xff]  }
  0x8e   : > { %2165 = vmatprep.subr.bf16.mxu0 %v3271_v28  ;;  %v3364_v28 = vld [vmem:[%s3787_s11 + $0x3fc] ss:$24 sps:$4 sm:$0xff]  }
  0x90   : > { %2209 = vmatpush1.bf16.msra.mxu1 %v3272_v31  ;;  %v3365_v31 = vld [vmem:[%s3787_s11 + $0x100] ss:$24 sps:$4 sm:$0xff]  }
  0x91   : > { %2166 = vmatpush1.bf16.msra.mxu0 %v3269_v30  ;;  %2210 = vmatprep.subr.bf16.mxu1 %v3280_v33  ;;  %v3362_v30 = vld [vmem:[%s3787_s11 + $0x3f8] ss:$24 sps:$4 sm:$0xff]   ;;  %v3373_v33 = vld [vmem:[%s3787_s11 + $0x134] ss:$24 sps:$4 sm:$0xff]  }
  0x92   : > { %2167 = vmatprep.subr.bf16.mxu0 %v3277_v32  ;;  %v3370_v32 = vld [vmem:[%s3787_s11 + $0x42c] ss:$24 sps:$4 sm:$0xff]  }
  0x94   : > { %2211 = vmatpush1.bf16.msra.mxu1 %v3278_v36  ;;  %v3371_v36 = vld [vmem:[%s3787_s11 + $0x130] ss:$24 sps:$4 sm:$0xff]  }
  0x95   : > { %2168 = vmatpush1.bf16.msra.mxu0 %v3275_v35  ;;  %2212 = vmatprep.subr.bf16.mxu1 %v3286_v38  ;;  %v3368_v35 = vld [vmem:[%s3787_s11 + $0x428] ss:$24 sps:$4 sm:$0xff]   ;;  %v3379_v38 = vld [vmem:[%s3787_s11 + $0x164] ss:$24 sps:$4 sm:$0xff]  }
  0x96   : > { %2169 = vmatprep.subr.bf16.mxu0 %v3283_v37  ;;  %v3376_v37 = vld [vmem:[%s3787_s11 + $0x45c] ss:$24 sps:$4 sm:$0xff]  }
  0x98   : > { %2213 = vmatpush1.bf16.msra.mxu1 %v3284_v40  ;;  %v3377_v40 = vld [vmem:[%s3787_s11 + $0x160] ss:$24 sps:$4 sm:$0xff]  }
  0x99   : > { %2170 = vmatpush1.bf16.msra.mxu0 %v3281_v39  ;;  %2214 = vmatprep.subr.bf16.mxu1 %v3292_v42  ;;  %v3374_v39 = vld [vmem:[%s3787_s11 + $0x458] ss:$24 sps:$4 sm:$0xff]   ;;  %v3385_v42 = vld [vmem:[%s3787_s11 + $0x194] ss:$24 sps:$4 sm:$0xff]  }
  0x9a   : > { %2171 = vmatprep.subr.bf16.mxu0 %v3289_v41  ;;  %v3382_v41 = vld [vmem:[%s3787_s11 + $0x48c] ss:$24 sps:$4 sm:$0xff]  }
  0x9c   : > { %2215 = vmatpush1.bf16.msra.mxu1 %v3290_v44  ;;  %v3383_v44 = vld [vmem:[%s3787_s11 + $0x190] ss:$24 sps:$4 sm:$0xff]  }
  0x9d   : > { %2172 = vmatpush1.bf16.msra.mxu0 %v3287_v43  ;;  %2216 = vmatprep.subr.bf16.mxu1 %v3298_v46  ;;  %v3380_v43 = vld [vmem:[%s3787_s11 + $0x488] ss:$24 sps:$4 sm:$0xff]   ;;  %v3391_v46 = vld [vmem:[%s3787_s11 + $0x1c4] ss:$24 sps:$4 sm:$0xff]  }
  0x9e   : > { %2173 = vmatprep.subr.bf16.mxu0 %v3295_v45  ;;  %v3388_v45 = vld [vmem:[%s3787_s11 + $0x4bc] ss:$24 sps:$4 sm:$0xff]  }
  0xa0   : > { %2217 = vmatpush1.bf16.msra.mxu1 %v3296_v50  ;;  %v3389_v50 = vld [vmem:[%s3787_s11 + $0x1c0] ss:$24 sps:$4 sm:$0xff]  }
  0xa1   : > { %2174 = vmatpush1.bf16.msra.mxu0 %v3293_v47  ;;  %2218 = vmatprep.subr.bf16.mxu1 %v3304_v52  ;;  %v3386_v47 = vld [vmem:[%s3787_s11 + $0x4b8] ss:$24 sps:$4 sm:$0xff]   ;;  %v3397_v52 = vld [vmem:[%s3787_s11 + $0x1f4] ss:$24 sps:$4 sm:$0xff]  }
  0xa2   : > { %2175 = vmatprep.subr.bf16.mxu0 %v3301_v51  ;;  %v3394_v51 = vld [vmem:[%s3787_s11 + $0x4ec] ss:$24 sps:$4 sm:$0xff]  }
  0xa4   : > { %2219 = vmatpush1.bf16.msra.mxu1 %v3302_v54  ;;  %v3395_v54 = vld [vmem:[%s3787_s11 + $0x1f0] ss:$24 sps:$4 sm:$0xff]  }
  0xa5   : > { %2176 = vmatpush1.bf16.msra.mxu0 %v3299_v53  ;;  %2220 = vmatprep.subr.bf16.mxu1 %v3310_v56  ;;  %v3392_v53 = vld [vmem:[%s3787_s11 + $0x4e8] ss:$24 sps:$4 sm:$0xff]   ;;  %v3403_v56 = vld [vmem:[%s3787_s11 + $0x224] ss:$24 sps:$4 sm:$0xff]  }
  0xa6   : > { %2177 = vmatprep.subr.bf16.mxu0 %v3307_v55  ;;  %v3400_v55 = vld [vmem:[%s3787_s11 + $0x51c] ss:$24 sps:$4 sm:$0xff]  }
  0xa8   : > { %2221 = vmatpush1.bf16.msra.mxu1 %v3308_v58  ;;  %v3401_v58 = vld [vmem:[%s3787_s11 + $0x220] ss:$24 sps:$4 sm:$0xff]  }
  0xa9   : > { %2178 = vmatpush1.bf16.msra.mxu0 %v3305_v57  ;;  %2222 = vmatprep.subr.bf16.mxu1 %v3316_v60  ;;  %v3398_v57 = vld [vmem:[%s3787_s11 + $0x518] ss:$24 sps:$4 sm:$0xff]   ;;  %v3409_v60 = vld [vmem:[%s3787_s11 + $0x254] ss:$24 sps:$4 sm:$0xff]  }
  0xaa   : > { %2179 = vmatprep.subr.bf16.mxu0 %v3313_v59  ;;  %v3406_v59 = vld [vmem:[%s3787_s11 + $0x54c] ss:$24 sps:$4 sm:$0xff]  }
  0xac   : > { %2223 = vmatpush1.bf16.msra.mxu1 %v3314_v62  ;;  %v3407_v62 = vld [vmem:[%s3787_s11 + $0x250] ss:$24 sps:$4 sm:$0xff]  }
  0xad   : > { %2180 = vmatpush1.bf16.msra.mxu0 %v3311_v61  ;;  %2224 = vmatprep.subr.bf16.mxu1 %v3322_v0  ;;  %v3404_v61 = vld [vmem:[%s3787_s11 + $0x548] ss:$24 sps:$4 sm:$0xff]   ;;  %v3415_v0 = vld [vmem:[%s3787_s11 + $0x284] ss:$24 sps:$4 sm:$0xff]  }
  0xae   : > { %2181 = vmatprep.subr.bf16.mxu0 %v3319_v63  ;;  %v3412_v63 = vld [vmem:[%s3787_s11 + $0x57c] ss:$24 sps:$4 sm:$0xff]  }
  0xb0   : > { %2225 = vmatpush1.bf16.msra.mxu1 %v3320_v2  ;;  %v3413_v2 = vld [vmem:[%s3787_s11 + $0x280] ss:$24 sps:$4 sm:$0xff]  }
  0xb1   : > { %2182 = vmatpush1.bf16.msra.mxu0 %v3317_v1  ;;  %2226 = vmatprep.subr.bf16.mxu1 %v3328_v4  ;;  %v3410_v1 = vld [vmem:[%s3787_s11 + $0x578] ss:$24 sps:$4 sm:$0xff]   ;;  %v3421_v4 = vld [vmem:[%s3787_s11 + $0x2b4] ss:$24 sps:$4 sm:$0xff]  }
  0xb2   : > { %2183 = vmatprep.subr.bf16.mxu0 %v3325_v3  ;;  %v3418_v3 = vld [vmem:[%s3787_s11 + $0x5ac] ss:$24 sps:$4 sm:$0xff]  }
  0xb4   : > { %2227 = vmatpush1.bf16.msra.mxu1 %v3326_v8  ;;  %v3419_v8 = vld [vmem:[%s3787_s11 + $0x2b0] ss:$24 sps:$4 sm:$0xff]  }
  0xb5   : > { %2184 = vmatpush1.bf16.msra.mxu0 %v3323_v5  ;;  %2239 = vmatprep.subr.bf16.mxu1 %v3334_v9  ;;  %v3416_v5 = vld [vmem:[%s3787_s11 + $0x5a8] ss:$24 sps:$4 sm:$0xff]   ;;  %v3424_v9 = vld [vmem:[%s3787_s11 + $0x5dc] ss:$24 sps:$4 sm:$0xff]  }
  0xb6   : > { %2325 = vmatprep.subr.bf16.mxu0 %v3337_v10  ;;  %v3427_v10 = vld [vmem:[%s3787_s11 + $0x2e4] ss:$24 sps:$4 sm:$0xff]  }
  0xb7   : > { %2229 = vmatmul.mubr.bf16.vlgmr.msra.gmra.mrb[4].mxu1 %v3876_v6 }
  0xb8   : > { %2186 = vmatmul.mubr.bf16.vlgmr.msra.gmra.mrb[0].mxu0 %v3957_v11  ;;  %2240 = vmatpush1.bf16.msra.mxu1 %v3332_v12  ;;  %v3422_v12 = vld [vmem:[%s3787_s11 + $0x5d8] ss:$24 sps:$4 sm:$0xff]  }
  0xb9   : > { %2326 = vmatpush1.bf16.msra.mxu0 %v3335_v13  ;;  %2241 = vmatprep.subr.bf16.mxu1 %v3340_v14  ;;  %v3425_v13 = vld [vmem:[%s3787_s11 + $0x2e0] ss:$24 sps:$4 sm:$0xff]   ;;  %v3430_v14 = vld [vmem:[%s3787_s11 + $0x60c] ss:$24 sps:$4 sm:$0xff]  }
  0xba   : > { %2327 = vmatprep.subr.bf16.mxu0 %v3343_v15  ;;  %2271 = vmatprep.mubr.bf16.mxu1 %v3849_v49  ;;  %v3361_v49 = vld [vmem:[%s3787_s11 + $0xd4] ss:$24 sps:$4 sm:$0xff]  }
  0xbb   : > { %2357 = vmatprep.mubr.bf16.mxu0 %v3844_v48  ;;  %v3358_v48 = vld [vmem:[%s3787_s11 + $0x3cc] ss:$24 sps:$4 sm:$0xff]  }
  0xbc   : > { %2242 = vmatpush1.bf16.msra.mxu1 %v3338_v16  ;;  %v3433_v15 = vld [vmem:[%s3787_s11 + $0x314] ss:$24 sps:$4 sm:$0xff]   ;;  %v3428_v16 = vld [vmem:[%s3787_s11 + $0x608] ss:$24 sps:$4 sm:$0xff]  }
  0xbd   : > { %2328 = vmatpush1.bf16.msra.mxu0 %v3341_v17  ;;  %2243 = vmatprep.subr.bf16.mxu1 %v3346_v18  ;;  %v3431_v17 = vld [vmem:[%s3787_s11 + $0x310] ss:$24 sps:$4 sm:$0xff]   ;;  %v3436_v18 = vld [vmem:[%s3787_s11 + $0x63c] ss:$24 sps:$4 sm:$0xff]  }
  0xbe   : > { %2329 = vmatprep.subr.bf16.mxu0 %v3349_v19  ;;  %v3439_v19 = vld [vmem:[%s3787_s11 + $0x344] ss:$24 sps:$4 sm:$0xff]  }
  0xc0   : > { %2244 = vmatpush1.bf16.msra.mxu1 %v3344_v20  ;;  %v3434_v20 = vld [vmem:[%s3787_s11 + $0x638] ss:$24 sps:$4 sm:$0xff]  }
  0xc1   : > { %2330 = vmatpush1.bf16.msra.mxu0 %v3347_v21  ;;  %2245 = vmatprep.subr.bf16.mxu1 %v3352_v22  ;;  %v3437_v21 = vld [vmem:[%s3787_s11 + $0x340] ss:$24 sps:$4 sm:$0xff]   ;;  %v3442_v22 = vld [vmem:[%s3787_s11 + $0x66c] ss:$24 sps:$4 sm:$0xff]  }
  0xc2   : > { %2331 = vmatprep.subr.bf16.mxu0 %v3355_v23  ;;  %v3445_v23 = vld [vmem:[%s3787_s11 + $0x374] ss:$24 sps:$4 sm:$0xff]  }
  0xc4   : > { %2246 = vmatpush1.bf16.msra.mxu1 %v3350_v24  ;;  %v3443_v24 = vld [vmem:[%s3787_s11 + $0x370] ss:$24 sps:$4 sm:$0xff]  }
  0xc5   : > { %2332 = vmatpush1.bf16.msra.mxu0 %v3353_v25  ;;  %2247 = vmatprep.subr.bf16.mxu1 %v3358_v48  ;;  %v3448_v25 = vld [vmem:[%s3787_s11 + $0x69c] ss:$24 sps:$4 sm:$0xff]  }
  0xc6   : > { %2333 = vmatprep.subr.bf16.mxu0 %v3361_v49  ;;  %v3451_v48 = vld [vmem:[%s3787_s11 + $0x3a4] ss:$24 sps:$4 sm:$0xff]   ;;  %v3446_v49 = vld [vmem:[%s3787_s11 + $0x698] ss:$24 sps:$4 sm:$0xff]  }
  0xc8   : > { %2248 = vmatpush1.bf16.msra.mxu1 %v3356_v26  ;;  %v3449_v26 = vld [vmem:[%s3787_s11 + $0x3a0] ss:$24 sps:$4 sm:$0xff]  }
  0xc9   : > { %2334 = vmatpush1.bf16.msra.mxu0 %v3359_v27  ;;  %2249 = vmatprep.subr.bf16.mxu1 %v3364_v28  ;;  %v3454_v27 = vld [vmem:[%s3787_s11 + $0x6cc] ss:$24 sps:$4 sm:$0xff]  }
  0xca   : > { %2335 = vmatprep.subr.bf16.mxu0 %v3367_v29  ;;  %v3457_v28 = vld [vmem:[%s3787_s11 + $0x3d4] ss:$24 sps:$4 sm:$0xff]   ;;  %v3452_v29 = vld [vmem:[%s3787_s11 + $0x6c8] ss:$24 sps:$4 sm:$0xff]  }
  0xcc   : > { %2250 = vmatpush1.bf16.msra.mxu1 %v3362_v30  ;;  %v3455_v30 = vld [vmem:[%s3787_s11 + $0x3d0] ss:$24 sps:$4 sm:$0xff]  }
  0xcd   : > { %2336 = vmatpush1.bf16.msra.mxu0 %v3365_v31  ;;  %2251 = vmatprep.subr.bf16.mxu1 %v3370_v32  ;;  %v3460_v31 = vld [vmem:[%s3787_s11 + $0x6fc] ss:$24 sps:$4 sm:$0xff]  }
  0xce   : > { %2337 = vmatprep.subr.bf16.mxu0 %v3373_v33  ;;  %v3463_v32 = vld [vmem:[%s3787_s11 + $0x404] ss:$24 sps:$4 sm:$0xff]   ;;  %v3458_v33 = vld [vmem:[%s3787_s11 + $0x6f8] ss:$24 sps:$4 sm:$0xff]  }
  0xd0   : > { %2252 = vmatpush1.bf16.msra.mxu1 %v3368_v35  ;;  %v3461_v35 = vld [vmem:[%s3787_s11 + $0x400] ss:$24 sps:$4 sm:$0xff]  }
  0xd1   : > { %2338 = vmatpush1.bf16.msra.mxu0 %v3371_v36  ;;  %2253 = vmatprep.subr.bf16.mxu1 %v3376_v37  ;;  %v3466_v36 = vld [vmem:[%s3787_s11 + $0x72c] ss:$24 sps:$4 sm:$0xff]  }
  0xd2   : > { %2339 = vmatprep.subr.bf16.mxu0 %v3379_v38  ;;  %v3469_v37 = vld [vmem:[%s3787_s11 + $0x434] ss:$24 sps:$4 sm:$0xff]   ;;  %v3464_v38 = vld [vmem:[%s3787_s11 + $0x728] ss:$24 sps:$4 sm:$0xff]  }
  0xd4   : > { %2254 = vmatpush1.bf16.msra.mxu1 %v3374_v39  ;;  %v3467_v39 = vld [vmem:[%s3787_s11 + $0x430] ss:$24 sps:$4 sm:$0xff]  }
  0xd5   : > { %2340 = vmatpush1.bf16.msra.mxu0 %v3377_v40  ;;  %2255 = vmatprep.subr.bf16.mxu1 %v3382_v41  ;;  %v3472_v40 = vld [vmem:[%s3787_s11 + $0x75c] ss:$24 sps:$4 sm:$0xff]  }
  0xd6   : > { %2341 = vmatprep.subr.bf16.mxu0 %v3385_v42  ;;  %v3475_v41 = vld [vmem:[%s3787_s11 + $0x464] ss:$24 sps:$4 sm:$0xff]   ;;  %v3470_v42 = vld [vmem:[%s3787_s11 + $0x758] ss:$24 sps:$4 sm:$0xff]  }
  0xd8   : > { %2256 = vmatpush1.bf16.msra.mxu1 %v3380_v43  ;;  %v3473_v43 = vld [vmem:[%s3787_s11 + $0x460] ss:$24 sps:$4 sm:$0xff]  }
  0xd9   : > { %2342 = vmatpush1.bf16.msra.mxu0 %v3383_v44  ;;  %2257 = vmatprep.subr.bf16.mxu1 %v3388_v45  ;;  %v3478_v44 = vld [vmem:[%s3787_s11 + $0x78c] ss:$24 sps:$4 sm:$0xff]  }
  0xda   : > { %2343 = vmatprep.subr.bf16.mxu0 %v3391_v46  ;;  %v3481_v45 = vld [vmem:[%s3787_s11 + $0x494] ss:$24 sps:$4 sm:$0xff]   ;;  %v3476_v46 = vld [vmem:[%s3787_s11 + $0x788] ss:$24 sps:$4 sm:$0xff]  }
  0xdc   : > { %2258 = vmatpush1.bf16.msra.mxu1 %v3386_v47  ;;  %v3479_v47 = vld [vmem:[%s3787_s11 + $0x490] ss:$24 sps:$4 sm:$0xff]  }
  0xdd   : > { %2344 = vmatpush1.bf16.msra.mxu0 %v3389_v50  ;;  %2259 = vmatprep.subr.bf16.mxu1 %v3394_v51  ;;  %v3484_v50 = vld [vmem:[%s3787_s11 + $0x7bc] ss:$24 sps:$4 sm:$0xff]  }
  0xde   : > { %2345 = vmatprep.subr.bf16.mxu0 %v3397_v52  ;;  %v3487_v51 = vld [vmem:[%s3787_s11 + $0x4c4] ss:$24 sps:$4 sm:$0xff]   ;;  %v3482_v52 = vld [vmem:[%s3787_s11 + $0x7b8] ss:$24 sps:$4 sm:$0xff]  }
  0xe0   : > { %2260 = vmatpush1.bf16.msra.mxu1 %v3392_v53  ;;  %v3485_v53 = vld [vmem:[%s3787_s11 + $0x4c0] ss:$24 sps:$4 sm:$0xff]  }
  0xe1   : > { %2346 = vmatpush1.bf16.msra.mxu0 %v3395_v54  ;;  %2261 = vmatprep.subr.bf16.mxu1 %v3400_v55  ;;  %v3490_v54 = vld [vmem:[%s3787_s11 + $0x7ec] ss:$24 sps:$4 sm:$0xff]  }
  0xe2   : > { %2347 = vmatprep.subr.bf16.mxu0 %v3403_v56  ;;  %v3493_v55 = vld [vmem:[%s3787_s11 + $0x4f4] ss:$24 sps:$4 sm:$0xff]   ;;  %v3488_v56 = vld [vmem:[%s3787_s11 + $0x7e8] ss:$24 sps:$4 sm:$0xff]  }
  0xe4   : > { %2262 = vmatpush1.bf16.msra.mxu1 %v3398_v57  ;;  %v3491_v57 = vld [vmem:[%s3787_s11 + $0x4f0] ss:$24 sps:$4 sm:$0xff]  }
  0xe5   : > { %2348 = vmatpush1.bf16.msra.mxu0 %v3401_v58  ;;  %2263 = vmatprep.subr.bf16.mxu1 %v3406_v59  ;;  %v3496_v58 = vld [vmem:[%s3787_s11 + $0x81c] ss:$24 sps:$4 sm:$0xff]  }
  0xe6   : > { %2349 = vmatprep.subr.bf16.mxu0 %v3409_v60  ;;  %v3499_v59 = vld [vmem:[%s3787_s11 + $0x524] ss:$24 sps:$4 sm:$0xff]   ;;  %v3494_v60 = vld [vmem:[%s3787_s11 + $0x818] ss:$24 sps:$4 sm:$0xff]  }
  0xe8   : > { %2264 = vmatpush1.bf16.msra.mxu1 %v3404_v61  ;;  %v3497_v61 = vld [vmem:[%s3787_s11 + $0x520] ss:$24 sps:$4 sm:$0xff]  }
  0xe9   : > { %2350 = vmatpush1.bf16.msra.mxu0 %v3407_v62  ;;  %2265 = vmatprep.subr.bf16.mxu1 %v3412_v63  ;;  %v3502_v62 = vld [vmem:[%s3787_s11 + $0x84c] ss:$24 sps:$4 sm:$0xff]  }
  0xea   : > { %2351 = vmatprep.subr.bf16.mxu0 %v3415_v0  ;;  %v3505_v63 = vld [vmem:[%s3787_s11 + $0x554] ss:$24 sps:$4 sm:$0xff]   ;;  %v3500_v0 = vld [vmem:[%s3787_s11 + $0x848] ss:$24 sps:$4 sm:$0xff]  }
  0xec   : > { %2266 = vmatpush1.bf16.msra.mxu1 %v3410_v1  ;;  %v3503_v1 = vld [vmem:[%s3787_s11 + $0x550] ss:$24 sps:$4 sm:$0xff]  }
  0xed   : > { %2352 = vmatpush1.bf16.msra.mxu0 %v3413_v2  ;;  %2267 = vmatprep.subr.bf16.mxu1 %v3418_v3  ;;  %v3508_v2 = vld [vmem:[%s3787_s11 + $0x87c] ss:$24 sps:$4 sm:$0xff]  }
  0xee   : > { %2353 = vmatprep.subr.bf16.mxu0 %v3421_v4  ;;  %v3511_v3 = vld [vmem:[%s3787_s11 + $0x584] ss:$24 sps:$4 sm:$0xff]   ;;  %v3506_v4 = vld [vmem:[%s3787_s11 + $0x878] ss:$24 sps:$4 sm:$0xff]  }
  0xf0   : > { %2268 = vmatpush1.bf16.msra.mxu1 %v3416_v5  ;;  %v3509_v5 = vld [vmem:[%s3787_s11 + $0x580] ss:$24 sps:$4 sm:$0xff]  }
  0xf1   : > { %2354 = vmatpush1.bf16.msra.mxu0 %v3419_v8  ;;  %2269 = vmatprep.subr.bf16.mxu1 %v3424_v9  ;;  %v3514_v8 = vld [vmem:[%s3787_s11 + $0x8ac] ss:$24 sps:$4 sm:$0xff]  }
  0xf2   : > { %2355 = vmatprep.subr.bf16.mxu0 %v3427_v10  ;;  %v3517_v9 = vld [vmem:[%s3787_s11 + $0x5b4] ss:$24 sps:$4 sm:$0xff]   ;;  %v3512_v10 = vld [vmem:[%s3787_s11 + $0x8a8] ss:$24 sps:$4 sm:$0xff]  }
  0xf4   : > { %2270 = vmatpush1.bf16.msra.mxu1 %v3422_v12  ;;  %v3515_v12 = vld [vmem:[%s3787_s11 + $0x5b0] ss:$24 sps:$4 sm:$0xff]  }
  0xf5   : > { %2356 = vmatpush1.bf16.msra.mxu0 %v3425_v13  ;;  %2282 = vmatprep.subr.bf16.mxu1 %v3430_v14  ;;  %v3520_v13 = vld [vmem:[%s3787_s11 + $0x8dc] ss:$24 sps:$4 sm:$0xff]  }
  0xf6   : > { %2368 = vmatprep.subr.bf16.mxu0 %v3433_v15  ;;  %v3523_v14 = vld [vmem:[%s3787_s11 + $0x5e4] ss:$24 sps:$4 sm:$0xff]   ;;  %v3518_v15 = vld [vmem:[%s3787_s11 + $0x8d8] ss:$24 sps:$4 sm:$0xff]  }
  0xf7   : > { %2272 = vmatmul.mubr.bf16.vlgmr.msra.gmra.mrb[4].mxu1 %v3881_v7  ;;  %v3572_v7 = vld [vmem:[%s4176_s0 + $0xc] ss:$24 sps:$4 sm:$0xff]  }
  0xf8   : > { %2358 = vmatmul.mubr.bf16.vlgmr.msra.gmra.mrb[4].mxu0 %v3876_v6  ;;  %2283 = vmatpush1.bf16.msra.mxu1 %v3428_v16  ;;  %v3440_v6 = vld [vmem:[%s3787_s11 + $0x668] ss:$24 sps:$4 sm:$0xff]  }
  0xf9   : > { %2369 = vmatpush1.bf16.msra.mxu0 %v3431_v17  ;;  %2284 = vmatprep.subr.bf16.mxu1 %v3436_v18  ;;  %v3521_v16 = vld [vmem:[%s3787_s11 + $0x5e0] ss:$24 sps:$4 sm:$0xff]   ;;  %v3526_v17 = vld [vmem:[%s3787_s11 + $0x614] ss:$24 sps:$4 sm:$0xff]   ;;  %v3524_v18 = vld [vmem:[%s3787_s11 + $0x610] ss:$24 sps:$4 sm:$0xff]  }
  0xfa   : > { %2370 = vmatprep.subr.bf16.mxu0 %v3439_v19  ;;  %2314 = vmatprep.mubr.bf16.mxu1 %v3915_v34  ;;  %v3529_v19 = vld [vmem:[%s3787_s11 + $0x644] ss:$24 sps:$4 sm:$0xff]  }
  0xfb   : > { %2400 = vmatprep.mubr.bf16.mxu0 %v3572_v7  ;;  %v3535_v7 = vld [vmem:[%s3787_s11 + $0x6a4] ss:$24 sps:$4 sm:$0xff]  }
  0xfc   : > { %2285 = vmatpush1.bf16.msra.mxu1 %v3434_v20  ;;  %v3573_v20 = vld [vmem:[%s4176_s0 + $0x8] ss:$24 sps:$4 sm:$0xff]  }
  0xfd   : > { %2371 = vmatpush1.bf16.msra.mxu0 %v3437_v21  ;;  %2286 = vmatprep.subr.bf16.mxu1 %v3442_v22  ;;  %v3527_v21 = vld [vmem:[%s3787_s11 + $0x640] ss:$24 sps:$4 sm:$0xff]   ;;  %v3532_v22 = vld [vmem:[%s3787_s11 + $0x674] ss:$24 sps:$4 sm:$0xff]  }
  0xfe   : > { %2372 = vmatprep.subr.bf16.mxu0 %v3445_v23  ;;  %v3530_v23 = vld [vmem:[%s3787_s11 + $0x670] ss:$24 sps:$4 sm:$0xff]  }
 0x100   : > { %2287 = vmatpush1.bf16.msra.mxu1 %v3440_v6  ;;  %v3533_v6 = vld [vmem:[%s3787_s11 + $0x6a0] ss:$24 sps:$4 sm:$0xff]  }
 0x101   : > { %2373 = vmatpush1.bf16.msra.mxu0 %v3443_v24  ;;  %2288 = vmatprep.subr.bf16.mxu1 %v3448_v25  ;;  %v3538_v24 = vld [vmem:[%s3787_s11 + $0x6d4] ss:$24 sps:$4 sm:$0xff]   ;;  %v3536_v25 = vld [vmem:[%s3787_s11 + $0x6d0] ss:$24 sps:$4 sm:$0xff]  }
 0x102   : > { %2374 = vmatprep.subr.bf16.mxu0 %v3451_v48  ;;  %v3541_v48 = vld [vmem:[%s3787_s11 + $0x704] ss:$24 sps:$4 sm:$0xff]  }
 0x104   : > { %2289 = vmatpush1.bf16.msra.mxu1 %v3446_v49  ;;  %v3544_v49 = vld [vmem:[%s3787_s11 + $0x734] ss:$24 sps:$4 sm:$0xff]  }
 0x105   : > { %2375 = vmatpush1.bf16.msra.mxu0 %v3449_v26  ;;  %2290 = vmatprep.subr.bf16.mxu1 %v3454_v27 }
 0x106   : > { %2376 = vmatprep.subr.bf16.mxu0 %v3457_v28  ;;  %v3542_v28 = vld [vmem:[%s3787_s11 + $0x730] ss:$24 sps:$4 sm:$0xff]  }
 0x108   : > { %2291 = vmatpush1.bf16.msra.mxu1 %v3452_v29 }
 0x109   : > { %2377 = vmatpush1.bf16.msra.mxu0 %v3455_v30  ;;  %2292 = vmatprep.subr.bf16.mxu1 %v3460_v31  ;;  %v3547_v30 = vld [vmem:[%s3787_s11 + $0x764] ss:$24 sps:$4 sm:$0xff]  }
 0x10a   : > { %2378 = vmatprep.subr.bf16.mxu0 %v3463_v32  ;;  %v3545_v32 = vld [vmem:[%s3787_s11 + $0x760] ss:$24 sps:$4 sm:$0xff]  }
 0x10c   : > { %2293 = vmatpush1.bf16.msra.mxu1 %v3458_v33  ;;  %v3550_v33 = vld [vmem:[%s3787_s11 + $0x794] ss:$24 sps:$4 sm:$0xff]  }
 0x10d   : > { %2379 = vmatpush1.bf16.msra.mxu0 %v3461_v35  ;;  %2294 = vmatprep.subr.bf16.mxu1 %v3466_v36  ;;  %v3548_v35 = vld [vmem:[%s3787_s11 + $0x790] ss:$24 sps:$4 sm:$0xff]   ;;  %v3553_v36 = vld [vmem:[%s3787_s11 + $0x7c4] ss:$24 sps:$4 sm:$0xff]  }
 0x10e   : > { %2380 = vmatprep.subr.bf16.mxu0 %v3469_v37  ;;  %v3551_v37 = vld [vmem:[%s3787_s11 + $0x7c0] ss:$24 sps:$4 sm:$0xff]  }
 0x110   : > { %2295 = vmatpush1.bf16.msra.mxu1 %v3464_v38  ;;  %v3556_v38 = vld [vmem:[%s3787_s11 + $0x7f4] ss:$24 sps:$4 sm:$0xff]  }
 0x111   : > { %2381 = vmatpush1.bf16.msra.mxu0 %v3467_v39  ;;  %2296 = vmatprep.subr.bf16.mxu1 %v3472_v40  ;;  %v3554_v39 = vld [vmem:[%s3787_s11 + $0x7f0] ss:$24 sps:$4 sm:$0xff]   ;;  %v3559_v40 = vld [vmem:[%s3787_s11 + $0x824] ss:$24 sps:$4 sm:$0xff]  }
 0x112   : > { %2382 = vmatprep.subr.bf16.mxu0 %v3475_v41  ;;  %v3557_v41 = vld [vmem:[%s3787_s11 + $0x820] ss:$24 sps:$4 sm:$0xff]  }
 0x114   : > { %2297 = vmatpush1.bf16.msra.mxu1 %v3470_v42  ;;  %v3562_v42 = vld [vmem:[%s3787_s11 + $0x854] ss:$24 sps:$4 sm:$0xff]  }
 0x115   : > { %2383 = vmatpush1.bf16.msra.mxu0 %v3473_v43  ;;  %2298 = vmatprep.subr.bf16.mxu1 %v3478_v44  ;;  %v3560_v43 = vld [vmem:[%s3787_s11 + $0x850] ss:$24 sps:$4 sm:$0xff]   ;;  %v3565_v44 = vld [vmem:[%s3787_s11 + $0x884] ss:$24 sps:$4 sm:$0xff]  }
 0x116   : > { %2384 = vmatprep.subr.bf16.mxu0 %v3481_v45  ;;  %v3563_v45 = vld [vmem:[%s3787_s11 + $0x880] ss:$24 sps:$4 sm:$0xff]  }
 0x118   : > { %2299 = vmatpush1.bf16.msra.mxu1 %v3476_v46  ;;  %v3568_v46 = vld [vmem:[%s3787_s11 + $0x8b4] ss:$24 sps:$4 sm:$0xff]  }
 0x119   : > { %2385 = vmatpush1.bf16.msra.mxu0 %v3479_v47  ;;  %2300 = vmatprep.subr.bf16.mxu1 %v3484_v50  ;;  %v3566_v47 = vld [vmem:[%s3787_s11 + $0x8b0] ss:$24 sps:$4 sm:$0xff]   ;;  %v3571_v50 = vld [vmem:[%s3787_s11 + $0x8e4] ss:$24 sps:$4 sm:$0xff]  }
 0x11a   : > { %2386 = vmatprep.subr.bf16.mxu0 %v3487_v51  ;;  %v3569_v51 = vld [vmem:[%s3787_s11 + $0x8e0] ss:$24 sps:$4 sm:$0xff]  }
 0x11c   : > { %2301 = vmatpush1.bf16.msra.mxu1 %v3482_v52  ;;  %v2495_v52 = vlaneseq }
 0x11d   : > { %2387 = vmatpush1.bf16.msra.mxu0 %v3485_v53  ;;  %2302 = vmatprep.subr.bf16.mxu1 %v3490_v54 }
 0x11e   : > { %2388 = vmatprep.subr.bf16.mxu0 %v3493_v55  ;;  %v2496_v53 = vshrl.u32 %v2495_v52, 7  ;;  %v2493_v55 = vld [vmem:[%s271_s5] sm:$0x3f] }
 0x120   : > { %2303 = vmatpush1.bf16.msra.mxu1 %v3488_v56  ;;  %v2497_v54 = vsub.s32 0, %v2496_v53  ;;  %v2501_v56 = vsub.s32 1, %v2496_v53 }
 0x121   : > { %2389 = vmatpush1.bf16.msra.mxu0 %v3491_v57  ;;  %2304 = vmatprep.subr.bf16.mxu1 %v3496_v58 }
 0x122   : > { %2390 = vmatprep.subr.bf16.mxu0 %v3499_v59  ;;  %v2498_v57 = vrot.slane %v2493_v55, %v2497_v54  ;;  %v2502_v59 = vrot.slane %v2493_v55, %v2501_v56 }
 0x124   : > { %2305 = vmatpush1.bf16.msra.mxu1 %v3494_v60 }
 0x125   : > { %2391 = vmatpush1.bf16.msra.mxu0 %v3497_v61  ;;  %2306 = vmatprep.subr.bf16.mxu1 %v3502_v62 }
 0x126   : > { %2392 = vmatprep.subr.bf16.mxu0 %v3505_v63 }
 0x128   : > { %2307 = vmatpush1.bf16.msra.mxu1 %v3500_v0 }
 0x129   : > { %2393 = vmatpush1.bf16.msra.mxu0 %v3503_v1  ;;  %2308 = vmatprep.subr.bf16.mxu1 %v3508_v2 }
 0x12a   : > { %2394 = vmatprep.subr.bf16.mxu0 %v3511_v3 }
 0x12c   : > { %2309 = vmatpush1.bf16.msra.mxu1 %v3506_v4 }
 0x12d   : > { %2395 = vmatpush1.bf16.msra.mxu0 %v3509_v5  ;;  %2310 = vmatprep.subr.bf16.mxu1 %v3514_v8 }
 0x12e   : > { %2396 = vmatprep.subr.bf16.mxu0 %v3517_v9 }
 0x130   : > { %2311 = vmatpush1.bf16.msra.mxu1 %v3512_v10  ;;  %v2505_v10 = vsub.s32 2, %v2496_v53 }
 0x131   : > { %2397 = vmatpush1.bf16.msra.mxu0 %v3515_v12  ;;  %2312 = vmatprep.subr.bf16.mxu1 %v3520_v13  ;;  %v2509_v12 = vsub.s32 3, %v2496_v53 }
 0x132   : > { %2398 = vmatprep.subr.bf16.mxu0 %v3523_v14  ;;  %v2506_v13 = vrot.slane %v2493_v55, %v2505_v10 }
 0x133   : > { %v2510_v14 = vrot.slane %v2493_v55, %v2509_v12 }
 0x134   : > { %2313 = vmatpush1.bf16.msra.mxu1 %v3518_v15 }
 0x135   : > { %2399 = vmatpush1.bf16.msra.mxu0 %v3521_v16 }
 0x136   : > { %2411 = vmatprep.subr.bf16.mxu0 %v3526_v17 }
 0x137   : > { %2315 = vmatmul.mubr.bf16.vlgmr.msra.gmra.mrb[4].mxu1 %v3957_v11 }
 0x138   : > { %2401 = vmatmul.mubr.bf16.vlgmr.msra.gmra.mrb[4].mxu0 %v3573_v20 }
 0x139   : > { %2412 = vmatpush1.bf16.msra.mxu0 %v3524_v18  ;;  %2443 = vmatprep.mubr.bf16.mxu0 %v3915_v34  ;;  %v3539_v34 = vld [vmem:[%s3787_s11 + $0x700] ss:$24 sps:$4 sm:$0xff]   ;;  %s3072_s11 = smul.u32 48, %s3783_s6 }
 0x13a   : > { %2413 = vmatprep.subr.bf16.mxu0 %v3529_v19  ;;  %s3045_s6 = smul.u32 (%p4185_p9), 24, %s3646_s15 }
 0x13b   : > { %s4138_s7 = scalar_lea.vmem [#allocation5], %s3072_s11 }
 0x13c   : > { %s2591_s18 = scalar_lea.vmem (%p4185_p9), %s4179_s3, %s3045_s6 }
 0x13d   : > { %2414 = vmatpush1.bf16.msra.mxu0 %v3527_v21 }
 0x13e   : > { %2415 = vmatprep.subr.bf16.mxu0 %v3532_v22 }
 0x141   : > { %2416 = vmatpush1.bf16.msra.mxu0 %v3530_v23 }
 0x142   : > { %2417 = vmatprep.subr.bf16.mxu0 %v3535_v7 }
 0x145   : > { %2418 = vmatpush1.bf16.msra.mxu0 %v3533_v6  ;;  %v2513_v6 = vsub.s32 4, %v2496_v53 }
 0x146   : > { %2419 = vmatprep.subr.bf16.mxu0 %v3538_v24  ;;  %v2517_v24 = vsub.s32 5, %v2496_v53 }
 0x149   : > { %2420 = vmatpush1.bf16.msra.mxu0 %v3536_v25  ;;  %v2514_v25 = vrot.slane %v2493_v55, %v2513_v6 }
 0x14a   : > { %2421 = vmatprep.subr.bf16.mxu0 %v3541_v48  ;;  %v2101_v26 = vpop.f32.mrb[0].mxu1  ;;  %v2518_v48 = vrot.slane %v2493_v55, %v2517_v24 }
 0x14b   : > { %v2103_v27 = vpop.f32.mrb[1].mxu1 }
 0x14c   : > { %v2105_v29 = vpop.f32.mrb[2].mxu1 }
 0x14d   : > { %2422 = vmatpush1.bf16.msra.mxu0 %v3539_v34  ;;  %v2107_v31 = vpop.f32.mrb[3].mxu1 }
 0x14e   : > { %2423 = vmatprep.subr.bf16.mxu0 %v3544_v49 }
 0x151   : > { %2424 = vmatpush1.bf16.msra.mxu0 %v3542_v28 }
 0x152   : > { %2425 = vmatprep.subr.bf16.mxu0 %v3547_v30 }
 0x155   : > { %2426 = vmatpush1.bf16.msra.mxu0 %v3545_v32 }
 0x156   : > { %2427 = vmatprep.subr.bf16.mxu0 %v3550_v33 }
 0x159   : > { %2428 = vmatpush1.bf16.msra.mxu0 %v3548_v35 }
 0x15a   : > { %2429 = vmatprep.subr.bf16.mxu0 %v3553_v36 }
 0x15d   : > { %2430 = vmatpush1.bf16.msra.mxu0 %v3551_v37 }
 0x15e   : > { %2431 = vmatprep.subr.bf16.mxu0 %v3556_v38 }
 0x161   : > { %2432 = vmatpush1.bf16.msra.mxu0 %v3554_v39 }
 0x162   : > { %2433 = vmatprep.subr.bf16.mxu0 %v3559_v40 }
 0x165   : > { %2434 = vmatpush1.bf16.msra.mxu0 %v3557_v41 }
 0x166   : > { %2435 = vmatprep.subr.bf16.mxu0 %v3562_v42 }
 0x169   : > { %2436 = vmatpush1.bf16.msra.mxu0 %v3560_v43 }
 0x16a   : > { %2437 = vmatprep.subr.bf16.mxu0 %v3565_v44 }
 0x16d   : > { %2438 = vmatpush1.bf16.msra.mxu0 %v3563_v45 }
 0x16e   : > { %2439 = vmatprep.subr.bf16.mxu0 %v3568_v46 }
 0x171   : > { %2440 = vmatpush1.bf16.msra.mxu0 %v3566_v47 }
 0x172   : > { %2441 = vmatprep.subr.bf16.mxu0 %v3571_v50 }
 0x175   : > { %2442 = vmatpush1.bf16.msra.mxu0 %v3569_v51 }
 0x178   : > { %2444 = vmatmul.mubr.bf16.vlgmr.msra.gmra.mrb[4].mxu0 %v3957_v11 }
 0x18b   : > { %v2187_v58 = vpop.f32.mrb[0].mxu0 }
 0x18c   : > { %v3046_v60 = vadd.f32 %v2187_v58, %v2101_v26  ;;  %v2189_v61 = vpop.f32.mrb[1].mxu0 }
 0x18d   : > { %v3047_v62 = vadd.f32 %v2189_v61, %v2103_v27  ;;  %v2191_v11 = vpop.f32.mrb[2].mxu0 }
 0x18e   : > { %v2525_v63 = vadd.f32 %v3046_v60, %v2498_v57  ;;  %v3048_v0 = vadd.f32 %v2191_v11, %v2105_v29  ;;  %v2193_v1 = vpop.f32.mrb[3].mxu0 }
 0x18f   : > { %v2526_v2 = vadd.f32 %v3047_v62, %v2502_v59  ;;  %v3049_v3 = vadd.f32 %v2193_v1, %v2107_v31 }
 0x190   : > { %v2531_v4 = vadd.f32 %v3048_v0, %v2498_v57 }
 0x191   : > { %v3039_v5 = vpack.c.bf16 %v2526_v2, %v2525_v63  ;;  %v2532_v8 = vadd.f32 %v3049_v3, %v2502_v59 }
 0x193   : > { %2573 = vst [vmem:[%s4138_s7] sm:$0xff] %v3039_v5  ;;  %v3042_v9 = vpack.c.bf16 %v2532_v8, %v2531_v4 }
 0x195   : > { %2576 = vst [vmem:[%s4138_s7 + $0x18] sm:$0xff] %v3042_v9 }
 0x19a   : > { %v2604_v35 = vld [vmem:[%s4138_s7] sm:$0xff] (%p4185_p9) }
 0x19b   : > { %2605 = vst [vmem:[%s2591_s18] sm:$0xff] (%p4185_p9), %v2604_v35 }
 0x19c   : > { %v2610_v38 = vld [vmem:[%s4138_s7 + $0x18] sm:$0xff] (%p4185_p9) }
 0x19d   : > { %2611 = vst [vmem:[%s2591_s18 + $0x48] sm:$0xff] (%p4185_p9), %v2610_v38 }
 0x20a   : > { %v2316_v15 = vpop.f32.mrb[4].mxu1 }
 0x20b   : > { %v2527_v16 = vadd.f32 %v2506_v13, %v2316_v15  ;;  %v2318_v17 = vpop.f32.mrb[5].mxu1 }
 0x20c   : > { %v2528_v18 = vadd.f32 %v2510_v14, %v2318_v17  ;;  %v2320_v19 = vpop.f32.mrb[6].mxu1 }
 0x20d   : > { %v2533_v20 = vadd.f32 %v2506_v13, %v2320_v19  ;;  %v2322_v21 = vpop.f32.mrb[7].mxu1 }
 0x20e   : > { %v3040_v22 = vpack.c.bf16 %v2528_v18, %v2527_v16  ;;  %v2534_v23 = vadd.f32 %v2510_v14, %v2322_v21 }
 0x210   : > { %2574 = vst [vmem:[%s4138_s7 + $0x8] sm:$0xff] %v3040_v22  ;;  %v3043_v7 = vpack.c.bf16 %v2534_v23, %v2533_v20 }
 0x212   : > { %2577 = vst [vmem:[%s4138_s7 + $0x20] sm:$0xff] %v3043_v7 }
 0x217   : > { %v2606_v36 = vld [vmem:[%s4138_s7 + $0x8] sm:$0xff] (%p4185_p9) }
 0x218   : > { %2607 = vst [vmem:[%s2591_s18 + $0x8] sm:$0xff] (%p4185_p9), %v2606_v36 }
 0x219   : > { %v2612_v39 = vld [vmem:[%s4138_s7 + $0x20] sm:$0xff] (%p4185_p9) }
 0x21a   : > { %2613 = vst [vmem:[%s2591_s18 + $0x50] sm:$0xff] (%p4185_p9), %v2612_v39 }
 0x24b   : > { %v2445_v34 = vpop.f32.mrb[4].mxu0 }
 0x24c   : > { %v2529_v49 = vadd.f32 %v2514_v25, %v2445_v34  ;;  %v2447_v26 = vpop.f32.mrb[5].mxu0 }
 0x24d   : > { %v2530_v27 = vadd.f32 %v2518_v48, %v2447_v26  ;;  %v2449_v28 = vpop.f32.mrb[6].mxu0  ;;  %2585 = sbr.rel (!%p4185_p9) target bundleno = 604 (0x25c), region = 48 }
 0x24e   : > { %v2535_v29 = vadd.f32 %v2514_v25, %v2449_v28  ;;  %v2451_v30 = vpop.f32.mrb[7].mxu0 }
 0x24f   : > { %v3041_v31 = vpack.c.bf16 %v2530_v27, %v2529_v49  ;;  %v2536_v32 = vadd.f32 %v2518_v48, %v2451_v30 }
 0x251   : > { %2575 = vst [vmem:[%s4138_s7 + $0x10] sm:$0xff] %v3041_v31  ;;  %v3044_v33 = vpack.c.bf16 %v2536_v32, %v2535_v29 }
 0x253   : > { %2578 = vst [vmem:[%s4138_s7 + $0x28] sm:$0xff] %v3044_v33 }
 0x258   : > { %v2608_v37 = vld [vmem:[%s4138_s7 + $0x10] sm:$0xff] }
 0x259   : > { %2609 = vst [vmem:[%s2591_s18 + $0x10] sm:$0xff] %v2608_v37 }
 0x25a   : > { %v2614_v40 = vld [vmem:[%s4138_s7 + $0x28] sm:$0xff] }
 0x25b   : > { %2615 = vst [vmem:[%s2591_s18 + $0x58] sm:$0xff] %v2614_v40 }
 0x25c PF: > { %s16_s17 = sadd.s32 1, %s3654_s17   ;;  %s4186_s12 = smov %s3638_s13 }
 0x25d   : > { %p13_p11 = scmp.ge.s32.totalorder %s16_s17, 5   ;;  %s4187_s13 = smov %s3642_s14 }
 0x25e   : > { %s4188_s14 = smov %s3728_s24  ;;  %s4189_s15 = smov %s3650_s16 }
 0x25f   : > { %s4190_s16 = smov %s4192_s19  ;;  %15 = sbr.rel (!%p13_p11) target bundleno = 4 (0x4), region = 109 }
 0x266   :  { %2631 = vsyncpa [#allocation4], 1 }
 0x267   :  { %2633 = vsyncpa [#allocation4 + $0x1], 1 }

// kernel: model_forward.89
= control target key start
LH: loop header
LB: loop body
LE: loop exit
PB: predicated region body
PF: predicated region fallthrough
CT: control target
= control target key end

     0   :  { %s4052_s1 = inlined_call_operand.vmem [shape: bf16[768,768], index: 1, kind: input, shape index: {}]   ;;  %s4053_s0 = inlined_call_operand.vmem [shape: bf16[16,768], index: 0, kind: input, shape index: {}]   ;;  %s4054_s2 = inlined_call_operand.vmem [shape: f32[1,768], index: 2, kind: input, shape index: {}]   ;;  %s4055_s3 = inlined_call_operand.vmem [shape: bf16[16,768], index: 3, kind: output, shape index: {}]  }
   0x1   :  { %v2652_v0 = vld [vmem:[%s4052_s1 + $0x4] ss:$24 sps:$4 sm:$0xff]   ;;  %v2656_v2 = vld [vmem:[%s4052_s1] ss:$24 sps:$4 sm:$0xff]   ;;  %v2658_v4 = vld [vmem:[%s4052_s1 + $0x34] ss:$24 sps:$4 sm:$0xff]  }
   0x2   :  { %v2654_v1 = vld [vmem:[%s4052_s1 + $0x304] ss:$24 sps:$4 sm:$0xff]   ;;  %1806 = vmatprep.subr.bf16.mxu1 %v2652_v0  ;;  %v2657_v3 = vld [vmem:[%s4052_s1 + $0x300] ss:$24 sps:$4 sm:$0xff]   ;;  %v2660_v5 = vld [vmem:[%s4052_s1 + $0x334] ss:$24 sps:$4 sm:$0xff]  }
   0x3   :  { %1849 = vmatprep.subr.bf16.mxu0 %v2654_v1  ;;  %1807 = vmatpush1.bf16.msra.mxu1 %v2656_v2  ;;  %v2662_v6 = vld [vmem:[%s4052_s1 + $0x30] ss:$24 sps:$4 sm:$0xff]   ;;  %v2664_v8 = vld [vmem:[%s4052_s1 + $0x64] ss:$24 sps:$4 sm:$0xff]   ;;  %v2668_v10 = vld [vmem:[%s4052_s1 + $0x60] ss:$24 sps:$4 sm:$0xff]  }
   0x4   :  { %1850 = vmatpush1.bf16.msra.mxu0 %v2657_v3  ;;  %1808 = vmatprep.subr.bf16.mxu1 %v2658_v4  ;;  %v2663_v7 = vld [vmem:[%s4052_s1 + $0x330] ss:$24 sps:$4 sm:$0xff]   ;;  %v2666_v9 = vld [vmem:[%s4052_s1 + $0x364] ss:$24 sps:$4 sm:$0xff]   ;;  %v2669_v11 = vld [vmem:[%s4052_s1 + $0x360] ss:$24 sps:$4 sm:$0xff]  }
   0x5   :  { %1851 = vmatprep.subr.bf16.mxu0 %v2660_v5  ;;  %v2670_v12 = vld [vmem:[%s4052_s1 + $0x94] ss:$24 sps:$4 sm:$0xff]   ;;  %v2674_v14 = vld [vmem:[%s4052_s1 + $0x90] ss:$24 sps:$4 sm:$0xff]   ;;  %v2676_v16 = vld [vmem:[%s4052_s1 + $0xc4] ss:$24 sps:$4 sm:$0xff]  }
   0x6   :  { %v2672_v13 = vld [vmem:[%s4052_s1 + $0x394] ss:$24 sps:$4 sm:$0xff]   ;;  %v2675_v15 = vld [vmem:[%s4052_s1 + $0x390] ss:$24 sps:$4 sm:$0xff]   ;;  %v2678_v17 = vld [vmem:[%s4052_s1 + $0x3c4] ss:$24 sps:$4 sm:$0xff]  }
   0x7   :  { %1809 = vmatpush1.bf16.msra.mxu1 %v2662_v6  ;;  %v2680_v18 = vld [vmem:[%s4052_s1 + $0xc0] ss:$24 sps:$4 sm:$0xff]   ;;  %v2682_v20 = vld [vmem:[%s4052_s1 + $0xf4] ss:$24 sps:$4 sm:$0xff]   ;;  %v2686_v22 = vld [vmem:[%s4052_s1 + $0xf0] ss:$24 sps:$4 sm:$0xff]  }
   0x8   :  { %1852 = vmatpush1.bf16.msra.mxu0 %v2663_v7  ;;  %1810 = vmatprep.subr.bf16.mxu1 %v2664_v8  ;;  %v2681_v19 = vld [vmem:[%s4052_s1 + $0x3c0] ss:$24 sps:$4 sm:$0xff]   ;;  %v2684_v21 = vld [vmem:[%s4052_s1 + $0x3f4] ss:$24 sps:$4 sm:$0xff]   ;;  %v2687_v23 = vld [vmem:[%s4052_s1 + $0x3f0] ss:$24 sps:$4 sm:$0xff]  }
   0x9   :  { %1853 = vmatprep.subr.bf16.mxu0 %v2666_v9  ;;  %v2688_v24 = vld [vmem:[%s4052_s1 + $0x124] ss:$24 sps:$4 sm:$0xff]   ;;  %v2692_v26 = vld [vmem:[%s4052_s1 + $0x120] ss:$24 sps:$4 sm:$0xff]   ;;  %v2694_v28 = vld [vmem:[%s4052_s1 + $0x154] ss:$24 sps:$4 sm:$0xff]  }
   0xa   :  { %v2690_v25 = vld [vmem:[%s4052_s1 + $0x424] ss:$24 sps:$4 sm:$0xff]   ;;  %v2693_v27 = vld [vmem:[%s4052_s1 + $0x420] ss:$24 sps:$4 sm:$0xff]   ;;  %v2696_v29 = vld [vmem:[%s4052_s1 + $0x454] ss:$24 sps:$4 sm:$0xff]  }
   0xb   :  { %1811 = vmatpush1.bf16.msra.mxu1 %v2668_v10  ;;  %v2698_v30 = vld [vmem:[%s4052_s1 + $0x150] ss:$24 sps:$4 sm:$0xff]   ;;  %v2700_v32 = vld [vmem:[%s4052_s1 + $0x184] ss:$24 sps:$4 sm:$0xff]   ;;  %v2704_v34 = vld [vmem:[%s4052_s1 + $0x180] ss:$24 sps:$4 sm:$0xff]  }
   0xc   :  { %1854 = vmatpush1.bf16.msra.mxu0 %v2669_v11  ;;  %1812 = vmatprep.subr.bf16.mxu1 %v2670_v12  ;;  %v2699_v31 = vld [vmem:[%s4052_s1 + $0x450] ss:$24 sps:$4 sm:$0xff]   ;;  %v2702_v33 = vld [vmem:[%s4052_s1 + $0x484] ss:$24 sps:$4 sm:$0xff]   ;;  %v2705_v35 = vld [vmem:[%s4052_s1 + $0x480] ss:$24 sps:$4 sm:$0xff]  }
   0xd   :  { %1855 = vmatprep.subr.bf16.mxu0 %v2672_v13  ;;  %v2706_v36 = vld [vmem:[%s4052_s1 + $0x1b4] ss:$24 sps:$4 sm:$0xff]   ;;  %v2710_v38 = vld [vmem:[%s4052_s1 + $0x1b0] ss:$24 sps:$4 sm:$0xff]   ;;  %v2712_v40 = vld [vmem:[%s4052_s1 + $0x1e4] ss:$24 sps:$4 sm:$0xff]  }
   0xe   :  { %v2708_v37 = vld [vmem:[%s4052_s1 + $0x4b4] ss:$24 sps:$4 sm:$0xff]   ;;  %v2711_v39 = vld [vmem:[%s4052_s1 + $0x4b0] ss:$24 sps:$4 sm:$0xff]   ;;  %v2714_v41 = vld [vmem:[%s4052_s1 + $0x4e4] ss:$24 sps:$4 sm:$0xff]  }
   0xf   :  { %1813 = vmatpush1.bf16.msra.mxu1 %v2674_v14  ;;  %v2716_v42 = vld [vmem:[%s4052_s1 + $0x1e0] ss:$24 sps:$4 sm:$0xff]   ;;  %v2718_v44 = vld [vmem:[%s4052_s1 + $0x214] ss:$24 sps:$4 sm:$0xff]   ;;  %v2722_v46 = vld [vmem:[%s4052_s1 + $0x210] ss:$24 sps:$4 sm:$0xff]  }
  0x10   :  { %1856 = vmatpush1.bf16.msra.mxu0 %v2675_v15  ;;  %1814 = vmatprep.subr.bf16.mxu1 %v2676_v16  ;;  %v2717_v43 = vld [vmem:[%s4052_s1 + $0x4e0] ss:$24 sps:$4 sm:$0xff]   ;;  %v2720_v45 = vld [vmem:[%s4052_s1 + $0x514] ss:$24 sps:$4 sm:$0xff]   ;;  %v2723_v47 = vld [vmem:[%s4052_s1 + $0x510] ss:$24 sps:$4 sm:$0xff]  }
  0x11   :  { %1857 = vmatprep.subr.bf16.mxu0 %v2678_v17  ;;  %v3262_v48 = vld [vmem:[%s4053_s0 + $0x4] ss:$24 sps:$4 sm:$0xff]   ;;  %v2728_v52 = vld [vmem:[%s4052_s1 + $0x240] ss:$24 sps:$4 sm:$0xff]   ;;  %v2730_v54 = vld [vmem:[%s4052_s1 + $0x274] ss:$24 sps:$4 sm:$0xff]  }
  0x12   :  { %v3267_v49 = vld [vmem:[%s4053_s0 + $0xc] ss:$24 sps:$4 sm:$0xff]   ;;  %1838 = vmatprep.mubr.bf16.mxu1 %v3262_v48  ;;  %v2729_v53 = vld [vmem:[%s4052_s1 + $0x540] ss:$24 sps:$4 sm:$0xff]   ;;  %v2734_v56 = vld [vmem:[%s4052_s1 + $0x270] ss:$24 sps:$4 sm:$0xff]  }
  0x13   :  { %1815 = vmatpush1.bf16.msra.mxu1 %v2680_v18  ;;  %v2724_v50 = vld [vmem:[%s4052_s1 + $0x244] ss:$24 sps:$4 sm:$0xff]   ;;  %1881 = vmatprep.mubr.bf16.mxu0 %v3267_v49  ;;  %v2732_v55 = vld [vmem:[%s4052_s1 + $0x574] ss:$24 sps:$4 sm:$0xff]   ;;  %v2735_v57 = vld [vmem:[%s4052_s1 + $0x570] ss:$24 sps:$4 sm:$0xff]  }
  0x14   :  { %1858 = vmatpush1.bf16.msra.mxu0 %v2681_v19  ;;  %1816 = vmatprep.subr.bf16.mxu1 %v2682_v20  ;;  %v2726_v51 = vld [vmem:[%s4052_s1 + $0x544] ss:$24 sps:$4 sm:$0xff]   ;;  %v2740_v60 = vld [vmem:[%s4052_s1 + $0x2a0] ss:$24 sps:$4 sm:$0xff]   ;;  %v2742_v62 = vld [vmem:[%s4052_s1 + $0x2d4] ss:$24 sps:$4 sm:$0xff]  }
  0x15   :  { %1859 = vmatprep.subr.bf16.mxu0 %v2684_v21  ;;  %v2736_v58 = vld [vmem:[%s4052_s1 + $0x2a4] ss:$24 sps:$4 sm:$0xff]   ;;  %v2741_v61 = vld [vmem:[%s4052_s1 + $0x5a0] ss:$24 sps:$4 sm:$0xff]   ;;  %v2744_v63 = vld [vmem:[%s4052_s1 + $0x5d4] ss:$24 sps:$4 sm:$0xff]  }
  0x16   :  { %v2738_v59 = vld [vmem:[%s4052_s1 + $0x5a4] ss:$24 sps:$4 sm:$0xff]   ;;  %v2746_v0 = vld [vmem:[%s4052_s1 + $0x2d0] ss:$24 sps:$4 sm:$0xff]   ;;  %v2752_v4 = vld [vmem:[%s4052_s1 + $0x600] ss:$24 sps:$4 sm:$0xff]  }
  0x17   :  { %1817 = vmatpush1.bf16.msra.mxu1 %v2686_v22  ;;  %v2747_v1 = vld [vmem:[%s4052_s1 + $0x5d0] ss:$24 sps:$4 sm:$0xff]   ;;  %v2754_v2 = vld [vmem:[%s4052_s1 + $0x604] ss:$24 sps:$4 sm:$0xff]   ;;  %v3334_v6 = vld [vmem:[%s4053_s0] ss:$24 sps:$4 sm:$0xff]  }
  0x18   :  { %1860 = vmatpush1.bf16.msra.mxu0 %v2687_v23  ;;  %1818 = vmatprep.subr.bf16.mxu1 %v2688_v24  ;;  %v2757_v3 = vld [vmem:[%s4052_s1 + $0xc] ss:$24 sps:$4 sm:$0xff]   ;;  %v2755_v5 = vld [vmem:[%s4052_s1 + $0x8] ss:$24 sps:$4 sm:$0xff]   ;;  %v2765_v9 = vld [vmem:[%s4052_s1 + $0x3c] ss:$24 sps:$4 sm:$0xff]  }
  0x19   :  { %1861 = vmatprep.subr.bf16.mxu0 %v2690_v25  ;;  %v3339_v7 = vld [vmem:[%s4053_s0 + $0x8] ss:$24 sps:$4 sm:$0xff]   ;;  %v2762_v8 = vld [vmem:[%s4052_s1 + $0x634] ss:$24 sps:$4 sm:$0xff]   ;;  %v2763_v11 = vld [vmem:[%s4052_s1 + $0x38] ss:$24 sps:$4 sm:$0xff]  }
  0x1a   :  { %v2760_v10 = vld [vmem:[%s4052_s1 + $0x630] ss:$24 sps:$4 sm:$0xff]   ;;  %v2768_v12 = vld [vmem:[%s4052_s1 + $0x664] ss:$24 sps:$4 sm:$0xff]   ;;  %v2766_v14 = vld [vmem:[%s4052_s1 + $0x660] ss:$24 sps:$4 sm:$0xff]  }
  0x1b   :  { %1819 = vmatpush1.bf16.msra.mxu1 %v2692_v26  ;;  %v2771_v13 = vld [vmem:[%s4052_s1 + $0x6c] ss:$24 sps:$4 sm:$0xff]   ;;  %v2769_v15 = vld [vmem:[%s4052_s1 + $0x68] ss:$24 sps:$4 sm:$0xff]   ;;  %v2777_v17 = vld [vmem:[%s4052_s1 + $0x9c] ss:$24 sps:$4 sm:$0xff]  }
  0x1c   :  { %1862 = vmatpush1.bf16.msra.mxu0 %v2693_v27  ;;  %1820 = vmatprep.subr.bf16.mxu1 %v2694_v28  ;;  %v2774_v16 = vld [vmem:[%s4052_s1 + $0x694] ss:$24 sps:$4 sm:$0xff]   ;;  %v2772_v18 = vld [vmem:[%s4052_s1 + $0x690] ss:$24 sps:$4 sm:$0xff]   ;;  %v2780_v20 = vld [vmem:[%s4052_s1 + $0x6c4] ss:$24 sps:$4 sm:$0xff]  }
  0x1d   :  { %1863 = vmatprep.subr.bf16.mxu0 %v2696_v29  ;;  %v2775_v19 = vld [vmem:[%s4052_s1 + $0x98] ss:$24 sps:$4 sm:$0xff]   ;;  %v2783_v21 = vld [vmem:[%s4052_s1 + $0xcc] ss:$24 sps:$4 sm:$0xff]   ;;  %v2781_v23 = vld [vmem:[%s4052_s1 + $0xc8] ss:$24 sps:$4 sm:$0xff]  }
  0x1e   :  { %v2778_v22 = vld [vmem:[%s4052_s1 + $0x6c0] ss:$24 sps:$4 sm:$0xff]   ;;  %v2786_v24 = vld [vmem:[%s4052_s1 + $0x6f4] ss:$24 sps:$4 sm:$0xff]   ;;  %v2784_v26 = vld [vmem:[%s4052_s1 + $0x6f0] ss:$24 sps:$4 sm:$0xff]  }
  0x1f   :  { %1821 = vmatpush1.bf16.msra.mxu1 %v2698_v30  ;;  %v2789_v25 = vld [vmem:[%s4052_s1 + $0xfc] ss:$24 sps:$4 sm:$0xff]   ;;  %v2787_v27 = vld [vmem:[%s4052_s1 + $0xf8] ss:$24 sps:$4 sm:$0xff]   ;;  %v2795_v29 = vld [vmem:[%s4052_s1 + $0x12c] ss:$24 sps:$4 sm:$0xff]  }
  0x20   :  { %1864 = vmatpush1.bf16.msra.mxu0 %v2699_v31  ;;  %1822 = vmatprep.subr.bf16.mxu1 %v2700_v32  ;;  %v2792_v28 = vld [vmem:[%s4052_s1 + $0x724] ss:$24 sps:$4 sm:$0xff]   ;;  %v2790_v30 = vld [vmem:[%s4052_s1 + $0x720] ss:$24 sps:$4 sm:$0xff]   ;;  %v2798_v32 = vld [vmem:[%s4052_s1 + $0x754] ss:$24 sps:$4 sm:$0xff]  }
  0x21   :  { %1865 = vmatprep.subr.bf16.mxu0 %v2702_v33  ;;  %v2793_v31 = vld [vmem:[%s4052_s1 + $0x128] ss:$24 sps:$4 sm:$0xff]   ;;  %v2801_v33 = vld [vmem:[%s4052_s1 + $0x15c] ss:$24 sps:$4 sm:$0xff]  }
  0x23   :  { %1823 = vmatpush1.bf16.msra.mxu1 %v2704_v34  ;;  %v3425_v34 = vld [vmem:[%s4053_s0 + $0x14] ss:$24 sps:$4 sm:$0xff]  }
  0x24   :  { %1866 = vmatpush1.bf16.msra.mxu0 %v2705_v35  ;;  %1824 = vmatprep.subr.bf16.mxu1 %v2706_v36  ;;  %v2796_v35 = vld [vmem:[%s4052_s1 + $0x750] ss:$24 sps:$4 sm:$0xff]  }
  0x25   :  { %1867 = vmatprep.subr.bf16.mxu0 %v2708_v37  ;;  %v2799_v36 = vld [vmem:[%s4052_s1 + $0x158] ss:$24 sps:$4 sm:$0xff]   ;;  %v2804_v37 = vld [vmem:[%s4052_s1 + $0x784] ss:$24 sps:$4 sm:$0xff]  }
  0x27   :  { %1825 = vmatpush1.bf16.msra.mxu1 %v2710_v38  ;;  %v2807_v38 = vld [vmem:[%s4052_s1 + $0x18c] ss:$24 sps:$4 sm:$0xff]  }
  0x28   :  { %1868 = vmatpush1.bf16.msra.mxu0 %v2711_v39  ;;  %1826 = vmatprep.subr.bf16.mxu1 %v2712_v40  ;;  %v2802_v39 = vld [vmem:[%s4052_s1 + $0x780] ss:$24 sps:$4 sm:$0xff]  }
  0x29   :  { %1869 = vmatprep.subr.bf16.mxu0 %v2714_v41  ;;  %v2805_v40 = vld [vmem:[%s4052_s1 + $0x188] ss:$24 sps:$4 sm:$0xff]   ;;  %v2810_v41 = vld [vmem:[%s4052_s1 + $0x7b4] ss:$24 sps:$4 sm:$0xff]  }
  0x2b   :  { %1827 = vmatpush1.bf16.msra.mxu1 %v2716_v42  ;;  %v2813_v42 = vld [vmem:[%s4052_s1 + $0x1bc] ss:$24 sps:$4 sm:$0xff]  }
  0x2c   :  { %1870 = vmatpush1.bf16.msra.mxu0 %v2717_v43  ;;  %1828 = vmatprep.subr.bf16.mxu1 %v2718_v44  ;;  %v2808_v43 = vld [vmem:[%s4052_s1 + $0x7b0] ss:$24 sps:$4 sm:$0xff]  }
  0x2d   :  { %1871 = vmatprep.subr.bf16.mxu0 %v2720_v45  ;;  %v2811_v44 = vld [vmem:[%s4052_s1 + $0x1b8] ss:$24 sps:$4 sm:$0xff]   ;;  %v2816_v45 = vld [vmem:[%s4052_s1 + $0x7e4] ss:$24 sps:$4 sm:$0xff]  }
  0x2f   :  { %1829 = vmatpush1.bf16.msra.mxu1 %v2722_v46  ;;  %v2819_v46 = vld [vmem:[%s4052_s1 + $0x1ec] ss:$24 sps:$4 sm:$0xff]  }
  0x30   :  { %1872 = vmatpush1.bf16.msra.mxu0 %v2723_v47  ;;  %1830 = vmatprep.subr.bf16.mxu1 %v2724_v50  ;;  %v2814_v47 = vld [vmem:[%s4052_s1 + $0x7e0] ss:$24 sps:$4 sm:$0xff]  }
  0x31   :  { %1873 = vmatprep.subr.bf16.mxu0 %v2726_v51  ;;  %v2817_v50 = vld [vmem:[%s4052_s1 + $0x1e8] ss:$24 sps:$4 sm:$0xff]   ;;  %v2822_v51 = vld [vmem:[%s4052_s1 + $0x814] ss:$24 sps:$4 sm:$0xff]  }
  0x33   :  { %1831 = vmatpush1.bf16.msra.mxu1 %v2728_v52  ;;  %v2825_v52 = vld [vmem:[%s4052_s1 + $0x21c] ss:$24 sps:$4 sm:$0xff]  }
  0x34   :  { %1874 = vmatpush1.bf16.msra.mxu0 %v2729_v53  ;;  %1832 = vmatprep.subr.bf16.mxu1 %v2730_v54  ;;  %v2820_v53 = vld [vmem:[%s4052_s1 + $0x810] ss:$24 sps:$4 sm:$0xff]  }
  0x35   :  { %1875 = vmatprep.subr.bf16.mxu0 %v2732_v55  ;;  %v2823_v54 = vld [vmem:[%s4052_s1 + $0x218] ss:$24 sps:$4 sm:$0xff]   ;;  %v2828_v55 = vld [vmem:[%s4052_s1 + $0x844] ss:$24 sps:$4 sm:$0xff]  }
  0x37   :  { %1833 = vmatpush1.bf16.msra.mxu1 %v2734_v56  ;;  %v2831_v56 = vld [vmem:[%s4052_s1 + $0x24c] ss:$24 sps:$4 sm:$0xff]  }
  0x38   :  { %1876 = vmatpush1.bf16.msra.mxu0 %v2735_v57  ;;  %1834 = vmatprep.subr.bf16.mxu1 %v2736_v58  ;;  %v2826_v57 = vld [vmem:[%s4052_s1 + $0x840] ss:$24 sps:$4 sm:$0xff]  }
  0x39   :  { %1877 = vmatprep.subr.bf16.mxu0 %v2738_v59  ;;  %v2829_v58 = vld [vmem:[%s4052_s1 + $0x248] ss:$24 sps:$4 sm:$0xff]   ;;  %v2834_v59 = vld [vmem:[%s4052_s1 + $0x874] ss:$24 sps:$4 sm:$0xff]  }
  0x3b   :  { %1835 = vmatpush1.bf16.msra.mxu1 %v2740_v60  ;;  %v2837_v60 = vld [vmem:[%s4052_s1 + $0x27c] ss:$24 sps:$4 sm:$0xff]  }
  0x3c   :  { %1878 = vmatpush1.bf16.msra.mxu0 %v2741_v61  ;;  %1836 = vmatprep.subr.bf16.mxu1 %v2742_v62  ;;  %v2832_v61 = vld [vmem:[%s4052_s1 + $0x870] ss:$24 sps:$4 sm:$0xff]  }
  0x3d   :  { %1879 = vmatprep.subr.bf16.mxu0 %v2744_v63  ;;  %v2835_v62 = vld [vmem:[%s4052_s1 + $0x278] ss:$24 sps:$4 sm:$0xff]   ;;  %v2840_v63 = vld [vmem:[%s4052_s1 + $0x8a4] ss:$24 sps:$4 sm:$0xff]  }
  0x3f   :  { %1837 = vmatpush1.bf16.msra.mxu1 %v2746_v0  ;;  %v2843_v0 = vld [vmem:[%s4052_s1 + $0x2ac] ss:$24 sps:$4 sm:$0xff]  }
  0x40   :  { %1880 = vmatpush1.bf16.msra.mxu0 %v2747_v1  ;;  %1935 = vmatprep.subr.bf16.mxu1 %v2757_v3  ;;  %v2838_v1 = vld [vmem:[%s4052_s1 + $0x8a0] ss:$24 sps:$4 sm:$0xff]   ;;  %v2846_v3 = vld [vmem:[%s4052_s1 + $0x8d4] ss:$24 sps:$4 sm:$0xff]  }
  0x41   :  { %1892 = vmatprep.subr.bf16.mxu0 %v2754_v2  ;;  %v2841_v2 = vld [vmem:[%s4052_s1 + $0x2a8] ss:$24 sps:$4 sm:$0xff]  }
  0x42   :  { %1839 = vmatmul.mubr.bf16.vlgmr.msra.gmra.mrb[0].mxu1 %v3334_v6 }
  0x43   :  { %1882 = vmatmul.mubr.bf16.vlgmr.msra.gmra.mrb[0].mxu0 %v3339_v7  ;;  %1936 = vmatpush1.bf16.msra.mxu1 %v2755_v5  ;;  %v2844_v5 = vld [vmem:[%s4052_s1 + $0x8d0] ss:$24 sps:$4 sm:$0xff]  }
  0x44   :  { %1893 = vmatpush1.bf16.msra.mxu0 %v2752_v4  ;;  %1937 = vmatprep.subr.bf16.mxu1 %v2765_v9  ;;  %v2849_v4 = vld [vmem:[%s4052_s1 + $0x2dc] ss:$24 sps:$4 sm:$0xff]   ;;  %v2855_v9 = vld [vmem:[%s4052_s1 + $0x30c] ss:$24 sps:$4 sm:$0xff]  }
  0x45   :  { %1894 = vmatprep.subr.bf16.mxu0 %v2762_v8  ;;  %1967 = vmatprep.mubr.bf16.mxu1 %v3262_v48  ;;  %v2847_v8 = vld [vmem:[%s4052_s1 + $0x2d8] ss:$24 sps:$4 sm:$0xff]  }
  0x46   :  { %1924 = vmatprep.mubr.bf16.mxu0 %v3425_v34 }
  0x47   :  { %1938 = vmatpush1.bf16.msra.mxu1 %v2763_v11  ;;  %v3539_v11 = vld [vmem:[%s4053_s0 + $0x10] ss:$24 sps:$4 sm:$0xff]  }
  0x48   :  { %1895 = vmatpush1.bf16.msra.mxu0 %v2760_v10  ;;  %1939 = vmatprep.subr.bf16.mxu1 %v2771_v13  ;;  %v2858_v10 = vld [vmem:[%s4052_s1 + $0x14] ss:$24 sps:$4 sm:$0xff]   ;;  %v2856_v13 = vld [vmem:[%s4052_s1 + $0x10] ss:$24 sps:$4 sm:$0xff]  }
  0x49   :  { %1896 = vmatprep.subr.bf16.mxu0 %v2768_v12  ;;  %v2853_v12 = vld [vmem:[%s4052_s1 + $0x308] ss:$24 sps:$4 sm:$0xff]  }
  0x4b   :  { %1940 = vmatpush1.bf16.msra.mxu1 %v2769_v15  ;;  %v2864_v15 = vld [vmem:[%s4052_s1 + $0x44] ss:$24 sps:$4 sm:$0xff]  }
  0x4c   :  { %1897 = vmatpush1.bf16.msra.mxu0 %v2766_v14  ;;  %1941 = vmatprep.subr.bf16.mxu1 %v2777_v17  ;;  %v2861_v14 = vld [vmem:[%s4052_s1 + $0x33c] ss:$24 sps:$4 sm:$0xff]   ;;  %v2862_v17 = vld [vmem:[%s4052_s1 + $0x40] ss:$24 sps:$4 sm:$0xff]  }
  0x4d   :  { %1898 = vmatprep.subr.bf16.mxu0 %v2774_v16  ;;  %v2859_v16 = vld [vmem:[%s4052_s1 + $0x338] ss:$24 sps:$4 sm:$0xff]  }
  0x4f   :  { %1942 = vmatpush1.bf16.msra.mxu1 %v2775_v19  ;;  %v2870_v19 = vld [vmem:[%s4052_s1 + $0x74] ss:$24 sps:$4 sm:$0xff]  }
  0x50   :  { %1899 = vmatpush1.bf16.msra.mxu0 %v2772_v18  ;;  %1943 = vmatprep.subr.bf16.mxu1 %v2783_v21  ;;  %v2867_v18 = vld [vmem:[%s4052_s1 + $0x36c] ss:$24 sps:$4 sm:$0xff]   ;;  %v2868_v21 = vld [vmem:[%s4052_s1 + $0x70] ss:$24 sps:$4 sm:$0xff]  }
  0x51   :  { %1900 = vmatprep.subr.bf16.mxu0 %v2780_v20  ;;  %v2865_v20 = vld [vmem:[%s4052_s1 + $0x368] ss:$24 sps:$4 sm:$0xff]  }
  0x53   :  { %1944 = vmatpush1.bf16.msra.mxu1 %v2781_v23  ;;  %v2874_v23 = vld [vmem:[%s4052_s1 + $0xa0] ss:$24 sps:$4 sm:$0xff]  }
  0x54   :  { %1901 = vmatpush1.bf16.msra.mxu0 %v2778_v22  ;;  %1945 = vmatprep.subr.bf16.mxu1 %v2789_v25  ;;  %v2873_v22 = vld [vmem:[%s4052_s1 + $0x39c] ss:$24 sps:$4 sm:$0xff]  }
  0x55   :  { %1902 = vmatprep.subr.bf16.mxu0 %v2786_v24  ;;  %v2879_v24 = vld [vmem:[%s4052_s1 + $0x3cc] ss:$24 sps:$4 sm:$0xff]  }
  0x56   :  { %v2882_v25 = vld [vmem:[%s4052_s1 + $0xd4] ss:$24 sps:$4 sm:$0xff]  }
  0x57   :  { %1946 = vmatpush1.bf16.msra.mxu1 %v2787_v27  ;;  %v2880_v27 = vld [vmem:[%s4052_s1 + $0xd0] ss:$24 sps:$4 sm:$0xff]  }
  0x58   :  { %1903 = vmatpush1.bf16.msra.mxu0 %v2784_v26  ;;  %1947 = vmatprep.subr.bf16.mxu1 %v2795_v29  ;;  %v2877_v26 = vld [vmem:[%s4052_s1 + $0x3c8] ss:$24 sps:$4 sm:$0xff]   ;;  %v2888_v29 = vld [vmem:[%s4052_s1 + $0x104] ss:$24 sps:$4 sm:$0xff]  }
  0x59   :  { %1904 = vmatprep.subr.bf16.mxu0 %v2792_v28  ;;  %v2885_v28 = vld [vmem:[%s4052_s1 + $0x3fc] ss:$24 sps:$4 sm:$0xff]  }
  0x5b   :  { %1948 = vmatpush1.bf16.msra.mxu1 %v2793_v31  ;;  %v2886_v31 = vld [vmem:[%s4052_s1 + $0x100] ss:$24 sps:$4 sm:$0xff]  }
  0x5c   :  { %1905 = vmatpush1.bf16.msra.mxu0 %v2790_v30  ;;  %1949 = vmatprep.subr.bf16.mxu1 %v2801_v33  ;;  %v2883_v30 = vld [vmem:[%s4052_s1 + $0x3f8] ss:$24 sps:$4 sm:$0xff]   ;;  %v2894_v33 = vld [vmem:[%s4052_s1 + $0x134] ss:$24 sps:$4 sm:$0xff]  }
  0x5d   :  { %1906 = vmatprep.subr.bf16.mxu0 %v2798_v32  ;;  %v2891_v32 = vld [vmem:[%s4052_s1 + $0x42c] ss:$24 sps:$4 sm:$0xff]  }
  0x5f   :  { %1950 = vmatpush1.bf16.msra.mxu1 %v2799_v36  ;;  %v2892_v36 = vld [vmem:[%s4052_s1 + $0x130] ss:$24 sps:$4 sm:$0xff]  }
  0x60   :  { %1907 = vmatpush1.bf16.msra.mxu0 %v2796_v35  ;;  %1951 = vmatprep.subr.bf16.mxu1 %v2807_v38  ;;  %v2889_v35 = vld [vmem:[%s4052_s1 + $0x428] ss:$24 sps:$4 sm:$0xff]   ;;  %v2900_v38 = vld [vmem:[%s4052_s1 + $0x164] ss:$24 sps:$4 sm:$0xff]  }
  0x61   :  { %1908 = vmatprep.subr.bf16.mxu0 %v2804_v37  ;;  %v2897_v37 = vld [vmem:[%s4052_s1 + $0x45c] ss:$24 sps:$4 sm:$0xff]  }
  0x63   :  { %1952 = vmatpush1.bf16.msra.mxu1 %v2805_v40  ;;  %v2898_v40 = vld [vmem:[%s4052_s1 + $0x160] ss:$24 sps:$4 sm:$0xff]  }
  0x64   :  { %1909 = vmatpush1.bf16.msra.mxu0 %v2802_v39  ;;  %1953 = vmatprep.subr.bf16.mxu1 %v2813_v42  ;;  %v2895_v39 = vld [vmem:[%s4052_s1 + $0x458] ss:$24 sps:$4 sm:$0xff]   ;;  %v2906_v42 = vld [vmem:[%s4052_s1 + $0x194] ss:$24 sps:$4 sm:$0xff]  }
  0x65   :  { %1910 = vmatprep.subr.bf16.mxu0 %v2810_v41  ;;  %v2903_v41 = vld [vmem:[%s4052_s1 + $0x48c] ss:$24 sps:$4 sm:$0xff]  }
  0x67   :  { %1954 = vmatpush1.bf16.msra.mxu1 %v2811_v44  ;;  %v2904_v44 = vld [vmem:[%s4052_s1 + $0x190] ss:$24 sps:$4 sm:$0xff]  }
  0x68   :  { %1911 = vmatpush1.bf16.msra.mxu0 %v2808_v43  ;;  %1955 = vmatprep.subr.bf16.mxu1 %v2819_v46  ;;  %v2901_v43 = vld [vmem:[%s4052_s1 + $0x488] ss:$24 sps:$4 sm:$0xff]   ;;  %v2912_v46 = vld [vmem:[%s4052_s1 + $0x1c4] ss:$24 sps:$4 sm:$0xff]  }
  0x69   :  { %1912 = vmatprep.subr.bf16.mxu0 %v2816_v45  ;;  %v2909_v45 = vld [vmem:[%s4052_s1 + $0x4bc] ss:$24 sps:$4 sm:$0xff]  }
  0x6b   :  { %1956 = vmatpush1.bf16.msra.mxu1 %v2817_v50  ;;  %v2910_v50 = vld [vmem:[%s4052_s1 + $0x1c0] ss:$24 sps:$4 sm:$0xff]  }
  0x6c   :  { %1913 = vmatpush1.bf16.msra.mxu0 %v2814_v47  ;;  %1957 = vmatprep.subr.bf16.mxu1 %v2825_v52  ;;  %v2907_v47 = vld [vmem:[%s4052_s1 + $0x4b8] ss:$24 sps:$4 sm:$0xff]   ;;  %v2918_v52 = vld [vmem:[%s4052_s1 + $0x1f4] ss:$24 sps:$4 sm:$0xff]  }
  0x6d   :  { %1914 = vmatprep.subr.bf16.mxu0 %v2822_v51  ;;  %v2915_v51 = vld [vmem:[%s4052_s1 + $0x4ec] ss:$24 sps:$4 sm:$0xff]  }
  0x6f   :  { %1958 = vmatpush1.bf16.msra.mxu1 %v2823_v54  ;;  %v2916_v54 = vld [vmem:[%s4052_s1 + $0x1f0] ss:$24 sps:$4 sm:$0xff]  }
  0x70   :  { %1915 = vmatpush1.bf16.msra.mxu0 %v2820_v53  ;;  %1959 = vmatprep.subr.bf16.mxu1 %v2831_v56  ;;  %v2913_v53 = vld [vmem:[%s4052_s1 + $0x4e8] ss:$24 sps:$4 sm:$0xff]   ;;  %v2924_v56 = vld [vmem:[%s4052_s1 + $0x224] ss:$24 sps:$4 sm:$0xff]  }
  0x71   :  { %1916 = vmatprep.subr.bf16.mxu0 %v2828_v55  ;;  %v2921_v55 = vld [vmem:[%s4052_s1 + $0x51c] ss:$24 sps:$4 sm:$0xff]  }
  0x73   :  { %1960 = vmatpush1.bf16.msra.mxu1 %v2829_v58  ;;  %v2922_v58 = vld [vmem:[%s4052_s1 + $0x220] ss:$24 sps:$4 sm:$0xff]  }
  0x74   :  { %1917 = vmatpush1.bf16.msra.mxu0 %v2826_v57  ;;  %1961 = vmatprep.subr.bf16.mxu1 %v2837_v60  ;;  %v2919_v57 = vld [vmem:[%s4052_s1 + $0x518] ss:$24 sps:$4 sm:$0xff]   ;;  %v2930_v60 = vld [vmem:[%s4052_s1 + $0x254] ss:$24 sps:$4 sm:$0xff]  }
  0x75   :  { %1918 = vmatprep.subr.bf16.mxu0 %v2834_v59  ;;  %v2927_v59 = vld [vmem:[%s4052_s1 + $0x54c] ss:$24 sps:$4 sm:$0xff]  }
  0x77   :  { %1962 = vmatpush1.bf16.msra.mxu1 %v2835_v62  ;;  %v2928_v62 = vld [vmem:[%s4052_s1 + $0x250] ss:$24 sps:$4 sm:$0xff]  }
  0x78   :  { %1919 = vmatpush1.bf16.msra.mxu0 %v2832_v61  ;;  %1963 = vmatprep.subr.bf16.mxu1 %v2843_v0  ;;  %v2925_v61 = vld [vmem:[%s4052_s1 + $0x548] ss:$24 sps:$4 sm:$0xff]   ;;  %v2936_v0 = vld [vmem:[%s4052_s1 + $0x284] ss:$24 sps:$4 sm:$0xff]  }
  0x79   :  { %1920 = vmatprep.subr.bf16.mxu0 %v2840_v63  ;;  %v2933_v63 = vld [vmem:[%s4052_s1 + $0x57c] ss:$24 sps:$4 sm:$0xff]  }
  0x7b   :  { %1964 = vmatpush1.bf16.msra.mxu1 %v2841_v2  ;;  %v2934_v2 = vld [vmem:[%s4052_s1 + $0x280] ss:$24 sps:$4 sm:$0xff]  }
  0x7c   :  { %1921 = vmatpush1.bf16.msra.mxu0 %v2838_v1  ;;  %1965 = vmatprep.subr.bf16.mxu1 %v2849_v4  ;;  %v2931_v1 = vld [vmem:[%s4052_s1 + $0x578] ss:$24 sps:$4 sm:$0xff]   ;;  %v2942_v4 = vld [vmem:[%s4052_s1 + $0x2b4] ss:$24 sps:$4 sm:$0xff]  }
  0x7d   :  { %1922 = vmatprep.subr.bf16.mxu0 %v2846_v3  ;;  %v2939_v3 = vld [vmem:[%s4052_s1 + $0x5ac] ss:$24 sps:$4 sm:$0xff]  }
  0x7f   :  { %1966 = vmatpush1.bf16.msra.mxu1 %v2847_v8  ;;  %v2940_v8 = vld [vmem:[%s4052_s1 + $0x2b0] ss:$24 sps:$4 sm:$0xff]  }
  0x80   :  { %1923 = vmatpush1.bf16.msra.mxu0 %v2844_v5  ;;  %1978 = vmatprep.subr.bf16.mxu1 %v2855_v9  ;;  %v2937_v5 = vld [vmem:[%s4052_s1 + $0x5a8] ss:$24 sps:$4 sm:$0xff]   ;;  %v2945_v9 = vld [vmem:[%s4052_s1 + $0x5dc] ss:$24 sps:$4 sm:$0xff]  }
  0x81   :  { %2064 = vmatprep.subr.bf16.mxu0 %v2858_v10  ;;  %v2948_v10 = vld [vmem:[%s4052_s1 + $0x2e4] ss:$24 sps:$4 sm:$0xff]  }
  0x82   :  { %1968 = vmatmul.mubr.bf16.vlgmr.msra.gmra.mrb[4].mxu1 %v3334_v6 }
  0x83   :  { %1925 = vmatmul.mubr.bf16.vlgmr.msra.gmra.mrb[0].mxu0 %v3539_v11  ;;  %1979 = vmatpush1.bf16.msra.mxu1 %v2853_v12  ;;  %v2943_v12 = vld [vmem:[%s4052_s1 + $0x5d8] ss:$24 sps:$4 sm:$0xff]  }
  0x84   :  { %2065 = vmatpush1.bf16.msra.mxu0 %v2856_v13  ;;  %1980 = vmatprep.subr.bf16.mxu1 %v2861_v14  ;;  %v2946_v13 = vld [vmem:[%s4052_s1 + $0x2e0] ss:$24 sps:$4 sm:$0xff]   ;;  %v2951_v14 = vld [vmem:[%s4052_s1 + $0x60c] ss:$24 sps:$4 sm:$0xff]  }
  0x85   :  { %2066 = vmatprep.subr.bf16.mxu0 %v2864_v15  ;;  %2010 = vmatprep.mubr.bf16.mxu1 %v3267_v49  ;;  %v2871_v49 = vld [vmem:[%s4052_s1 + $0x398] ss:$24 sps:$4 sm:$0xff]   ;;  %v2954_v15 = vld [vmem:[%s4052_s1 + $0x314] ss:$24 sps:$4 sm:$0xff]  }
  0x86   :  { %2096 = vmatprep.mubr.bf16.mxu0 %v3262_v48  ;;  %v2876_v48 = vld [vmem:[%s4052_s1 + $0xa4] ss:$24 sps:$4 sm:$0xff]  }
  0x87   :  { %1981 = vmatpush1.bf16.msra.mxu1 %v2859_v16  ;;  %v2949_v16 = vld [vmem:[%s4052_s1 + $0x608] ss:$24 sps:$4 sm:$0xff]  }
  0x88   :  { %2067 = vmatpush1.bf16.msra.mxu0 %v2862_v17  ;;  %1982 = vmatprep.subr.bf16.mxu1 %v2867_v18  ;;  %v2952_v17 = vld [vmem:[%s4052_s1 + $0x310] ss:$24 sps:$4 sm:$0xff]   ;;  %v2957_v18 = vld [vmem:[%s4052_s1 + $0x63c] ss:$24 sps:$4 sm:$0xff]  }
  0x89   :  { %2068 = vmatprep.subr.bf16.mxu0 %v2870_v19  ;;  %v2960_v19 = vld [vmem:[%s4052_s1 + $0x344] ss:$24 sps:$4 sm:$0xff]  }
  0x8b   :  { %1983 = vmatpush1.bf16.msra.mxu1 %v2865_v20  ;;  %v2955_v20 = vld [vmem:[%s4052_s1 + $0x638] ss:$24 sps:$4 sm:$0xff]  }
  0x8c   :  { %2069 = vmatpush1.bf16.msra.mxu0 %v2868_v21  ;;  %1984 = vmatprep.subr.bf16.mxu1 %v2873_v22  ;;  %v2958_v21 = vld [vmem:[%s4052_s1 + $0x340] ss:$24 sps:$4 sm:$0xff]   ;;  %v2963_v22 = vld [vmem:[%s4052_s1 + $0x66c] ss:$24 sps:$4 sm:$0xff]  }
  0x8d   :  { %2070 = vmatprep.subr.bf16.mxu0 %v2876_v48  ;;  %v2961_v48 = vld [vmem:[%s4052_s1 + $0x668] ss:$24 sps:$4 sm:$0xff]  }
  0x8f   :  { %1985 = vmatpush1.bf16.msra.mxu1 %v2871_v49  ;;  %v2964_v49 = vld [vmem:[%s4052_s1 + $0x370] ss:$24 sps:$4 sm:$0xff]  }
  0x90   :  { %2071 = vmatpush1.bf16.msra.mxu0 %v2874_v23  ;;  %1986 = vmatprep.subr.bf16.mxu1 %v2879_v24  ;;  %v2969_v23 = vld [vmem:[%s4052_s1 + $0x69c] ss:$24 sps:$4 sm:$0xff]  }
  0x91   :  { %2072 = vmatprep.subr.bf16.mxu0 %v2882_v25  ;;  %v2972_v24 = vld [vmem:[%s4052_s1 + $0x3a4] ss:$24 sps:$4 sm:$0xff]   ;;  %v2967_v25 = vld [vmem:[%s4052_s1 + $0x698] ss:$24 sps:$4 sm:$0xff]  }
  0x93   :  { %1987 = vmatpush1.bf16.msra.mxu1 %v2877_v26  ;;  %v2970_v26 = vld [vmem:[%s4052_s1 + $0x3a0] ss:$24 sps:$4 sm:$0xff]  }
  0x94   :  { %2073 = vmatpush1.bf16.msra.mxu0 %v2880_v27  ;;  %1988 = vmatprep.subr.bf16.mxu1 %v2885_v28  ;;  %v2975_v27 = vld [vmem:[%s4052_s1 + $0x6cc] ss:$24 sps:$4 sm:$0xff]  }
  0x95   :  { %2074 = vmatprep.subr.bf16.mxu0 %v2888_v29  ;;  %v2978_v28 = vld [vmem:[%s4052_s1 + $0x3d4] ss:$24 sps:$4 sm:$0xff]   ;;  %v2973_v29 = vld [vmem:[%s4052_s1 + $0x6c8] ss:$24 sps:$4 sm:$0xff]  }
  0x97   :  { %1989 = vmatpush1.bf16.msra.mxu1 %v2883_v30  ;;  %v2976_v30 = vld [vmem:[%s4052_s1 + $0x3d0] ss:$24 sps:$4 sm:$0xff]  }
  0x98   :  { %2075 = vmatpush1.bf16.msra.mxu0 %v2886_v31  ;;  %1990 = vmatprep.subr.bf16.mxu1 %v2891_v32  ;;  %v2981_v31 = vld [vmem:[%s4052_s1 + $0x6fc] ss:$24 sps:$4 sm:$0xff]  }
  0x99   :  { %2076 = vmatprep.subr.bf16.mxu0 %v2894_v33  ;;  %v2984_v32 = vld [vmem:[%s4052_s1 + $0x404] ss:$24 sps:$4 sm:$0xff]   ;;  %v2979_v33 = vld [vmem:[%s4052_s1 + $0x6f8] ss:$24 sps:$4 sm:$0xff]  }
  0x9b   :  { %1991 = vmatpush1.bf16.msra.mxu1 %v2889_v35  ;;  %v2982_v35 = vld [vmem:[%s4052_s1 + $0x400] ss:$24 sps:$4 sm:$0xff]  }
  0x9c   :  { %2077 = vmatpush1.bf16.msra.mxu0 %v2892_v36  ;;  %1992 = vmatprep.subr.bf16.mxu1 %v2897_v37  ;;  %v2987_v36 = vld [vmem:[%s4052_s1 + $0x72c] ss:$24 sps:$4 sm:$0xff]  }
  0x9d   :  { %2078 = vmatprep.subr.bf16.mxu0 %v2900_v38  ;;  %v2990_v37 = vld [vmem:[%s4052_s1 + $0x434] ss:$24 sps:$4 sm:$0xff]   ;;  %v2985_v38 = vld [vmem:[%s4052_s1 + $0x728] ss:$24 sps:$4 sm:$0xff]  }
  0x9f   :  { %1993 = vmatpush1.bf16.msra.mxu1 %v2895_v39  ;;  %v2988_v39 = vld [vmem:[%s4052_s1 + $0x430] ss:$24 sps:$4 sm:$0xff]  }
  0xa0   :  { %2079 = vmatpush1.bf16.msra.mxu0 %v2898_v40  ;;  %1994 = vmatprep.subr.bf16.mxu1 %v2903_v41  ;;  %v2993_v40 = vld [vmem:[%s4052_s1 + $0x75c] ss:$24 sps:$4 sm:$0xff]  }
  0xa1   :  { %2080 = vmatprep.subr.bf16.mxu0 %v2906_v42  ;;  %v2996_v41 = vld [vmem:[%s4052_s1 + $0x464] ss:$24 sps:$4 sm:$0xff]   ;;  %v2991_v42 = vld [vmem:[%s4052_s1 + $0x758] ss:$24 sps:$4 sm:$0xff]  }
  0xa3   :  { %1995 = vmatpush1.bf16.msra.mxu1 %v2901_v43  ;;  %v2994_v43 = vld [vmem:[%s4052_s1 + $0x460] ss:$24 sps:$4 sm:$0xff]  }
  0xa4   :  { %2081 = vmatpush1.bf16.msra.mxu0 %v2904_v44  ;;  %1996 = vmatprep.subr.bf16.mxu1 %v2909_v45  ;;  %v2999_v44 = vld [vmem:[%s4052_s1 + $0x78c] ss:$24 sps:$4 sm:$0xff]  }
  0xa5   :  { %2082 = vmatprep.subr.bf16.mxu0 %v2912_v46  ;;  %v3002_v45 = vld [vmem:[%s4052_s1 + $0x494] ss:$24 sps:$4 sm:$0xff]   ;;  %v2997_v46 = vld [vmem:[%s4052_s1 + $0x788] ss:$24 sps:$4 sm:$0xff]  }
  0xa7   :  { %1997 = vmatpush1.bf16.msra.mxu1 %v2907_v47  ;;  %v3000_v47 = vld [vmem:[%s4052_s1 + $0x490] ss:$24 sps:$4 sm:$0xff]  }
  0xa8   :  { %2083 = vmatpush1.bf16.msra.mxu0 %v2910_v50  ;;  %1998 = vmatprep.subr.bf16.mxu1 %v2915_v51  ;;  %v3005_v50 = vld [vmem:[%s4052_s1 + $0x7bc] ss:$24 sps:$4 sm:$0xff]  }
  0xa9   :  { %2084 = vmatprep.subr.bf16.mxu0 %v2918_v52  ;;  %v3008_v51 = vld [vmem:[%s4052_s1 + $0x4c4] ss:$24 sps:$4 sm:$0xff]   ;;  %v3003_v52 = vld [vmem:[%s4052_s1 + $0x7b8] ss:$24 sps:$4 sm:$0xff]  }
  0xab   :  { %1999 = vmatpush1.bf16.msra.mxu1 %v2913_v53  ;;  %v3006_v53 = vld [vmem:[%s4052_s1 + $0x4c0] ss:$24 sps:$4 sm:$0xff]  }
  0xac   :  { %2085 = vmatpush1.bf16.msra.mxu0 %v2916_v54  ;;  %2000 = vmatprep.subr.bf16.mxu1 %v2921_v55  ;;  %v3011_v54 = vld [vmem:[%s4052_s1 + $0x7ec] ss:$24 sps:$4 sm:$0xff]  }
  0xad   :  { %2086 = vmatprep.subr.bf16.mxu0 %v2924_v56  ;;  %v3014_v55 = vld [vmem:[%s4052_s1 + $0x4f4] ss:$24 sps:$4 sm:$0xff]   ;;  %v3009_v56 = vld [vmem:[%s4052_s1 + $0x7e8] ss:$24 sps:$4 sm:$0xff]  }
  0xaf   :  { %2001 = vmatpush1.bf16.msra.mxu1 %v2919_v57  ;;  %v3012_v57 = vld [vmem:[%s4052_s1 + $0x4f0] ss:$24 sps:$4 sm:$0xff]  }
  0xb0   :  { %2087 = vmatpush1.bf16.msra.mxu0 %v2922_v58  ;;  %2002 = vmatprep.subr.bf16.mxu1 %v2927_v59  ;;  %v3017_v58 = vld [vmem:[%s4052_s1 + $0x81c] ss:$24 sps:$4 sm:$0xff]  }
  0xb1   :  { %2088 = vmatprep.subr.bf16.mxu0 %v2930_v60  ;;  %v3020_v59 = vld [vmem:[%s4052_s1 + $0x524] ss:$24 sps:$4 sm:$0xff]   ;;  %v3015_v60 = vld [vmem:[%s4052_s1 + $0x818] ss:$24 sps:$4 sm:$0xff]  }
  0xb3   :  { %2003 = vmatpush1.bf16.msra.mxu1 %v2925_v61  ;;  %v3018_v61 = vld [vmem:[%s4052_s1 + $0x520] ss:$24 sps:$4 sm:$0xff]  }
  0xb4   :  { %2089 = vmatpush1.bf16.msra.mxu0 %v2928_v62  ;;  %2004 = vmatprep.subr.bf16.mxu1 %v2933_v63  ;;  %v3023_v62 = vld [vmem:[%s4052_s1 + $0x84c] ss:$24 sps:$4 sm:$0xff]  }
  0xb5   :  { %2090 = vmatprep.subr.bf16.mxu0 %v2936_v0  ;;  %v3026_v63 = vld [vmem:[%s4052_s1 + $0x554] ss:$24 sps:$4 sm:$0xff]   ;;  %v3021_v0 = vld [vmem:[%s4052_s1 + $0x848] ss:$24 sps:$4 sm:$0xff]  }
  0xb7   :  { %2005 = vmatpush1.bf16.msra.mxu1 %v2931_v1  ;;  %v3024_v1 = vld [vmem:[%s4052_s1 + $0x550] ss:$24 sps:$4 sm:$0xff]  }
  0xb8   :  { %2091 = vmatpush1.bf16.msra.mxu0 %v2934_v2  ;;  %2006 = vmatprep.subr.bf16.mxu1 %v2939_v3  ;;  %v3029_v2 = vld [vmem:[%s4052_s1 + $0x87c] ss:$24 sps:$4 sm:$0xff]  }
  0xb9   :  { %2092 = vmatprep.subr.bf16.mxu0 %v2942_v4  ;;  %v3032_v3 = vld [vmem:[%s4052_s1 + $0x584] ss:$24 sps:$4 sm:$0xff]   ;;  %v3027_v4 = vld [vmem:[%s4052_s1 + $0x878] ss:$24 sps:$4 sm:$0xff]  }
  0xbb   :  { %2007 = vmatpush1.bf16.msra.mxu1 %v2937_v5  ;;  %v3030_v5 = vld [vmem:[%s4052_s1 + $0x580] ss:$24 sps:$4 sm:$0xff]  }
  0xbc   :  { %2093 = vmatpush1.bf16.msra.mxu0 %v2940_v8  ;;  %2008 = vmatprep.subr.bf16.mxu1 %v2945_v9  ;;  %v3035_v8 = vld [vmem:[%s4052_s1 + $0x8ac] ss:$24 sps:$4 sm:$0xff]  }
  0xbd   :  { %2094 = vmatprep.subr.bf16.mxu0 %v2948_v10  ;;  %v3038_v9 = vld [vmem:[%s4052_s1 + $0x5b4] ss:$24 sps:$4 sm:$0xff]   ;;  %v3033_v10 = vld [vmem:[%s4052_s1 + $0x8a8] ss:$24 sps:$4 sm:$0xff]  }
  0xbf   :  { %2009 = vmatpush1.bf16.msra.mxu1 %v2943_v12  ;;  %v3036_v12 = vld [vmem:[%s4052_s1 + $0x5b0] ss:$24 sps:$4 sm:$0xff]  }
  0xc0   :  { %2095 = vmatpush1.bf16.msra.mxu0 %v2946_v13  ;;  %2021 = vmatprep.subr.bf16.mxu1 %v2951_v14  ;;  %v3041_v13 = vld [vmem:[%s4052_s1 + $0x8dc] ss:$24 sps:$4 sm:$0xff]  }
  0xc1   :  { %2107 = vmatprep.subr.bf16.mxu0 %v2954_v15  ;;  %v3044_v14 = vld [vmem:[%s4052_s1 + $0x5e4] ss:$24 sps:$4 sm:$0xff]   ;;  %v3039_v15 = vld [vmem:[%s4052_s1 + $0x8d8] ss:$24 sps:$4 sm:$0xff]  }
  0xc2   :  { %2011 = vmatmul.mubr.bf16.vlgmr.msra.gmra.mrb[4].mxu1 %v3339_v7  ;;  %v3093_v7 = vld [vmem:[%s4053_s0 + $0xc] ss:$24 sps:$4 sm:$0xff]  }
  0xc3   :  { %2097 = vmatmul.mubr.bf16.vlgmr.msra.gmra.mrb[4].mxu0 %v3334_v6  ;;  %2022 = vmatpush1.bf16.msra.mxu1 %v2949_v16  ;;  %v2966_v6 = vld [vmem:[%s4052_s1 + $0x374] ss:$24 sps:$4 sm:$0xff]   ;;  %v3042_v16 = vld [vmem:[%s4052_s1 + $0x5e0] ss:$24 sps:$4 sm:$0xff]  }
  0xc4   :  { %2108 = vmatpush1.bf16.msra.mxu0 %v2952_v17  ;;  %2023 = vmatprep.subr.bf16.mxu1 %v2957_v18  ;;  %v3047_v17 = vld [vmem:[%s4052_s1 + $0x614] ss:$24 sps:$4 sm:$0xff]   ;;  %v3045_v18 = vld [vmem:[%s4052_s1 + $0x610] ss:$24 sps:$4 sm:$0xff]  }
  0xc5   :  { %2109 = vmatprep.subr.bf16.mxu0 %v2960_v19  ;;  %2053 = vmatprep.mubr.bf16.mxu1 %v3425_v34  ;;  %v3050_v19 = vld [vmem:[%s4052_s1 + $0x644] ss:$24 sps:$4 sm:$0xff]  }
  0xc6   :  { %2139 = vmatprep.mubr.bf16.mxu0 %v3093_v7  ;;  %v3056_v7 = vld [vmem:[%s4052_s1 + $0x6a4] ss:$24 sps:$4 sm:$0xff]  }
  0xc7   :  { %2024 = vmatpush1.bf16.msra.mxu1 %v2955_v20  ;;  %v3094_v20 = vld [vmem:[%s4053_s0 + $0x8] ss:$24 sps:$4 sm:$0xff]  }
  0xc8   :  { %2110 = vmatpush1.bf16.msra.mxu0 %v2958_v21  ;;  %2025 = vmatprep.subr.bf16.mxu1 %v2963_v22  ;;  %v3048_v21 = vld [vmem:[%s4052_s1 + $0x640] ss:$24 sps:$4 sm:$0xff]   ;;  %v3053_v22 = vld [vmem:[%s4052_s1 + $0x674] ss:$24 sps:$4 sm:$0xff]  }
  0xc9   :  { %2111 = vmatprep.subr.bf16.mxu0 %v2966_v6  ;;  %v3051_v6 = vld [vmem:[%s4052_s1 + $0x670] ss:$24 sps:$4 sm:$0xff]  }
  0xcb   :  { %2026 = vmatpush1.bf16.msra.mxu1 %v2961_v48  ;;  %v3059_v48 = vld [vmem:[%s4052_s1 + $0x6d4] ss:$24 sps:$4 sm:$0xff]  }
  0xcc   :  { %2112 = vmatpush1.bf16.msra.mxu0 %v2964_v49  ;;  %2027 = vmatprep.subr.bf16.mxu1 %v2969_v23  ;;  %v3057_v49 = vld [vmem:[%s4052_s1 + $0x6d0] ss:$24 sps:$4 sm:$0xff]   ;;  %v3062_v23 = vld [vmem:[%s4052_s1 + $0x704] ss:$24 sps:$4 sm:$0xff]  }
  0xcd   :  { %2113 = vmatprep.subr.bf16.mxu0 %v2972_v24  ;;  %v3060_v24 = vld [vmem:[%s4052_s1 + $0x700] ss:$24 sps:$4 sm:$0xff]  }
  0xcf   :  { %2028 = vmatpush1.bf16.msra.mxu1 %v2967_v25  ;;  %v3065_v25 = vld [vmem:[%s4052_s1 + $0x734] ss:$24 sps:$4 sm:$0xff]  }
  0xd0   :  { %2114 = vmatpush1.bf16.msra.mxu0 %v2970_v26  ;;  %2029 = vmatprep.subr.bf16.mxu1 %v2975_v27 }
  0xd1   :  { %2115 = vmatprep.subr.bf16.mxu0 %v2978_v28  ;;  %v3063_v28 = vld [vmem:[%s4052_s1 + $0x730] ss:$24 sps:$4 sm:$0xff]  }
  0xd3   :  { %2030 = vmatpush1.bf16.msra.mxu1 %v2973_v29 }
  0xd4   :  { %2116 = vmatpush1.bf16.msra.mxu0 %v2976_v30  ;;  %2031 = vmatprep.subr.bf16.mxu1 %v2981_v31  ;;  %v3068_v30 = vld [vmem:[%s4052_s1 + $0x764] ss:$24 sps:$4 sm:$0xff]  }
  0xd5   :  { %2117 = vmatprep.subr.bf16.mxu0 %v2984_v32  ;;  %v3066_v32 = vld [vmem:[%s4052_s1 + $0x760] ss:$24 sps:$4 sm:$0xff]  }
  0xd7   :  { %2032 = vmatpush1.bf16.msra.mxu1 %v2979_v33  ;;  %v3071_v33 = vld [vmem:[%s4052_s1 + $0x794] ss:$24 sps:$4 sm:$0xff]  }
  0xd8   :  { %2118 = vmatpush1.bf16.msra.mxu0 %v2982_v35  ;;  %2033 = vmatprep.subr.bf16.mxu1 %v2987_v36  ;;  %v3069_v35 = vld [vmem:[%s4052_s1 + $0x790] ss:$24 sps:$4 sm:$0xff]   ;;  %v3074_v36 = vld [vmem:[%s4052_s1 + $0x7c4] ss:$24 sps:$4 sm:$0xff]  }
  0xd9   :  { %2119 = vmatprep.subr.bf16.mxu0 %v2990_v37  ;;  %v3072_v37 = vld [vmem:[%s4052_s1 + $0x7c0] ss:$24 sps:$4 sm:$0xff]  }
  0xdb   :  { %2034 = vmatpush1.bf16.msra.mxu1 %v2985_v38  ;;  %v3077_v38 = vld [vmem:[%s4052_s1 + $0x7f4] ss:$24 sps:$4 sm:$0xff]  }
  0xdc   :  { %2120 = vmatpush1.bf16.msra.mxu0 %v2988_v39  ;;  %2035 = vmatprep.subr.bf16.mxu1 %v2993_v40  ;;  %v3075_v39 = vld [vmem:[%s4052_s1 + $0x7f0] ss:$24 sps:$4 sm:$0xff]   ;;  %v3080_v40 = vld [vmem:[%s4052_s1 + $0x824] ss:$24 sps:$4 sm:$0xff]  }
  0xdd   :  { %2121 = vmatprep.subr.bf16.mxu0 %v2996_v41  ;;  %v3078_v41 = vld [vmem:[%s4052_s1 + $0x820] ss:$24 sps:$4 sm:$0xff]  }
  0xdf   :  { %2036 = vmatpush1.bf16.msra.mxu1 %v2991_v42  ;;  %v3083_v42 = vld [vmem:[%s4052_s1 + $0x854] ss:$24 sps:$4 sm:$0xff]  }
  0xe0   :  { %2122 = vmatpush1.bf16.msra.mxu0 %v2994_v43  ;;  %2037 = vmatprep.subr.bf16.mxu1 %v2999_v44  ;;  %v3081_v43 = vld [vmem:[%s4052_s1 + $0x850] ss:$24 sps:$4 sm:$0xff]   ;;  %v3086_v44 = vld [vmem:[%s4052_s1 + $0x884] ss:$24 sps:$4 sm:$0xff]  }
  0xe1   :  { %2123 = vmatprep.subr.bf16.mxu0 %v3002_v45  ;;  %v3084_v45 = vld [vmem:[%s4052_s1 + $0x880] ss:$24 sps:$4 sm:$0xff]  }
  0xe3   :  { %2038 = vmatpush1.bf16.msra.mxu1 %v2997_v46  ;;  %v3089_v46 = vld [vmem:[%s4052_s1 + $0x8b4] ss:$24 sps:$4 sm:$0xff]  }
  0xe4   :  { %2124 = vmatpush1.bf16.msra.mxu0 %v3000_v47  ;;  %2039 = vmatprep.subr.bf16.mxu1 %v3005_v50  ;;  %v3087_v47 = vld [vmem:[%s4052_s1 + $0x8b0] ss:$24 sps:$4 sm:$0xff]   ;;  %v3092_v50 = vld [vmem:[%s4052_s1 + $0x8e4] ss:$24 sps:$4 sm:$0xff]  }
  0xe5   :  { %2125 = vmatprep.subr.bf16.mxu0 %v3008_v51  ;;  %v3090_v51 = vld [vmem:[%s4052_s1 + $0x8e0] ss:$24 sps:$4 sm:$0xff]  }
  0xe7   :  { %2040 = vmatpush1.bf16.msra.mxu1 %v3003_v52  ;;  %v2234_v52 = vlaneseq }
  0xe8   :  { %2126 = vmatpush1.bf16.msra.mxu0 %v3006_v53  ;;  %2041 = vmatprep.subr.bf16.mxu1 %v3011_v54 }
  0xe9   :  { %2127 = vmatprep.subr.bf16.mxu0 %v3014_v55  ;;  %v2235_v53 = vshrl.u32 %v2234_v52, 7  ;;  %v2232_v55 = vld [vmem:[%s4054_s2] sm:$0x3f] }
  0xeb   :  { %2042 = vmatpush1.bf16.msra.mxu1 %v3009_v56  ;;  %v2236_v54 = vsub.s32 0, %v2235_v53  ;;  %v2240_v56 = vsub.s32 1, %v2235_v53 }
  0xec   :  { %2128 = vmatpush1.bf16.msra.mxu0 %v3012_v57  ;;  %2043 = vmatprep.subr.bf16.mxu1 %v3017_v58 }
  0xed   :  { %2129 = vmatprep.subr.bf16.mxu0 %v3020_v59  ;;  %v2237_v57 = vrot.slane %v2232_v55, %v2236_v54  ;;  %v2241_v59 = vrot.slane %v2232_v55, %v2240_v56 }
  0xef   :  { %2044 = vmatpush1.bf16.msra.mxu1 %v3015_v60 }
  0xf0   :  { %2130 = vmatpush1.bf16.msra.mxu0 %v3018_v61  ;;  %2045 = vmatprep.subr.bf16.mxu1 %v3023_v62 }
  0xf1   :  { %2131 = vmatprep.subr.bf16.mxu0 %v3026_v63 }
  0xf3   :  { %2046 = vmatpush1.bf16.msra.mxu1 %v3021_v0 }
  0xf4   :  { %2132 = vmatpush1.bf16.msra.mxu0 %v3024_v1  ;;  %2047 = vmatprep.subr.bf16.mxu1 %v3029_v2 }
  0xf5   :  { %2133 = vmatprep.subr.bf16.mxu0 %v3032_v3 }
  0xf7   :  { %2048 = vmatpush1.bf16.msra.mxu1 %v3027_v4 }
  0xf8   :  { %2134 = vmatpush1.bf16.msra.mxu0 %v3030_v5  ;;  %2049 = vmatprep.subr.bf16.mxu1 %v3035_v8 }
  0xf9   :  { %2135 = vmatprep.subr.bf16.mxu0 %v3038_v9 }
  0xfb   :  { %2050 = vmatpush1.bf16.msra.mxu1 %v3033_v10  ;;  %v2244_v10 = vsub.s32 2, %v2235_v53 }
  0xfc   :  { %2136 = vmatpush1.bf16.msra.mxu0 %v3036_v12  ;;  %2051 = vmatprep.subr.bf16.mxu1 %v3041_v13  ;;  %v2248_v12 = vsub.s32 3, %v2235_v53 }
  0xfd   :  { %2137 = vmatprep.subr.bf16.mxu0 %v3044_v14  ;;  %v2245_v13 = vrot.slane %v2232_v55, %v2244_v10 }
  0xfe   :  { %v2249_v14 = vrot.slane %v2232_v55, %v2248_v12 }
  0xff   :  { %2052 = vmatpush1.bf16.msra.mxu1 %v3039_v15 }
 0x100   :  { %2138 = vmatpush1.bf16.msra.mxu0 %v3042_v16 }
 0x101   :  { %2150 = vmatprep.subr.bf16.mxu0 %v3047_v17 }
 0x102   :  { %2054 = vmatmul.mubr.bf16.vlgmr.msra.gmra.mrb[4].mxu1 %v3539_v11 }
 0x103   :  { %2140 = vmatmul.mubr.bf16.vlgmr.msra.gmra.mrb[4].mxu0 %v3094_v20 }
 0x104   :  { %2151 = vmatpush1.bf16.msra.mxu0 %v3045_v18  ;;  %2182 = vmatprep.mubr.bf16.mxu0 %v3425_v34  ;;  %v3054_v34 = vld [vmem:[%s4052_s1 + $0x6a0] ss:$24 sps:$4 sm:$0xff]  }
 0x105   :  { %2152 = vmatprep.subr.bf16.mxu0 %v3050_v19 }
 0x108   :  { %2153 = vmatpush1.bf16.msra.mxu0 %v3048_v21 }
 0x109   :  { %2154 = vmatprep.subr.bf16.mxu0 %v3053_v22 }
 0x10c   :  { %2155 = vmatpush1.bf16.msra.mxu0 %v3051_v6 }
 0x10d   :  { %2156 = vmatprep.subr.bf16.mxu0 %v3056_v7 }
 0x110   :  { %2157 = vmatpush1.bf16.msra.mxu0 %v3054_v34  ;;  %v2252_v34 = vsub.s32 4, %v2235_v53 }
 0x111   :  { %2158 = vmatprep.subr.bf16.mxu0 %v3059_v48  ;;  %v2256_v48 = vsub.s32 5, %v2235_v53 }
 0x114   :  { %2159 = vmatpush1.bf16.msra.mxu0 %v3057_v49  ;;  %v2253_v49 = vrot.slane %v2232_v55, %v2252_v34 }
 0x115   :  { %2160 = vmatprep.subr.bf16.mxu0 %v3062_v23  ;;  %v1840_v26 = vpop.f32.mrb[0].mxu1  ;;  %v2257_v23 = vrot.slane %v2232_v55, %v2256_v48 }
 0x116   :  { %v1842_v27 = vpop.f32.mrb[1].mxu1 }
 0x117   :  { %v1844_v29 = vpop.f32.mrb[2].mxu1 }
 0x118   :  { %2161 = vmatpush1.bf16.msra.mxu0 %v3060_v24  ;;  %v1846_v31 = vpop.f32.mrb[3].mxu1 }
 0x119   :  { %2162 = vmatprep.subr.bf16.mxu0 %v3065_v25 }
 0x11c   :  { %2163 = vmatpush1.bf16.msra.mxu0 %v3063_v28 }
 0x11d   :  { %2164 = vmatprep.subr.bf16.mxu0 %v3068_v30 }
 0x120   :  { %2165 = vmatpush1.bf16.msra.mxu0 %v3066_v32 }
 0x121   :  { %2166 = vmatprep.subr.bf16.mxu0 %v3071_v33 }
 0x124   :  { %2167 = vmatpush1.bf16.msra.mxu0 %v3069_v35 }
 0x125   :  { %2168 = vmatprep.subr.bf16.mxu0 %v3074_v36 }
 0x128   :  { %2169 = vmatpush1.bf16.msra.mxu0 %v3072_v37 }
 0x129   :  { %2170 = vmatprep.subr.bf16.mxu0 %v3077_v38 }
 0x12c   :  { %2171 = vmatpush1.bf16.msra.mxu0 %v3075_v39 }
 0x12d   :  { %2172 = vmatprep.subr.bf16.mxu0 %v3080_v40 }
 0x130   :  { %2173 = vmatpush1.bf16.msra.mxu0 %v3078_v41 }
 0x131   :  { %2174 = vmatprep.subr.bf16.mxu0 %v3083_v42 }
 0x134   :  { %2175 = vmatpush1.bf16.msra.mxu0 %v3081_v43 }
 0x135   :  { %2176 = vmatprep.subr.bf16.mxu0 %v3086_v44 }
 0x138   :  { %2177 = vmatpush1.bf16.msra.mxu0 %v3084_v45 }
 0x139   :  { %2178 = vmatprep.subr.bf16.mxu0 %v3089_v46 }
 0x13c   :  { %2179 = vmatpush1.bf16.msra.mxu0 %v3087_v47 }
 0x13d   :  { %2180 = vmatprep.subr.bf16.mxu0 %v3092_v50 }
 0x140   :  { %2181 = vmatpush1.bf16.msra.mxu0 %v3090_v51 }
 0x143   :  { %2183 = vmatmul.mubr.bf16.vlgmr.msra.gmra.mrb[4].mxu0 %v3539_v11 }
 0x156   :  { %v1926_v58 = vpop.f32.mrb[0].mxu0 }
 0x157   :  { %v2628_v60 = vadd.f32 %v1926_v58, %v1840_v26  ;;  %v1928_v61 = vpop.f32.mrb[1].mxu0 }
 0x158   :  { %v2629_v62 = vadd.f32 %v1928_v61, %v1842_v27  ;;  %v1930_v63 = vpop.f32.mrb[2].mxu0 }
 0x159   :  { %v2264_v0 = vadd.f32 %v2628_v60, %v2237_v57  ;;  %v2630_v1 = vadd.f32 %v1930_v63, %v1844_v29  ;;  %v1932_v2 = vpop.f32.mrb[3].mxu0 }
 0x15a   :  { %v2265_v3 = vadd.f32 %v2629_v62, %v2241_v59  ;;  %v2631_v11 = vadd.f32 %v1932_v2, %v1846_v31 }
 0x15b   :  { %v2270_v4 = vadd.f32 %v2630_v1, %v2237_v57 }
 0x15c   :  { %v2622_v5 = vpack.c.bf16 %v2265_v3, %v2264_v0  ;;  %v2271_v8 = vadd.f32 %v2631_v11, %v2241_v59 }
 0x15e   :  { %2312 = vst [vmem:[%s4055_s3] sm:$0xff] %v2622_v5  ;;  %v2625_v9 = vpack.c.bf16 %v2271_v8, %v2270_v4 }
 0x160   :  { %2315 = vst [vmem:[%s4055_s3 + $0x18] sm:$0xff] %v2625_v9 }
 0x1d5   :  { %v2055_v15 = vpop.f32.mrb[4].mxu1 }
 0x1d6   :  { %v2266_v16 = vadd.f32 %v2245_v13, %v2055_v15  ;;  %v2057_v17 = vpop.f32.mrb[5].mxu1 }
 0x1d7   :  { %v2267_v18 = vadd.f32 %v2249_v14, %v2057_v17  ;;  %v2059_v19 = vpop.f32.mrb[6].mxu1 }
 0x1d8   :  { %v2272_v20 = vadd.f32 %v2245_v13, %v2059_v19  ;;  %v2061_v21 = vpop.f32.mrb[7].mxu1 }
 0x1d9   :  { %v2623_v22 = vpack.c.bf16 %v2267_v18, %v2266_v16  ;;  %v2273_v6 = vadd.f32 %v2249_v14, %v2061_v21 }
 0x1db   :  { %2313 = vst [vmem:[%s4055_s3 + $0x8] sm:$0xff] %v2623_v22  ;;  %v2626_v7 = vpack.c.bf16 %v2273_v6, %v2272_v20 }
 0x1dd   :  { %2316 = vst [vmem:[%s4055_s3 + $0x20] sm:$0xff] %v2626_v7 }
 0x216   :  { %v2184_v24 = vpop.f32.mrb[4].mxu0 }
 0x217   :  { %v2268_v25 = vadd.f32 %v2253_v49, %v2184_v24  ;;  %v2186_v26 = vpop.f32.mrb[5].mxu0 }
 0x218   :  { %v2269_v27 = vadd.f32 %v2257_v23, %v2186_v26  ;;  %v2188_v28 = vpop.f32.mrb[6].mxu0 }
 0x219   :  { %v2274_v29 = vadd.f32 %v2253_v49, %v2188_v28  ;;  %v2190_v30 = vpop.f32.mrb[7].mxu0 }
 0x21a   :  { %v2624_v31 = vpack.c.bf16 %v2269_v27, %v2268_v25  ;;  %v2275_v32 = vadd.f32 %v2257_v23, %v2190_v30 }
 0x21c   :  { %2314 = vst [vmem:[%s4055_s3 + $0x10] sm:$0xff] %v2624_v31  ;;  %v2627_v33 = vpack.c.bf16 %v2275_v32, %v2274_v29 }
 0x21e   :  { %2317 = vst [vmem:[%s4055_s3 + $0x28] sm:$0xff] %v2627_v33 }

// kernel: model_forward.91
= control target key start
LH: loop header
LB: loop body
LE: loop exit
PB: predicated region body
PF: predicated region fallthrough
CT: control target
= control target key end

     0   :  { %8 = vsyncpa [#allocation4], 0  ;;  %s4324_s0 = inlined_call_operand.vmem [shape: bf16[16,768], index: 0, kind: input, shape index: {}]   ;;  %s4325_s1 = inlined_call_operand.hbm [shape: bf16[768,3072], index: 1, kind: input, shape index: {}]   ;;  %s4326_s2 = inlined_call_operand.vmem [shape: f32[1,3072], index: 2, kind: input, shape index: {}]   ;;  %s4327_s3 = inlined_call_operand.vmem [shape: bf16[16,3072], index: 3, kind: output, shape index: {}]  }
   0x1   :  { %10 = vsyncpa [#allocation4 + $0x1], 0  ;;  %s3812_s12 = smov 0   ;;  %s3814_s13 = smov 0  }
   0x2   :  { %s3816_s14 = smov 0   ;;  %s3818_s15 = smov 0  }
   0x3   :  { %s3820_s16 = smov 0   ;;  %s3822_s17 = smov 0  }
   0x4 LB: > { %s2836_s18 = sadd.s32 4294967295, %s3786_s17   ;;  %s31_s19 = sadd.s32 1, %s3782_s16  ;;  %s3786_s17 = sphi %s3822_s17, %s16_s17   ;;  %s3782_s16 = sphi %s3820_s16, %s4338_s16   ;;  %s3778_s15 = sphi %s3818_s15, %s4337_s15   ;;  %s3774_s14 = sphi %s3816_s14, %s4336_s14   ;;  %s3770_s13 = sphi %s3814_s13, %s4335_s13   ;;  %s3766_s12 = sphi %s3812_s12, %s4334_s12  }
   0x5   : > { %p33_p0 = scmp.ge.s32.totalorder %s31_s19, 4  ;;  %s72_s20 = sadd.s32 1, %s3774_s14 }
   0x6   : > { %p79_p1 = scmp.ne.s32.totalorder %s3774_s14, %s3770_s13  ;;  %p80_p2 = scmp.eq.s32.totalorder %s3786_s17, 0 }
   0x7   : > { %s4340_s19 = smov (%p33_p0, %s31_s19), 0  ;;  %p85_p4 = scmp.ne.s32.totalorder %s3770_s13, %s3766_s12 }
   0x8   : > { %p3848_p3 = por %p80_p2, %p79_p1  ;;  %s68_s22 = ssub.s32 %s3782_s16, %s4340_s19 }
   0x9   : > { %p86_p5 = scmp.eq.s32.totalorder %s2836_s18, 0  ;;  %p70_p6 = scmp.eq.s32.totalorder %s68_s22, 0 }
   0xa   : > { %p137_p7 = scmp.eq.s32.totalorder %s2836_s18, 3  ;;  %p3187_p10 = scmp.lt.s32.totalorder %s3786_s17, 4 }
   0xb   : > { %p3855_p8 = por %p86_p5, %p85_p4  ;;  %s178_s26 = sand.u32 1, %s3774_s14  }
   0xc   : > { %s3860_s24 = scalar_select %p70_p6, %s3774_s14, %s72_s20  }
   0xd   : > { %p3862_p9 = por %p137_p7, %p79_p1  ;;  %s3146_s27 = smul.u32 384, %s3782_s16 }
   0xe   : > { %s3178_s28 = smul.u32 2304, %s178_s26  ;;  %p3876_p11 = pnand %p3187_p10, %p3848_p3 }
   0xf   : > { %s4330_s25 = scalar_select %p3862_p9, 1, 0 }
  0x10   : > { %s3872_s4 = scalar_lea.hbm %s4325_s1, %s3146_s27  ;;  %s182_s6 = scalar_lea.vmem [#allocation3], %s3178_s28 }
  0x11   : > { %s192_s7 = sshll.u32 %s182_s6, 4  ;;  %s3883_s8 = scalar_lea.sflag [#allocation4], %s178_s26  ;;  %s3880_s7 = int_to_ptr.vmem [resolvable:$true] %s192_s7 }
  0x12   : > { %s3706_s9 = scalar_lea.hbm %s3872_s4, 36864  ;;  %p3708_p0 = pneg %p3876_p11 }
  0x13   : > { %p3707_p13 = scmp.ne.s32.totalorder %s3872_s4, %s3706_s9  ;;  %s3711_s12 = scalar_lea.hbm %s4325_s1, 147456 }
  0x14   : > { %p3712_p3 = scmp.lt.u32.totalorder %s3872_s4, %s4325_s1  ;;  %p3713_p4 = scmp.lt.u32.totalorder %s3711_s12, %s3706_s9 }
  0x15   : > { %p3709_p1 = pnand %p3708_p0, %p3707_p13  ;;  %p3715_p6 = scmp.lt.u32.totalorder %s3706_s9, %s3872_s4 }
  0x16   : > { %p3714_p5 = por %p3713_p4, %p3712_p3 }
  0x17   : > { %p3710_p2 = pneg %p3709_p1 }
  0x18   : > { %p3716_p7 = por %p3715_p6, %p3714_p5 }
  0x1a   : > { %p3717_p10 = pnand %p3716_p7, %p3710_p2 }
  0x1c   : > { %3720 = shalt.err (!%p3717_p10)
}
  0x1d   : > { %s3721_s21 = scalar_lea.vmem %s3880_s7, 36864  ;;  %s3788_s22 = smov [#allocation3]  }
  0x1e   : > { %p3722_p13 = scmp.ne.s32.totalorder %s3880_s7, %s3721_s21  ;;  %s3726_s26 = sshll.u32 %s3788_s22, 4  ;;  %s3727_s26 = int_to_ptr.vmem [resolvable:$false] %s3726_s26 }
  0x1f   : > { %s3728_s27 = scalar_lea.vmem %s3727_s26, 73728  ;;  %p3729_p9 = scmp.lt.s32.totalorder %s3880_s7, %s3727_s26 }
  0x20   : > { %p3724_p1 = pnand %p3722_p13, %p3708_p0  ;;  %p3730_p3 = scmp.lt.s32.totalorder %s3728_s27, %s3721_s21 }
  0x22   : > { %p3725_p12 = pneg %p3724_p1  ;;  %p3731_p4 = por %p3730_p3, %p3729_p9 }
  0x24   : > { %p3732_p5 = pnand %p3731_p4, %p3725_p12 }
  0x26   : > { %3735 = shalt.err (!%p3732_p5)
}
  0x27   : > { %s3789_s28 = smov 1536   ;;  %s3790_s29 = smov 384  }
  0x28   : > { %s3791_s30 = smov 24   ;;  %p208_p0 = scmp.lt.s32.totalorder %s3786_s17, 5 }
  0x29   : > { %3186 = dma.hbm_to_vmem [thread:$0]  (!%p3876_p11), %s3872_s4, 36864, %s3880_s7, %s3883_s8, %s3789_s28, %s3790_s29, %s3791_s30  }
  0x2a   : > { %p4332_p2 = scmp.ge.s32.totalorder %s3786_s17, 1 }
  0x2c   : > { %p209_p6 = pnand %p4332_p2, %p208_p0 }
  0x2d   : > { %s3915_s6 = sand.u32 (!%p209_p6), 1, %s3770_s13  }
  0x2e   : > { %212 = sbr.rel (%p209_p6) target bundleno = 629 (0x275), region = 32  ;;  %s215_s10 = scalar_lea.sflag (!%p209_p6), [#allocation4], %s3915_s6 }
  0x2f   : > { %s3179_s9 = smul.u32 (!%p209_p6), 2304, %s3915_s6 }
  0x31   : > { %s3919_s11 = scalar_lea.vmem (!%p209_p6), [#allocation3], %s3179_s9 }
  0x35   : > { %3761 = dma.done.wait (%p3855_p8), %s215_s10, 36864  }
  0x36   : > { %3763 = vsyncadd (%p3855_p8), %s215_s10, 4294930432  ;;  %v3239_v0 = vld [vmem:[%s3919_s11 + $0x4] ss:$24 sps:$4 sm:$0xff]   ;;  %v3243_v2 = vld [vmem:[%s3919_s11] ss:$24 sps:$4 sm:$0xff]   ;;  %s268_s10 = smul.u32 6, %s3778_s15 }
  0x37   : > { %v3241_v1 = vld [vmem:[%s3919_s11 + $0x304] ss:$24 sps:$4 sm:$0xff]   ;;  %2067 = vmatprep.subr.bf16.mxu1 %v3239_v0  ;;  %v3244_v3 = vld [vmem:[%s3919_s11 + $0x300] ss:$24 sps:$4 sm:$0xff]   ;;  %v3245_v4 = vld [vmem:[%s3919_s11 + $0x34] ss:$24 sps:$4 sm:$0xff]  }
  0x38   : > { %2110 = vmatprep.subr.bf16.mxu0 %v3241_v1  ;;  %2068 = vmatpush1.bf16.msra.mxu1 %v3243_v2  ;;  %v3247_v5 = vld [vmem:[%s3919_s11 + $0x334] ss:$24 sps:$4 sm:$0xff]   ;;  %v3249_v6 = vld [vmem:[%s3919_s11 + $0x30] ss:$24 sps:$4 sm:$0xff]   ;;  %v3251_v8 = vld [vmem:[%s3919_s11 + $0x64] ss:$24 sps:$4 sm:$0xff]  }
  0x39   : > { %2111 = vmatpush1.bf16.msra.mxu0 %v3244_v3  ;;  %2069 = vmatprep.subr.bf16.mxu1 %v3245_v4  ;;  %v3250_v7 = vld [vmem:[%s3919_s11 + $0x330] ss:$24 sps:$4 sm:$0xff]   ;;  %v3253_v9 = vld [vmem:[%s3919_s11 + $0x364] ss:$24 sps:$4 sm:$0xff]   ;;  %v3255_v10 = vld [vmem:[%s3919_s11 + $0x60] ss:$24 sps:$4 sm:$0xff]  }
  0x3a   : > { %2112 = vmatprep.subr.bf16.mxu0 %v3247_v5  ;;  %v3256_v11 = vld [vmem:[%s3919_s11 + $0x360] ss:$24 sps:$4 sm:$0xff]   ;;  %v3257_v12 = vld [vmem:[%s3919_s11 + $0x94] ss:$24 sps:$4 sm:$0xff]   ;;  %v3261_v14 = vld [vmem:[%s3919_s11 + $0x90] ss:$24 sps:$4 sm:$0xff]  }
  0x3b   : > { %v3259_v13 = vld [vmem:[%s3919_s11 + $0x394] ss:$24 sps:$4 sm:$0xff]   ;;  %v3262_v15 = vld [vmem:[%s3919_s11 + $0x390] ss:$24 sps:$4 sm:$0xff]   ;;  %v3263_v16 = vld [vmem:[%s3919_s11 + $0xc4] ss:$24 sps:$4 sm:$0xff]  }
  0x3c   : > { %2070 = vmatpush1.bf16.msra.mxu1 %v3249_v6  ;;  %v3265_v17 = vld [vmem:[%s3919_s11 + $0x3c4] ss:$24 sps:$4 sm:$0xff]   ;;  %v3267_v18 = vld [vmem:[%s3919_s11 + $0xc0] ss:$24 sps:$4 sm:$0xff]   ;;  %v3269_v20 = vld [vmem:[%s3919_s11 + $0xf4] ss:$24 sps:$4 sm:$0xff]  }
  0x3d   : > { %2113 = vmatpush1.bf16.msra.mxu0 %v3250_v7  ;;  %2071 = vmatprep.subr.bf16.mxu1 %v3251_v8  ;;  %v3268_v19 = vld [vmem:[%s3919_s11 + $0x3c0] ss:$24 sps:$4 sm:$0xff]   ;;  %v3271_v21 = vld [vmem:[%s3919_s11 + $0x3f4] ss:$24 sps:$4 sm:$0xff]   ;;  %v3273_v22 = vld [vmem:[%s3919_s11 + $0xf0] ss:$24 sps:$4 sm:$0xff]  }
  0x3e   : > { %2114 = vmatprep.subr.bf16.mxu0 %v3253_v9  ;;  %v3274_v23 = vld [vmem:[%s3919_s11 + $0x3f0] ss:$24 sps:$4 sm:$0xff]   ;;  %v3275_v24 = vld [vmem:[%s3919_s11 + $0x124] ss:$24 sps:$4 sm:$0xff]   ;;  %v3279_v26 = vld [vmem:[%s3919_s11 + $0x120] ss:$24 sps:$4 sm:$0xff]  }
  0x3f   : > { %v3277_v25 = vld [vmem:[%s3919_s11 + $0x424] ss:$24 sps:$4 sm:$0xff]   ;;  %v3280_v27 = vld [vmem:[%s3919_s11 + $0x420] ss:$24 sps:$4 sm:$0xff]   ;;  %v3281_v28 = vld [vmem:[%s3919_s11 + $0x154] ss:$24 sps:$4 sm:$0xff]  }
  0x40   : > { %2072 = vmatpush1.bf16.msra.mxu1 %v3255_v10  ;;  %v3283_v29 = vld [vmem:[%s3919_s11 + $0x454] ss:$24 sps:$4 sm:$0xff]   ;;  %v3285_v30 = vld [vmem:[%s3919_s11 + $0x150] ss:$24 sps:$4 sm:$0xff]   ;;  %v3287_v32 = vld [vmem:[%s3919_s11 + $0x184] ss:$24 sps:$4 sm:$0xff]  }
  0x41   : > { %2115 = vmatpush1.bf16.msra.mxu0 %v3256_v11  ;;  %2073 = vmatprep.subr.bf16.mxu1 %v3257_v12  ;;  %v3286_v31 = vld [vmem:[%s3919_s11 + $0x450] ss:$24 sps:$4 sm:$0xff]   ;;  %v3289_v33 = vld [vmem:[%s3919_s11 + $0x484] ss:$24 sps:$4 sm:$0xff]   ;;  %v3291_v34 = vld [vmem:[%s3919_s11 + $0x180] ss:$24 sps:$4 sm:$0xff]  }
  0x42   : > { %2116 = vmatprep.subr.bf16.mxu0 %v3259_v13  ;;  %v3292_v35 = vld [vmem:[%s3919_s11 + $0x480] ss:$24 sps:$4 sm:$0xff]   ;;  %v3293_v36 = vld [vmem:[%s3919_s11 + $0x1b4] ss:$24 sps:$4 sm:$0xff]   ;;  %v3297_v38 = vld [vmem:[%s3919_s11 + $0x1b0] ss:$24 sps:$4 sm:$0xff]  }
  0x43   : > { %v3295_v37 = vld [vmem:[%s3919_s11 + $0x4b4] ss:$24 sps:$4 sm:$0xff]   ;;  %v3298_v39 = vld [vmem:[%s3919_s11 + $0x4b0] ss:$24 sps:$4 sm:$0xff]   ;;  %v3299_v40 = vld [vmem:[%s3919_s11 + $0x1e4] ss:$24 sps:$4 sm:$0xff]  }
  0x44   : > { %2074 = vmatpush1.bf16.msra.mxu1 %v3261_v14  ;;  %v3301_v41 = vld [vmem:[%s3919_s11 + $0x4e4] ss:$24 sps:$4 sm:$0xff]   ;;  %v3303_v42 = vld [vmem:[%s3919_s11 + $0x1e0] ss:$24 sps:$4 sm:$0xff]   ;;  %v3305_v44 = vld [vmem:[%s3919_s11 + $0x214] ss:$24 sps:$4 sm:$0xff]  }
  0x45   : > { %2117 = vmatpush1.bf16.msra.mxu0 %v3262_v15  ;;  %2075 = vmatprep.subr.bf16.mxu1 %v3263_v16  ;;  %v3304_v43 = vld [vmem:[%s3919_s11 + $0x4e0] ss:$24 sps:$4 sm:$0xff]   ;;  %v3307_v45 = vld [vmem:[%s3919_s11 + $0x514] ss:$24 sps:$4 sm:$0xff]   ;;  %v3309_v46 = vld [vmem:[%s3919_s11 + $0x210] ss:$24 sps:$4 sm:$0xff]  }
  0x46   : > { %2118 = vmatprep.subr.bf16.mxu0 %v3265_v17  ;;  %v3310_v47 = vld [vmem:[%s3919_s11 + $0x510] ss:$24 sps:$4 sm:$0xff]   ;;  %v3976_v48 = vld [vmem:[%s4324_s0 + $0x4] ss:$24 sps:$4 sm:$0xff]   ;;  %v3315_v52 = vld [vmem:[%s3919_s11 + $0x240] ss:$24 sps:$4 sm:$0xff]  }
  0x47   : > { %v3981_v49 = vld [vmem:[%s4324_s0 + $0xc] ss:$24 sps:$4 sm:$0xff]   ;;  %v3311_v50 = vld [vmem:[%s3919_s11 + $0x244] ss:$24 sps:$4 sm:$0xff]   ;;  %2099 = vmatprep.mubr.bf16.mxu1 %v3976_v48  ;;  %v3316_v53 = vld [vmem:[%s3919_s11 + $0x540] ss:$24 sps:$4 sm:$0xff]  }
  0x48   : > { %2076 = vmatpush1.bf16.msra.mxu1 %v3267_v18  ;;  %v3313_v51 = vld [vmem:[%s3919_s11 + $0x544] ss:$24 sps:$4 sm:$0xff]   ;;  %2142 = vmatprep.mubr.bf16.mxu0 %v3981_v49  ;;  %v3317_v54 = vld [vmem:[%s3919_s11 + $0x274] ss:$24 sps:$4 sm:$0xff]   ;;  %v3321_v56 = vld [vmem:[%s3919_s11 + $0x270] ss:$24 sps:$4 sm:$0xff]  }
  0x49   : > { %2119 = vmatpush1.bf16.msra.mxu0 %v3268_v19  ;;  %2077 = vmatprep.subr.bf16.mxu1 %v3269_v20  ;;  %v3319_v55 = vld [vmem:[%s3919_s11 + $0x574] ss:$24 sps:$4 sm:$0xff]   ;;  %v3322_v57 = vld [vmem:[%s3919_s11 + $0x570] ss:$24 sps:$4 sm:$0xff]   ;;  %v3323_v58 = vld [vmem:[%s3919_s11 + $0x2a4] ss:$24 sps:$4 sm:$0xff]  }
  0x4a   : > { %2120 = vmatprep.subr.bf16.mxu0 %v3271_v21  ;;  %v3325_v59 = vld [vmem:[%s3919_s11 + $0x5a4] ss:$24 sps:$4 sm:$0xff]   ;;  %v3327_v60 = vld [vmem:[%s3919_s11 + $0x2a0] ss:$24 sps:$4 sm:$0xff]   ;;  %v3329_v62 = vld [vmem:[%s3919_s11 + $0x2d4] ss:$24 sps:$4 sm:$0xff]  }
  0x4b   : > { %v3328_v61 = vld [vmem:[%s3919_s11 + $0x5a0] ss:$24 sps:$4 sm:$0xff]   ;;  %v3331_v63 = vld [vmem:[%s3919_s11 + $0x5d4] ss:$24 sps:$4 sm:$0xff]   ;;  %v3333_v0 = vld [vmem:[%s3919_s11 + $0x2d0] ss:$24 sps:$4 sm:$0xff]  }
  0x4c   : > { %2078 = vmatpush1.bf16.msra.mxu1 %v3273_v22  ;;  %v3334_v1 = vld [vmem:[%s3919_s11 + $0x5d0] ss:$24 sps:$4 sm:$0xff]   ;;  %v3341_v2 = vld [vmem:[%s3919_s11 + $0x604] ss:$24 sps:$4 sm:$0xff]   ;;  %v3339_v4 = vld [vmem:[%s3919_s11 + $0x600] ss:$24 sps:$4 sm:$0xff]  }
  0x4d   : > { %2121 = vmatpush1.bf16.msra.mxu0 %v3274_v23  ;;  %2079 = vmatprep.subr.bf16.mxu1 %v3275_v24  ;;  %v3344_v3 = vld [vmem:[%s3919_s11 + $0xc] ss:$24 sps:$4 sm:$0xff]   ;;  %v3342_v5 = vld [vmem:[%s3919_s11 + $0x8] ss:$24 sps:$4 sm:$0xff]   ;;  %v3352_v9 = vld [vmem:[%s3919_s11 + $0x3c] ss:$24 sps:$4 sm:$0xff]  }
  0x4e   : > { %2122 = vmatprep.subr.bf16.mxu0 %v3277_v25  ;;  %v4008_v6 = vld [vmem:[%s4324_s0] ss:$24 sps:$4 sm:$0xff]   ;;  %v3349_v8 = vld [vmem:[%s3919_s11 + $0x634] ss:$24 sps:$4 sm:$0xff]   ;;  %v3350_v11 = vld [vmem:[%s3919_s11 + $0x38] ss:$24 sps:$4 sm:$0xff]  }
  0x4f   : > { %v4013_v7 = vld [vmem:[%s4324_s0 + $0x8] ss:$24 sps:$4 sm:$0xff]   ;;  %v3355_v12 = vld [vmem:[%s3919_s11 + $0x664] ss:$24 sps:$4 sm:$0xff]   ;;  %v3353_v14 = vld [vmem:[%s3919_s11 + $0x660] ss:$24 sps:$4 sm:$0xff]  }
  0x50   : > { %2080 = vmatpush1.bf16.msra.mxu1 %v3279_v26  ;;  %v3347_v10 = vld [vmem:[%s3919_s11 + $0x630] ss:$24 sps:$4 sm:$0xff]   ;;  %v3358_v13 = vld [vmem:[%s3919_s11 + $0x6c] ss:$24 sps:$4 sm:$0xff]   ;;  %v3364_v17 = vld [vmem:[%s3919_s11 + $0x9c] ss:$24 sps:$4 sm:$0xff]  }
  0x51   : > { %2123 = vmatpush1.bf16.msra.mxu0 %v3280_v27  ;;  %2081 = vmatprep.subr.bf16.mxu1 %v3281_v28  ;;  %v3356_v15 = vld [vmem:[%s3919_s11 + $0x68] ss:$24 sps:$4 sm:$0xff]   ;;  %v3361_v16 = vld [vmem:[%s3919_s11 + $0x694] ss:$24 sps:$4 sm:$0xff]   ;;  %v3362_v19 = vld [vmem:[%s3919_s11 + $0x98] ss:$24 sps:$4 sm:$0xff]  }
  0x52   : > { %2124 = vmatprep.subr.bf16.mxu0 %v3283_v29  ;;  %v3359_v18 = vld [vmem:[%s3919_s11 + $0x690] ss:$24 sps:$4 sm:$0xff]   ;;  %v3367_v20 = vld [vmem:[%s3919_s11 + $0x6c4] ss:$24 sps:$4 sm:$0xff]   ;;  %v3365_v22 = vld [vmem:[%s3919_s11 + $0x6c0] ss:$24 sps:$4 sm:$0xff]  }
  0x53   : > { %v3370_v21 = vld [vmem:[%s3919_s11 + $0xcc] ss:$24 sps:$4 sm:$0xff]   ;;  %v3368_v23 = vld [vmem:[%s3919_s11 + $0xc8] ss:$24 sps:$4 sm:$0xff]   ;;  %v3376_v25 = vld [vmem:[%s3919_s11 + $0xfc] ss:$24 sps:$4 sm:$0xff]  }
  0x54   : > { %2082 = vmatpush1.bf16.msra.mxu1 %v3285_v30  ;;  %v3373_v24 = vld [vmem:[%s3919_s11 + $0x6f4] ss:$24 sps:$4 sm:$0xff]   ;;  %v3371_v26 = vld [vmem:[%s3919_s11 + $0x6f0] ss:$24 sps:$4 sm:$0xff]   ;;  %v3379_v28 = vld [vmem:[%s3919_s11 + $0x724] ss:$24 sps:$4 sm:$0xff]  }
  0x55   : > { %2125 = vmatpush1.bf16.msra.mxu0 %v3286_v31  ;;  %2083 = vmatprep.subr.bf16.mxu1 %v3287_v32  ;;  %v3374_v27 = vld [vmem:[%s3919_s11 + $0xf8] ss:$24 sps:$4 sm:$0xff]   ;;  %v3382_v29 = vld [vmem:[%s3919_s11 + $0x12c] ss:$24 sps:$4 sm:$0xff]   ;;  %v3380_v31 = vld [vmem:[%s3919_s11 + $0x128] ss:$24 sps:$4 sm:$0xff]  }
  0x56   : > { %2126 = vmatprep.subr.bf16.mxu0 %v3289_v33  ;;  %v3377_v30 = vld [vmem:[%s3919_s11 + $0x720] ss:$24 sps:$4 sm:$0xff]   ;;  %v3385_v32 = vld [vmem:[%s3919_s11 + $0x754] ss:$24 sps:$4 sm:$0xff]   ;;  %p269_p8 = scmp.lt.s32.totalorder %s268_s10, 23  ;;  %p4333_p9 = scmp.ne.s32.totalorder %s4330_s25, 0 }
  0x57   : > { %v3388_v33 = vld [vmem:[%s3919_s11 + $0x15c] ss:$24 sps:$4 sm:$0xff]  }
  0x58   : > { %2084 = vmatpush1.bf16.msra.mxu1 %v3291_v34  ;;  %v4047_v34 = vld [vmem:[%s4324_s0 + $0x14] ss:$24 sps:$4 sm:$0xff]   ;;  %s4342_s10 = smov (!%p269_p8, %s268_s10), 23 }
  0x59   : > { %2127 = vmatpush1.bf16.msra.mxu0 %v3292_v35  ;;  %2085 = vmatprep.subr.bf16.mxu1 %v3293_v36  ;;  %v3383_v35 = vld [vmem:[%s3919_s11 + $0x750] ss:$24 sps:$4 sm:$0xff]   ;;  %s271_s5 = scalar_lea.vmem %s4326_s2, %s4342_s10 }
  0x5a   : > { %2128 = vmatprep.subr.bf16.mxu0 %v3295_v37  ;;  %v3386_v36 = vld [vmem:[%s3919_s11 + $0x158] ss:$24 sps:$4 sm:$0xff]   ;;  %v3391_v37 = vld [vmem:[%s3919_s11 + $0x784] ss:$24 sps:$4 sm:$0xff]  }
  0x5c   : > { %2086 = vmatpush1.bf16.msra.mxu1 %v3297_v38  ;;  %v3394_v38 = vld [vmem:[%s3919_s11 + $0x18c] ss:$24 sps:$4 sm:$0xff]  }
  0x5d   : > { %2129 = vmatpush1.bf16.msra.mxu0 %v3298_v39  ;;  %2087 = vmatprep.subr.bf16.mxu1 %v3299_v40  ;;  %v3389_v39 = vld [vmem:[%s3919_s11 + $0x780] ss:$24 sps:$4 sm:$0xff]  }
  0x5e   : > { %2130 = vmatprep.subr.bf16.mxu0 %v3301_v41  ;;  %v3392_v40 = vld [vmem:[%s3919_s11 + $0x188] ss:$24 sps:$4 sm:$0xff]   ;;  %v3397_v41 = vld [vmem:[%s3919_s11 + $0x7b4] ss:$24 sps:$4 sm:$0xff]  }
  0x60   : > { %2088 = vmatpush1.bf16.msra.mxu1 %v3303_v42  ;;  %v3400_v42 = vld [vmem:[%s3919_s11 + $0x1bc] ss:$24 sps:$4 sm:$0xff]  }
  0x61   : > { %2131 = vmatpush1.bf16.msra.mxu0 %v3304_v43  ;;  %2089 = vmatprep.subr.bf16.mxu1 %v3305_v44  ;;  %v3395_v43 = vld [vmem:[%s3919_s11 + $0x7b0] ss:$24 sps:$4 sm:$0xff]  }
  0x62   : > { %2132 = vmatprep.subr.bf16.mxu0 %v3307_v45  ;;  %v3398_v44 = vld [vmem:[%s3919_s11 + $0x1b8] ss:$24 sps:$4 sm:$0xff]   ;;  %v3403_v45 = vld [vmem:[%s3919_s11 + $0x7e4] ss:$24 sps:$4 sm:$0xff]  }
  0x64   : > { %2090 = vmatpush1.bf16.msra.mxu1 %v3309_v46  ;;  %v3406_v46 = vld [vmem:[%s3919_s11 + $0x1ec] ss:$24 sps:$4 sm:$0xff]  }
  0x65   : > { %2133 = vmatpush1.bf16.msra.mxu0 %v3310_v47  ;;  %2091 = vmatprep.subr.bf16.mxu1 %v3311_v50  ;;  %v3401_v47 = vld [vmem:[%s3919_s11 + $0x7e0] ss:$24 sps:$4 sm:$0xff]  }
  0x66   : > { %2134 = vmatprep.subr.bf16.mxu0 %v3313_v51  ;;  %v3404_v50 = vld [vmem:[%s3919_s11 + $0x1e8] ss:$24 sps:$4 sm:$0xff]   ;;  %v3409_v51 = vld [vmem:[%s3919_s11 + $0x814] ss:$24 sps:$4 sm:$0xff]  }
  0x68   : > { %2092 = vmatpush1.bf16.msra.mxu1 %v3315_v52  ;;  %v3412_v52 = vld [vmem:[%s3919_s11 + $0x21c] ss:$24 sps:$4 sm:$0xff]  }
  0x69   : > { %2135 = vmatpush1.bf16.msra.mxu0 %v3316_v53  ;;  %2093 = vmatprep.subr.bf16.mxu1 %v3317_v54  ;;  %v3407_v53 = vld [vmem:[%s3919_s11 + $0x810] ss:$24 sps:$4 sm:$0xff]  }
  0x6a   : > { %2136 = vmatprep.subr.bf16.mxu0 %v3319_v55  ;;  %v3410_v54 = vld [vmem:[%s3919_s11 + $0x218] ss:$24 sps:$4 sm:$0xff]   ;;  %v3415_v55 = vld [vmem:[%s3919_s11 + $0x844] ss:$24 sps:$4 sm:$0xff]  }
  0x6c   : > { %2094 = vmatpush1.bf16.msra.mxu1 %v3321_v56  ;;  %v3418_v56 = vld [vmem:[%s3919_s11 + $0x24c] ss:$24 sps:$4 sm:$0xff]  }
  0x6d   : > { %2137 = vmatpush1.bf16.msra.mxu0 %v3322_v57  ;;  %2095 = vmatprep.subr.bf16.mxu1 %v3323_v58  ;;  %v3413_v57 = vld [vmem:[%s3919_s11 + $0x840] ss:$24 sps:$4 sm:$0xff]  }
  0x6e   : > { %2138 = vmatprep.subr.bf16.mxu0 %v3325_v59  ;;  %v3416_v58 = vld [vmem:[%s3919_s11 + $0x248] ss:$24 sps:$4 sm:$0xff]   ;;  %v3421_v59 = vld [vmem:[%s3919_s11 + $0x874] ss:$24 sps:$4 sm:$0xff]  }
  0x70   : > { %2096 = vmatpush1.bf16.msra.mxu1 %v3327_v60  ;;  %v3424_v60 = vld [vmem:[%s3919_s11 + $0x27c] ss:$24 sps:$4 sm:$0xff]  }
  0x71   : > { %2139 = vmatpush1.bf16.msra.mxu0 %v3328_v61  ;;  %2097 = vmatprep.subr.bf16.mxu1 %v3329_v62  ;;  %v3419_v61 = vld [vmem:[%s3919_s11 + $0x870] ss:$24 sps:$4 sm:$0xff]  }
  0x72   : > { %2140 = vmatprep.subr.bf16.mxu0 %v3331_v63  ;;  %v3422_v62 = vld [vmem:[%s3919_s11 + $0x278] ss:$24 sps:$4 sm:$0xff]   ;;  %v3427_v63 = vld [vmem:[%s3919_s11 + $0x8a4] ss:$24 sps:$4 sm:$0xff]  }
  0x74   : > { %2098 = vmatpush1.bf16.msra.mxu1 %v3333_v0  ;;  %v3430_v0 = vld [vmem:[%s3919_s11 + $0x2ac] ss:$24 sps:$4 sm:$0xff]  }
  0x75   : > { %2141 = vmatpush1.bf16.msra.mxu0 %v3334_v1  ;;  %2196 = vmatprep.subr.bf16.mxu1 %v3344_v3  ;;  %v3425_v1 = vld [vmem:[%s3919_s11 + $0x8a0] ss:$24 sps:$4 sm:$0xff]   ;;  %v3433_v3 = vld [vmem:[%s3919_s11 + $0x8d4] ss:$24 sps:$4 sm:$0xff]  }
  0x76   : > { %2153 = vmatprep.subr.bf16.mxu0 %v3341_v2  ;;  %v3428_v2 = vld [vmem:[%s3919_s11 + $0x2a8] ss:$24 sps:$4 sm:$0xff]  }
  0x77   : > { %2100 = vmatmul.mubr.bf16.vlgmr.msra.gmra.mrb[0].mxu1 %v4008_v6 }
  0x78   : > { %2143 = vmatmul.mubr.bf16.vlgmr.msra.gmra.mrb[0].mxu0 %v4013_v7  ;;  %2197 = vmatpush1.bf16.msra.mxu1 %v3342_v5  ;;  %v3431_v5 = vld [vmem:[%s3919_s11 + $0x8d0] ss:$24 sps:$4 sm:$0xff]  }
  0x79   : > { %2154 = vmatpush1.bf16.msra.mxu0 %v3339_v4  ;;  %2198 = vmatprep.subr.bf16.mxu1 %v3352_v9  ;;  %v3436_v4 = vld [vmem:[%s3919_s11 + $0x2dc] ss:$24 sps:$4 sm:$0xff]   ;;  %v3442_v9 = vld [vmem:[%s3919_s11 + $0x30c] ss:$24 sps:$4 sm:$0xff]  }
  0x7a   : > { %2155 = vmatprep.subr.bf16.mxu0 %v3349_v8  ;;  %2228 = vmatprep.mubr.bf16.mxu1 %v3976_v48  ;;  %v3434_v8 = vld [vmem:[%s3919_s11 + $0x2d8] ss:$24 sps:$4 sm:$0xff]  }
  0x7b   : > { %2185 = vmatprep.mubr.bf16.mxu0 %v4047_v34 }
  0x7c   : > { %2199 = vmatpush1.bf16.msra.mxu1 %v3350_v11  ;;  %v4089_v11 = vld [vmem:[%s4324_s0 + $0x10] ss:$24 sps:$4 sm:$0xff]  }
  0x7d   : > { %2156 = vmatpush1.bf16.msra.mxu0 %v3347_v10  ;;  %2200 = vmatprep.subr.bf16.mxu1 %v3358_v13  ;;  %v3445_v10 = vld [vmem:[%s3919_s11 + $0x14] ss:$24 sps:$4 sm:$0xff]   ;;  %v3443_v13 = vld [vmem:[%s3919_s11 + $0x10] ss:$24 sps:$4 sm:$0xff]  }
  0x7e   : > { %2157 = vmatprep.subr.bf16.mxu0 %v3355_v12  ;;  %v3440_v12 = vld [vmem:[%s3919_s11 + $0x308] ss:$24 sps:$4 sm:$0xff]  }
  0x80   : > { %2201 = vmatpush1.bf16.msra.mxu1 %v3356_v15  ;;  %v3451_v15 = vld [vmem:[%s3919_s11 + $0x44] ss:$24 sps:$4 sm:$0xff]  }
  0x81   : > { %2158 = vmatpush1.bf16.msra.mxu0 %v3353_v14  ;;  %2202 = vmatprep.subr.bf16.mxu1 %v3364_v17  ;;  %v3448_v14 = vld [vmem:[%s3919_s11 + $0x33c] ss:$24 sps:$4 sm:$0xff]   ;;  %v3449_v17 = vld [vmem:[%s3919_s11 + $0x40] ss:$24 sps:$4 sm:$0xff]  }
  0x82   : > { %2159 = vmatprep.subr.bf16.mxu0 %v3361_v16  ;;  %v3446_v16 = vld [vmem:[%s3919_s11 + $0x338] ss:$24 sps:$4 sm:$0xff]  }
  0x84   : > { %2203 = vmatpush1.bf16.msra.mxu1 %v3362_v19  ;;  %v3457_v19 = vld [vmem:[%s3919_s11 + $0x74] ss:$24 sps:$4 sm:$0xff]  }
  0x85   : > { %2160 = vmatpush1.bf16.msra.mxu0 %v3359_v18  ;;  %2204 = vmatprep.subr.bf16.mxu1 %v3370_v21  ;;  %v3454_v18 = vld [vmem:[%s3919_s11 + $0x36c] ss:$24 sps:$4 sm:$0xff]   ;;  %v3455_v21 = vld [vmem:[%s3919_s11 + $0x70] ss:$24 sps:$4 sm:$0xff]  }
  0x86   : > { %2161 = vmatprep.subr.bf16.mxu0 %v3367_v20  ;;  %v3452_v20 = vld [vmem:[%s3919_s11 + $0x368] ss:$24 sps:$4 sm:$0xff]  }
  0x88   : > { %2205 = vmatpush1.bf16.msra.mxu1 %v3368_v23  ;;  %v3463_v23 = vld [vmem:[%s3919_s11 + $0xa4] ss:$24 sps:$4 sm:$0xff]  }
  0x89   : > { %2162 = vmatpush1.bf16.msra.mxu0 %v3365_v22  ;;  %2206 = vmatprep.subr.bf16.mxu1 %v3376_v25  ;;  %v3460_v22 = vld [vmem:[%s3919_s11 + $0x39c] ss:$24 sps:$4 sm:$0xff]   ;;  %v3461_v25 = vld [vmem:[%s3919_s11 + $0xa0] ss:$24 sps:$4 sm:$0xff]  }
  0x8a   : > { %2163 = vmatprep.subr.bf16.mxu0 %v3373_v24  ;;  %v3458_v24 = vld [vmem:[%s3919_s11 + $0x398] ss:$24 sps:$4 sm:$0xff]  }
  0x8c   : > { %2207 = vmatpush1.bf16.msra.mxu1 %v3374_v27  ;;  %v3467_v27 = vld [vmem:[%s3919_s11 + $0xd0] ss:$24 sps:$4 sm:$0xff]  }
  0x8d   : > { %2164 = vmatpush1.bf16.msra.mxu0 %v3371_v26  ;;  %2208 = vmatprep.subr.bf16.mxu1 %v3382_v29  ;;  %v3464_v26 = vld [vmem:[%s3919_s11 + $0x3c8] ss:$24 sps:$4 sm:$0xff]   ;;  %v3475_v29 = vld [vmem:[%s3919_s11 + $0x104] ss:$24 sps:$4 sm:$0xff]  }
  0x8e   : > { %2165 = vmatprep.subr.bf16.mxu0 %v3379_v28  ;;  %v3472_v28 = vld [vmem:[%s3919_s11 + $0x3fc] ss:$24 sps:$4 sm:$0xff]  }
  0x90   : > { %2209 = vmatpush1.bf16.msra.mxu1 %v3380_v31  ;;  %v3473_v31 = vld [vmem:[%s3919_s11 + $0x100] ss:$24 sps:$4 sm:$0xff]  }
  0x91   : > { %2166 = vmatpush1.bf16.msra.mxu0 %v3377_v30  ;;  %2210 = vmatprep.subr.bf16.mxu1 %v3388_v33  ;;  %v3470_v30 = vld [vmem:[%s3919_s11 + $0x3f8] ss:$24 sps:$4 sm:$0xff]   ;;  %v3481_v33 = vld [vmem:[%s3919_s11 + $0x134] ss:$24 sps:$4 sm:$0xff]  }
  0x92   : > { %2167 = vmatprep.subr.bf16.mxu0 %v3385_v32  ;;  %v3478_v32 = vld [vmem:[%s3919_s11 + $0x42c] ss:$24 sps:$4 sm:$0xff]  }
  0x94   : > { %2211 = vmatpush1.bf16.msra.mxu1 %v3386_v36  ;;  %v3479_v36 = vld [vmem:[%s3919_s11 + $0x130] ss:$24 sps:$4 sm:$0xff]  }
  0x95   : > { %2168 = vmatpush1.bf16.msra.mxu0 %v3383_v35  ;;  %2212 = vmatprep.subr.bf16.mxu1 %v3394_v38  ;;  %v3476_v35 = vld [vmem:[%s3919_s11 + $0x428] ss:$24 sps:$4 sm:$0xff]   ;;  %v3487_v38 = vld [vmem:[%s3919_s11 + $0x164] ss:$24 sps:$4 sm:$0xff]  }
  0x96   : > { %2169 = vmatprep.subr.bf16.mxu0 %v3391_v37  ;;  %v3484_v37 = vld [vmem:[%s3919_s11 + $0x45c] ss:$24 sps:$4 sm:$0xff]  }
  0x98   : > { %2213 = vmatpush1.bf16.msra.mxu1 %v3392_v40  ;;  %v3485_v40 = vld [vmem:[%s3919_s11 + $0x160] ss:$24 sps:$4 sm:$0xff]  }
  0x99   : > { %2170 = vmatpush1.bf16.msra.mxu0 %v3389_v39  ;;  %2214 = vmatprep.subr.bf16.mxu1 %v3400_v42  ;;  %v3482_v39 = vld [vmem:[%s3919_s11 + $0x458] ss:$24 sps:$4 sm:$0xff]   ;;  %v3493_v42 = vld [vmem:[%s3919_s11 + $0x194] ss:$24 sps:$4 sm:$0xff]  }
  0x9a   : > { %2171 = vmatprep.subr.bf16.mxu0 %v3397_v41  ;;  %v3490_v41 = vld [vmem:[%s3919_s11 + $0x48c] ss:$24 sps:$4 sm:$0xff]  }
  0x9c   : > { %2215 = vmatpush1.bf16.msra.mxu1 %v3398_v44  ;;  %v3491_v44 = vld [vmem:[%s3919_s11 + $0x190] ss:$24 sps:$4 sm:$0xff]  }
  0x9d   : > { %2172 = vmatpush1.bf16.msra.mxu0 %v3395_v43  ;;  %2216 = vmatprep.subr.bf16.mxu1 %v3406_v46  ;;  %v3488_v43 = vld [vmem:[%s3919_s11 + $0x488] ss:$24 sps:$4 sm:$0xff]   ;;  %v3499_v46 = vld [vmem:[%s3919_s11 + $0x1c4] ss:$24 sps:$4 sm:$0xff]  }
  0x9e   : > { %2173 = vmatprep.subr.bf16.mxu0 %v3403_v45  ;;  %v3496_v45 = vld [vmem:[%s3919_s11 + $0x4bc] ss:$24 sps:$4 sm:$0xff]  }
  0xa0   : > { %2217 = vmatpush1.bf16.msra.mxu1 %v3404_v50  ;;  %v3497_v50 = vld [vmem:[%s3919_s11 + $0x1c0] ss:$24 sps:$4 sm:$0xff]  }
  0xa1   : > { %2174 = vmatpush1.bf16.msra.mxu0 %v3401_v47  ;;  %2218 = vmatprep.subr.bf16.mxu1 %v3412_v52  ;;  %v3494_v47 = vld [vmem:[%s3919_s11 + $0x4b8] ss:$24 sps:$4 sm:$0xff]   ;;  %v3505_v52 = vld [vmem:[%s3919_s11 + $0x1f4] ss:$24 sps:$4 sm:$0xff]  }
  0xa2   : > { %2175 = vmatprep.subr.bf16.mxu0 %v3409_v51  ;;  %v3502_v51 = vld [vmem:[%s3919_s11 + $0x4ec] ss:$24 sps:$4 sm:$0xff]  }
  0xa4   : > { %2219 = vmatpush1.bf16.msra.mxu1 %v3410_v54  ;;  %v3503_v54 = vld [vmem:[%s3919_s11 + $0x1f0] ss:$24 sps:$4 sm:$0xff]  }
  0xa5   : > { %2176 = vmatpush1.bf16.msra.mxu0 %v3407_v53  ;;  %2220 = vmatprep.subr.bf16.mxu1 %v3418_v56  ;;  %v3500_v53 = vld [vmem:[%s3919_s11 + $0x4e8] ss:$24 sps:$4 sm:$0xff]   ;;  %v3511_v56 = vld [vmem:[%s3919_s11 + $0x224] ss:$24 sps:$4 sm:$0xff]  }
  0xa6   : > { %2177 = vmatprep.subr.bf16.mxu0 %v3415_v55  ;;  %v3508_v55 = vld [vmem:[%s3919_s11 + $0x51c] ss:$24 sps:$4 sm:$0xff]  }
  0xa8   : > { %2221 = vmatpush1.bf16.msra.mxu1 %v3416_v58  ;;  %v3509_v58 = vld [vmem:[%s3919_s11 + $0x220] ss:$24 sps:$4 sm:$0xff]  }
  0xa9   : > { %2178 = vmatpush1.bf16.msra.mxu0 %v3413_v57  ;;  %2222 = vmatprep.subr.bf16.mxu1 %v3424_v60  ;;  %v3506_v57 = vld [vmem:[%s3919_s11 + $0x518] ss:$24 sps:$4 sm:$0xff]   ;;  %v3517_v60 = vld [vmem:[%s3919_s11 + $0x254] ss:$24 sps:$4 sm:$0xff]  }
  0xaa   : > { %2179 = vmatprep.subr.bf16.mxu0 %v3421_v59  ;;  %v3514_v59 = vld [vmem:[%s3919_s11 + $0x54c] ss:$24 sps:$4 sm:$0xff]  }
  0xac   : > { %2223 = vmatpush1.bf16.msra.mxu1 %v3422_v62  ;;  %v3515_v62 = vld [vmem:[%s3919_s11 + $0x250] ss:$24 sps:$4 sm:$0xff]  }
  0xad   : > { %2180 = vmatpush1.bf16.msra.mxu0 %v3419_v61  ;;  %2224 = vmatprep.subr.bf16.mxu1 %v3430_v0  ;;  %v3512_v61 = vld [vmem:[%s3919_s11 + $0x548] ss:$24 sps:$4 sm:$0xff]   ;;  %v3523_v0 = vld [vmem:[%s3919_s11 + $0x284] ss:$24 sps:$4 sm:$0xff]  }
  0xae   : > { %2181 = vmatprep.subr.bf16.mxu0 %v3427_v63  ;;  %v3520_v63 = vld [vmem:[%s3919_s11 + $0x57c] ss:$24 sps:$4 sm:$0xff]  }
  0xb0   : > { %2225 = vmatpush1.bf16.msra.mxu1 %v3428_v2  ;;  %v3521_v2 = vld [vmem:[%s3919_s11 + $0x280] ss:$24 sps:$4 sm:$0xff]  }
  0xb1   : > { %2182 = vmatpush1.bf16.msra.mxu0 %v3425_v1  ;;  %2226 = vmatprep.subr.bf16.mxu1 %v3436_v4  ;;  %v3518_v1 = vld [vmem:[%s3919_s11 + $0x578] ss:$24 sps:$4 sm:$0xff]   ;;  %v3529_v4 = vld [vmem:[%s3919_s11 + $0x2b4] ss:$24 sps:$4 sm:$0xff]  }
  0xb2   : > { %2183 = vmatprep.subr.bf16.mxu0 %v3433_v3  ;;  %v3526_v3 = vld [vmem:[%s3919_s11 + $0x5ac] ss:$24 sps:$4 sm:$0xff]  }
  0xb4   : > { %2227 = vmatpush1.bf16.msra.mxu1 %v3434_v8  ;;  %v3527_v8 = vld [vmem:[%s3919_s11 + $0x2b0] ss:$24 sps:$4 sm:$0xff]  }
  0xb5   : > { %2184 = vmatpush1.bf16.msra.mxu0 %v3431_v5  ;;  %2239 = vmatprep.subr.bf16.mxu1 %v3442_v9  ;;  %v3524_v5 = vld [vmem:[%s3919_s11 + $0x5a8] ss:$24 sps:$4 sm:$0xff]   ;;  %v3532_v9 = vld [vmem:[%s3919_s11 + $0x5dc] ss:$24 sps:$4 sm:$0xff]  }
  0xb6   : > { %2325 = vmatprep.subr.bf16.mxu0 %v3445_v10  ;;  %v3535_v10 = vld [vmem:[%s3919_s11 + $0x2e4] ss:$24 sps:$4 sm:$0xff]  }
  0xb7   : > { %2229 = vmatmul.mubr.bf16.vlgmr.msra.gmra.mrb[4].mxu1 %v4008_v6 }
  0xb8   : > { %2186 = vmatmul.mubr.bf16.vlgmr.msra.gmra.mrb[0].mxu0 %v4089_v11  ;;  %2240 = vmatpush1.bf16.msra.mxu1 %v3440_v12  ;;  %v3530_v12 = vld [vmem:[%s3919_s11 + $0x5d8] ss:$24 sps:$4 sm:$0xff]  }
  0xb9   : > { %2326 = vmatpush1.bf16.msra.mxu0 %v3443_v13  ;;  %2241 = vmatprep.subr.bf16.mxu1 %v3448_v14  ;;  %v3533_v13 = vld [vmem:[%s3919_s11 + $0x2e0] ss:$24 sps:$4 sm:$0xff]   ;;  %v3538_v14 = vld [vmem:[%s3919_s11 + $0x60c] ss:$24 sps:$4 sm:$0xff]  }
  0xba   : > { %2327 = vmatprep.subr.bf16.mxu0 %v3451_v15  ;;  %2271 = vmatprep.mubr.bf16.mxu1 %v3981_v49  ;;  %v3469_v49 = vld [vmem:[%s3919_s11 + $0xd4] ss:$24 sps:$4 sm:$0xff]  }
  0xbb   : > { %2357 = vmatprep.mubr.bf16.mxu0 %v3976_v48  ;;  %v3466_v48 = vld [vmem:[%s3919_s11 + $0x3cc] ss:$24 sps:$4 sm:$0xff]  }
  0xbc   : > { %2242 = vmatpush1.bf16.msra.mxu1 %v3446_v16  ;;  %v3541_v15 = vld [vmem:[%s3919_s11 + $0x314] ss:$24 sps:$4 sm:$0xff]   ;;  %v3536_v16 = vld [vmem:[%s3919_s11 + $0x608] ss:$24 sps:$4 sm:$0xff]  }
  0xbd   : > { %2328 = vmatpush1.bf16.msra.mxu0 %v3449_v17  ;;  %2243 = vmatprep.subr.bf16.mxu1 %v3454_v18  ;;  %v3539_v17 = vld [vmem:[%s3919_s11 + $0x310] ss:$24 sps:$4 sm:$0xff]   ;;  %v3544_v18 = vld [vmem:[%s3919_s11 + $0x63c] ss:$24 sps:$4 sm:$0xff]  }
  0xbe   : > { %2329 = vmatprep.subr.bf16.mxu0 %v3457_v19  ;;  %v3547_v19 = vld [vmem:[%s3919_s11 + $0x344] ss:$24 sps:$4 sm:$0xff]  }
  0xc0   : > { %2244 = vmatpush1.bf16.msra.mxu1 %v3452_v20  ;;  %v3542_v20 = vld [vmem:[%s3919_s11 + $0x638] ss:$24 sps:$4 sm:$0xff]  }
  0xc1   : > { %2330 = vmatpush1.bf16.msra.mxu0 %v3455_v21  ;;  %2245 = vmatprep.subr.bf16.mxu1 %v3460_v22  ;;  %v3545_v21 = vld [vmem:[%s3919_s11 + $0x340] ss:$24 sps:$4 sm:$0xff]   ;;  %v3550_v22 = vld [vmem:[%s3919_s11 + $0x66c] ss:$24 sps:$4 sm:$0xff]  }
  0xc2   : > { %2331 = vmatprep.subr.bf16.mxu0 %v3463_v23  ;;  %v3553_v23 = vld [vmem:[%s3919_s11 + $0x374] ss:$24 sps:$4 sm:$0xff]  }
  0xc4   : > { %2246 = vmatpush1.bf16.msra.mxu1 %v3458_v24  ;;  %v3551_v24 = vld [vmem:[%s3919_s11 + $0x370] ss:$24 sps:$4 sm:$0xff]  }
  0xc5   : > { %2332 = vmatpush1.bf16.msra.mxu0 %v3461_v25  ;;  %2247 = vmatprep.subr.bf16.mxu1 %v3466_v48  ;;  %v3556_v25 = vld [vmem:[%s3919_s11 + $0x69c] ss:$24 sps:$4 sm:$0xff]  }
  0xc6   : > { %2333 = vmatprep.subr.bf16.mxu0 %v3469_v49  ;;  %v3559_v48 = vld [vmem:[%s3919_s11 + $0x3a4] ss:$24 sps:$4 sm:$0xff]   ;;  %v3554_v49 = vld [vmem:[%s3919_s11 + $0x698] ss:$24 sps:$4 sm:$0xff]  }
  0xc8   : > { %2248 = vmatpush1.bf16.msra.mxu1 %v3464_v26  ;;  %v3557_v26 = vld [vmem:[%s3919_s11 + $0x3a0] ss:$24 sps:$4 sm:$0xff]  }
  0xc9   : > { %2334 = vmatpush1.bf16.msra.mxu0 %v3467_v27  ;;  %2249 = vmatprep.subr.bf16.mxu1 %v3472_v28  ;;  %v3562_v27 = vld [vmem:[%s3919_s11 + $0x6cc] ss:$24 sps:$4 sm:$0xff]  }
  0xca   : > { %2335 = vmatprep.subr.bf16.mxu0 %v3475_v29  ;;  %v3565_v28 = vld [vmem:[%s3919_s11 + $0x3d4] ss:$24 sps:$4 sm:$0xff]   ;;  %v3560_v29 = vld [vmem:[%s3919_s11 + $0x6c8] ss:$24 sps:$4 sm:$0xff]  }
  0xcc   : > { %2250 = vmatpush1.bf16.msra.mxu1 %v3470_v30  ;;  %v3563_v30 = vld [vmem:[%s3919_s11 + $0x3d0] ss:$24 sps:$4 sm:$0xff]  }
  0xcd   : > { %2336 = vmatpush1.bf16.msra.mxu0 %v3473_v31  ;;  %2251 = vmatprep.subr.bf16.mxu1 %v3478_v32  ;;  %v3568_v31 = vld [vmem:[%s3919_s11 + $0x6fc] ss:$24 sps:$4 sm:$0xff]  }
  0xce   : > { %2337 = vmatprep.subr.bf16.mxu0 %v3481_v33  ;;  %v3571_v32 = vld [vmem:[%s3919_s11 + $0x404] ss:$24 sps:$4 sm:$0xff]   ;;  %v3566_v33 = vld [vmem:[%s3919_s11 + $0x6f8] ss:$24 sps:$4 sm:$0xff]  }
  0xd0   : > { %2252 = vmatpush1.bf16.msra.mxu1 %v3476_v35  ;;  %v3569_v35 = vld [vmem:[%s3919_s11 + $0x400] ss:$24 sps:$4 sm:$0xff]  }
  0xd1   : > { %2338 = vmatpush1.bf16.msra.mxu0 %v3479_v36  ;;  %2253 = vmatprep.subr.bf16.mxu1 %v3484_v37  ;;  %v3574_v36 = vld [vmem:[%s3919_s11 + $0x72c] ss:$24 sps:$4 sm:$0xff]  }
  0xd2   : > { %2339 = vmatprep.subr.bf16.mxu0 %v3487_v38  ;;  %v3577_v37 = vld [vmem:[%s3919_s11 + $0x434] ss:$24 sps:$4 sm:$0xff]   ;;  %v3572_v38 = vld [vmem:[%s3919_s11 + $0x728] ss:$24 sps:$4 sm:$0xff]  }
  0xd4   : > { %2254 = vmatpush1.bf16.msra.mxu1 %v3482_v39  ;;  %v3575_v39 = vld [vmem:[%s3919_s11 + $0x430] ss:$24 sps:$4 sm:$0xff]  }
  0xd5   : > { %2340 = vmatpush1.bf16.msra.mxu0 %v3485_v40  ;;  %2255 = vmatprep.subr.bf16.mxu1 %v3490_v41  ;;  %v3580_v40 = vld [vmem:[%s3919_s11 + $0x75c] ss:$24 sps:$4 sm:$0xff]  }
  0xd6   : > { %2341 = vmatprep.subr.bf16.mxu0 %v3493_v42  ;;  %v3583_v41 = vld [vmem:[%s3919_s11 + $0x464] ss:$24 sps:$4 sm:$0xff]   ;;  %v3578_v42 = vld [vmem:[%s3919_s11 + $0x758] ss:$24 sps:$4 sm:$0xff]  }
  0xd8   : > { %2256 = vmatpush1.bf16.msra.mxu1 %v3488_v43  ;;  %v3581_v43 = vld [vmem:[%s3919_s11 + $0x460] ss:$24 sps:$4 sm:$0xff]  }
  0xd9   : > { %2342 = vmatpush1.bf16.msra.mxu0 %v3491_v44  ;;  %2257 = vmatprep.subr.bf16.mxu1 %v3496_v45  ;;  %v3586_v44 = vld [vmem:[%s3919_s11 + $0x78c] ss:$24 sps:$4 sm:$0xff]  }
  0xda   : > { %2343 = vmatprep.subr.bf16.mxu0 %v3499_v46  ;;  %v3589_v45 = vld [vmem:[%s3919_s11 + $0x494] ss:$24 sps:$4 sm:$0xff]   ;;  %v3584_v46 = vld [vmem:[%s3919_s11 + $0x788] ss:$24 sps:$4 sm:$0xff]  }
  0xdc   : > { %2258 = vmatpush1.bf16.msra.mxu1 %v3494_v47  ;;  %v3587_v47 = vld [vmem:[%s3919_s11 + $0x490] ss:$24 sps:$4 sm:$0xff]  }
  0xdd   : > { %2344 = vmatpush1.bf16.msra.mxu0 %v3497_v50  ;;  %2259 = vmatprep.subr.bf16.mxu1 %v3502_v51  ;;  %v3592_v50 = vld [vmem:[%s3919_s11 + $0x7bc] ss:$24 sps:$4 sm:$0xff]  }
  0xde   : > { %2345 = vmatprep.subr.bf16.mxu0 %v3505_v52  ;;  %v3595_v51 = vld [vmem:[%s3919_s11 + $0x4c4] ss:$24 sps:$4 sm:$0xff]   ;;  %v3590_v52 = vld [vmem:[%s3919_s11 + $0x7b8] ss:$24 sps:$4 sm:$0xff]  }
  0xe0   : > { %2260 = vmatpush1.bf16.msra.mxu1 %v3500_v53  ;;  %v3593_v53 = vld [vmem:[%s3919_s11 + $0x4c0] ss:$24 sps:$4 sm:$0xff]  }
  0xe1   : > { %2346 = vmatpush1.bf16.msra.mxu0 %v3503_v54  ;;  %2261 = vmatprep.subr.bf16.mxu1 %v3508_v55  ;;  %v3598_v54 = vld [vmem:[%s3919_s11 + $0x7ec] ss:$24 sps:$4 sm:$0xff]  }
  0xe2   : > { %2347 = vmatprep.subr.bf16.mxu0 %v3511_v56  ;;  %v3601_v55 = vld [vmem:[%s3919_s11 + $0x4f4] ss:$24 sps:$4 sm:$0xff]   ;;  %v3596_v56 = vld [vmem:[%s3919_s11 + $0x7e8] ss:$24 sps:$4 sm:$0xff]  }
  0xe4   : > { %2262 = vmatpush1.bf16.msra.mxu1 %v3506_v57  ;;  %v3599_v57 = vld [vmem:[%s3919_s11 + $0x4f0] ss:$24 sps:$4 sm:$0xff]  }
  0xe5   : > { %2348 = vmatpush1.bf16.msra.mxu0 %v3509_v58  ;;  %2263 = vmatprep.subr.bf16.mxu1 %v3514_v59  ;;  %v3604_v58 = vld [vmem:[%s3919_s11 + $0x81c] ss:$24 sps:$4 sm:$0xff]  }
  0xe6   : > { %2349 = vmatprep.subr.bf16.mxu0 %v3517_v60  ;;  %v3607_v59 = vld [vmem:[%s3919_s11 + $0x524] ss:$24 sps:$4 sm:$0xff]   ;;  %v3602_v60 = vld [vmem:[%s3919_s11 + $0x818] ss:$24 sps:$4 sm:$0xff]  }
  0xe8   : > { %2264 = vmatpush1.bf16.msra.mxu1 %v3512_v61  ;;  %v3605_v61 = vld [vmem:[%s3919_s11 + $0x520] ss:$24 sps:$4 sm:$0xff]  }
  0xe9   : > { %2350 = vmatpush1.bf16.msra.mxu0 %v3515_v62  ;;  %2265 = vmatprep.subr.bf16.mxu1 %v3520_v63  ;;  %v3610_v62 = vld [vmem:[%s3919_s11 + $0x84c] ss:$24 sps:$4 sm:$0xff]  }
  0xea   : > { %2351 = vmatprep.subr.bf16.mxu0 %v3523_v0  ;;  %v3613_v63 = vld [vmem:[%s3919_s11 + $0x554] ss:$24 sps:$4 sm:$0xff]   ;;  %v3608_v0 = vld [vmem:[%s3919_s11 + $0x848] ss:$24 sps:$4 sm:$0xff]  }
  0xec   : > { %2266 = vmatpush1.bf16.msra.mxu1 %v3518_v1  ;;  %v3611_v1 = vld [vmem:[%s3919_s11 + $0x550] ss:$24 sps:$4 sm:$0xff]  }
  0xed   : > { %2352 = vmatpush1.bf16.msra.mxu0 %v3521_v2  ;;  %2267 = vmatprep.subr.bf16.mxu1 %v3526_v3  ;;  %v3616_v2 = vld [vmem:[%s3919_s11 + $0x87c] ss:$24 sps:$4 sm:$0xff]  }
  0xee   : > { %2353 = vmatprep.subr.bf16.mxu0 %v3529_v4  ;;  %v3619_v3 = vld [vmem:[%s3919_s11 + $0x584] ss:$24 sps:$4 sm:$0xff]   ;;  %v3614_v4 = vld [vmem:[%s3919_s11 + $0x878] ss:$24 sps:$4 sm:$0xff]  }
  0xf0   : > { %2268 = vmatpush1.bf16.msra.mxu1 %v3524_v5  ;;  %v3617_v5 = vld [vmem:[%s3919_s11 + $0x580] ss:$24 sps:$4 sm:$0xff]  }
  0xf1   : > { %2354 = vmatpush1.bf16.msra.mxu0 %v3527_v8  ;;  %2269 = vmatprep.subr.bf16.mxu1 %v3532_v9  ;;  %v3622_v8 = vld [vmem:[%s3919_s11 + $0x8ac] ss:$24 sps:$4 sm:$0xff]  }
  0xf2   : > { %2355 = vmatprep.subr.bf16.mxu0 %v3535_v10  ;;  %v3625_v9 = vld [vmem:[%s3919_s11 + $0x5b4] ss:$24 sps:$4 sm:$0xff]   ;;  %v3620_v10 = vld [vmem:[%s3919_s11 + $0x8a8] ss:$24 sps:$4 sm:$0xff]  }
  0xf4   : > { %2270 = vmatpush1.bf16.msra.mxu1 %v3530_v12  ;;  %v3623_v12 = vld [vmem:[%s3919_s11 + $0x5b0] ss:$24 sps:$4 sm:$0xff]  }
  0xf5   : > { %2356 = vmatpush1.bf16.msra.mxu0 %v3533_v13  ;;  %2282 = vmatprep.subr.bf16.mxu1 %v3538_v14  ;;  %v3628_v13 = vld [vmem:[%s3919_s11 + $0x8dc] ss:$24 sps:$4 sm:$0xff]  }
  0xf6   : > { %2368 = vmatprep.subr.bf16.mxu0 %v3541_v15  ;;  %v3631_v14 = vld [vmem:[%s3919_s11 + $0x5e4] ss:$24 sps:$4 sm:$0xff]   ;;  %v3626_v15 = vld [vmem:[%s3919_s11 + $0x8d8] ss:$24 sps:$4 sm:$0xff]  }
  0xf7   : > { %2272 = vmatmul.mubr.bf16.vlgmr.msra.gmra.mrb[4].mxu1 %v4013_v7  ;;  %v3704_v7 = vld [vmem:[%s4324_s0 + $0xc] ss:$24 sps:$4 sm:$0xff]  }
  0xf8   : > { %2358 = vmatmul.mubr.bf16.vlgmr.msra.gmra.mrb[4].mxu0 %v4008_v6  ;;  %2283 = vmatpush1.bf16.msra.mxu1 %v3536_v16  ;;  %v3548_v6 = vld [vmem:[%s3919_s11 + $0x668] ss:$24 sps:$4 sm:$0xff]  }
  0xf9   : > { %2369 = vmatpush1.bf16.msra.mxu0 %v3539_v17  ;;  %2284 = vmatprep.subr.bf16.mxu1 %v3544_v18  ;;  %v3629_v16 = vld [vmem:[%s3919_s11 + $0x5e0] ss:$24 sps:$4 sm:$0xff]   ;;  %v3634_v17 = vld [vmem:[%s3919_s11 + $0x614] ss:$24 sps:$4 sm:$0xff]   ;;  %v3632_v18 = vld [vmem:[%s3919_s11 + $0x610] ss:$24 sps:$4 sm:$0xff]  }
  0xfa   : > { %2370 = vmatprep.subr.bf16.mxu0 %v3547_v19  ;;  %2314 = vmatprep.mubr.bf16.mxu1 %v4047_v34  ;;  %v3637_v19 = vld [vmem:[%s3919_s11 + $0x644] ss:$24 sps:$4 sm:$0xff]  }
  0xfb   : > { %2400 = vmatprep.mubr.bf16.mxu0 %v3704_v7  ;;  %v3643_v7 = vld [vmem:[%s3919_s11 + $0x6a4] ss:$24 sps:$4 sm:$0xff]  }
  0xfc   : > { %2285 = vmatpush1.bf16.msra.mxu1 %v3542_v20  ;;  %v3705_v20 = vld [vmem:[%s4324_s0 + $0x8] ss:$24 sps:$4 sm:$0xff]  }
  0xfd   : > { %2371 = vmatpush1.bf16.msra.mxu0 %v3545_v21  ;;  %2286 = vmatprep.subr.bf16.mxu1 %v3550_v22  ;;  %v3635_v21 = vld [vmem:[%s3919_s11 + $0x640] ss:$24 sps:$4 sm:$0xff]   ;;  %v3640_v22 = vld [vmem:[%s3919_s11 + $0x674] ss:$24 sps:$4 sm:$0xff]  }
  0xfe   : > { %2372 = vmatprep.subr.bf16.mxu0 %v3553_v23  ;;  %v3638_v23 = vld [vmem:[%s3919_s11 + $0x670] ss:$24 sps:$4 sm:$0xff]  }
 0x100   : > { %2287 = vmatpush1.bf16.msra.mxu1 %v3548_v6  ;;  %v3641_v6 = vld [vmem:[%s3919_s11 + $0x6a0] ss:$24 sps:$4 sm:$0xff]  }
 0x101   : > { %2373 = vmatpush1.bf16.msra.mxu0 %v3551_v24  ;;  %2288 = vmatprep.subr.bf16.mxu1 %v3556_v25  ;;  %v3646_v24 = vld [vmem:[%s3919_s11 + $0x6d4] ss:$24 sps:$4 sm:$0xff]   ;;  %v3644_v25 = vld [vmem:[%s3919_s11 + $0x6d0] ss:$24 sps:$4 sm:$0xff]  }
 0x102   : > { %2374 = vmatprep.subr.bf16.mxu0 %v3559_v48  ;;  %v3649_v48 = vld [vmem:[%s3919_s11 + $0x704] ss:$24 sps:$4 sm:$0xff]  }
 0x104   : > { %2289 = vmatpush1.bf16.msra.mxu1 %v3554_v49  ;;  %v3652_v49 = vld [vmem:[%s3919_s11 + $0x734] ss:$24 sps:$4 sm:$0xff]  }
 0x105   : > { %2375 = vmatpush1.bf16.msra.mxu0 %v3557_v26  ;;  %2290 = vmatprep.subr.bf16.mxu1 %v3562_v27 }
 0x106   : > { %2376 = vmatprep.subr.bf16.mxu0 %v3565_v28  ;;  %v3650_v28 = vld [vmem:[%s3919_s11 + $0x730] ss:$24 sps:$4 sm:$0xff]  }
 0x108   : > { %2291 = vmatpush1.bf16.msra.mxu1 %v3560_v29 }
 0x109   : > { %2377 = vmatpush1.bf16.msra.mxu0 %v3563_v30  ;;  %2292 = vmatprep.subr.bf16.mxu1 %v3568_v31  ;;  %v3655_v30 = vld [vmem:[%s3919_s11 + $0x764] ss:$24 sps:$4 sm:$0xff]  }
 0x10a   : > { %2378 = vmatprep.subr.bf16.mxu0 %v3571_v32  ;;  %v3653_v32 = vld [vmem:[%s3919_s11 + $0x760] ss:$24 sps:$4 sm:$0xff]  }
 0x10c   : > { %2293 = vmatpush1.bf16.msra.mxu1 %v3566_v33  ;;  %v3658_v33 = vld [vmem:[%s3919_s11 + $0x794] ss:$24 sps:$4 sm:$0xff]  }
 0x10d   : > { %2379 = vmatpush1.bf16.msra.mxu0 %v3569_v35  ;;  %2294 = vmatprep.subr.bf16.mxu1 %v3574_v36  ;;  %v3656_v35 = vld [vmem:[%s3919_s11 + $0x790] ss:$24 sps:$4 sm:$0xff]   ;;  %v3661_v36 = vld [vmem:[%s3919_s11 + $0x7c4] ss:$24 sps:$4 sm:$0xff]  }
 0x10e   : > { %2380 = vmatprep.subr.bf16.mxu0 %v3577_v37  ;;  %v3659_v37 = vld [vmem:[%s3919_s11 + $0x7c0] ss:$24 sps:$4 sm:$0xff]  }
 0x110   : > { %2295 = vmatpush1.bf16.msra.mxu1 %v3572_v38  ;;  %v3664_v38 = vld [vmem:[%s3919_s11 + $0x7f4] ss:$24 sps:$4 sm:$0xff]  }
 0x111   : > { %2381 = vmatpush1.bf16.msra.mxu0 %v3575_v39  ;;  %2296 = vmatprep.subr.bf16.mxu1 %v3580_v40  ;;  %v3662_v39 = vld [vmem:[%s3919_s11 + $0x7f0] ss:$24 sps:$4 sm:$0xff]   ;;  %v3667_v40 = vld [vmem:[%s3919_s11 + $0x824] ss:$24 sps:$4 sm:$0xff]  }
 0x112   : > { %2382 = vmatprep.subr.bf16.mxu0 %v3583_v41  ;;  %v3665_v41 = vld [vmem:[%s3919_s11 + $0x820] ss:$24 sps:$4 sm:$0xff]  }
 0x114   : > { %2297 = vmatpush1.bf16.msra.mxu1 %v3578_v42  ;;  %v3670_v42 = vld [vmem:[%s3919_s11 + $0x854] ss:$24 sps:$4 sm:$0xff]  }
 0x115   : > { %2383 = vmatpush1.bf16.msra.mxu0 %v3581_v43  ;;  %2298 = vmatprep.subr.bf16.mxu1 %v3586_v44  ;;  %v3668_v43 = vld [vmem:[%s3919_s11 + $0x850] ss:$24 sps:$4 sm:$0xff]   ;;  %v3673_v44 = vld [vmem:[%s3919_s11 + $0x884] ss:$24 sps:$4 sm:$0xff]  }
 0x116   : > { %2384 = vmatprep.subr.bf16.mxu0 %v3589_v45  ;;  %v3671_v45 = vld [vmem:[%s3919_s11 + $0x880] ss:$24 sps:$4 sm:$0xff]  }
 0x118   : > { %2299 = vmatpush1.bf16.msra.mxu1 %v3584_v46  ;;  %v3676_v46 = vld [vmem:[%s3919_s11 + $0x8b4] ss:$24 sps:$4 sm:$0xff]  }
 0x119   : > { %2385 = vmatpush1.bf16.msra.mxu0 %v3587_v47  ;;  %2300 = vmatprep.subr.bf16.mxu1 %v3592_v50  ;;  %v3674_v47 = vld [vmem:[%s3919_s11 + $0x8b0] ss:$24 sps:$4 sm:$0xff]   ;;  %v3679_v50 = vld [vmem:[%s3919_s11 + $0x8e4] ss:$24 sps:$4 sm:$0xff]  }
 0x11a   : > { %2386 = vmatprep.subr.bf16.mxu0 %v3595_v51  ;;  %v3677_v51 = vld [vmem:[%s3919_s11 + $0x8e0] ss:$24 sps:$4 sm:$0xff]  }
 0x11c   : > { %2301 = vmatpush1.bf16.msra.mxu1 %v3590_v52  ;;  %v2495_v52 = vlaneseq }
 0x11d   : > { %2387 = vmatpush1.bf16.msra.mxu0 %v3593_v53  ;;  %2302 = vmatprep.subr.bf16.mxu1 %v3598_v54 }
 0x11e   : > { %2388 = vmatprep.subr.bf16.mxu0 %v3601_v55  ;;  %v4266_v53 = vshrl.u32 %v2495_v52, 7  ;;  %v4272_v55 = vld [vmem:[%s271_s5] sm:$0x3f] }
 0x120   : > { %2303 = vmatpush1.bf16.msra.mxu1 %v3596_v56  ;;  %v2497_v54 = vsub.s32 0, %v4266_v53  ;;  %v2501_v56 = vsub.s32 1, %v4266_v53 }
 0x121   : > { %2389 = vmatpush1.bf16.msra.mxu0 %v3599_v57  ;;  %2304 = vmatprep.subr.bf16.mxu1 %v3604_v58 }
 0x122   : > { %2390 = vmatprep.subr.bf16.mxu0 %v3607_v59  ;;  %v2498_v57 = vrot.slane %v4272_v55, %v2497_v54 }
 0x124   : > { %2305 = vmatpush1.bf16.msra.mxu1 %v3602_v60 }
 0x125   : > { %2391 = vmatpush1.bf16.msra.mxu0 %v3605_v61  ;;  %2306 = vmatprep.subr.bf16.mxu1 %v3610_v62 }
 0x126   : > { %2392 = vmatprep.subr.bf16.mxu0 %v3613_v63 }
 0x128   : > { %2307 = vmatpush1.bf16.msra.mxu1 %v3608_v0 }
 0x129   : > { %2393 = vmatpush1.bf16.msra.mxu0 %v3611_v1  ;;  %2308 = vmatprep.subr.bf16.mxu1 %v3616_v2 }
 0x12a   : > { %2394 = vmatprep.subr.bf16.mxu0 %v3619_v3 }
 0x12c   : > { %2309 = vmatpush1.bf16.msra.mxu1 %v3614_v4 }
 0x12d   : > { %2395 = vmatpush1.bf16.msra.mxu0 %v3617_v5  ;;  %2310 = vmatprep.subr.bf16.mxu1 %v3622_v8 }
 0x12e   : > { %2396 = vmatprep.subr.bf16.mxu0 %v3625_v9 }
 0x130   : > { %2311 = vmatpush1.bf16.msra.mxu1 %v3620_v10 }
 0x131   : > { %2397 = vmatpush1.bf16.msra.mxu0 %v3623_v12  ;;  %2312 = vmatprep.subr.bf16.mxu1 %v3628_v13 }
 0x132   : > { %2398 = vmatprep.subr.bf16.mxu0 %v3631_v14 }
 0x134   : > { %2313 = vmatpush1.bf16.msra.mxu1 %v3626_v15 }
 0x135   : > { %2399 = vmatpush1.bf16.msra.mxu0 %v3629_v16 }
 0x136   : > { %2411 = vmatprep.subr.bf16.mxu0 %v3634_v17 }
 0x137   : > { %2315 = vmatmul.mubr.bf16.vlgmr.msra.gmra.mrb[4].mxu1 %v4089_v11 }
 0x138   : > { %2401 = vmatmul.mubr.bf16.vlgmr.msra.gmra.mrb[4].mxu0 %v3705_v20 }
 0x139   : > { %2412 = vmatpush1.bf16.msra.mxu0 %v3632_v18  ;;  %2443 = vmatprep.mubr.bf16.mxu0 %v4047_v34  ;;  %v3647_v34 = vld [vmem:[%s3919_s11 + $0x700] ss:$24 sps:$4 sm:$0xff]   ;;  %s3180_s11 = smul.u32 48, %s3915_s6 }
 0x13a   : > { %2413 = vmatprep.subr.bf16.mxu0 %v3637_v19  ;;  %s3153_s6 = smul.u32 (%p4333_p9), 24, %s3778_s15 }
 0x13b   : > { %s4278_s7 = scalar_lea.vmem [#allocation5], %s3180_s11 }
 0x13c   : > { %s2699_s18 = scalar_lea.vmem (%p4333_p9), %s4327_s3, %s3153_s6 }
 0x13d   : > { %2414 = vmatpush1.bf16.msra.mxu0 %v3635_v21 }
 0x13e   : > { %2415 = vmatprep.subr.bf16.mxu0 %v3640_v22 }
 0x141   : > { %2416 = vmatpush1.bf16.msra.mxu0 %v3638_v23 }
 0x142   : > { %2417 = vmatprep.subr.bf16.mxu0 %v3643_v7 }
 0x145   : > { %2418 = vmatpush1.bf16.msra.mxu0 %v3641_v6 }
 0x146   : > { %2419 = vmatprep.subr.bf16.mxu0 %v3646_v24 }
 0x149   : > { %2420 = vmatpush1.bf16.msra.mxu0 %v3644_v25 }
 0x14a   : > { %2421 = vmatprep.subr.bf16.mxu0 %v3649_v48  ;;  %v2101_v26 = vpop.f32.mrb[0].mxu1 }
 0x14b   : > { %v2103_v27 = vpop.f32.mrb[1].mxu1 }
 0x14c   : > { %v2105_v29 = vpop.f32.mrb[2].mxu1 }
 0x14d   : > { %2422 = vmatpush1.bf16.msra.mxu0 %v3647_v34  ;;  %v2107_v31 = vpop.f32.mrb[3].mxu1 }
 0x14e   : > { %2423 = vmatprep.subr.bf16.mxu0 %v3652_v49 }
 0x151   : > { %2424 = vmatpush1.bf16.msra.mxu0 %v3650_v28 }
 0x152   : > { %2425 = vmatprep.subr.bf16.mxu0 %v3655_v30 }
 0x155   : > { %2426 = vmatpush1.bf16.msra.mxu0 %v3653_v32 }
 0x156   : > { %2427 = vmatprep.subr.bf16.mxu0 %v3658_v33 }
 0x159   : > { %2428 = vmatpush1.bf16.msra.mxu0 %v3656_v35 }
 0x15a   : > { %2429 = vmatprep.subr.bf16.mxu0 %v3661_v36 }
 0x15d   : > { %2430 = vmatpush1.bf16.msra.mxu0 %v3659_v37 }
 0x15e   : > { %2431 = vmatprep.subr.bf16.mxu0 %v3664_v38 }
 0x161   : > { %2432 = vmatpush1.bf16.msra.mxu0 %v3662_v39 }
 0x162   : > { %2433 = vmatprep.subr.bf16.mxu0 %v3667_v40 }
 0x165   : > { %2434 = vmatpush1.bf16.msra.mxu0 %v3665_v41 }
 0x166   : > { %2435 = vmatprep.subr.bf16.mxu0 %v3670_v42 }
 0x169   : > { %2436 = vmatpush1.bf16.msra.mxu0 %v3668_v43  ;;  %v2505_v43 = vsub.s32 2, %v4266_v53 }
 0x16a   : > { %2437 = vmatprep.subr.bf16.mxu0 %v3673_v44  ;;  %v2509_v44 = vsub.s32 3, %v4266_v53 }
 0x16d   : > { %2438 = vmatpush1.bf16.msra.mxu0 %v3671_v45  ;;  %v2506_v45 = vrot.slane %v4272_v55, %v2505_v43 }
 0x16e   : > { %2439 = vmatprep.subr.bf16.mxu0 %v3676_v46  ;;  %v2510_v46 = vrot.slane %v4272_v55, %v2509_v44 }
 0x171   : > { %2440 = vmatpush1.bf16.msra.mxu0 %v3674_v47 }
 0x172   : > { %2441 = vmatprep.subr.bf16.mxu0 %v3679_v50 }
 0x175   : > { %2442 = vmatpush1.bf16.msra.mxu0 %v3677_v51 }
 0x178   : > { %2444 = vmatmul.mubr.bf16.vlgmr.msra.gmra.mrb[4].mxu0 %v4089_v11  ;;  %v2502_v11 = vrot.slane %v4272_v55, %v2501_v56 }
 0x18b   : > { %v2187_v58 = vpop.f32.mrb[0].mxu0 }
 0x18c   : > { %v3154_v59 = vadd.f32 %v2187_v58, %v2101_v26  ;;  %v2189_v60 = vpop.f32.mrb[1].mxu0 }
 0x18d   : > { %v3155_v61 = vadd.f32 %v2189_v60, %v2103_v27  ;;  %v2191_v62 = vpop.f32.mrb[2].mxu0 }
 0x18e   : > { %v2525_v63 = vadd.f32 %v3154_v59, %v2498_v57  ;;  %v3156_v0 = vadd.f32 %v2191_v62, %v2105_v29  ;;  %v2193_v1 = vpop.f32.mrb[3].mxu0 }
 0x18f   : > { %v2526_v2 = vadd.f32 %v3155_v61, %v2502_v11  ;;  %v3157_v3 = vadd.f32 %v2193_v1, %v2107_v31 }
 0x190   : > { %v2549_v4 = vmul.f32 0.044715, %v2525_v63  ;;  %v2531_v5 = vadd.f32 %v3156_v0, %v2498_v57  ;;  %v2537_v26 = vmul.f32 0.5, %v2525_v63 }
 0x191   : > { %v2550_v8 = vmul.f32 0.044715, %v2526_v2  ;;  %v2532_v9 = vadd.f32 %v3157_v3, %v2502_v11  ;;  %v2538_v29 = vmul.f32 0.5, %v2526_v2 }
 0x192   : > { %v2561_v10 = vmul.f32 %v2549_v4, %v2525_v63  ;;  %v2555_v12 = vmul.f32 0.044715, %v2531_v5  ;;  %v2543_v33 = vmul.f32 0.5, %v2531_v5 }
 0x193   : > { %v2562_v13 = vmul.f32 %v2550_v8, %v2526_v2  ;;  %v2556_v14 = vmul.f32 0.044715, %v2532_v9  ;;  %v2544_v37 = vmul.f32 0.5, %v2532_v9 }
 0x194   : > { %v2573_v15 = vmul.f32 %v2561_v10, %v2525_v63  ;;  %v2567_v16 = vmul.f32 %v2555_v12, %v2531_v5 }
 0x195   : > { %v2574_v17 = vmul.f32 %v2562_v13, %v2526_v2  ;;  %v2568_v18 = vmul.f32 %v2556_v14, %v2532_v9 }
 0x196   : > { %v2585_v19 = vadd.f32 %v2573_v15, %v2525_v63  ;;  %v2579_v20 = vmul.f32 %v2567_v16, %v2531_v5 }
 0x197   : > { %v2586_v21 = vadd.f32 %v2574_v17, %v2526_v2  ;;  %v2580_v22 = vmul.f32 %v2568_v18, %v2532_v9 }
 0x198   : > { %v2597_v23 = vmul.f32 0.7978846, %v2585_v19  ;;  %v2591_v7 = vadd.f32 %v2579_v20, %v2531_v5 }
 0x199   : > { %v2598_v6 = vmul.f32 0.7978846, %v2586_v21  ;;  %v2592_v24 = vadd.f32 %v2580_v22, %v2532_v9 }
 0x19a   : > { %3680 = vtanh.f32 %v2597_v23  ;;  %v2603_v25 = vmul.f32 0.7978846, %v2591_v7 }
 0x19b   : > { %3682 = vtanh.f32 %v2598_v6  ;;  %v2604_v48 = vmul.f32 0.7978846, %v2592_v24 }
 0x19c   : > { %3684 = vtanh.f32 %v2603_v25 }
 0x19d   : > { %3686 = vtanh.f32 %v2604_v48 }
 0x1a4   : > { %v3681_v34 = vpop.eup %3680 }
 0x1a5   : > { %v3683_v49 = vpop.eup %3682  ;;  %v2621_v27 = vadd.f32 1.0, %v3681_v34 }
 0x1a6   : > { %v3685_v28 = vpop.eup %3684  ;;  %v2622_v30 = vadd.f32 1.0, %v3683_v49 }
 0x1a7   : > { %v3687_v31 = vpop.eup %3686  ;;  %v2633_v32 = vmul.f32 %v2621_v27, %v2537_v26  ;;  %v2627_v35 = vadd.f32 1.0, %v3685_v28 }
 0x1a8   : > { %v2634_v36 = vmul.f32 %v2622_v30, %v2538_v29  ;;  %v2628_v38 = vadd.f32 1.0, %v3687_v31  ;;  %v2513_v30 = vsub.s32 4, %v4266_v53  ;;  %v2517_v31 = vsub.s32 5, %v4266_v53 }
 0x1a9   : > { %v2639_v39 = vmul.f32 %v2627_v35, %v2543_v33 }
 0x1aa   : > { %v3147_v40 = vpack.c.bf16 %v2634_v36, %v2633_v32  ;;  %v2640_v41 = vmul.f32 %v2628_v38, %v2544_v37  ;;  %v2514_v32 = vrot.slane %v4272_v55, %v2513_v30  ;;  %v2518_v33 = vrot.slane %v4272_v55, %v2517_v31 }
 0x1ac   : > { %2681 = vst [vmem:[%s4278_s7] sm:$0xff] %v3147_v40  ;;  %v3150_v42 = vpack.c.bf16 %v2640_v41, %v2639_v39 }
 0x1ae   : > { %2684 = vst [vmem:[%s4278_s7 + $0x18] sm:$0xff] %v3150_v42 }
 0x20a   : > { %v2316_v47 = vpop.f32.mrb[4].mxu1 }
 0x20b   : > { %v2527_v50 = vadd.f32 %v2506_v45, %v2316_v47  ;;  %v2318_v51 = vpop.f32.mrb[5].mxu1 }
 0x20c   : > { %v2528_v52 = vadd.f32 %v2510_v46, %v2318_v51  ;;  %v2320_v54 = vpop.f32.mrb[6].mxu1 }
 0x20d   : > { %v2551_v56 = vmul.f32 0.044715, %v2527_v50  ;;  %v2533_v57 = vadd.f32 %v2506_v45, %v2320_v54  ;;  %v2322_v58 = vpop.f32.mrb[7].mxu1  ;;  %v2539_v19 = vmul.f32 0.5, %v2527_v50 }
 0x20e   : > { %v2552_v11 = vmul.f32 0.044715, %v2528_v52  ;;  %v2534_v59 = vadd.f32 %v2510_v46, %v2322_v58  ;;  %v2540_v22 = vmul.f32 0.5, %v2528_v52 }
 0x20f   : > { %v2563_v60 = vmul.f32 %v2551_v56, %v2527_v50  ;;  %v2557_v61 = vmul.f32 0.044715, %v2533_v57  ;;  %v2545_v24 = vmul.f32 0.5, %v2533_v57 }
 0x210   : > { %v2564_v62 = vmul.f32 %v2552_v11, %v2528_v52  ;;  %v2558_v63 = vmul.f32 0.044715, %v2534_v59  ;;  %v2546_v34 = vmul.f32 0.5, %v2534_v59 }
 0x211   : > { %v2575_v0 = vmul.f32 %v2563_v60, %v2527_v50  ;;  %v2569_v1 = vmul.f32 %v2557_v61, %v2533_v57 }
 0x212   : > { %v2576_v2 = vmul.f32 %v2564_v62, %v2528_v52  ;;  %v2570_v3 = vmul.f32 %v2558_v63, %v2534_v59 }
 0x213   : > { %v2587_v4 = vadd.f32 %v2575_v0, %v2527_v50  ;;  %v2581_v5 = vmul.f32 %v2569_v1, %v2533_v57 }
 0x214   : > { %v2588_v8 = vadd.f32 %v2576_v2, %v2528_v52  ;;  %v2582_v9 = vmul.f32 %v2570_v3, %v2534_v59 }
 0x215   : > { %v2599_v10 = vmul.f32 0.7978846, %v2587_v4  ;;  %v2593_v12 = vadd.f32 %v2581_v5, %v2533_v57 }
 0x216   : > { %v2600_v13 = vmul.f32 0.7978846, %v2588_v8  ;;  %v2594_v14 = vadd.f32 %v2582_v9, %v2534_v59 }
 0x217   : > { %3688 = vtanh.f32 %v2599_v10  ;;  %v2605_v15 = vmul.f32 0.7978846, %v2593_v12 }
 0x218   : > { %3690 = vtanh.f32 %v2600_v13  ;;  %v2606_v16 = vmul.f32 0.7978846, %v2594_v14 }
 0x219   : > { %3692 = vtanh.f32 %v2605_v15 }
 0x21a   : > { %3694 = vtanh.f32 %v2606_v16 }
 0x221   : > { %v3689_v17 = vpop.eup %3688 }
 0x222   : > { %v3691_v18 = vpop.eup %3690  ;;  %v2623_v20 = vadd.f32 1.0, %v3689_v17 }
 0x223   : > { %v3693_v21 = vpop.eup %3692  ;;  %v2624_v23 = vadd.f32 1.0, %v3691_v18 }
 0x224   : > { %v3695_v7 = vpop.eup %3694  ;;  %v2635_v6 = vmul.f32 %v2623_v20, %v2539_v19  ;;  %v2629_v25 = vadd.f32 1.0, %v3693_v21  ;;  %v2712_v21 = vld [vmem:[%s4278_s7] sm:$0xff] (%p4333_p9) }
 0x225   : > { %v2636_v48 = vmul.f32 %v2624_v23, %v2540_v22  ;;  %v2630_v49 = vadd.f32 1.0, %v3695_v7  ;;  %v2718_v7 = vld [vmem:[%s4278_s7 + $0x18] sm:$0xff] (%p4333_p9)  ;;  %2713 = vst [vmem:[%s2699_s18] sm:$0xff] (%p4333_p9), %v2712_v21 }
 0x226   : > { %v2641_v26 = vmul.f32 %v2629_v25, %v2545_v24  ;;  %2719 = vst [vmem:[%s2699_s18 + $0x60] sm:$0xff] (%p4333_p9), %v2718_v7 }
 0x227   : > { %v3148_v27 = vpack.c.bf16 %v2636_v48, %v2635_v6  ;;  %v2642_v28 = vmul.f32 %v2630_v49, %v2546_v34 }
 0x229   : > { %2682 = vst [vmem:[%s4278_s7 + $0x8] sm:$0xff] %v3148_v27  ;;  %v3151_v29 = vpack.c.bf16 %v2642_v28, %v2641_v26 }
 0x22b   : > { %2685 = vst [vmem:[%s4278_s7 + $0x20] sm:$0xff] %v3151_v29 }
 0x230   : > { %v2714_v22 = vld [vmem:[%s4278_s7 + $0x8] sm:$0xff] (%p4333_p9) }
 0x231   : > { %2715 = vst [vmem:[%s2699_s18 + $0x8] sm:$0xff] (%p4333_p9), %v2714_v22 }
 0x232   : > { %v2720_v6 = vld [vmem:[%s4278_s7 + $0x20] sm:$0xff] (%p4333_p9) }
 0x233   : > { %2721 = vst [vmem:[%s2699_s18 + $0x68] sm:$0xff] (%p4333_p9), %v2720_v6 }
 0x24b   : > { %v2445_v35 = vpop.f32.mrb[4].mxu0 }
 0x24c   : > { %v2529_v36 = vadd.f32 %v2514_v32, %v2445_v35  ;;  %v2447_v37 = vpop.f32.mrb[5].mxu0 }
 0x24d   : > { %v2530_v38 = vadd.f32 %v2518_v33, %v2447_v37  ;;  %v2449_v39 = vpop.f32.mrb[6].mxu0 }
 0x24e   : > { %v2553_v40 = vmul.f32 0.044715, %v2529_v36  ;;  %v2535_v41 = vadd.f32 %v2514_v32, %v2449_v39  ;;  %v2451_v42 = vpop.f32.mrb[7].mxu0  ;;  %v2541_v2 = vmul.f32 0.5, %v2529_v36 }
 0x24f   : > { %v2554_v43 = vmul.f32 0.044715, %v2530_v38  ;;  %v2536_v44 = vadd.f32 %v2518_v33, %v2451_v42  ;;  %v2542_v5 = vmul.f32 0.5, %v2530_v38 }
 0x250   : > { %v2565_v45 = vmul.f32 %v2553_v40, %v2529_v36  ;;  %v2559_v46 = vmul.f32 0.044715, %v2535_v41  ;;  %v2547_v12 = vmul.f32 0.5, %v2535_v41 }
 0x251   : > { %v2566_v47 = vmul.f32 %v2554_v43, %v2530_v38  ;;  %v2560_v50 = vmul.f32 0.044715, %v2536_v44  ;;  %v2548_v15 = vmul.f32 0.5, %v2536_v44 }
 0x252   : > { %v2577_v51 = vmul.f32 %v2565_v45, %v2529_v36  ;;  %v2571_v53 = vmul.f32 %v2559_v46, %v2535_v41 }
 0x253   : > { %v2578_v52 = vmul.f32 %v2566_v47, %v2530_v38  ;;  %v2572_v54 = vmul.f32 %v2560_v50, %v2536_v44 }
 0x254   : > { %v2589_v56 = vadd.f32 %v2577_v51, %v2529_v36  ;;  %v2583_v55 = vmul.f32 %v2571_v53, %v2535_v41 }
 0x255   : > { %v2590_v57 = vadd.f32 %v2578_v52, %v2530_v38  ;;  %v2584_v58 = vmul.f32 %v2572_v54, %v2536_v44 }
 0x256   : > { %v2601_v11 = vmul.f32 0.7978846, %v2589_v56  ;;  %v2595_v59 = vadd.f32 %v2583_v55, %v2535_v41 }
 0x257   : > { %v2602_v60 = vmul.f32 0.7978846, %v2590_v57  ;;  %v2596_v61 = vadd.f32 %v2584_v58, %v2536_v44 }
 0x258   : > { %3696 = vtanh.f32 %v2601_v11  ;;  %v2607_v62 = vmul.f32 0.7978846, %v2595_v59 }
 0x259   : > { %3698 = vtanh.f32 %v2602_v60  ;;  %v2608_v63 = vmul.f32 0.7978846, %v2596_v61 }
 0x25a   : > { %3700 = vtanh.f32 %v2607_v62 }
 0x25b   : > { %3702 = vtanh.f32 %v2608_v63 }
 0x262   : > { %v3697_v0 = vpop.eup %3696 }
 0x263   : > { %v3699_v1 = vpop.eup %3698  ;;  %v2625_v3 = vadd.f32 1.0, %v3697_v0 }
 0x264   : > { %v3701_v4 = vpop.eup %3700  ;;  %v2626_v8 = vadd.f32 1.0, %v3699_v1 }
 0x265   : > { %v3703_v9 = vpop.eup %3702  ;;  %v2637_v10 = vmul.f32 %v2625_v3, %v2541_v2  ;;  %v2631_v13 = vadd.f32 1.0, %v3701_v4 }
 0x266   : > { %v2638_v14 = vmul.f32 %v2626_v8, %v2542_v5  ;;  %v2632_v16 = vadd.f32 1.0, %v3703_v9  ;;  %2693 = sbr.rel (!%p4333_p9) target bundleno = 629 (0x275), region = 48 }
 0x267   : > { %v2643_v17 = vmul.f32 %v2631_v13, %v2547_v12 }
 0x268   : > { %v3149_v18 = vpack.c.bf16 %v2638_v14, %v2637_v10  ;;  %v2644_v19 = vmul.f32 %v2632_v16, %v2548_v15 }
 0x26a   : > { %2683 = vst [vmem:[%s4278_s7 + $0x10] sm:$0xff] %v3149_v18  ;;  %v3152_v20 = vpack.c.bf16 %v2644_v19, %v2643_v17 }
 0x26c   : > { %2686 = vst [vmem:[%s4278_s7 + $0x28] sm:$0xff] %v3152_v20 }
 0x271   : > { %v2716_v23 = vld [vmem:[%s4278_s7 + $0x10] sm:$0xff] }
 0x272   : > { %2717 = vst [vmem:[%s2699_s18 + $0x10] sm:$0xff] %v2716_v23 }
 0x273   : > { %v2722_v24 = vld [vmem:[%s4278_s7 + $0x28] sm:$0xff] }
 0x274   : > { %2723 = vst [vmem:[%s2699_s18 + $0x70] sm:$0xff] %v2722_v24 }
 0x275 PF: > { %s16_s17 = sadd.s32 1, %s3786_s17   ;;  %s4334_s12 = smov %s3770_s13 }
 0x276   : > { %p13_p11 = scmp.ge.s32.totalorder %s16_s17, 6   ;;  %s4335_s13 = smov %s3774_s14 }
 0x277   : > { %s4336_s14 = smov %s3860_s24  ;;  %s4337_s15 = smov %s3782_s16 }
 0x278   : > { %s4338_s16 = smov %s4340_s19  ;;  %15 = sbr.rel (!%p13_p11) target bundleno = 4 (0x4), region = 109 }
 0x27f   :  { %2739 = vsyncpa [#allocation4], 1 }
 0x280   :  { %2741 = vsyncpa [#allocation4 + $0x1], 1 }

// kernel: model_forward.92
= control target key start
LH: loop header
LB: loop body
LE: loop exit
PB: predicated region body
PF: predicated region fallthrough
CT: control target
= control target key end

     0   :  { %8 = vsyncpa [#allocation5], 0  ;;  %s4160_s0 = inlined_call_operand.vmem [shape: bf16[16,3072], index: 0, kind: input, shape index: {}]   ;;  %s4161_s1 = inlined_call_operand.hbm [shape: bf16[3072,768], index: 1, kind: input, shape index: {}]   ;;  %s4162_s2 = inlined_call_operand.vmem [shape: f32[1,768], index: 2, kind: input, shape index: {}]   ;;  %s4163_s3 = inlined_call_operand.vmem [shape: bf16[16,768], index: 3, kind: output, shape index: {}]  }
   0x1   :  { %10 = vsyncpa [#allocation5 + $0x1], 0  ;;  %s3693_s12 = smov 0   ;;  %s3695_s13 = smov 0  }
   0x2   :  { %s3697_s14 = smov 0   ;;  %s3699_s15 = smov 0  }
   0x3   :  { %s3701_s16 = smov 0   ;;  %s3703_s17 = smov 0  }
   0x4 LB: > { %s2743_s18 = sadd.s32 4294967295, %s3667_s17   ;;  %s28_s19 = sadd.s32 1, %s3663_s16  ;;  %s3667_s17 = sphi %s3703_s17, %s16_s17   ;;  %s3663_s16 = sphi %s3701_s16, %s4170_s16   ;;  %s3659_s15 = sphi %s3699_s15, %s4169_s15   ;;  %s3655_s14 = sphi %s3697_s14, %s4168_s14   ;;  %s3651_s13 = sphi %s3695_s13, %s4167_s13   ;;  %s3647_s12 = sphi %s3693_s12, %s4166_s12  }
   0x5   : > { %p29_p0 = scmp.ge.s32.totalorder %s28_s19, 4  ;;  %s44_s20 = sadd.s32 1, %s3655_s14 }
   0x6   : > { %p51_p1 = scmp.ne.s32.totalorder %s3655_s14, %s3651_s13  ;;  %p52_p2 = scmp.eq.s32.totalorder %s3667_s17, 0 }
   0x7   : > { %s4172_s19 = smov (%p29_p0, %s28_s19), 0  ;;  %p85_p4 = scmp.ne.s32.totalorder %s3651_s13, %s3647_s12 }
   0x8   : > { %p3729_p3 = por %p52_p2, %p51_p1  ;;  %s40_s22 = ssub.s32 %s3663_s16, %s4172_s19 }
   0x9   : > { %p86_p5 = scmp.eq.s32.totalorder %s2743_s18, 0  ;;  %p42_p6 = scmp.eq.s32.totalorder %s40_s22, 0 }
   0xa   : > { %p2746_p8 = scmp.ge.s32.totalorder %s3667_s17, 4 }
   0xb   : > { %p3736_p7 = por %p86_p5, %p85_p4 }
   0xc   : > { %s3741_s24 = scalar_select %p42_p6, %s3655_s14, %s44_s20  }
   0xd   : > { %167 = sbr.rel (%p2746_p8) target bundleno = 54 (0x36), region = 20 }
  0x14   : > { %170 = sbr.rel (!%p3729_p3) target bundleno = 28 (0x1c), region = 24  ;;  %s172_s25 = sand.u32 (%p3729_p3), 1, %s3655_s14  }
  0x15   : > { %s3056_s26 = smul.u32 (%p3729_p3), 24, %s3663_s16 }
  0x16   : > { %s3087_s27 = smul.u32 (%p3729_p3), 48, %s172_s25 }
  0x17   : > { %s180_s30 = scalar_lea.vmem (%p3729_p3), %s4160_s0, %s3056_s26 }
  0x18   : > { %v193_v0 = vld [vmem:[%s180_s30] sm:$0xff] (%p3729_p3)  ;;  %v195_v1 = vld [vmem:[%s180_s30 + $0x8] sm:$0xff] (%p3729_p3)  ;;  %v197_v2 = vld [vmem:[%s180_s30 + $0x10] sm:$0xff] (%p3729_p3)  ;;  %s174_s4 = scalar_lea.vmem (%p3729_p3), [#allocation3], %s3087_s27 }
  0x19   : > { %194 = vst [vmem:[%s174_s4] sm:$0xff] (%p3729_p3), %v193_v0  ;;  %196 = vst [vmem:[%s174_s4 + $0x8] sm:$0xff] (%p3729_p3), %v195_v1  ;;  %v199_v3 = vld [vmem:[%s180_s30 + $0x60] sm:$0xff] (%p3729_p3)  ;;  %v201_v4 = vld [vmem:[%s180_s30 + $0x68] sm:$0xff] (%p3729_p3) }
  0x1a   : > { %198 = vst [vmem:[%s174_s4 + $0x10] sm:$0xff] (%p3729_p3), %v197_v2  ;;  %v203_v5 = vld [vmem:[%s180_s30 + $0x70] sm:$0xff] (%p3729_p3)  ;;  %200 = vst [vmem:[%s174_s4 + $0x18] sm:$0xff] (%p3729_p3), %v199_v3 }
  0x1b   : > { %202 = vst [vmem:[%s174_s4 + $0x20] sm:$0xff] %v201_v4  ;;  %204 = vst [vmem:[%s174_s4 + $0x28] sm:$0xff] %v203_v5 }
  0x1c PF: > { %s211_s5 = sand.u32 1, %s3655_s14   ;;  %s3094_s7 = smul.u32 36864, %s3663_s16 }
  0x1d   : > { %s3088_s6 = smul.u32 2304, %s211_s5  ;;  %s3760_s18 = scalar_lea.sflag [#allocation5], %s211_s5 }
  0x1e   : > { %s3756_s10 = scalar_lea.hbm %s4161_s1, %s3094_s7  ;;  %s3593_s26 = scalar_lea.hbm %s4161_s1, 147456 }
  0x1f   : > { %s215_s11 = scalar_lea.vmem [#allocation4], %s3088_s6  ;;  %s3589_s20 = scalar_lea.hbm %s3756_s10, 36864 }
  0x20   : > { %s225_s12 = sshll.u32 %s215_s11, 4  ;;  %p3590_p9 = scmp.ne.s32.totalorder %s3756_s10, %s3589_s20  ;;  %s3758_s12 = int_to_ptr.vmem [resolvable:$true] %s225_s12 }
  0x21   : > { %p3594_p12 = scmp.lt.u32.totalorder %s3756_s10, %s4161_s1  ;;  %p3595_p13 = scmp.lt.u32.totalorder %s3593_s26, %s3589_s20 }
  0x22   : > { %p3591_p10 = pnand %p3590_p9, %p3729_p3  ;;  %p3597_p1 = scmp.lt.u32.totalorder %s3589_s20, %s3756_s10 }
  0x23   : > { %p3596_p0 = por %p3595_p13, %p3594_p12 }
  0x24   : > { %p3592_p11 = pneg %p3591_p10 }
  0x25   : > { %p3598_p2 = por %p3597_p1, %p3596_p0 }
  0x27   : > { %p3599_p4 = pnand %p3598_p2, %p3592_p11 }
  0x29   : > { %3602 = shalt.err (!%p3599_p4)
}
  0x2a   : > { %s3603_s29 = scalar_lea.vmem %s3758_s12, 36864  ;;  %s3669_s30 = smov [#allocation4]  }
  0x2b   : > { %p3604_p5 = scmp.ne.s32.totalorder %s3758_s12, %s3603_s29  ;;  %s3607_s4 = sshll.u32 %s3669_s30, 4  ;;  %s3608_s4 = int_to_ptr.vmem [resolvable:$false] %s3607_s4 }
  0x2c   : > { %s3609_s5 = scalar_lea.vmem %s3608_s4, 73728  ;;  %p3610_p9 = scmp.lt.s32.totalorder %s3758_s12, %s3608_s4 }
  0x2d   : > { %p3605_p6 = pnand %p3604_p5, %p3729_p3  ;;  %p3611_p10 = scmp.lt.s32.totalorder %s3609_s5, %s3603_s29 }
  0x2f   : > { %p3606_p8 = pneg %p3605_p6  ;;  %p3612_p12 = por %p3611_p10, %p3610_p9 }
  0x31   : > { %p3613_p13 = pnand %p3612_p12, %p3606_p8 }
  0x33   : > { %3616 = shalt.err (!%p3613_p13)
}
  0x34   : > { %s3670_s6 = smov 384   ;;  %s3671_s7 = smov 24  }
  0x35   : > { %3092 = dma.hbm_to_vmem [thread:$0]  (%p3729_p3), %s3756_s10, 36864, %s3758_s12, %s3760_s18, %s3670_s6, %s3670_s6, %s3671_s7  }
  0x36 PF: > { %p2749_p11 = scmp.ge.s32.totalorder %s3667_s17, 1  ;;  %p233_p0 = scmp.lt.s32.totalorder %s3667_s17, 5 }
  0x38   : > { %p234_p1 = pnand %p2749_p11, %p233_p0 }
  0x39   : > { %s240_s8 = sand.u32 (!%p234_p1), 1, %s3651_s13  }
  0x3a   : > { %237 = sbr.rel (%p234_p1) target bundleno = 627 (0x273), region = 51  ;;  %s247_s22 = scalar_lea.sflag (!%p234_p1), [#allocation5], %s240_s8 }
  0x3b   : > { %s3090_s9 = smul.u32 (!%p234_p1), 48, %s240_s8 }
  0x3c   : > { %s3091_s11 = smul.u32 (!%p234_p1), 2304, %s240_s8 }
  0x3d   : > { %s3787_s20 = scalar_lea.vmem (!%p234_p1), [#allocation3], %s3090_s9 }
  0x3e   : > { %s3789_s25 = scalar_lea.vmem (!%p234_p1), [#allocation4], %s3091_s11 }
  0x41   : > { %3642 = dma.done.wait (%p3736_p7), %s247_s22, 36864  }
  0x42   : > { %3644 = vsyncadd (%p3736_p7), %s247_s22, 4294930432  ;;  %p2750_p3 = scmp.ne.s32.totalorder %s3659_s15, 0 }
  0x43   : > { %v3672_v6 = vmov (!%p2750_p3), 0.0  }
  0x44   : > { %310 = sbr.rel (%p2750_p3) target bundleno = 75 (0x4b), region = 63  ;;  %311 = vst [vmem:[#allocation2] sm:$0xff] (!%p2750_p3), %v3672_v6  ;;  %312 = vst [vmem:[#allocation2 + $0x8] sm:$0xff] (!%p2750_p3), %v3672_v6 }
  0x45   : > { %313 = vst [vmem:[#allocation2 + $0x10] sm:$0xff] (!%p2750_p3), %v3672_v6  ;;  %314 = vst [vmem:[#allocation2 + $0x18] sm:$0xff] (!%p2750_p3), %v3672_v6 }
  0x46   : > { %315 = vst [vmem:[#allocation2 + $0x20] sm:$0xff] (!%p2750_p3), %v3672_v6  ;;  %316 = vst [vmem:[#allocation2 + $0x28] sm:$0xff] (!%p2750_p3), %v3672_v6 }
  0x47   : > { %317 = vst [vmem:[#allocation2 + $0x30] sm:$0xff] (!%p2750_p3), %v3672_v6  ;;  %318 = vst [vmem:[#allocation2 + $0x38] sm:$0xff] (!%p2750_p3), %v3672_v6 }
  0x48   : > { %319 = vst [vmem:[#allocation2 + $0x40] sm:$0xff] (!%p2750_p3), %v3672_v6  ;;  %320 = vst [vmem:[#allocation2 + $0x48] sm:$0xff] (!%p2750_p3), %v3672_v6 }
  0x49   : > { %321 = vst [vmem:[#allocation2 + $0x50] sm:$0xff] (!%p2750_p3), %v3672_v6  ;;  %322 = vst [vmem:[#allocation2 + $0x58] sm:$0xff] (!%p2750_p3), %v3672_v6 }
  0x4b PF: > { %v3146_v7 = vld [vmem:[%s3789_s25 + $0x4] ss:$24 sps:$4 sm:$0xff]   ;;  %v3150_v9 = vld [vmem:[%s3789_s25] ss:$24 sps:$4 sm:$0xff]   ;;  %v3152_v11 = vld [vmem:[%s3789_s25 + $0x34] ss:$24 sps:$4 sm:$0xff]  }
  0x4c   : > { %v3148_v8 = vld [vmem:[%s3789_s25 + $0x304] ss:$24 sps:$4 sm:$0xff]   ;;  %2099 = vmatprep.subr.bf16.mxu1 %v3146_v7  ;;  %v3151_v10 = vld [vmem:[%s3789_s25 + $0x300] ss:$24 sps:$4 sm:$0xff]   ;;  %v3154_v12 = vld [vmem:[%s3789_s25 + $0x334] ss:$24 sps:$4 sm:$0xff]  }
  0x4d   : > { %2142 = vmatprep.subr.bf16.mxu0 %v3148_v8  ;;  %2100 = vmatpush1.bf16.msra.mxu1 %v3150_v9  ;;  %v3156_v13 = vld [vmem:[%s3789_s25 + $0x30] ss:$24 sps:$4 sm:$0xff]   ;;  %v3158_v15 = vld [vmem:[%s3789_s25 + $0x64] ss:$24 sps:$4 sm:$0xff]   ;;  %v3162_v17 = vld [vmem:[%s3789_s25 + $0x60] ss:$24 sps:$4 sm:$0xff]  }
  0x4e   : > { %2143 = vmatpush1.bf16.msra.mxu0 %v3151_v10  ;;  %2101 = vmatprep.subr.bf16.mxu1 %v3152_v11  ;;  %v3157_v14 = vld [vmem:[%s3789_s25 + $0x330] ss:$24 sps:$4 sm:$0xff]   ;;  %v3160_v16 = vld [vmem:[%s3789_s25 + $0x364] ss:$24 sps:$4 sm:$0xff]   ;;  %v3163_v18 = vld [vmem:[%s3789_s25 + $0x360] ss:$24 sps:$4 sm:$0xff]  }
  0x4f   : > { %2144 = vmatprep.subr.bf16.mxu0 %v3154_v12  ;;  %v3164_v19 = vld [vmem:[%s3789_s25 + $0x94] ss:$24 sps:$4 sm:$0xff]   ;;  %v3168_v21 = vld [vmem:[%s3789_s25 + $0x90] ss:$24 sps:$4 sm:$0xff]   ;;  %v3170_v23 = vld [vmem:[%s3789_s25 + $0xc4] ss:$24 sps:$4 sm:$0xff]  }
  0x50   : > { %v3166_v20 = vld [vmem:[%s3789_s25 + $0x394] ss:$24 sps:$4 sm:$0xff]   ;;  %v3169_v22 = vld [vmem:[%s3789_s25 + $0x390] ss:$24 sps:$4 sm:$0xff]   ;;  %v3172_v24 = vld [vmem:[%s3789_s25 + $0x3c4] ss:$24 sps:$4 sm:$0xff]  }
  0x51   : > { %2102 = vmatpush1.bf16.msra.mxu1 %v3156_v13  ;;  %v3174_v25 = vld [vmem:[%s3789_s25 + $0xc0] ss:$24 sps:$4 sm:$0xff]   ;;  %v3176_v27 = vld [vmem:[%s3789_s25 + $0xf4] ss:$24 sps:$4 sm:$0xff]   ;;  %v3180_v29 = vld [vmem:[%s3789_s25 + $0xf0] ss:$24 sps:$4 sm:$0xff]  }
  0x52   : > { %2145 = vmatpush1.bf16.msra.mxu0 %v3157_v14  ;;  %2103 = vmatprep.subr.bf16.mxu1 %v3158_v15  ;;  %v3175_v26 = vld [vmem:[%s3789_s25 + $0x3c0] ss:$24 sps:$4 sm:$0xff]   ;;  %v3178_v28 = vld [vmem:[%s3789_s25 + $0x3f4] ss:$24 sps:$4 sm:$0xff]   ;;  %v3181_v30 = vld [vmem:[%s3789_s25 + $0x3f0] ss:$24 sps:$4 sm:$0xff]  }
  0x53   : > { %2146 = vmatprep.subr.bf16.mxu0 %v3160_v16  ;;  %v3182_v31 = vld [vmem:[%s3789_s25 + $0x124] ss:$24 sps:$4 sm:$0xff]   ;;  %v3186_v33 = vld [vmem:[%s3789_s25 + $0x120] ss:$24 sps:$4 sm:$0xff]   ;;  %v3188_v35 = vld [vmem:[%s3789_s25 + $0x154] ss:$24 sps:$4 sm:$0xff]  }
  0x54   : > { %v3184_v32 = vld [vmem:[%s3789_s25 + $0x424] ss:$24 sps:$4 sm:$0xff]   ;;  %v3187_v34 = vld [vmem:[%s3789_s25 + $0x420] ss:$24 sps:$4 sm:$0xff]   ;;  %v3190_v36 = vld [vmem:[%s3789_s25 + $0x454] ss:$24 sps:$4 sm:$0xff]  }
  0x55   : > { %2104 = vmatpush1.bf16.msra.mxu1 %v3162_v17  ;;  %v3192_v37 = vld [vmem:[%s3789_s25 + $0x150] ss:$24 sps:$4 sm:$0xff]   ;;  %v3194_v39 = vld [vmem:[%s3789_s25 + $0x184] ss:$24 sps:$4 sm:$0xff]   ;;  %v3198_v41 = vld [vmem:[%s3789_s25 + $0x180] ss:$24 sps:$4 sm:$0xff]  }
  0x56   : > { %2147 = vmatpush1.bf16.msra.mxu0 %v3163_v18  ;;  %2105 = vmatprep.subr.bf16.mxu1 %v3164_v19  ;;  %v3193_v38 = vld [vmem:[%s3789_s25 + $0x450] ss:$24 sps:$4 sm:$0xff]   ;;  %v3196_v40 = vld [vmem:[%s3789_s25 + $0x484] ss:$24 sps:$4 sm:$0xff]   ;;  %v3199_v42 = vld [vmem:[%s3789_s25 + $0x480] ss:$24 sps:$4 sm:$0xff]  }
  0x57   : > { %2148 = vmatprep.subr.bf16.mxu0 %v3166_v20  ;;  %v3200_v43 = vld [vmem:[%s3789_s25 + $0x1b4] ss:$24 sps:$4 sm:$0xff]   ;;  %v3204_v45 = vld [vmem:[%s3789_s25 + $0x1b0] ss:$24 sps:$4 sm:$0xff]   ;;  %v3206_v47 = vld [vmem:[%s3789_s25 + $0x1e4] ss:$24 sps:$4 sm:$0xff]  }
  0x58   : > { %v3202_v44 = vld [vmem:[%s3789_s25 + $0x4b4] ss:$24 sps:$4 sm:$0xff]   ;;  %v3205_v46 = vld [vmem:[%s3789_s25 + $0x4b0] ss:$24 sps:$4 sm:$0xff]   ;;  %v3208_v48 = vld [vmem:[%s3789_s25 + $0x4e4] ss:$24 sps:$4 sm:$0xff]  }
  0x59   : > { %2106 = vmatpush1.bf16.msra.mxu1 %v3168_v21  ;;  %v3210_v49 = vld [vmem:[%s3789_s25 + $0x1e0] ss:$24 sps:$4 sm:$0xff]   ;;  %v3212_v51 = vld [vmem:[%s3789_s25 + $0x214] ss:$24 sps:$4 sm:$0xff]   ;;  %v3216_v53 = vld [vmem:[%s3789_s25 + $0x210] ss:$24 sps:$4 sm:$0xff]  }
  0x5a   : > { %2149 = vmatpush1.bf16.msra.mxu0 %v3169_v22  ;;  %2107 = vmatprep.subr.bf16.mxu1 %v3170_v23  ;;  %v3211_v50 = vld [vmem:[%s3789_s25 + $0x4e0] ss:$24 sps:$4 sm:$0xff]   ;;  %v3214_v52 = vld [vmem:[%s3789_s25 + $0x514] ss:$24 sps:$4 sm:$0xff]   ;;  %v3217_v54 = vld [vmem:[%s3789_s25 + $0x510] ss:$24 sps:$4 sm:$0xff]  }
  0x5b   : > { %2150 = vmatprep.subr.bf16.mxu0 %v3172_v24  ;;  %v3845_v55 = vld [vmem:[%s3787_s20 + $0x4] ss:$24 sps:$4 sm:$0xff]   ;;  %v3222_v59 = vld [vmem:[%s3789_s25 + $0x240] ss:$24 sps:$4 sm:$0xff]   ;;  %v3228_v63 = vld [vmem:[%s3789_s25 + $0x270] ss:$24 sps:$4 sm:$0xff]  }
  0x5c   : > { %v3848_v56 = vld [vmem:[%s3787_s20 + $0xc] ss:$24 sps:$4 sm:$0xff]   ;;  %2131 = vmatprep.mubr.bf16.mxu1 %v3845_v55  ;;  %v3223_v60 = vld [vmem:[%s3789_s25 + $0x540] ss:$24 sps:$4 sm:$0xff]   ;;  %v3229_v0 = vld [vmem:[%s3789_s25 + $0x570] ss:$24 sps:$4 sm:$0xff]  }
  0x5d   : > { %2108 = vmatpush1.bf16.msra.mxu1 %v3174_v25  ;;  %v3218_v57 = vld [vmem:[%s3789_s25 + $0x244] ss:$24 sps:$4 sm:$0xff]   ;;  %2174 = vmatprep.mubr.bf16.mxu0 %v3848_v56  ;;  %v3224_v61 = vld [vmem:[%s3789_s25 + $0x274] ss:$24 sps:$4 sm:$0xff]   ;;  %v3234_v3 = vld [vmem:[%s3789_s25 + $0x2a0] ss:$24 sps:$4 sm:$0xff]  }
  0x5e   : > { %2151 = vmatpush1.bf16.msra.mxu0 %v3175_v26  ;;  %2109 = vmatprep.subr.bf16.mxu1 %v3176_v27  ;;  %v3220_v58 = vld [vmem:[%s3789_s25 + $0x544] ss:$24 sps:$4 sm:$0xff]   ;;  %v3226_v62 = vld [vmem:[%s3789_s25 + $0x574] ss:$24 sps:$4 sm:$0xff]   ;;  %v3235_v4 = vld [vmem:[%s3789_s25 + $0x5a0] ss:$24 sps:$4 sm:$0xff]  }
  0x5f   : > { %2152 = vmatprep.subr.bf16.mxu0 %v3178_v28  ;;  %v3230_v1 = vld [vmem:[%s3789_s25 + $0x2a4] ss:$24 sps:$4 sm:$0xff]   ;;  %v3236_v5 = vld [vmem:[%s3789_s25 + $0x2d4] ss:$24 sps:$4 sm:$0xff]   ;;  %v3240_v7 = vld [vmem:[%s3789_s25 + $0x2d0] ss:$24 sps:$4 sm:$0xff]  }
  0x60   : > { %v3232_v2 = vld [vmem:[%s3789_s25 + $0x5a4] ss:$24 sps:$4 sm:$0xff]   ;;  %v3238_v6 = vld [vmem:[%s3789_s25 + $0x5d4] ss:$24 sps:$4 sm:$0xff]   ;;  %v3241_v8 = vld [vmem:[%s3789_s25 + $0x5d0] ss:$24 sps:$4 sm:$0xff]  }
  0x61   : > { %2110 = vmatpush1.bf16.msra.mxu1 %v3180_v29  ;;  %v3248_v9 = vld [vmem:[%s3789_s25 + $0x604] ss:$24 sps:$4 sm:$0xff]   ;;  %v3246_v11 = vld [vmem:[%s3789_s25 + $0x600] ss:$24 sps:$4 sm:$0xff]   ;;  %v3256_v15 = vld [vmem:[%s3789_s25 + $0x634] ss:$24 sps:$4 sm:$0xff]  }
  0x62   : > { %2153 = vmatpush1.bf16.msra.mxu0 %v3181_v30  ;;  %2111 = vmatprep.subr.bf16.mxu1 %v3182_v31  ;;  %v3251_v10 = vld [vmem:[%s3789_s25 + $0xc] ss:$24 sps:$4 sm:$0xff]   ;;  %v3249_v12 = vld [vmem:[%s3789_s25 + $0x8] ss:$24 sps:$4 sm:$0xff]   ;;  %v3259_v16 = vld [vmem:[%s3789_s25 + $0x3c] ss:$24 sps:$4 sm:$0xff]  }
  0x63   : > { %2154 = vmatprep.subr.bf16.mxu0 %v3184_v32  ;;  %v3873_v13 = vld [vmem:[%s3787_s20] ss:$24 sps:$4 sm:$0xff]   ;;  %v3262_v19 = vld [vmem:[%s3789_s25 + $0x664] ss:$24 sps:$4 sm:$0xff]   ;;  %v3268_v23 = vld [vmem:[%s3789_s25 + $0x694] ss:$24 sps:$4 sm:$0xff]  }
  0x64   : > { %v3876_v14 = vld [vmem:[%s3787_s20 + $0x8] ss:$24 sps:$4 sm:$0xff]   ;;  %v3265_v20 = vld [vmem:[%s3789_s25 + $0x6c] ss:$24 sps:$4 sm:$0xff]   ;;  %v3271_v24 = vld [vmem:[%s3789_s25 + $0x9c] ss:$24 sps:$4 sm:$0xff]  }
  0x65   : > { %2112 = vmatpush1.bf16.msra.mxu1 %v3186_v33  ;;  %v3254_v17 = vld [vmem:[%s3789_s25 + $0x630] ss:$24 sps:$4 sm:$0xff]   ;;  %v3260_v21 = vld [vmem:[%s3789_s25 + $0x660] ss:$24 sps:$4 sm:$0xff]   ;;  %v3274_v27 = vld [vmem:[%s3789_s25 + $0x6c4] ss:$24 sps:$4 sm:$0xff]  }
  0x66   : > { %2155 = vmatpush1.bf16.msra.mxu0 %v3187_v34  ;;  %2113 = vmatprep.subr.bf16.mxu1 %v3188_v35  ;;  %v3257_v18 = vld [vmem:[%s3789_s25 + $0x38] ss:$24 sps:$4 sm:$0xff]   ;;  %v3263_v22 = vld [vmem:[%s3789_s25 + $0x68] ss:$24 sps:$4 sm:$0xff]   ;;  %v3277_v28 = vld [vmem:[%s3789_s25 + $0xcc] ss:$24 sps:$4 sm:$0xff]  }
  0x67   : > { %2156 = vmatprep.subr.bf16.mxu0 %v3190_v36  ;;  %v3266_v25 = vld [vmem:[%s3789_s25 + $0x690] ss:$24 sps:$4 sm:$0xff]   ;;  %v3272_v29 = vld [vmem:[%s3789_s25 + $0x6c0] ss:$24 sps:$4 sm:$0xff]   ;;  %v3280_v31 = vld [vmem:[%s3789_s25 + $0x6f4] ss:$24 sps:$4 sm:$0xff]  }
  0x68   : > { %v3269_v26 = vld [vmem:[%s3789_s25 + $0x98] ss:$24 sps:$4 sm:$0xff]   ;;  %v3275_v30 = vld [vmem:[%s3789_s25 + $0xc8] ss:$24 sps:$4 sm:$0xff]   ;;  %v3283_v32 = vld [vmem:[%s3789_s25 + $0xfc] ss:$24 sps:$4 sm:$0xff]  }
  0x69   : > { %2114 = vmatpush1.bf16.msra.mxu1 %v3192_v37  ;;  %v3278_v33 = vld [vmem:[%s3789_s25 + $0x6f0] ss:$24 sps:$4 sm:$0xff]   ;;  %v3286_v35 = vld [vmem:[%s3789_s25 + $0x724] ss:$24 sps:$4 sm:$0xff]   ;;  %v3284_v37 = vld [vmem:[%s3789_s25 + $0x720] ss:$24 sps:$4 sm:$0xff]  }
  0x6a   : > { %2157 = vmatpush1.bf16.msra.mxu0 %v3193_v38  ;;  %2115 = vmatprep.subr.bf16.mxu1 %v3194_v39  ;;  %v3281_v34 = vld [vmem:[%s3789_s25 + $0xf8] ss:$24 sps:$4 sm:$0xff]   ;;  %v3289_v36 = vld [vmem:[%s3789_s25 + $0x12c] ss:$24 sps:$4 sm:$0xff]   ;;  %v3287_v38 = vld [vmem:[%s3789_s25 + $0x128] ss:$24 sps:$4 sm:$0xff]  }
  0x6b   : > { %2158 = vmatprep.subr.bf16.mxu0 %v3196_v40  ;;  %v3292_v39 = vld [vmem:[%s3789_s25 + $0x754] ss:$24 sps:$4 sm:$0xff]   ;;  %p3045_p7 = scmp.ne.s32.totalorder %s3659_s15, 3 }
  0x6c   : > { %v3295_v40 = vld [vmem:[%s3789_s25 + $0x15c] ss:$24 sps:$4 sm:$0xff]  }
  0x6d   : > { %2116 = vmatpush1.bf16.msra.mxu1 %v3198_v41  ;;  %v3908_v41 = vld [vmem:[%s3787_s20 + $0x14] ss:$24 sps:$4 sm:$0xff]  }
  0x6e   : > { %2159 = vmatpush1.bf16.msra.mxu0 %v3199_v42  ;;  %2117 = vmatprep.subr.bf16.mxu1 %v3200_v43  ;;  %v3290_v42 = vld [vmem:[%s3789_s25 + $0x750] ss:$24 sps:$4 sm:$0xff]  }
  0x6f   : > { %2160 = vmatprep.subr.bf16.mxu0 %v3202_v44  ;;  %v3293_v43 = vld [vmem:[%s3789_s25 + $0x158] ss:$24 sps:$4 sm:$0xff]   ;;  %v3298_v44 = vld [vmem:[%s3789_s25 + $0x784] ss:$24 sps:$4 sm:$0xff]  }
  0x71   : > { %2118 = vmatpush1.bf16.msra.mxu1 %v3204_v45  ;;  %v3301_v45 = vld [vmem:[%s3789_s25 + $0x18c] ss:$24 sps:$4 sm:$0xff]  }
  0x72   : > { %2161 = vmatpush1.bf16.msra.mxu0 %v3205_v46  ;;  %2119 = vmatprep.subr.bf16.mxu1 %v3206_v47  ;;  %v3296_v46 = vld [vmem:[%s3789_s25 + $0x780] ss:$24 sps:$4 sm:$0xff]  }
  0x73   : > { %2162 = vmatprep.subr.bf16.mxu0 %v3208_v48  ;;  %v3299_v47 = vld [vmem:[%s3789_s25 + $0x188] ss:$24 sps:$4 sm:$0xff]   ;;  %v3304_v48 = vld [vmem:[%s3789_s25 + $0x7b4] ss:$24 sps:$4 sm:$0xff]  }
  0x75   : > { %2120 = vmatpush1.bf16.msra.mxu1 %v3210_v49  ;;  %v3307_v49 = vld [vmem:[%s3789_s25 + $0x1bc] ss:$24 sps:$4 sm:$0xff]  }
  0x76   : > { %2163 = vmatpush1.bf16.msra.mxu0 %v3211_v50  ;;  %2121 = vmatprep.subr.bf16.mxu1 %v3212_v51  ;;  %v3302_v50 = vld [vmem:[%s3789_s25 + $0x7b0] ss:$24 sps:$4 sm:$0xff]  }
  0x77   : > { %2164 = vmatprep.subr.bf16.mxu0 %v3214_v52  ;;  %v3305_v51 = vld [vmem:[%s3789_s25 + $0x1b8] ss:$24 sps:$4 sm:$0xff]   ;;  %v3310_v52 = vld [vmem:[%s3789_s25 + $0x7e4] ss:$24 sps:$4 sm:$0xff]  }
  0x79   : > { %2122 = vmatpush1.bf16.msra.mxu1 %v3216_v53  ;;  %v3313_v53 = vld [vmem:[%s3789_s25 + $0x1ec] ss:$24 sps:$4 sm:$0xff]  }
  0x7a   : > { %2165 = vmatpush1.bf16.msra.mxu0 %v3217_v54  ;;  %2123 = vmatprep.subr.bf16.mxu1 %v3218_v57  ;;  %v3308_v54 = vld [vmem:[%s3789_s25 + $0x7e0] ss:$24 sps:$4 sm:$0xff]  }
  0x7b   : > { %2166 = vmatprep.subr.bf16.mxu0 %v3220_v58  ;;  %v3311_v57 = vld [vmem:[%s3789_s25 + $0x1e8] ss:$24 sps:$4 sm:$0xff]   ;;  %v3316_v58 = vld [vmem:[%s3789_s25 + $0x814] ss:$24 sps:$4 sm:$0xff]  }
  0x7d   : > { %2124 = vmatpush1.bf16.msra.mxu1 %v3222_v59  ;;  %v3319_v59 = vld [vmem:[%s3789_s25 + $0x21c] ss:$24 sps:$4 sm:$0xff]  }
  0x7e   : > { %2167 = vmatpush1.bf16.msra.mxu0 %v3223_v60  ;;  %2125 = vmatprep.subr.bf16.mxu1 %v3224_v61  ;;  %v3314_v60 = vld [vmem:[%s3789_s25 + $0x810] ss:$24 sps:$4 sm:$0xff]  }
  0x7f   : > { %2168 = vmatprep.subr.bf16.mxu0 %v3226_v62  ;;  %v3317_v61 = vld [vmem:[%s3789_s25 + $0x218] ss:$24 sps:$4 sm:$0xff]   ;;  %v3322_v62 = vld [vmem:[%s3789_s25 + $0x844] ss:$24 sps:$4 sm:$0xff]  }
  0x81   : > { %2126 = vmatpush1.bf16.msra.mxu1 %v3228_v63  ;;  %v3325_v63 = vld [vmem:[%s3789_s25 + $0x24c] ss:$24 sps:$4 sm:$0xff]  }
  0x82   : > { %2169 = vmatpush1.bf16.msra.mxu0 %v3229_v0  ;;  %2127 = vmatprep.subr.bf16.mxu1 %v3230_v1  ;;  %v3320_v0 = vld [vmem:[%s3789_s25 + $0x840] ss:$24 sps:$4 sm:$0xff]  }
  0x83   : > { %2170 = vmatprep.subr.bf16.mxu0 %v3232_v2  ;;  %v3323_v1 = vld [vmem:[%s3789_s25 + $0x248] ss:$24 sps:$4 sm:$0xff]   ;;  %v3328_v2 = vld [vmem:[%s3789_s25 + $0x874] ss:$24 sps:$4 sm:$0xff]  }
  0x85   : > { %2128 = vmatpush1.bf16.msra.mxu1 %v3234_v3  ;;  %v3331_v3 = vld [vmem:[%s3789_s25 + $0x27c] ss:$24 sps:$4 sm:$0xff]  }
  0x86   : > { %2171 = vmatpush1.bf16.msra.mxu0 %v3235_v4  ;;  %2129 = vmatprep.subr.bf16.mxu1 %v3236_v5  ;;  %v3326_v4 = vld [vmem:[%s3789_s25 + $0x870] ss:$24 sps:$4 sm:$0xff]  }
  0x87   : > { %2172 = vmatprep.subr.bf16.mxu0 %v3238_v6  ;;  %v3329_v5 = vld [vmem:[%s3789_s25 + $0x278] ss:$24 sps:$4 sm:$0xff]   ;;  %v3334_v6 = vld [vmem:[%s3789_s25 + $0x8a4] ss:$24 sps:$4 sm:$0xff]  }
  0x89   : > { %2130 = vmatpush1.bf16.msra.mxu1 %v3240_v7  ;;  %v3337_v7 = vld [vmem:[%s3789_s25 + $0x2ac] ss:$24 sps:$4 sm:$0xff]  }
  0x8a   : > { %2173 = vmatpush1.bf16.msra.mxu0 %v3241_v8  ;;  %2228 = vmatprep.subr.bf16.mxu1 %v3251_v10  ;;  %v3332_v8 = vld [vmem:[%s3789_s25 + $0x8a0] ss:$24 sps:$4 sm:$0xff]   ;;  %v3340_v10 = vld [vmem:[%s3789_s25 + $0x8d4] ss:$24 sps:$4 sm:$0xff]  }
  0x8b   : > { %2185 = vmatprep.subr.bf16.mxu0 %v3248_v9  ;;  %v3335_v9 = vld [vmem:[%s3789_s25 + $0x2a8] ss:$24 sps:$4 sm:$0xff]  }
  0x8c   : > { %2132 = vmatmul.mubr.bf16.vlgmr.msra.gmra.mrb[0].mxu1 %v3873_v13 }
  0x8d   : > { %2175 = vmatmul.mubr.bf16.vlgmr.msra.gmra.mrb[0].mxu0 %v3876_v14  ;;  %2229 = vmatpush1.bf16.msra.mxu1 %v3249_v12  ;;  %v3338_v12 = vld [vmem:[%s3789_s25 + $0x8d0] ss:$24 sps:$4 sm:$0xff]  }
  0x8e   : > { %2186 = vmatpush1.bf16.msra.mxu0 %v3246_v11  ;;  %2230 = vmatprep.subr.bf16.mxu1 %v3259_v16  ;;  %v3343_v11 = vld [vmem:[%s3789_s25 + $0x2dc] ss:$24 sps:$4 sm:$0xff]   ;;  %v3349_v16 = vld [vmem:[%s3789_s25 + $0x30c] ss:$24 sps:$4 sm:$0xff]  }
  0x8f   : > { %2187 = vmatprep.subr.bf16.mxu0 %v3256_v15  ;;  %2260 = vmatprep.mubr.bf16.mxu1 %v3845_v55  ;;  %v3341_v15 = vld [vmem:[%s3789_s25 + $0x2d8] ss:$24 sps:$4 sm:$0xff]  }
  0x90   : > { %2217 = vmatprep.mubr.bf16.mxu0 %v3908_v41 }
  0x91   : > { %2231 = vmatpush1.bf16.msra.mxu1 %v3257_v18  ;;  %v3948_v18 = vld [vmem:[%s3787_s20 + $0x10] ss:$24 sps:$4 sm:$0xff]  }
  0x92   : > { %2188 = vmatpush1.bf16.msra.mxu0 %v3254_v17  ;;  %2232 = vmatprep.subr.bf16.mxu1 %v3265_v20  ;;  %v3352_v17 = vld [vmem:[%s3789_s25 + $0x14] ss:$24 sps:$4 sm:$0xff]   ;;  %v3350_v20 = vld [vmem:[%s3789_s25 + $0x10] ss:$24 sps:$4 sm:$0xff]  }
  0x93   : > { %2189 = vmatprep.subr.bf16.mxu0 %v3262_v19  ;;  %v3347_v19 = vld [vmem:[%s3789_s25 + $0x308] ss:$24 sps:$4 sm:$0xff]  }
  0x95   : > { %2233 = vmatpush1.bf16.msra.mxu1 %v3263_v22  ;;  %v3358_v22 = vld [vmem:[%s3789_s25 + $0x44] ss:$24 sps:$4 sm:$0xff]  }
  0x96   : > { %2190 = vmatpush1.bf16.msra.mxu0 %v3260_v21  ;;  %2234 = vmatprep.subr.bf16.mxu1 %v3271_v24  ;;  %v3355_v21 = vld [vmem:[%s3789_s25 + $0x33c] ss:$24 sps:$4 sm:$0xff]   ;;  %v3356_v24 = vld [vmem:[%s3789_s25 + $0x40] ss:$24 sps:$4 sm:$0xff]  }
  0x97   : > { %2191 = vmatprep.subr.bf16.mxu0 %v3268_v23  ;;  %v3353_v23 = vld [vmem:[%s3789_s25 + $0x338] ss:$24 sps:$4 sm:$0xff]  }
  0x99   : > { %2235 = vmatpush1.bf16.msra.mxu1 %v3269_v26  ;;  %v3364_v26 = vld [vmem:[%s3789_s25 + $0x74] ss:$24 sps:$4 sm:$0xff]  }
  0x9a   : > { %2192 = vmatpush1.bf16.msra.mxu0 %v3266_v25  ;;  %2236 = vmatprep.subr.bf16.mxu1 %v3277_v28  ;;  %v3361_v25 = vld [vmem:[%s3789_s25 + $0x36c] ss:$24 sps:$4 sm:$0xff]   ;;  %v3362_v28 = vld [vmem:[%s3789_s25 + $0x70] ss:$24 sps:$4 sm:$0xff]  }
  0x9b   : > { %2193 = vmatprep.subr.bf16.mxu0 %v3274_v27  ;;  %v3359_v27 = vld [vmem:[%s3789_s25 + $0x368] ss:$24 sps:$4 sm:$0xff]  }
  0x9d   : > { %2237 = vmatpush1.bf16.msra.mxu1 %v3275_v30  ;;  %v3370_v30 = vld [vmem:[%s3789_s25 + $0xa4] ss:$24 sps:$4 sm:$0xff]  }
  0x9e   : > { %2194 = vmatpush1.bf16.msra.mxu0 %v3272_v29  ;;  %2238 = vmatprep.subr.bf16.mxu1 %v3283_v32  ;;  %v3367_v29 = vld [vmem:[%s3789_s25 + $0x39c] ss:$24 sps:$4 sm:$0xff]   ;;  %v3368_v32 = vld [vmem:[%s3789_s25 + $0xa0] ss:$24 sps:$4 sm:$0xff]  }
  0x9f   : > { %2195 = vmatprep.subr.bf16.mxu0 %v3280_v31  ;;  %v3365_v31 = vld [vmem:[%s3789_s25 + $0x398] ss:$24 sps:$4 sm:$0xff]  }
  0xa1   : > { %2239 = vmatpush1.bf16.msra.mxu1 %v3281_v34  ;;  %v3374_v34 = vld [vmem:[%s3789_s25 + $0xd0] ss:$24 sps:$4 sm:$0xff]  }
  0xa2   : > { %2196 = vmatpush1.bf16.msra.mxu0 %v3278_v33  ;;  %2240 = vmatprep.subr.bf16.mxu1 %v3289_v36  ;;  %v3371_v33 = vld [vmem:[%s3789_s25 + $0x3c8] ss:$24 sps:$4 sm:$0xff]   ;;  %v3382_v36 = vld [vmem:[%s3789_s25 + $0x104] ss:$24 sps:$4 sm:$0xff]  }
  0xa3   : > { %2197 = vmatprep.subr.bf16.mxu0 %v3286_v35  ;;  %v3379_v35 = vld [vmem:[%s3789_s25 + $0x3fc] ss:$24 sps:$4 sm:$0xff]  }
  0xa5   : > { %2241 = vmatpush1.bf16.msra.mxu1 %v3287_v38  ;;  %v3380_v38 = vld [vmem:[%s3789_s25 + $0x100] ss:$24 sps:$4 sm:$0xff]  }
  0xa6   : > { %2198 = vmatpush1.bf16.msra.mxu0 %v3284_v37  ;;  %2242 = vmatprep.subr.bf16.mxu1 %v3295_v40  ;;  %v3377_v37 = vld [vmem:[%s3789_s25 + $0x3f8] ss:$24 sps:$4 sm:$0xff]   ;;  %v3388_v40 = vld [vmem:[%s3789_s25 + $0x134] ss:$24 sps:$4 sm:$0xff]  }
  0xa7   : > { %2199 = vmatprep.subr.bf16.mxu0 %v3292_v39  ;;  %v3385_v39 = vld [vmem:[%s3789_s25 + $0x42c] ss:$24 sps:$4 sm:$0xff]  }
  0xa9   : > { %2243 = vmatpush1.bf16.msra.mxu1 %v3293_v43  ;;  %v3386_v43 = vld [vmem:[%s3789_s25 + $0x130] ss:$24 sps:$4 sm:$0xff]  }
  0xaa   : > { %2200 = vmatpush1.bf16.msra.mxu0 %v3290_v42  ;;  %2244 = vmatprep.subr.bf16.mxu1 %v3301_v45  ;;  %v3383_v42 = vld [vmem:[%s3789_s25 + $0x428] ss:$24 sps:$4 sm:$0xff]   ;;  %v3394_v45 = vld [vmem:[%s3789_s25 + $0x164] ss:$24 sps:$4 sm:$0xff]  }
  0xab   : > { %2201 = vmatprep.subr.bf16.mxu0 %v3298_v44  ;;  %v3391_v44 = vld [vmem:[%s3789_s25 + $0x45c] ss:$24 sps:$4 sm:$0xff]  }
  0xad   : > { %2245 = vmatpush1.bf16.msra.mxu1 %v3299_v47  ;;  %v3392_v47 = vld [vmem:[%s3789_s25 + $0x160] ss:$24 sps:$4 sm:$0xff]  }
  0xae   : > { %2202 = vmatpush1.bf16.msra.mxu0 %v3296_v46  ;;  %2246 = vmatprep.subr.bf16.mxu1 %v3307_v49  ;;  %v3389_v46 = vld [vmem:[%s3789_s25 + $0x458] ss:$24 sps:$4 sm:$0xff]   ;;  %v3400_v49 = vld [vmem:[%s3789_s25 + $0x194] ss:$24 sps:$4 sm:$0xff]  }
  0xaf   : > { %2203 = vmatprep.subr.bf16.mxu0 %v3304_v48  ;;  %v3397_v48 = vld [vmem:[%s3789_s25 + $0x48c] ss:$24 sps:$4 sm:$0xff]  }
  0xb1   : > { %2247 = vmatpush1.bf16.msra.mxu1 %v3305_v51  ;;  %v3398_v51 = vld [vmem:[%s3789_s25 + $0x190] ss:$24 sps:$4 sm:$0xff]  }
  0xb2   : > { %2204 = vmatpush1.bf16.msra.mxu0 %v3302_v50  ;;  %2248 = vmatprep.subr.bf16.mxu1 %v3313_v53  ;;  %v3395_v50 = vld [vmem:[%s3789_s25 + $0x488] ss:$24 sps:$4 sm:$0xff]   ;;  %v3406_v53 = vld [vmem:[%s3789_s25 + $0x1c4] ss:$24 sps:$4 sm:$0xff]  }
  0xb3   : > { %2205 = vmatprep.subr.bf16.mxu0 %v3310_v52  ;;  %v3403_v52 = vld [vmem:[%s3789_s25 + $0x4bc] ss:$24 sps:$4 sm:$0xff]  }
  0xb5   : > { %2249 = vmatpush1.bf16.msra.mxu1 %v3311_v57  ;;  %v3404_v57 = vld [vmem:[%s3789_s25 + $0x1c0] ss:$24 sps:$4 sm:$0xff]  }
  0xb6   : > { %2206 = vmatpush1.bf16.msra.mxu0 %v3308_v54  ;;  %2250 = vmatprep.subr.bf16.mxu1 %v3319_v59  ;;  %v3401_v54 = vld [vmem:[%s3789_s25 + $0x4b8] ss:$24 sps:$4 sm:$0xff]   ;;  %v3412_v59 = vld [vmem:[%s3789_s25 + $0x1f4] ss:$24 sps:$4 sm:$0xff]  }
  0xb7   : > { %2207 = vmatprep.subr.bf16.mxu0 %v3316_v58  ;;  %v3409_v58 = vld [vmem:[%s3789_s25 + $0x4ec] ss:$24 sps:$4 sm:$0xff]  }
  0xb9   : > { %2251 = vmatpush1.bf16.msra.mxu1 %v3317_v61  ;;  %v3410_v61 = vld [vmem:[%s3789_s25 + $0x1f0] ss:$24 sps:$4 sm:$0xff]  }
  0xba   : > { %2208 = vmatpush1.bf16.msra.mxu0 %v3314_v60  ;;  %2252 = vmatprep.subr.bf16.mxu1 %v3325_v63  ;;  %v3407_v60 = vld [vmem:[%s3789_s25 + $0x4e8] ss:$24 sps:$4 sm:$0xff]   ;;  %v3418_v63 = vld [vmem:[%s3789_s25 + $0x224] ss:$24 sps:$4 sm:$0xff]  }
  0xbb   : > { %2209 = vmatprep.subr.bf16.mxu0 %v3322_v62  ;;  %v3415_v62 = vld [vmem:[%s3789_s25 + $0x51c] ss:$24 sps:$4 sm:$0xff]  }
  0xbd   : > { %2253 = vmatpush1.bf16.msra.mxu1 %v3323_v1  ;;  %v3416_v1 = vld [vmem:[%s3789_s25 + $0x220] ss:$24 sps:$4 sm:$0xff]  }
  0xbe   : > { %2210 = vmatpush1.bf16.msra.mxu0 %v3320_v0  ;;  %2254 = vmatprep.subr.bf16.mxu1 %v3331_v3  ;;  %v3413_v0 = vld [vmem:[%s3789_s25 + $0x518] ss:$24 sps:$4 sm:$0xff]   ;;  %v3424_v3 = vld [vmem:[%s3789_s25 + $0x254] ss:$24 sps:$4 sm:$0xff]  }
  0xbf   : > { %2211 = vmatprep.subr.bf16.mxu0 %v3328_v2  ;;  %v3421_v2 = vld [vmem:[%s3789_s25 + $0x54c] ss:$24 sps:$4 sm:$0xff]  }
  0xc1   : > { %2255 = vmatpush1.bf16.msra.mxu1 %v3329_v5  ;;  %v3422_v5 = vld [vmem:[%s3789_s25 + $0x250] ss:$24 sps:$4 sm:$0xff]  }
  0xc2   : > { %2212 = vmatpush1.bf16.msra.mxu0 %v3326_v4  ;;  %2256 = vmatprep.subr.bf16.mxu1 %v3337_v7  ;;  %v3419_v4 = vld [vmem:[%s3789_s25 + $0x548] ss:$24 sps:$4 sm:$0xff]   ;;  %v3430_v7 = vld [vmem:[%s3789_s25 + $0x284] ss:$24 sps:$4 sm:$0xff]  }
  0xc3   : > { %2213 = vmatprep.subr.bf16.mxu0 %v3334_v6  ;;  %v3427_v6 = vld [vmem:[%s3789_s25 + $0x57c] ss:$24 sps:$4 sm:$0xff]  }
  0xc5   : > { %2257 = vmatpush1.bf16.msra.mxu1 %v3335_v9  ;;  %v3428_v9 = vld [vmem:[%s3789_s25 + $0x280] ss:$24 sps:$4 sm:$0xff]  }
  0xc6   : > { %2214 = vmatpush1.bf16.msra.mxu0 %v3332_v8  ;;  %2258 = vmatprep.subr.bf16.mxu1 %v3343_v11  ;;  %v3425_v8 = vld [vmem:[%s3789_s25 + $0x578] ss:$24 sps:$4 sm:$0xff]   ;;  %v3436_v11 = vld [vmem:[%s3789_s25 + $0x2b4] ss:$24 sps:$4 sm:$0xff]  }
  0xc7   : > { %2215 = vmatprep.subr.bf16.mxu0 %v3340_v10  ;;  %v3433_v10 = vld [vmem:[%s3789_s25 + $0x5ac] ss:$24 sps:$4 sm:$0xff]  }
  0xc9   : > { %2259 = vmatpush1.bf16.msra.mxu1 %v3341_v15  ;;  %v3434_v15 = vld [vmem:[%s3789_s25 + $0x2b0] ss:$24 sps:$4 sm:$0xff]  }
  0xca   : > { %2216 = vmatpush1.bf16.msra.mxu0 %v3338_v12  ;;  %2271 = vmatprep.subr.bf16.mxu1 %v3349_v16  ;;  %v3431_v12 = vld [vmem:[%s3789_s25 + $0x5a8] ss:$24 sps:$4 sm:$0xff]   ;;  %v3439_v16 = vld [vmem:[%s3789_s25 + $0x5dc] ss:$24 sps:$4 sm:$0xff]  }
  0xcb   : > { %2357 = vmatprep.subr.bf16.mxu0 %v3352_v17  ;;  %v3442_v17 = vld [vmem:[%s3789_s25 + $0x2e4] ss:$24 sps:$4 sm:$0xff]  }
  0xcc   : > { %2261 = vmatmul.mubr.bf16.vlgmr.msra.gmra.mrb[4].mxu1 %v3873_v13 }
  0xcd   : > { %2218 = vmatmul.mubr.bf16.vlgmr.msra.gmra.mrb[0].mxu0 %v3948_v18  ;;  %2272 = vmatpush1.bf16.msra.mxu1 %v3347_v19  ;;  %v3437_v19 = vld [vmem:[%s3789_s25 + $0x5d8] ss:$24 sps:$4 sm:$0xff]  }
  0xce   : > { %2358 = vmatpush1.bf16.msra.mxu0 %v3350_v20  ;;  %2273 = vmatprep.subr.bf16.mxu1 %v3355_v21  ;;  %v3440_v20 = vld [vmem:[%s3789_s25 + $0x2e0] ss:$24 sps:$4 sm:$0xff]   ;;  %v3445_v21 = vld [vmem:[%s3789_s25 + $0x60c] ss:$24 sps:$4 sm:$0xff]  }
  0xcf   : > { %2359 = vmatprep.subr.bf16.mxu0 %v3358_v22  ;;  %2303 = vmatprep.mubr.bf16.mxu1 %v3848_v56  ;;  %v3376_v56 = vld [vmem:[%s3789_s25 + $0xd4] ss:$24 sps:$4 sm:$0xff]  }
  0xd0   : > { %2389 = vmatprep.mubr.bf16.mxu0 %v3845_v55  ;;  %v3373_v55 = vld [vmem:[%s3789_s25 + $0x3cc] ss:$24 sps:$4 sm:$0xff]  }
  0xd1   : > { %2274 = vmatpush1.bf16.msra.mxu1 %v3353_v23  ;;  %v3448_v22 = vld [vmem:[%s3789_s25 + $0x314] ss:$24 sps:$4 sm:$0xff]   ;;  %v3443_v23 = vld [vmem:[%s3789_s25 + $0x608] ss:$24 sps:$4 sm:$0xff]  }
  0xd2   : > { %2360 = vmatpush1.bf16.msra.mxu0 %v3356_v24  ;;  %2275 = vmatprep.subr.bf16.mxu1 %v3361_v25  ;;  %v3446_v24 = vld [vmem:[%s3789_s25 + $0x310] ss:$24 sps:$4 sm:$0xff]   ;;  %v3451_v25 = vld [vmem:[%s3789_s25 + $0x63c] ss:$24 sps:$4 sm:$0xff]  }
  0xd3   : > { %2361 = vmatprep.subr.bf16.mxu0 %v3364_v26  ;;  %v3454_v26 = vld [vmem:[%s3789_s25 + $0x344] ss:$24 sps:$4 sm:$0xff]  }
  0xd5   : > { %2276 = vmatpush1.bf16.msra.mxu1 %v3359_v27  ;;  %v3449_v27 = vld [vmem:[%s3789_s25 + $0x638] ss:$24 sps:$4 sm:$0xff]  }
  0xd6   : > { %2362 = vmatpush1.bf16.msra.mxu0 %v3362_v28  ;;  %2277 = vmatprep.subr.bf16.mxu1 %v3367_v29  ;;  %v3452_v28 = vld [vmem:[%s3789_s25 + $0x340] ss:$24 sps:$4 sm:$0xff]   ;;  %v3457_v29 = vld [vmem:[%s3789_s25 + $0x66c] ss:$24 sps:$4 sm:$0xff]  }
  0xd7   : > { %2363 = vmatprep.subr.bf16.mxu0 %v3370_v30  ;;  %v3460_v30 = vld [vmem:[%s3789_s25 + $0x374] ss:$24 sps:$4 sm:$0xff]  }
  0xd9   : > { %2278 = vmatpush1.bf16.msra.mxu1 %v3365_v31  ;;  %v3587_v31 = vld [vmem:[%s3787_s20 + $0xc] ss:$24 sps:$4 sm:$0xff]  }
  0xda   : > { %2364 = vmatpush1.bf16.msra.mxu0 %v3368_v32  ;;  %2279 = vmatprep.subr.bf16.mxu1 %v3373_v55  ;;  %v3463_v32 = vld [vmem:[%s3789_s25 + $0x69c] ss:$24 sps:$4 sm:$0xff]  }
  0xdb   : > { %2365 = vmatprep.subr.bf16.mxu0 %v3376_v56  ;;  %v3466_v55 = vld [vmem:[%s3789_s25 + $0x3a4] ss:$24 sps:$4 sm:$0xff]   ;;  %v3461_v56 = vld [vmem:[%s3789_s25 + $0x698] ss:$24 sps:$4 sm:$0xff]  }
  0xdd   : > { %2280 = vmatpush1.bf16.msra.mxu1 %v3371_v33  ;;  %v3464_v33 = vld [vmem:[%s3789_s25 + $0x3a0] ss:$24 sps:$4 sm:$0xff]  }
  0xde   : > { %2366 = vmatpush1.bf16.msra.mxu0 %v3374_v34  ;;  %2281 = vmatprep.subr.bf16.mxu1 %v3379_v35  ;;  %v3469_v34 = vld [vmem:[%s3789_s25 + $0x6cc] ss:$24 sps:$4 sm:$0xff]  }
  0xdf   : > { %2367 = vmatprep.subr.bf16.mxu0 %v3382_v36  ;;  %v3472_v35 = vld [vmem:[%s3789_s25 + $0x3d4] ss:$24 sps:$4 sm:$0xff]   ;;  %v3467_v36 = vld [vmem:[%s3789_s25 + $0x6c8] ss:$24 sps:$4 sm:$0xff]  }
  0xe1   : > { %2282 = vmatpush1.bf16.msra.mxu1 %v3377_v37  ;;  %v3470_v37 = vld [vmem:[%s3789_s25 + $0x3d0] ss:$24 sps:$4 sm:$0xff]  }
  0xe2   : > { %2368 = vmatpush1.bf16.msra.mxu0 %v3380_v38  ;;  %2283 = vmatprep.subr.bf16.mxu1 %v3385_v39  ;;  %v3475_v38 = vld [vmem:[%s3789_s25 + $0x6fc] ss:$24 sps:$4 sm:$0xff]  }
  0xe3   : > { %2369 = vmatprep.subr.bf16.mxu0 %v3388_v40  ;;  %v3478_v39 = vld [vmem:[%s3789_s25 + $0x404] ss:$24 sps:$4 sm:$0xff]   ;;  %v3473_v40 = vld [vmem:[%s3789_s25 + $0x6f8] ss:$24 sps:$4 sm:$0xff]  }
  0xe5   : > { %2284 = vmatpush1.bf16.msra.mxu1 %v3383_v42  ;;  %v3476_v42 = vld [vmem:[%s3789_s25 + $0x400] ss:$24 sps:$4 sm:$0xff]  }
  0xe6   : > { %2370 = vmatpush1.bf16.msra.mxu0 %v3386_v43  ;;  %2285 = vmatprep.subr.bf16.mxu1 %v3391_v44  ;;  %v3481_v43 = vld [vmem:[%s3789_s25 + $0x72c] ss:$24 sps:$4 sm:$0xff]  }
  0xe7   : > { %2371 = vmatprep.subr.bf16.mxu0 %v3394_v45  ;;  %v3484_v44 = vld [vmem:[%s3789_s25 + $0x434] ss:$24 sps:$4 sm:$0xff]   ;;  %v3479_v45 = vld [vmem:[%s3789_s25 + $0x728] ss:$24 sps:$4 sm:$0xff]  }
  0xe9   : > { %2286 = vmatpush1.bf16.msra.mxu1 %v3389_v46  ;;  %v3482_v46 = vld [vmem:[%s3789_s25 + $0x430] ss:$24 sps:$4 sm:$0xff]  }
  0xea   : > { %2372 = vmatpush1.bf16.msra.mxu0 %v3392_v47  ;;  %2287 = vmatprep.subr.bf16.mxu1 %v3397_v48  ;;  %v3487_v47 = vld [vmem:[%s3789_s25 + $0x75c] ss:$24 sps:$4 sm:$0xff]  }
  0xeb   : > { %2373 = vmatprep.subr.bf16.mxu0 %v3400_v49  ;;  %v3490_v48 = vld [vmem:[%s3789_s25 + $0x464] ss:$24 sps:$4 sm:$0xff]   ;;  %v3485_v49 = vld [vmem:[%s3789_s25 + $0x758] ss:$24 sps:$4 sm:$0xff]  }
  0xed   : > { %2288 = vmatpush1.bf16.msra.mxu1 %v3395_v50  ;;  %v3488_v50 = vld [vmem:[%s3789_s25 + $0x460] ss:$24 sps:$4 sm:$0xff]  }
  0xee   : > { %2374 = vmatpush1.bf16.msra.mxu0 %v3398_v51  ;;  %2289 = vmatprep.subr.bf16.mxu1 %v3403_v52  ;;  %v3493_v51 = vld [vmem:[%s3789_s25 + $0x78c] ss:$24 sps:$4 sm:$0xff]  }
  0xef   : > { %2375 = vmatprep.subr.bf16.mxu0 %v3406_v53  ;;  %v3496_v52 = vld [vmem:[%s3789_s25 + $0x494] ss:$24 sps:$4 sm:$0xff]   ;;  %v3491_v53 = vld [vmem:[%s3789_s25 + $0x788] ss:$24 sps:$4 sm:$0xff]  }
  0xf1   : > { %2290 = vmatpush1.bf16.msra.mxu1 %v3401_v54  ;;  %v3494_v54 = vld [vmem:[%s3789_s25 + $0x490] ss:$24 sps:$4 sm:$0xff]  }
  0xf2   : > { %2376 = vmatpush1.bf16.msra.mxu0 %v3404_v57  ;;  %2291 = vmatprep.subr.bf16.mxu1 %v3409_v58  ;;  %v3499_v57 = vld [vmem:[%s3789_s25 + $0x7bc] ss:$24 sps:$4 sm:$0xff]  }
  0xf3   : > { %2377 = vmatprep.subr.bf16.mxu0 %v3412_v59  ;;  %v3502_v58 = vld [vmem:[%s3789_s25 + $0x4c4] ss:$24 sps:$4 sm:$0xff]   ;;  %v3497_v59 = vld [vmem:[%s3789_s25 + $0x7b8] ss:$24 sps:$4 sm:$0xff]  }
  0xf5   : > { %2292 = vmatpush1.bf16.msra.mxu1 %v3407_v60  ;;  %v3500_v60 = vld [vmem:[%s3789_s25 + $0x4c0] ss:$24 sps:$4 sm:$0xff]  }
  0xf6   : > { %2378 = vmatpush1.bf16.msra.mxu0 %v3410_v61  ;;  %2293 = vmatprep.subr.bf16.mxu1 %v3415_v62  ;;  %v3505_v61 = vld [vmem:[%s3789_s25 + $0x7ec] ss:$24 sps:$4 sm:$0xff]  }
  0xf7   : > { %2379 = vmatprep.subr.bf16.mxu0 %v3418_v63  ;;  %v3508_v62 = vld [vmem:[%s3789_s25 + $0x4f4] ss:$24 sps:$4 sm:$0xff]   ;;  %v3503_v63 = vld [vmem:[%s3789_s25 + $0x7e8] ss:$24 sps:$4 sm:$0xff]  }
  0xf9   : > { %2294 = vmatpush1.bf16.msra.mxu1 %v3413_v0  ;;  %v3506_v0 = vld [vmem:[%s3789_s25 + $0x4f0] ss:$24 sps:$4 sm:$0xff]  }
  0xfa   : > { %2380 = vmatpush1.bf16.msra.mxu0 %v3416_v1  ;;  %2295 = vmatprep.subr.bf16.mxu1 %v3421_v2  ;;  %v3511_v1 = vld [vmem:[%s3789_s25 + $0x81c] ss:$24 sps:$4 sm:$0xff]  }
  0xfb   : > { %2381 = vmatprep.subr.bf16.mxu0 %v3424_v3  ;;  %v3514_v2 = vld [vmem:[%s3789_s25 + $0x524] ss:$24 sps:$4 sm:$0xff]   ;;  %v3509_v3 = vld [vmem:[%s3789_s25 + $0x818] ss:$24 sps:$4 sm:$0xff]  }
  0xfd   : > { %2296 = vmatpush1.bf16.msra.mxu1 %v3419_v4  ;;  %v3512_v4 = vld [vmem:[%s3789_s25 + $0x520] ss:$24 sps:$4 sm:$0xff]  }
  0xfe   : > { %2382 = vmatpush1.bf16.msra.mxu0 %v3422_v5  ;;  %2297 = vmatprep.subr.bf16.mxu1 %v3427_v6  ;;  %v3517_v5 = vld [vmem:[%s3789_s25 + $0x84c] ss:$24 sps:$4 sm:$0xff]  }
  0xff   : > { %2383 = vmatprep.subr.bf16.mxu0 %v3430_v7  ;;  %v3520_v6 = vld [vmem:[%s3789_s25 + $0x554] ss:$24 sps:$4 sm:$0xff]   ;;  %v3515_v7 = vld [vmem:[%s3789_s25 + $0x848] ss:$24 sps:$4 sm:$0xff]  }
 0x101   : > { %2298 = vmatpush1.bf16.msra.mxu1 %v3425_v8  ;;  %v3518_v8 = vld [vmem:[%s3789_s25 + $0x550] ss:$24 sps:$4 sm:$0xff]  }
 0x102   : > { %2384 = vmatpush1.bf16.msra.mxu0 %v3428_v9  ;;  %2299 = vmatprep.subr.bf16.mxu1 %v3433_v10  ;;  %v3523_v9 = vld [vmem:[%s3789_s25 + $0x87c] ss:$24 sps:$4 sm:$0xff]  }
 0x103   : > { %2385 = vmatprep.subr.bf16.mxu0 %v3436_v11  ;;  %v3526_v10 = vld [vmem:[%s3789_s25 + $0x584] ss:$24 sps:$4 sm:$0xff]   ;;  %v3521_v11 = vld [vmem:[%s3789_s25 + $0x878] ss:$24 sps:$4 sm:$0xff]  }
 0x105   : > { %2300 = vmatpush1.bf16.msra.mxu1 %v3431_v12  ;;  %v3524_v12 = vld [vmem:[%s3789_s25 + $0x580] ss:$24 sps:$4 sm:$0xff]  }
 0x106   : > { %2386 = vmatpush1.bf16.msra.mxu0 %v3434_v15  ;;  %2301 = vmatprep.subr.bf16.mxu1 %v3439_v16  ;;  %v3529_v15 = vld [vmem:[%s3789_s25 + $0x8ac] ss:$24 sps:$4 sm:$0xff]  }
 0x107   : > { %2387 = vmatprep.subr.bf16.mxu0 %v3442_v17  ;;  %v3532_v16 = vld [vmem:[%s3789_s25 + $0x5b4] ss:$24 sps:$4 sm:$0xff]   ;;  %v3527_v17 = vld [vmem:[%s3789_s25 + $0x8a8] ss:$24 sps:$4 sm:$0xff]  }
 0x109   : > { %2302 = vmatpush1.bf16.msra.mxu1 %v3437_v19  ;;  %v3530_v19 = vld [vmem:[%s3789_s25 + $0x5b0] ss:$24 sps:$4 sm:$0xff]  }
 0x10a   : > { %2388 = vmatpush1.bf16.msra.mxu0 %v3440_v20  ;;  %2314 = vmatprep.subr.bf16.mxu1 %v3445_v21  ;;  %v3535_v20 = vld [vmem:[%s3789_s25 + $0x8dc] ss:$24 sps:$4 sm:$0xff]  }
 0x10b   : > { %2400 = vmatprep.subr.bf16.mxu0 %v3448_v22  ;;  %v3538_v21 = vld [vmem:[%s3789_s25 + $0x5e4] ss:$24 sps:$4 sm:$0xff]   ;;  %v3533_v22 = vld [vmem:[%s3789_s25 + $0x8d8] ss:$24 sps:$4 sm:$0xff]  }
 0x10c   : > { %2304 = vmatmul.mubr.bf16.vlgmr.msra.gmra.mrb[4].mxu1 %v3876_v14  ;;  %v3458_v14 = vld [vmem:[%s3789_s25 + $0x370] ss:$24 sps:$4 sm:$0xff]  }
 0x10d   : > { %2390 = vmatmul.mubr.bf16.vlgmr.msra.gmra.mrb[4].mxu0 %v3873_v13  ;;  %2315 = vmatpush1.bf16.msra.mxu1 %v3443_v23  ;;  %v3455_v13 = vld [vmem:[%s3789_s25 + $0x668] ss:$24 sps:$4 sm:$0xff]  }
 0x10e   : > { %2401 = vmatpush1.bf16.msra.mxu0 %v3446_v24  ;;  %2316 = vmatprep.subr.bf16.mxu1 %v3451_v25  ;;  %v3536_v23 = vld [vmem:[%s3789_s25 + $0x5e0] ss:$24 sps:$4 sm:$0xff]   ;;  %v3541_v24 = vld [vmem:[%s3789_s25 + $0x614] ss:$24 sps:$4 sm:$0xff]   ;;  %v3539_v25 = vld [vmem:[%s3789_s25 + $0x610] ss:$24 sps:$4 sm:$0xff]  }
 0x10f   : > { %2402 = vmatprep.subr.bf16.mxu0 %v3454_v26  ;;  %2346 = vmatprep.mubr.bf16.mxu1 %v3908_v41  ;;  %v3544_v26 = vld [vmem:[%s3789_s25 + $0x644] ss:$24 sps:$4 sm:$0xff]  }
 0x110   : > { %2432 = vmatprep.mubr.bf16.mxu0 %v3587_v31  ;;  %v3550_v31 = vld [vmem:[%s3789_s25 + $0x6a4] ss:$24 sps:$4 sm:$0xff]  }
 0x111   : > { %2317 = vmatpush1.bf16.msra.mxu1 %v3449_v27  ;;  %v3588_v27 = vld [vmem:[%s3787_s20 + $0x8] ss:$24 sps:$4 sm:$0xff]  }
 0x112   : > { %2403 = vmatpush1.bf16.msra.mxu0 %v3452_v28  ;;  %2318 = vmatprep.subr.bf16.mxu1 %v3457_v29  ;;  %v3542_v28 = vld [vmem:[%s3789_s25 + $0x640] ss:$24 sps:$4 sm:$0xff]   ;;  %v3547_v29 = vld [vmem:[%s3789_s25 + $0x674] ss:$24 sps:$4 sm:$0xff]  }
 0x113   : > { %2404 = vmatprep.subr.bf16.mxu0 %v3460_v30  ;;  %v3545_v30 = vld [vmem:[%s3789_s25 + $0x670] ss:$24 sps:$4 sm:$0xff]  }
 0x115   : > { %2319 = vmatpush1.bf16.msra.mxu1 %v3455_v13  ;;  %v3548_v13 = vld [vmem:[%s3789_s25 + $0x6a0] ss:$24 sps:$4 sm:$0xff]  }
 0x116   : > { %2405 = vmatpush1.bf16.msra.mxu0 %v3458_v14  ;;  %2320 = vmatprep.subr.bf16.mxu1 %v3463_v32  ;;  %v3553_v14 = vld [vmem:[%s3789_s25 + $0x6d4] ss:$24 sps:$4 sm:$0xff]   ;;  %v3551_v32 = vld [vmem:[%s3789_s25 + $0x6d0] ss:$24 sps:$4 sm:$0xff]  }
 0x117   : > { %2406 = vmatprep.subr.bf16.mxu0 %v3466_v55  ;;  %v3556_v55 = vld [vmem:[%s3789_s25 + $0x704] ss:$24 sps:$4 sm:$0xff]  }
 0x119   : > { %2321 = vmatpush1.bf16.msra.mxu1 %v3461_v56  ;;  %v3559_v56 = vld [vmem:[%s3789_s25 + $0x734] ss:$24 sps:$4 sm:$0xff]  }
 0x11a   : > { %2407 = vmatpush1.bf16.msra.mxu0 %v3464_v33  ;;  %2322 = vmatprep.subr.bf16.mxu1 %v3469_v34 }
 0x11b   : > { %2408 = vmatprep.subr.bf16.mxu0 %v3472_v35  ;;  %v3557_v35 = vld [vmem:[%s3789_s25 + $0x730] ss:$24 sps:$4 sm:$0xff]  }
 0x11d   : > { %2323 = vmatpush1.bf16.msra.mxu1 %v3467_v36 }
 0x11e   : > { %2409 = vmatpush1.bf16.msra.mxu0 %v3470_v37  ;;  %2324 = vmatprep.subr.bf16.mxu1 %v3475_v38  ;;  %v3562_v37 = vld [vmem:[%s3789_s25 + $0x764] ss:$24 sps:$4 sm:$0xff]  }
 0x11f   : > { %2410 = vmatprep.subr.bf16.mxu0 %v3478_v39  ;;  %v3560_v39 = vld [vmem:[%s3789_s25 + $0x760] ss:$24 sps:$4 sm:$0xff]  }
 0x121   : > { %2325 = vmatpush1.bf16.msra.mxu1 %v3473_v40  ;;  %v3565_v40 = vld [vmem:[%s3789_s25 + $0x794] ss:$24 sps:$4 sm:$0xff]  }
 0x122   : > { %2411 = vmatpush1.bf16.msra.mxu0 %v3476_v42  ;;  %2326 = vmatprep.subr.bf16.mxu1 %v3481_v43  ;;  %v3563_v42 = vld [vmem:[%s3789_s25 + $0x790] ss:$24 sps:$4 sm:$0xff]   ;;  %v3568_v43 = vld [vmem:[%s3789_s25 + $0x7c4] ss:$24 sps:$4 sm:$0xff]  }
 0x123   : > { %2412 = vmatprep.subr.bf16.mxu0 %v3484_v44  ;;  %v3566_v44 = vld [vmem:[%s3789_s25 + $0x7c0] ss:$24 sps:$4 sm:$0xff]  }
 0x125   : > { %2327 = vmatpush1.bf16.msra.mxu1 %v3479_v45  ;;  %v3571_v45 = vld [vmem:[%s3789_s25 + $0x7f4] ss:$24 sps:$4 sm:$0xff]  }
 0x126   : > { %2413 = vmatpush1.bf16.msra.mxu0 %v3482_v46  ;;  %2328 = vmatprep.subr.bf16.mxu1 %v3487_v47  ;;  %v3569_v46 = vld [vmem:[%s3789_s25 + $0x7f0] ss:$24 sps:$4 sm:$0xff]   ;;  %v3574_v47 = vld [vmem:[%s3789_s25 + $0x824] ss:$24 sps:$4 sm:$0xff]  }
 0x127   : > { %2414 = vmatprep.subr.bf16.mxu0 %v3490_v48  ;;  %v3572_v48 = vld [vmem:[%s3789_s25 + $0x820] ss:$24 sps:$4 sm:$0xff]  }
 0x129   : > { %2329 = vmatpush1.bf16.msra.mxu1 %v3485_v49  ;;  %v3577_v49 = vld [vmem:[%s3789_s25 + $0x854] ss:$24 sps:$4 sm:$0xff]  }
 0x12a   : > { %2415 = vmatpush1.bf16.msra.mxu0 %v3488_v50  ;;  %2330 = vmatprep.subr.bf16.mxu1 %v3493_v51  ;;  %v3575_v50 = vld [vmem:[%s3789_s25 + $0x850] ss:$24 sps:$4 sm:$0xff]   ;;  %v3580_v51 = vld [vmem:[%s3789_s25 + $0x884] ss:$24 sps:$4 sm:$0xff]  }
 0x12b   : > { %2416 = vmatprep.subr.bf16.mxu0 %v3496_v52  ;;  %v3578_v52 = vld [vmem:[%s3789_s25 + $0x880] ss:$24 sps:$4 sm:$0xff]  }
 0x12d   : > { %2331 = vmatpush1.bf16.msra.mxu1 %v3491_v53  ;;  %v3583_v53 = vld [vmem:[%s3789_s25 + $0x8b4] ss:$24 sps:$4 sm:$0xff]  }
 0x12e   : > { %2417 = vmatpush1.bf16.msra.mxu0 %v3494_v54  ;;  %2332 = vmatprep.subr.bf16.mxu1 %v3499_v57  ;;  %v3581_v54 = vld [vmem:[%s3789_s25 + $0x8b0] ss:$24 sps:$4 sm:$0xff]   ;;  %v3586_v57 = vld [vmem:[%s3789_s25 + $0x8e4] ss:$24 sps:$4 sm:$0xff]  }
 0x12f   : > { %2418 = vmatprep.subr.bf16.mxu0 %v3502_v58  ;;  %v3584_v58 = vld [vmem:[%s3789_s25 + $0x8e0] ss:$24 sps:$4 sm:$0xff]  }
 0x131   : > { %2333 = vmatpush1.bf16.msra.mxu1 %v3497_v59  ;;  %v323_v59 = vld [vmem:[#allocation2] sm:$0xff] }
 0x132   : > { %2419 = vmatpush1.bf16.msra.mxu0 %v3500_v60  ;;  %2334 = vmatprep.subr.bf16.mxu1 %v3505_v61 }
 0x133   : > { %2420 = vmatprep.subr.bf16.mxu0 %v3508_v62  ;;  %v324_v62 = vld [vmem:[#allocation2 + $0x8] sm:$0xff] }
 0x135   : > { %2335 = vmatpush1.bf16.msra.mxu1 %v3503_v63 }
 0x136   : > { %2421 = vmatpush1.bf16.msra.mxu0 %v3506_v0  ;;  %2336 = vmatprep.subr.bf16.mxu1 %v3511_v1  ;;  %v329_v1 = vld [vmem:[#allocation2 + $0x30] sm:$0xff] }
 0x137   : > { %2422 = vmatprep.subr.bf16.mxu0 %v3514_v2 }
 0x139   : > { %2337 = vmatpush1.bf16.msra.mxu1 %v3509_v3 }
 0x13a   : > { %2423 = vmatpush1.bf16.msra.mxu0 %v3512_v4  ;;  %2338 = vmatprep.subr.bf16.mxu1 %v3517_v5  ;;  %v330_v5 = vld [vmem:[#allocation2 + $0x38] sm:$0xff] }
 0x13b   : > { %2424 = vmatprep.subr.bf16.mxu0 %v3520_v6 }
 0x13d   : > { %2339 = vmatpush1.bf16.msra.mxu1 %v3515_v7 }
 0x13e   : > { %2425 = vmatpush1.bf16.msra.mxu0 %v3518_v8  ;;  %2340 = vmatprep.subr.bf16.mxu1 %v3523_v9 }
 0x13f   : > { %2426 = vmatprep.subr.bf16.mxu0 %v3526_v10 }
 0x141   : > { %2341 = vmatpush1.bf16.msra.mxu1 %v3521_v11  ;;  %v326_v11 = vld [vmem:[#allocation2 + $0x18] sm:$0xff] }
 0x142   : > { %2427 = vmatpush1.bf16.msra.mxu0 %v3524_v12  ;;  %2342 = vmatprep.subr.bf16.mxu1 %v3529_v15  ;;  %v331_v15 = vld [vmem:[#allocation2 + $0x40] sm:$0xff] }
 0x143   : > { %2428 = vmatprep.subr.bf16.mxu0 %v3532_v16 }
 0x145   : > { %2343 = vmatpush1.bf16.msra.mxu1 %v3527_v17 }
 0x146   : > { %2429 = vmatpush1.bf16.msra.mxu0 %v3530_v19  ;;  %2344 = vmatprep.subr.bf16.mxu1 %v3535_v20  ;;  %v332_v19 = vld [vmem:[#allocation2 + $0x48] sm:$0xff] }
 0x147   : > { %2430 = vmatprep.subr.bf16.mxu0 %v3538_v21 }
 0x149   : > { %2345 = vmatpush1.bf16.msra.mxu1 %v3533_v22 }
 0x14a   : > { %2431 = vmatpush1.bf16.msra.mxu0 %v3536_v23 }
 0x14b   : > { %2443 = vmatprep.subr.bf16.mxu0 %v3541_v24 }
 0x14c   : > { %2347 = vmatmul.mubr.bf16.vlgmr.msra.gmra.mrb[4].mxu1 %v3948_v18 }
 0x14d   : > { %2433 = vmatmul.mubr.bf16.vlgmr.msra.gmra.mrb[4].mxu0 %v3588_v27 }
 0x14e   : > { %2444 = vmatpush1.bf16.msra.mxu0 %v3539_v25  ;;  %2475 = vmatprep.mubr.bf16.mxu0 %v3908_v41  ;;  %v3554_v41 = vld [vmem:[%s3789_s25 + $0x700] ss:$24 sps:$4 sm:$0xff]  }
 0x14f   : > { %2445 = vmatprep.subr.bf16.mxu0 %v3544_v26  ;;  %v327_v25 = vld [vmem:[#allocation2 + $0x20] sm:$0xff]  ;;  %v328_v26 = vld [vmem:[#allocation2 + $0x28] sm:$0xff] }
 0x152   : > { %2446 = vmatpush1.bf16.msra.mxu0 %v3542_v28  ;;  %v333_v28 = vld [vmem:[#allocation2 + $0x50] sm:$0xff] }
 0x153   : > { %2447 = vmatprep.subr.bf16.mxu0 %v3547_v29 }
 0x156   : > { %2448 = vmatpush1.bf16.msra.mxu0 %v3545_v30 }
 0x157   : > { %2449 = vmatprep.subr.bf16.mxu0 %v3550_v31  ;;  %v334_v31 = vld [vmem:[#allocation2 + $0x58] sm:$0xff] }
 0x15a   : > { %2450 = vmatpush1.bf16.msra.mxu0 %v3548_v13 }
 0x15b   : > { %2451 = vmatprep.subr.bf16.mxu0 %v3553_v14 }
 0x15e   : > { %2452 = vmatpush1.bf16.msra.mxu0 %v3551_v32 }
 0x15f   : > { %2453 = vmatprep.subr.bf16.mxu0 %v3556_v55  ;;  %v2133_v33 = vpop.f32.mrb[0].mxu1 }
 0x160   : > { %v2135_v34 = vpop.f32.mrb[1].mxu1 }
 0x161   : > { %v2137_v36 = vpop.f32.mrb[2].mxu1 }
 0x162   : > { %2454 = vmatpush1.bf16.msra.mxu0 %v3554_v41  ;;  %v2139_v38 = vpop.f32.mrb[3].mxu1 }
 0x163   : > { %2455 = vmatprep.subr.bf16.mxu0 %v3559_v56  ;;  %v2528_v56 = vlaneseq (!%p3045_p7) }
 0x166   : > { %2456 = vmatpush1.bf16.msra.mxu0 %v3557_v35 }
 0x167   : > { %2457 = vmatprep.subr.bf16.mxu0 %v3562_v37 }
 0x16a   : > { %2458 = vmatpush1.bf16.msra.mxu0 %v3560_v39 }
 0x16b   : > { %2459 = vmatprep.subr.bf16.mxu0 %v3565_v40 }
 0x16e   : > { %2460 = vmatpush1.bf16.msra.mxu0 %v3563_v42 }
 0x16f   : > { %2461 = vmatprep.subr.bf16.mxu0 %v3568_v43 }
 0x172   : > { %2462 = vmatpush1.bf16.msra.mxu0 %v3566_v44 }
 0x173   : > { %2463 = vmatprep.subr.bf16.mxu0 %v3571_v45 }
 0x176   : > { %2464 = vmatpush1.bf16.msra.mxu0 %v3569_v46 }
 0x177   : > { %2465 = vmatprep.subr.bf16.mxu0 %v3574_v47 }
 0x17a   : > { %2466 = vmatpush1.bf16.msra.mxu0 %v3572_v48 }
 0x17b   : > { %2467 = vmatprep.subr.bf16.mxu0 %v3577_v49 }
 0x17e   : > { %2468 = vmatpush1.bf16.msra.mxu0 %v3575_v50 }
 0x17f   : > { %2469 = vmatprep.subr.bf16.mxu0 %v3580_v51 }
 0x182   : > { %2470 = vmatpush1.bf16.msra.mxu0 %v3578_v52 }
 0x183   : > { %2471 = vmatprep.subr.bf16.mxu0 %v3583_v53 }
 0x186   : > { %2472 = vmatpush1.bf16.msra.mxu0 %v3581_v54 }
 0x187   : > { %2473 = vmatprep.subr.bf16.mxu0 %v3586_v57 }
 0x18a   : > { %2474 = vmatpush1.bf16.msra.mxu0 %v3584_v58 }
 0x18d   : > { %2476 = vmatmul.mubr.bf16.vlgmr.msra.gmra.mrb[4].mxu0 %v3948_v18  ;;  %v325_v18 = vld [vmem:[#allocation2 + $0x10] sm:$0xff] }
 0x1a0   : > { %v2219_v60 = vpop.f32.mrb[0].mxu0 }
 0x1a1   : > { %v3063_v61 = vadd.f32 %v2219_v60, %v2133_v33  ;;  %v2221_v63 = vpop.f32.mrb[1].mxu0  ;;  %v2529_v33 = vshrl.u32 (!%p3045_p7), %v2528_v56, 7 }
 0x1a2   : > { %v3064_v0 = vadd.f32 %v2221_v63, %v2135_v34  ;;  %v2223_v2 = vpop.f32.mrb[2].mxu0  ;;  %v2526_v34 = vld [vmem:[%s4162_s2] sm:$0x3f] (!%p3045_p7) }
 0x1a3   : > { %v2486_v3 = vadd.f32 %v3063_v61, %v323_v59  ;;  %v3065_v4 = vadd.f32 %v2223_v2, %v2137_v36  ;;  %v2225_v6 = vpop.f32.mrb[3].mxu0  ;;  %v2530_v37 = vsub.s32 (!%p3045_p7), 0, %v2529_v33  ;;  %v2538_v39 = vsub.s32 (!%p3045_p7), 2, %v2529_v33 }
 0x1a4   : > { %v2487_v7 = vadd.f32 %v3064_v0, %v324_v62  ;;  %v3066_v8 = vadd.f32 %v2225_v6, %v2139_v38  ;;  %v2534_v38 = vsub.s32 (!%p3045_p7), 1, %v2529_v33  ;;  %v2542_v40 = vsub.s32 (!%p3045_p7), 3, %v2529_v33 }
 0x1a5   : > { %2498 = vst [vmem:[#allocation2] sm:$0xff] %v2486_v3  ;;  %v2492_v9 = vadd.f32 %v3065_v4, %v329_v1  ;;  %v2546_v45 = vsub.s32 (!%p3045_p7), 4, %v2529_v33  ;;  %v2550_v46 = vsub.s32 (!%p3045_p7), 5, %v2529_v33  ;;  %v2531_v47 = vrot.slane (!%p3045_p7), %v2526_v34, %v2530_v37 }
 0x1a6   : > { %2499 = vst [vmem:[#allocation2 + $0x8] sm:$0xff] %v2487_v7  ;;  %v2493_v10 = vadd.f32 %v3066_v8, %v330_v5  ;;  %v2535_v48 = vrot.slane (!%p3045_p7), %v2526_v34, %v2534_v38  ;;  %v2539_v49 = vrot.slane (!%p3045_p7), %v2526_v34, %v2538_v39  ;;  %v2543_v50 = vrot.slane (!%p3045_p7), %v2526_v34, %v2542_v40 }
 0x1a7   : > { %2504 = vst [vmem:[#allocation2 + $0x30] sm:$0xff] %v2492_v9  ;;  %v2547_v54 = vrot.slane (!%p3045_p7), %v2526_v34, %v2546_v45  ;;  %v2551_v57 = vrot.slane (!%p3045_p7), %v2526_v34, %v2550_v46 }
 0x1a8   : > { %2505 = vst [vmem:[#allocation2 + $0x38] sm:$0xff] %v2493_v10 }
 0x1ac   : > { %v2514_v35 = vld [vmem:[#allocation2] sm:$0xff] (!%p3045_p7) }
 0x1ad   : > { %v2515_v36 = vld [vmem:[#allocation2 + $0x8] sm:$0xff] (!%p3045_p7)  ;;  %v2558_v60 = vadd.f32 (!%p3045_p7), %v2531_v47, %v2514_v35 }
 0x1ae   : > { %v2520_v52 = vld [vmem:[#allocation2 + $0x30] sm:$0xff] (!%p3045_p7)  ;;  %v2559_v61 = vadd.f32 (!%p3045_p7), %v2535_v48, %v2515_v36 }
 0x1af   : > { %v2521_v53 = vld [vmem:[#allocation2 + $0x38] sm:$0xff] (!%p3045_p7)  ;;  %v2564_v4 = vadd.f32 (!%p3045_p7), %v2531_v47, %v2520_v52 }
 0x1b0   : > { %v2565_v5 = vadd.f32 (!%p3045_p7), %v2535_v48, %v2521_v53  ;;  %v3057_v6 = vpack.c.bf16 (!%p3045_p7), %v2559_v61, %v2558_v60 }
 0x1b2   : > { %2606 = vst [vmem:[%s4163_s3] sm:$0xff] (!%p3045_p7), %v3057_v6 }
 0x21f   : > { %v2348_v12 = vpop.f32.mrb[4].mxu1 }
 0x220   : > { %v2488_v16 = vadd.f32 %v2348_v12, %v325_v18  ;;  %v2350_v17 = vpop.f32.mrb[5].mxu1  ;;  %v3060_v18 = vpack.c.bf16 (!%p3045_p7), %v2565_v5, %v2564_v4 }
 0x221   : > { %v2489_v20 = vadd.f32 %v2350_v17, %v326_v11  ;;  %v2352_v21 = vpop.f32.mrb[6].mxu1 }
 0x222   : > { %2500 = vst [vmem:[#allocation2 + $0x10] sm:$0xff] %v2488_v16  ;;  %v2494_v22 = vadd.f32 %v2352_v21, %v331_v15  ;;  %v2354_v23 = vpop.f32.mrb[7].mxu1  ;;  %2609 = vst [vmem:[%s4163_s3 + $0x18] sm:$0xff] (!%p3045_p7), %v3060_v18 }
 0x223   : > { %2501 = vst [vmem:[#allocation2 + $0x18] sm:$0xff] %v2489_v20  ;;  %v2495_v24 = vadd.f32 %v2354_v23, %v332_v19 }
 0x224   : > { %2506 = vst [vmem:[#allocation2 + $0x40] sm:$0xff] %v2494_v22 }
 0x225   : > { %2507 = vst [vmem:[#allocation2 + $0x48] sm:$0xff] %v2495_v24 }
 0x229   : > { %v2516_v42 = vld [vmem:[#allocation2 + $0x10] sm:$0xff] (!%p3045_p7) }
 0x22a   : > { %v2517_v43 = vld [vmem:[#allocation2 + $0x18] sm:$0xff] (!%p3045_p7)  ;;  %v2560_v62 = vadd.f32 (!%p3045_p7), %v2539_v49, %v2516_v42 }
 0x22b   : > { %v2522_v58 = vld [vmem:[#allocation2 + $0x40] sm:$0xff] (!%p3045_p7)  ;;  %v2561_v63 = vadd.f32 (!%p3045_p7), %v2543_v50, %v2517_v43 }
 0x22c   : > { %v2523_v59 = vld [vmem:[#allocation2 + $0x48] sm:$0xff] (!%p3045_p7)  ;;  %v2566_v8 = vadd.f32 (!%p3045_p7), %v2539_v49, %v2522_v58 }
 0x22d   : > { %v3058_v7 = vpack.c.bf16 (!%p3045_p7), %v2561_v63, %v2560_v62  ;;  %v2567_v9 = vadd.f32 (!%p3045_p7), %v2543_v50, %v2523_v59 }
 0x22f   : > { %2607 = vst [vmem:[%s4163_s3 + $0x8] sm:$0xff] (!%p3045_p7), %v3058_v7  ;;  %v3061_v15 = vpack.c.bf16 (!%p3045_p7), %v2567_v9, %v2566_v8 }
 0x231   : > { %2610 = vst [vmem:[%s4163_s3 + $0x20] sm:$0xff] (!%p3045_p7), %v3061_v15 }
 0x260   : > { %v2477_v27 = vpop.f32.mrb[4].mxu0  ;;  %2513 = sbr.rel (%p3045_p7) target bundleno = 627 (0x273), region = 67 }
 0x261   : > { %v2490_v29 = vadd.f32 %v2477_v27, %v327_v25  ;;  %v2479_v30 = vpop.f32.mrb[5].mxu0 }
 0x262   : > { %v2491_v13 = vadd.f32 %v2479_v30, %v328_v26  ;;  %v2481_v14 = vpop.f32.mrb[6].mxu0 }
 0x263   : > { %2502 = vst [vmem:[#allocation2 + $0x20] sm:$0xff] %v2490_v29  ;;  %v2496_v32 = vadd.f32 %v2481_v14, %v333_v28  ;;  %v2483_v55 = vpop.f32.mrb[7].mxu0 }
 0x264   : > { %2503 = vst [vmem:[#allocation2 + $0x28] sm:$0xff] %v2491_v13  ;;  %v2497_v41 = vadd.f32 %v2483_v55, %v334_v31 }
 0x265   : > { %2508 = vst [vmem:[#allocation2 + $0x50] sm:$0xff] %v2496_v32 }
 0x266   : > { %2509 = vst [vmem:[#allocation2 + $0x58] sm:$0xff] %v2497_v41 }
 0x26a   : > { %v2518_v44 = vld [vmem:[#allocation2 + $0x20] sm:$0xff] }
 0x26b   : > { %v2519_v51 = vld [vmem:[#allocation2 + $0x28] sm:$0xff]  ;;  %v2562_v2 = vadd.f32 %v2547_v54, %v2518_v44 }
 0x26c   : > { %v2524_v0 = vld [vmem:[#allocation2 + $0x50] sm:$0xff]  ;;  %v2563_v3 = vadd.f32 %v2551_v57, %v2519_v51 }
 0x26d   : > { %v2525_v1 = vld [vmem:[#allocation2 + $0x58] sm:$0xff]  ;;  %v2568_v11 = vadd.f32 %v2547_v54, %v2524_v0 }
 0x26e   : > { %v3059_v10 = vpack.c.bf16 %v2563_v3, %v2562_v2  ;;  %v2569_v12 = vadd.f32 %v2551_v57, %v2525_v1 }
 0x270   : > { %2608 = vst [vmem:[%s4163_s3 + $0x10] sm:$0xff] %v3059_v10  ;;  %v3062_v16 = vpack.c.bf16 %v2569_v12, %v2568_v11 }
 0x272   : > { %2611 = vst [vmem:[%s4163_s3 + $0x28] sm:$0xff] %v3062_v16 }
 0x273 PF: > { %s16_s17 = sadd.s32 1, %s3667_s17   ;;  %s4166_s12 = smov %s3651_s13 }
 0x274   : > { %p13_p2 = scmp.ge.s32.totalorder %s16_s17, 6   ;;  %s4167_s13 = smov %s3655_s14 }
 0x275   : > { %s4168_s14 = smov %s3741_s24  ;;  %s4169_s15 = smov %s3663_s16 }
 0x276   : > { %s4170_s16 = smov %s4172_s19  ;;  %15 = sbr.rel (!%p13_p2) target bundleno = 4 (0x4), region = 114 }
 0x27d   :  { %2645 = vsyncpa [#allocation5], 1 }
 0x27e   :  { %2647 = vsyncpa [#allocation5 + $0x1], 1 }

// kernel: model_forward.94
= control target key start
LH: loop header
LB: loop body
LE: loop exit
PB: predicated region body
PF: predicated region fallthrough
CT: control target
= control target key end

     0   :  { %s4186_s12 = smov 0   ;;  %s4188_s13 = smov 0   ;;  %s5204_s0 = inlined_call_operand.vmem [shape: bf16[16,768], index: 0, kind: input, shape index: {}]   ;;  %s5205_s1 = inlined_call_operand.vmem [shape: bf16[768,2304], index: 1, kind: input, shape index: {}]   ;;  %s5206_s2 = inlined_call_operand.vmem [shape: f32[1,2304], index: 2, kind: input, shape index: {}]   ;;  %s5207_s3 = inlined_call_operand.vmem [shape: bf16[16,2304], index: 3, kind: output, shape index: {}]  }
   0x1   :  { %s4190_s14 = smov 0   ;;  %s4192_s15 = smov 0  }
   0x2   :  { %s4194_s16 = smov 0  }
   0x3 LB: > { %s28_s17 = sadd.s32 1, %s4160_s15  ;;  %s3297_s18 = sadd.s32 4294967295, %s4164_s16   ;;  %s4164_s16 = sphi %s4194_s16, %s13_s16   ;;  %s4160_s15 = sphi %s4192_s15, %s5212_s15   ;;  %s4156_s14 = sphi %s4190_s14, %s5211_s14   ;;  %s4152_s13 = sphi %s4188_s13, %s5210_s13   ;;  %s4148_s12 = sphi %s4186_s12, %s5209_s12  }
   0x4   : > { %p30_p0 = scmp.ge.s32.totalorder %s28_s17, 3  ;;  %p76_p1 = scmp.ne.s32.totalorder %s4152_s13, %s4148_s12 }
   0x5   : > { %p77_p2 = scmp.eq.s32.totalorder %s4164_s16, 0  ;;  %p134_p4 = scmp.eq.s32.totalorder %s3297_s18, 2 }
   0x6   : > { %s5214_s17 = smov (%p30_p0, %s28_s17), 0  ;;  %s69_s20 = sadd.s32 1, %s4152_s13 }
   0x7   : > { %p78_p3 = por %p77_p2, %p76_p1  ;;  %s65_s19 = ssub.s32 %s4160_s15, %s5214_s17 }
   0x8   : > { %p67_p5 = scmp.eq.s32.totalorder %s65_s19, 0  ;;  %p4221_p6 = por %p134_p4, %p76_p1 }
   0x9   : > { %p3301_p7 = scmp.ge.s32.totalorder %s4164_s16, 3 }
   0xa   : > { %s4226_s22 = scalar_select %p67_p5, %s4152_s13, %s69_s20  }
   0xb   : > { %171 = sbr.rel (%p3301_p7) target bundleno = 167 (0xa7), region = 20 }
  0x12   : > { %174 = sbr.rel (!%p78_p3) target bundleno = 167 (0xa7), region = 24  ;;  %s176_s23 = sand.u32 (%p78_p3), 1, %s4152_s13  }
  0x13   : > { %s3607_s24 = smul.u32 (%p78_p3), 24, %s4160_s15 }
  0x14   : > { %s3639_s25 = smul.u32 (%p78_p3), 2304, %s176_s23 }
  0x15   : > { %s4234_s28 = scalar_lea.vmem (%p78_p3), %s5205_s1, %s3607_s24 }
  0x16   : > { %v197_v0 = vld [vmem:[%s4234_s28] sm:$0xff] (%p78_p3)  ;;  %v199_v1 = vld [vmem:[%s4234_s28 + $0x8] sm:$0xff] (%p78_p3)  ;;  %v201_v2 = vld [vmem:[%s4234_s28 + $0x10] sm:$0xff] (%p78_p3)  ;;  %s4239_s29 = scalar_lea.vmem (%p78_p3), [#allocation3], %s3639_s25 }
  0x17   : > { %198 = vst [vmem:[%s4239_s29] sm:$0xff] (%p78_p3), %v197_v0  ;;  %200 = vst [vmem:[%s4239_s29 + $0x8] sm:$0xff] (%p78_p3), %v199_v1  ;;  %v203_v3 = vld [vmem:[%s4234_s28 + $0x48] sm:$0xff] (%p78_p3)  ;;  %v205_v4 = vld [vmem:[%s4234_s28 + $0x50] sm:$0xff] (%p78_p3) }
  0x18   : > { %202 = vst [vmem:[%s4239_s29 + $0x10] sm:$0xff] (%p78_p3), %v201_v2  ;;  %v207_v5 = vld [vmem:[%s4234_s28 + $0x58] sm:$0xff] (%p78_p3)  ;;  %204 = vst [vmem:[%s4239_s29 + $0x18] sm:$0xff] (%p78_p3), %v203_v3  ;;  %v209_v6 = vld [vmem:[%s4234_s28 + $0x90] sm:$0xff] (%p78_p3) }
  0x19   : > { %206 = vst [vmem:[%s4239_s29 + $0x20] sm:$0xff] %v205_v4  ;;  %208 = vst [vmem:[%s4239_s29 + $0x28] sm:$0xff] %v207_v5  ;;  %v211_v7 = vld [vmem:[%s4234_s28 + $0x98] sm:$0xff]  ;;  %v213_v8 = vld [vmem:[%s4234_s28 + $0xa0] sm:$0xff] }
  0x1a   : > { %210 = vst [vmem:[%s4239_s29 + $0x30] sm:$0xff] %v209_v6  ;;  %212 = vst [vmem:[%s4239_s29 + $0x38] sm:$0xff] %v211_v7  ;;  %v215_v9 = vld [vmem:[%s4234_s28 + $0xd8] sm:$0xff]  ;;  %v217_v10 = vld [vmem:[%s4234_s28 + $0xe0] sm:$0xff] }
  0x1b   : > { %214 = vst [vmem:[%s4239_s29 + $0x40] sm:$0xff] %v213_v8  ;;  %v219_v11 = vld [vmem:[%s4234_s28 + $0xe8] sm:$0xff]  ;;  %216 = vst [vmem:[%s4239_s29 + $0x48] sm:$0xff] %v215_v9  ;;  %v221_v12 = vld [vmem:[%s4234_s28 + $0x120] sm:$0xff] }
  0x1c   : > { %218 = vst [vmem:[%s4239_s29 + $0x50] sm:$0xff] %v217_v10  ;;  %220 = vst [vmem:[%s4239_s29 + $0x58] sm:$0xff] %v219_v11  ;;  %v223_v13 = vld [vmem:[%s4234_s28 + $0x128] sm:$0xff]  ;;  %v225_v14 = vld [vmem:[%s4234_s28 + $0x130] sm:$0xff] }
  0x1d   : > { %222 = vst [vmem:[%s4239_s29 + $0x60] sm:$0xff] %v221_v12  ;;  %224 = vst [vmem:[%s4239_s29 + $0x68] sm:$0xff] %v223_v13  ;;  %v227_v15 = vld [vmem:[%s4234_s28 + $0x168] sm:$0xff]  ;;  %v229_v16 = vld [vmem:[%s4234_s28 + $0x170] sm:$0xff] }
  0x1e   : > { %226 = vst [vmem:[%s4239_s29 + $0x70] sm:$0xff] %v225_v14  ;;  %v231_v17 = vld [vmem:[%s4234_s28 + $0x178] sm:$0xff]  ;;  %228 = vst [vmem:[%s4239_s29 + $0x78] sm:$0xff] %v227_v15  ;;  %v233_v18 = vld [vmem:[%s4234_s28 + $0x1b0] sm:$0xff] }
  0x1f   : > { %230 = vst [vmem:[%s4239_s29 + $0x80] sm:$0xff] %v229_v16  ;;  %232 = vst [vmem:[%s4239_s29 + $0x88] sm:$0xff] %v231_v17  ;;  %v235_v19 = vld [vmem:[%s4234_s28 + $0x1b8] sm:$0xff]  ;;  %v237_v20 = vld [vmem:[%s4234_s28 + $0x1c0] sm:$0xff] }
  0x20   : > { %234 = vst [vmem:[%s4239_s29 + $0x90] sm:$0xff] %v233_v18  ;;  %236 = vst [vmem:[%s4239_s29 + $0x98] sm:$0xff] %v235_v19  ;;  %v239_v21 = vld [vmem:[%s4234_s28 + $0x1f8] sm:$0xff]  ;;  %v241_v22 = vld [vmem:[%s4234_s28 + $0x200] sm:$0xff] }
  0x21   : > { %238 = vst [vmem:[%s4239_s29 + $0xa0] sm:$0xff] %v237_v20  ;;  %v243_v23 = vld [vmem:[%s4234_s28 + $0x208] sm:$0xff]  ;;  %240 = vst [vmem:[%s4239_s29 + $0xa8] sm:$0xff] %v239_v21  ;;  %v245_v24 = vld [vmem:[%s4234_s28 + $0x240] sm:$0xff] }
  0x22   : > { %242 = vst [vmem:[%s4239_s29 + $0xb0] sm:$0xff] %v241_v22  ;;  %244 = vst [vmem:[%s4239_s29 + $0xb8] sm:$0xff] %v243_v23  ;;  %v247_v25 = vld [vmem:[%s4234_s28 + $0x248] sm:$0xff]  ;;  %v249_v26 = vld [vmem:[%s4234_s28 + $0x250] sm:$0xff] }
  0x23   : > { %246 = vst [vmem:[%s4239_s29 + $0xc0] sm:$0xff] %v245_v24  ;;  %248 = vst [vmem:[%s4239_s29 + $0xc8] sm:$0xff] %v247_v25  ;;  %v251_v27 = vld [vmem:[%s4234_s28 + $0x288] sm:$0xff]  ;;  %v253_v28 = vld [vmem:[%s4234_s28 + $0x290] sm:$0xff] }
  0x24   : > { %250 = vst [vmem:[%s4239_s29 + $0xd0] sm:$0xff] %v249_v26  ;;  %v255_v29 = vld [vmem:[%s4234_s28 + $0x298] sm:$0xff]  ;;  %252 = vst [vmem:[%s4239_s29 + $0xd8] sm:$0xff] %v251_v27  ;;  %v257_v30 = vld [vmem:[%s4234_s28 + $0x2d0] sm:$0xff] }
  0x25   : > { %254 = vst [vmem:[%s4239_s29 + $0xe0] sm:$0xff] %v253_v28  ;;  %256 = vst [vmem:[%s4239_s29 + $0xe8] sm:$0xff] %v255_v29  ;;  %v259_v31 = vld [vmem:[%s4234_s28 + $0x2d8] sm:$0xff]  ;;  %v261_v32 = vld [vmem:[%s4234_s28 + $0x2e0] sm:$0xff] }
  0x26   : > { %258 = vst [vmem:[%s4239_s29 + $0xf0] sm:$0xff] %v257_v30  ;;  %260 = vst [vmem:[%s4239_s29 + $0xf8] sm:$0xff] %v259_v31  ;;  %v263_v33 = vld [vmem:[%s4234_s28 + $0x318] sm:$0xff]  ;;  %v265_v34 = vld [vmem:[%s4234_s28 + $0x320] sm:$0xff] }
  0x27   : > { %262 = vst [vmem:[%s4239_s29 + $0x100] sm:$0xff] %v261_v32  ;;  %v267_v35 = vld [vmem:[%s4234_s28 + $0x328] sm:$0xff]  ;;  %264 = vst [vmem:[%s4239_s29 + $0x108] sm:$0xff] %v263_v33  ;;  %v269_v36 = vld [vmem:[%s4234_s28 + $0x360] sm:$0xff] }
  0x28   : > { %266 = vst [vmem:[%s4239_s29 + $0x110] sm:$0xff] %v265_v34  ;;  %268 = vst [vmem:[%s4239_s29 + $0x118] sm:$0xff] %v267_v35  ;;  %v271_v37 = vld [vmem:[%s4234_s28 + $0x368] sm:$0xff]  ;;  %v273_v38 = vld [vmem:[%s4234_s28 + $0x370] sm:$0xff] }
  0x29   : > { %270 = vst [vmem:[%s4239_s29 + $0x120] sm:$0xff] %v269_v36  ;;  %272 = vst [vmem:[%s4239_s29 + $0x128] sm:$0xff] %v271_v37  ;;  %v275_v39 = vld [vmem:[%s4234_s28 + $0x3a8] sm:$0xff]  ;;  %v277_v40 = vld [vmem:[%s4234_s28 + $0x3b0] sm:$0xff] }
  0x2a   : > { %274 = vst [vmem:[%s4239_s29 + $0x130] sm:$0xff] %v273_v38  ;;  %v279_v41 = vld [vmem:[%s4234_s28 + $0x3b8] sm:$0xff]  ;;  %276 = vst [vmem:[%s4239_s29 + $0x138] sm:$0xff] %v275_v39  ;;  %v281_v42 = vld [vmem:[%s4234_s28 + $0x3f0] sm:$0xff] }
  0x2b   : > { %278 = vst [vmem:[%s4239_s29 + $0x140] sm:$0xff] %v277_v40  ;;  %280 = vst [vmem:[%s4239_s29 + $0x148] sm:$0xff] %v279_v41  ;;  %v283_v43 = vld [vmem:[%s4234_s28 + $0x3f8] sm:$0xff]  ;;  %v285_v44 = vld [vmem:[%s4234_s28 + $0x400] sm:$0xff] }
  0x2c   : > { %282 = vst [vmem:[%s4239_s29 + $0x150] sm:$0xff] %v281_v42  ;;  %284 = vst [vmem:[%s4239_s29 + $0x158] sm:$0xff] %v283_v43  ;;  %v287_v45 = vld [vmem:[%s4234_s28 + $0x438] sm:$0xff]  ;;  %v289_v46 = vld [vmem:[%s4234_s28 + $0x440] sm:$0xff] }
  0x2d   : > { %286 = vst [vmem:[%s4239_s29 + $0x160] sm:$0xff] %v285_v44  ;;  %v291_v47 = vld [vmem:[%s4234_s28 + $0x448] sm:$0xff]  ;;  %288 = vst [vmem:[%s4239_s29 + $0x168] sm:$0xff] %v287_v45  ;;  %v293_v48 = vld [vmem:[%s4234_s28 + $0x480] sm:$0xff] }
  0x2e   : > { %290 = vst [vmem:[%s4239_s29 + $0x170] sm:$0xff] %v289_v46  ;;  %292 = vst [vmem:[%s4239_s29 + $0x178] sm:$0xff] %v291_v47  ;;  %v295_v49 = vld [vmem:[%s4234_s28 + $0x488] sm:$0xff]  ;;  %v297_v50 = vld [vmem:[%s4234_s28 + $0x490] sm:$0xff] }
  0x2f   : > { %294 = vst [vmem:[%s4239_s29 + $0x180] sm:$0xff] %v293_v48  ;;  %296 = vst [vmem:[%s4239_s29 + $0x188] sm:$0xff] %v295_v49  ;;  %v299_v51 = vld [vmem:[%s4234_s28 + $0x4c8] sm:$0xff]  ;;  %v301_v52 = vld [vmem:[%s4234_s28 + $0x4d0] sm:$0xff] }
  0x30   : > { %298 = vst [vmem:[%s4239_s29 + $0x190] sm:$0xff] %v297_v50  ;;  %v303_v53 = vld [vmem:[%s4234_s28 + $0x4d8] sm:$0xff]  ;;  %300 = vst [vmem:[%s4239_s29 + $0x198] sm:$0xff] %v299_v51  ;;  %v305_v54 = vld [vmem:[%s4234_s28 + $0x510] sm:$0xff] }
  0x31   : > { %302 = vst [vmem:[%s4239_s29 + $0x1a0] sm:$0xff] %v301_v52  ;;  %304 = vst [vmem:[%s4239_s29 + $0x1a8] sm:$0xff] %v303_v53  ;;  %v307_v55 = vld [vmem:[%s4234_s28 + $0x518] sm:$0xff]  ;;  %v309_v56 = vld [vmem:[%s4234_s28 + $0x520] sm:$0xff] }
  0x32   : > { %306 = vst [vmem:[%s4239_s29 + $0x1b0] sm:$0xff] %v305_v54  ;;  %308 = vst [vmem:[%s4239_s29 + $0x1b8] sm:$0xff] %v307_v55  ;;  %v311_v57 = vld [vmem:[%s4234_s28 + $0x558] sm:$0xff]  ;;  %v313_v58 = vld [vmem:[%s4234_s28 + $0x560] sm:$0xff] }
  0x33   : > { %310 = vst [vmem:[%s4239_s29 + $0x1c0] sm:$0xff] %v309_v56  ;;  %v315_v59 = vld [vmem:[%s4234_s28 + $0x568] sm:$0xff]  ;;  %312 = vst [vmem:[%s4239_s29 + $0x1c8] sm:$0xff] %v311_v57  ;;  %v317_v60 = vld [vmem:[%s4234_s28 + $0x5a0] sm:$0xff] }
  0x34   : > { %314 = vst [vmem:[%s4239_s29 + $0x1d0] sm:$0xff] %v313_v58  ;;  %316 = vst [vmem:[%s4239_s29 + $0x1d8] sm:$0xff] %v315_v59  ;;  %v319_v61 = vld [vmem:[%s4234_s28 + $0x5a8] sm:$0xff]  ;;  %v321_v62 = vld [vmem:[%s4234_s28 + $0x5b0] sm:$0xff] }
  0x35   : > { %318 = vst [vmem:[%s4239_s29 + $0x1e0] sm:$0xff] %v317_v60  ;;  %320 = vst [vmem:[%s4239_s29 + $0x1e8] sm:$0xff] %v319_v61  ;;  %v323_v63 = vld [vmem:[%s4234_s28 + $0x5e8] sm:$0xff]  ;;  %v325_v0 = vld [vmem:[%s4234_s28 + $0x5f0] sm:$0xff] }
  0x36   : > { %322 = vst [vmem:[%s4239_s29 + $0x1f0] sm:$0xff] %v321_v62  ;;  %v327_v1 = vld [vmem:[%s4234_s28 + $0x5f8] sm:$0xff]  ;;  %324 = vst [vmem:[%s4239_s29 + $0x1f8] sm:$0xff] %v323_v63  ;;  %v329_v2 = vld [vmem:[%s4234_s28 + $0x630] sm:$0xff] }
  0x37   : > { %326 = vst [vmem:[%s4239_s29 + $0x200] sm:$0xff] %v325_v0  ;;  %328 = vst [vmem:[%s4239_s29 + $0x208] sm:$0xff] %v327_v1  ;;  %v331_v3 = vld [vmem:[%s4234_s28 + $0x638] sm:$0xff]  ;;  %v333_v4 = vld [vmem:[%s4234_s28 + $0x640] sm:$0xff] }
  0x38   : > { %330 = vst [vmem:[%s4239_s29 + $0x210] sm:$0xff] %v329_v2  ;;  %332 = vst [vmem:[%s4239_s29 + $0x218] sm:$0xff] %v331_v3  ;;  %v335_v5 = vld [vmem:[%s4234_s28 + $0x678] sm:$0xff]  ;;  %v337_v6 = vld [vmem:[%s4234_s28 + $0x680] sm:$0xff] }
  0x39   : > { %334 = vst [vmem:[%s4239_s29 + $0x220] sm:$0xff] %v333_v4  ;;  %v339_v7 = vld [vmem:[%s4234_s28 + $0x688] sm:$0xff]  ;;  %336 = vst [vmem:[%s4239_s29 + $0x228] sm:$0xff] %v335_v5  ;;  %v341_v8 = vld [vmem:[%s4234_s28 + $0x6c0] sm:$0xff] }
  0x3a   : > { %338 = vst [vmem:[%s4239_s29 + $0x230] sm:$0xff] %v337_v6  ;;  %340 = vst [vmem:[%s4239_s29 + $0x238] sm:$0xff] %v339_v7  ;;  %v343_v9 = vld [vmem:[%s4234_s28 + $0x6c8] sm:$0xff]  ;;  %v345_v10 = vld [vmem:[%s4234_s28 + $0x6d0] sm:$0xff] }
  0x3b   : > { %342 = vst [vmem:[%s4239_s29 + $0x240] sm:$0xff] %v341_v8  ;;  %344 = vst [vmem:[%s4239_s29 + $0x248] sm:$0xff] %v343_v9  ;;  %v347_v11 = vld [vmem:[%s4234_s28 + $0x708] sm:$0xff]  ;;  %v349_v12 = vld [vmem:[%s4234_s28 + $0x710] sm:$0xff] }
  0x3c   : > { %346 = vst [vmem:[%s4239_s29 + $0x250] sm:$0xff] %v345_v10  ;;  %v351_v13 = vld [vmem:[%s4234_s28 + $0x718] sm:$0xff]  ;;  %348 = vst [vmem:[%s4239_s29 + $0x258] sm:$0xff] %v347_v11  ;;  %v353_v14 = vld [vmem:[%s4234_s28 + $0x750] sm:$0xff] }
  0x3d   : > { %350 = vst [vmem:[%s4239_s29 + $0x260] sm:$0xff] %v349_v12  ;;  %352 = vst [vmem:[%s4239_s29 + $0x268] sm:$0xff] %v351_v13  ;;  %v355_v15 = vld [vmem:[%s4234_s28 + $0x758] sm:$0xff]  ;;  %v357_v16 = vld [vmem:[%s4234_s28 + $0x760] sm:$0xff] }
  0x3e   : > { %354 = vst [vmem:[%s4239_s29 + $0x270] sm:$0xff] %v353_v14  ;;  %356 = vst [vmem:[%s4239_s29 + $0x278] sm:$0xff] %v355_v15  ;;  %v359_v17 = vld [vmem:[%s4234_s28 + $0x798] sm:$0xff]  ;;  %v361_v18 = vld [vmem:[%s4234_s28 + $0x7a0] sm:$0xff] }
  0x3f   : > { %358 = vst [vmem:[%s4239_s29 + $0x280] sm:$0xff] %v357_v16  ;;  %v363_v19 = vld [vmem:[%s4234_s28 + $0x7a8] sm:$0xff]  ;;  %360 = vst [vmem:[%s4239_s29 + $0x288] sm:$0xff] %v359_v17  ;;  %v365_v20 = vld [vmem:[%s4234_s28 + $0x7e0] sm:$0xff] }
  0x40   : > { %362 = vst [vmem:[%s4239_s29 + $0x290] sm:$0xff] %v361_v18  ;;  %364 = vst [vmem:[%s4239_s29 + $0x298] sm:$0xff] %v363_v19  ;;  %v367_v21 = vld [vmem:[%s4234_s28 + $0x7e8] sm:$0xff]  ;;  %v369_v22 = vld [vmem:[%s4234_s28 + $0x7f0] sm:$0xff] }
  0x41   : > { %366 = vst [vmem:[%s4239_s29 + $0x2a0] sm:$0xff] %v365_v20  ;;  %368 = vst [vmem:[%s4239_s29 + $0x2a8] sm:$0xff] %v367_v21  ;;  %v371_v23 = vld [vmem:[%s4234_s28 + $0x828] sm:$0xff]  ;;  %v373_v24 = vld [vmem:[%s4234_s28 + $0x830] sm:$0xff] }
  0x42   : > { %370 = vst [vmem:[%s4239_s29 + $0x2b0] sm:$0xff] %v369_v22  ;;  %v375_v25 = vld [vmem:[%s4234_s28 + $0x838] sm:$0xff]  ;;  %372 = vst [vmem:[%s4239_s29 + $0x2b8] sm:$0xff] %v371_v23  ;;  %v377_v26 = vld [vmem:[%s4234_s28 + $0x870] sm:$0xff] }
  0x43   : > { %374 = vst [vmem:[%s4239_s29 + $0x2c0] sm:$0xff] %v373_v24  ;;  %376 = vst [vmem:[%s4239_s29 + $0x2c8] sm:$0xff] %v375_v25  ;;  %v379_v27 = vld [vmem:[%s4234_s28 + $0x878] sm:$0xff]  ;;  %v381_v28 = vld [vmem:[%s4234_s28 + $0x880] sm:$0xff] }
  0x44   : > { %378 = vst [vmem:[%s4239_s29 + $0x2d0] sm:$0xff] %v377_v26  ;;  %380 = vst [vmem:[%s4239_s29 + $0x2d8] sm:$0xff] %v379_v27  ;;  %v383_v29 = vld [vmem:[%s4234_s28 + $0x8b8] sm:$0xff]  ;;  %v385_v30 = vld [vmem:[%s4234_s28 + $0x8c0] sm:$0xff] }
  0x45   : > { %382 = vst [vmem:[%s4239_s29 + $0x2e0] sm:$0xff] %v381_v28  ;;  %v387_v31 = vld [vmem:[%s4234_s28 + $0x8c8] sm:$0xff]  ;;  %384 = vst [vmem:[%s4239_s29 + $0x2e8] sm:$0xff] %v383_v29  ;;  %v389_v32 = vld [vmem:[%s4234_s28 + $0x900] sm:$0xff] }
  0x46   : > { %386 = vst [vmem:[%s4239_s29 + $0x2f0] sm:$0xff] %v385_v30  ;;  %388 = vst [vmem:[%s4239_s29 + $0x2f8] sm:$0xff] %v387_v31  ;;  %v391_v33 = vld [vmem:[%s4234_s28 + $0x908] sm:$0xff]  ;;  %v393_v34 = vld [vmem:[%s4234_s28 + $0x910] sm:$0xff] }
  0x47   : > { %390 = vst [vmem:[%s4239_s29 + $0x300] sm:$0xff] %v389_v32  ;;  %392 = vst [vmem:[%s4239_s29 + $0x308] sm:$0xff] %v391_v33  ;;  %v395_v35 = vld [vmem:[%s4234_s28 + $0x948] sm:$0xff]  ;;  %v397_v36 = vld [vmem:[%s4234_s28 + $0x950] sm:$0xff] }
  0x48   : > { %394 = vst [vmem:[%s4239_s29 + $0x310] sm:$0xff] %v393_v34  ;;  %v399_v37 = vld [vmem:[%s4234_s28 + $0x958] sm:$0xff]  ;;  %396 = vst [vmem:[%s4239_s29 + $0x318] sm:$0xff] %v395_v35  ;;  %v401_v38 = vld [vmem:[%s4234_s28 + $0x990] sm:$0xff] }
  0x49   : > { %398 = vst [vmem:[%s4239_s29 + $0x320] sm:$0xff] %v397_v36  ;;  %400 = vst [vmem:[%s4239_s29 + $0x328] sm:$0xff] %v399_v37  ;;  %v403_v39 = vld [vmem:[%s4234_s28 + $0x998] sm:$0xff]  ;;  %v405_v40 = vld [vmem:[%s4234_s28 + $0x9a0] sm:$0xff] }
  0x4a   : > { %402 = vst [vmem:[%s4239_s29 + $0x330] sm:$0xff] %v401_v38  ;;  %404 = vst [vmem:[%s4239_s29 + $0x338] sm:$0xff] %v403_v39  ;;  %v407_v41 = vld [vmem:[%s4234_s28 + $0x9d8] sm:$0xff]  ;;  %v409_v42 = vld [vmem:[%s4234_s28 + $0x9e0] sm:$0xff] }
  0x4b   : > { %406 = vst [vmem:[%s4239_s29 + $0x340] sm:$0xff] %v405_v40  ;;  %v411_v43 = vld [vmem:[%s4234_s28 + $0x9e8] sm:$0xff]  ;;  %408 = vst [vmem:[%s4239_s29 + $0x348] sm:$0xff] %v407_v41  ;;  %v413_v44 = vld [vmem:[%s4234_s28 + $0xa20] sm:$0xff] }
  0x4c   : > { %410 = vst [vmem:[%s4239_s29 + $0x350] sm:$0xff] %v409_v42  ;;  %412 = vst [vmem:[%s4239_s29 + $0x358] sm:$0xff] %v411_v43  ;;  %v415_v45 = vld [vmem:[%s4234_s28 + $0xa28] sm:$0xff]  ;;  %v417_v46 = vld [vmem:[%s4234_s28 + $0xa30] sm:$0xff] }
  0x4d   : > { %414 = vst [vmem:[%s4239_s29 + $0x360] sm:$0xff] %v413_v44  ;;  %416 = vst [vmem:[%s4239_s29 + $0x368] sm:$0xff] %v415_v45  ;;  %v419_v47 = vld [vmem:[%s4234_s28 + $0xa68] sm:$0xff]  ;;  %v421_v48 = vld [vmem:[%s4234_s28 + $0xa70] sm:$0xff] }
  0x4e   : > { %418 = vst [vmem:[%s4239_s29 + $0x370] sm:$0xff] %v417_v46  ;;  %v423_v49 = vld [vmem:[%s4234_s28 + $0xa78] sm:$0xff]  ;;  %420 = vst [vmem:[%s4239_s29 + $0x378] sm:$0xff] %v419_v47  ;;  %v425_v50 = vld [vmem:[%s4234_s28 + $0xab0] sm:$0xff] }
  0x4f   : > { %422 = vst [vmem:[%s4239_s29 + $0x380] sm:$0xff] %v421_v48  ;;  %424 = vst [vmem:[%s4239_s29 + $0x388] sm:$0xff] %v423_v49  ;;  %v427_v51 = vld [vmem:[%s4234_s28 + $0xab8] sm:$0xff]  ;;  %v429_v52 = vld [vmem:[%s4234_s28 + $0xac0] sm:$0xff] }
  0x50   : > { %426 = vst [vmem:[%s4239_s29 + $0x390] sm:$0xff] %v425_v50  ;;  %428 = vst [vmem:[%s4239_s29 + $0x398] sm:$0xff] %v427_v51  ;;  %v431_v53 = vld [vmem:[%s4234_s28 + $0xaf8] sm:$0xff]  ;;  %v433_v54 = vld [vmem:[%s4234_s28 + $0xb00] sm:$0xff] }
  0x51   : > { %430 = vst [vmem:[%s4239_s29 + $0x3a0] sm:$0xff] %v429_v52  ;;  %v435_v55 = vld [vmem:[%s4234_s28 + $0xb08] sm:$0xff]  ;;  %432 = vst [vmem:[%s4239_s29 + $0x3a8] sm:$0xff] %v431_v53  ;;  %v437_v56 = vld [vmem:[%s4234_s28 + $0xb40] sm:$0xff] }
  0x52   : > { %434 = vst [vmem:[%s4239_s29 + $0x3b0] sm:$0xff] %v433_v54  ;;  %436 = vst [vmem:[%s4239_s29 + $0x3b8] sm:$0xff] %v435_v55  ;;  %v439_v57 = vld [vmem:[%s4234_s28 + $0xb48] sm:$0xff]  ;;  %v441_v58 = vld [vmem:[%s4234_s28 + $0xb50] sm:$0xff] }
  0x53   : > { %438 = vst [vmem:[%s4239_s29 + $0x3c0] sm:$0xff] %v437_v56  ;;  %440 = vst [vmem:[%s4239_s29 + $0x3c8] sm:$0xff] %v439_v57  ;;  %v443_v59 = vld [vmem:[%s4234_s28 + $0xb88] sm:$0xff]  ;;  %v445_v60 = vld [vmem:[%s4234_s28 + $0xb90] sm:$0xff] }
  0x54   : > { %442 = vst [vmem:[%s4239_s29 + $0x3d0] sm:$0xff] %v441_v58  ;;  %v447_v61 = vld [vmem:[%s4234_s28 + $0xb98] sm:$0xff]  ;;  %444 = vst [vmem:[%s4239_s29 + $0x3d8] sm:$0xff] %v443_v59  ;;  %v449_v62 = vld [vmem:[%s4234_s28 + $0xbd0] sm:$0xff] }
  0x55   : > { %446 = vst [vmem:[%s4239_s29 + $0x3e0] sm:$0xff] %v445_v60  ;;  %448 = vst [vmem:[%s4239_s29 + $0x3e8] sm:$0xff] %v447_v61  ;;  %v451_v63 = vld [vmem:[%s4234_s28 + $0xbd8] sm:$0xff]  ;;  %v453_v0 = vld [vmem:[%s4234_s28 + $0xbe0] sm:$0xff] }
  0x56   : > { %450 = vst [vmem:[%s4239_s29 + $0x3f0] sm:$0xff] %v449_v62  ;;  %452 = vst [vmem:[%s4239_s29 + $0x3f8] sm:$0xff] %v451_v63  ;;  %v455_v1 = vld [vmem:[%s4234_s28 + $0xc18] sm:$0xff]  ;;  %v457_v2 = vld [vmem:[%s4234_s28 + $0xc20] sm:$0xff] }
  0x57   : > { %454 = vst [vmem:[%s4239_s29 + $0x400] sm:$0xff] %v453_v0  ;;  %v459_v3 = vld [vmem:[%s4234_s28 + $0xc28] sm:$0xff]  ;;  %456 = vst [vmem:[%s4239_s29 + $0x408] sm:$0xff] %v455_v1  ;;  %v461_v4 = vld [vmem:[%s4234_s28 + $0xc60] sm:$0xff] }
  0x58   : > { %458 = vst [vmem:[%s4239_s29 + $0x410] sm:$0xff] %v457_v2  ;;  %460 = vst [vmem:[%s4239_s29 + $0x418] sm:$0xff] %v459_v3  ;;  %v463_v5 = vld [vmem:[%s4234_s28 + $0xc68] sm:$0xff]  ;;  %v465_v6 = vld [vmem:[%s4234_s28 + $0xc70] sm:$0xff] }
  0x59   : > { %462 = vst [vmem:[%s4239_s29 + $0x420] sm:$0xff] %v461_v4  ;;  %464 = vst [vmem:[%s4239_s29 + $0x428] sm:$0xff] %v463_v5  ;;  %v467_v7 = vld [vmem:[%s4234_s28 + $0xca8] sm:$0xff]  ;;  %v469_v8 = vld [vmem:[%s4234_s28 + $0xcb0] sm:$0xff] }
  0x5a   : > { %466 = vst [vmem:[%s4239_s29 + $0x430] sm:$0xff] %v465_v6  ;;  %v471_v9 = vld [vmem:[%s4234_s28 + $0xcb8] sm:$0xff]  ;;  %468 = vst [vmem:[%s4239_s29 + $0x438] sm:$0xff] %v467_v7  ;;  %v473_v10 = vld [vmem:[%s4234_s28 + $0xcf0] sm:$0xff] }
  0x5b   : > { %470 = vst [vmem:[%s4239_s29 + $0x440] sm:$0xff] %v469_v8  ;;  %472 = vst [vmem:[%s4239_s29 + $0x448] sm:$0xff] %v471_v9  ;;  %v475_v11 = vld [vmem:[%s4234_s28 + $0xcf8] sm:$0xff]  ;;  %v477_v12 = vld [vmem:[%s4234_s28 + $0xd00] sm:$0xff] }
  0x5c   : > { %474 = vst [vmem:[%s4239_s29 + $0x450] sm:$0xff] %v473_v10  ;;  %476 = vst [vmem:[%s4239_s29 + $0x458] sm:$0xff] %v475_v11  ;;  %v479_v13 = vld [vmem:[%s4234_s28 + $0xd38] sm:$0xff]  ;;  %v481_v14 = vld [vmem:[%s4234_s28 + $0xd40] sm:$0xff] }
  0x5d   : > { %478 = vst [vmem:[%s4239_s29 + $0x460] sm:$0xff] %v477_v12  ;;  %v483_v15 = vld [vmem:[%s4234_s28 + $0xd48] sm:$0xff]  ;;  %480 = vst [vmem:[%s4239_s29 + $0x468] sm:$0xff] %v479_v13  ;;  %v485_v16 = vld [vmem:[%s4234_s28 + $0xd80] sm:$0xff] }
  0x5e   : > { %482 = vst [vmem:[%s4239_s29 + $0x470] sm:$0xff] %v481_v14  ;;  %484 = vst [vmem:[%s4239_s29 + $0x478] sm:$0xff] %v483_v15  ;;  %v487_v17 = vld [vmem:[%s4234_s28 + $0xd88] sm:$0xff]  ;;  %v489_v18 = vld [vmem:[%s4234_s28 + $0xd90] sm:$0xff] }
  0x5f   : > { %486 = vst [vmem:[%s4239_s29 + $0x480] sm:$0xff] %v485_v16  ;;  %488 = vst [vmem:[%s4239_s29 + $0x488] sm:$0xff] %v487_v17  ;;  %v491_v19 = vld [vmem:[%s4234_s28 + $0xdc8] sm:$0xff]  ;;  %v493_v20 = vld [vmem:[%s4234_s28 + $0xdd0] sm:$0xff] }
  0x60   : > { %490 = vst [vmem:[%s4239_s29 + $0x490] sm:$0xff] %v489_v18  ;;  %v495_v21 = vld [vmem:[%s4234_s28 + $0xdd8] sm:$0xff]  ;;  %492 = vst [vmem:[%s4239_s29 + $0x498] sm:$0xff] %v491_v19  ;;  %v497_v22 = vld [vmem:[%s4234_s28 + $0xe10] sm:$0xff] }
  0x61   : > { %494 = vst [vmem:[%s4239_s29 + $0x4a0] sm:$0xff] %v493_v20  ;;  %496 = vst [vmem:[%s4239_s29 + $0x4a8] sm:$0xff] %v495_v21  ;;  %v499_v23 = vld [vmem:[%s4234_s28 + $0xe18] sm:$0xff]  ;;  %v501_v24 = vld [vmem:[%s4234_s28 + $0xe20] sm:$0xff] }
  0x62   : > { %498 = vst [vmem:[%s4239_s29 + $0x4b0] sm:$0xff] %v497_v22  ;;  %500 = vst [vmem:[%s4239_s29 + $0x4b8] sm:$0xff] %v499_v23  ;;  %v503_v25 = vld [vmem:[%s4234_s28 + $0xe58] sm:$0xff]  ;;  %v505_v26 = vld [vmem:[%s4234_s28 + $0xe60] sm:$0xff] }
  0x63   : > { %502 = vst [vmem:[%s4239_s29 + $0x4c0] sm:$0xff] %v501_v24  ;;  %v507_v27 = vld [vmem:[%s4234_s28 + $0xe68] sm:$0xff]  ;;  %504 = vst [vmem:[%s4239_s29 + $0x4c8] sm:$0xff] %v503_v25  ;;  %v509_v28 = vld [vmem:[%s4234_s28 + $0xea0] sm:$0xff] }
  0x64   : > { %506 = vst [vmem:[%s4239_s29 + $0x4d0] sm:$0xff] %v505_v26  ;;  %508 = vst [vmem:[%s4239_s29 + $0x4d8] sm:$0xff] %v507_v27  ;;  %v511_v29 = vld [vmem:[%s4234_s28 + $0xea8] sm:$0xff]  ;;  %v513_v30 = vld [vmem:[%s4234_s28 + $0xeb0] sm:$0xff] }
  0x65   : > { %510 = vst [vmem:[%s4239_s29 + $0x4e0] sm:$0xff] %v509_v28  ;;  %512 = vst [vmem:[%s4239_s29 + $0x4e8] sm:$0xff] %v511_v29  ;;  %v515_v31 = vld [vmem:[%s4234_s28 + $0xee8] sm:$0xff]  ;;  %v517_v32 = vld [vmem:[%s4234_s28 + $0xef0] sm:$0xff] }
  0x66   : > { %514 = vst [vmem:[%s4239_s29 + $0x4f0] sm:$0xff] %v513_v30  ;;  %v519_v33 = vld [vmem:[%s4234_s28 + $0xef8] sm:$0xff]  ;;  %516 = vst [vmem:[%s4239_s29 + $0x4f8] sm:$0xff] %v515_v31  ;;  %v521_v34 = vld [vmem:[%s4234_s28 + $0xf30] sm:$0xff] }
  0x67   : > { %518 = vst [vmem:[%s4239_s29 + $0x500] sm:$0xff] %v517_v32  ;;  %520 = vst [vmem:[%s4239_s29 + $0x508] sm:$0xff] %v519_v33  ;;  %v523_v35 = vld [vmem:[%s4234_s28 + $0xf38] sm:$0xff]  ;;  %v525_v36 = vld [vmem:[%s4234_s28 + $0xf40] sm:$0xff] }
  0x68   : > { %522 = vst [vmem:[%s4239_s29 + $0x510] sm:$0xff] %v521_v34  ;;  %524 = vst [vmem:[%s4239_s29 + $0x518] sm:$0xff] %v523_v35  ;;  %v527_v37 = vld [vmem:[%s4234_s28 + $0xf78] sm:$0xff]  ;;  %v529_v38 = vld [vmem:[%s4234_s28 + $0xf80] sm:$0xff] }
  0x69   : > { %526 = vst [vmem:[%s4239_s29 + $0x520] sm:$0xff] %v525_v36  ;;  %v531_v39 = vld [vmem:[%s4234_s28 + $0xf88] sm:$0xff]  ;;  %528 = vst [vmem:[%s4239_s29 + $0x528] sm:$0xff] %v527_v37  ;;  %v533_v40 = vld [vmem:[%s4234_s28 + $0xfc0] sm:$0xff] }
  0x6a   : > { %530 = vst [vmem:[%s4239_s29 + $0x530] sm:$0xff] %v529_v38  ;;  %532 = vst [vmem:[%s4239_s29 + $0x538] sm:$0xff] %v531_v39  ;;  %v535_v41 = vld [vmem:[%s4234_s28 + $0xfc8] sm:$0xff]  ;;  %v537_v42 = vld [vmem:[%s4234_s28 + $0xfd0] sm:$0xff] }
  0x6b   : > { %534 = vst [vmem:[%s4239_s29 + $0x540] sm:$0xff] %v533_v40  ;;  %536 = vst [vmem:[%s4239_s29 + $0x548] sm:$0xff] %v535_v41  ;;  %v539_v43 = vld [vmem:[%s4234_s28 + $0x1008] sm:$0xff]  ;;  %v541_v44 = vld [vmem:[%s4234_s28 + $0x1010] sm:$0xff] }
  0x6c   : > { %538 = vst [vmem:[%s4239_s29 + $0x550] sm:$0xff] %v537_v42  ;;  %v543_v45 = vld [vmem:[%s4234_s28 + $0x1018] sm:$0xff]  ;;  %540 = vst [vmem:[%s4239_s29 + $0x558] sm:$0xff] %v539_v43  ;;  %v545_v46 = vld [vmem:[%s4234_s28 + $0x1050] sm:$0xff] }
  0x6d   : > { %542 = vst [vmem:[%s4239_s29 + $0x560] sm:$0xff] %v541_v44  ;;  %544 = vst [vmem:[%s4239_s29 + $0x568] sm:$0xff] %v543_v45  ;;  %v547_v47 = vld [vmem:[%s4234_s28 + $0x1058] sm:$0xff]  ;;  %v549_v48 = vld [vmem:[%s4234_s28 + $0x1060] sm:$0xff] }
  0x6e   : > { %546 = vst [vmem:[%s4239_s29 + $0x570] sm:$0xff] %v545_v46  ;;  %548 = vst [vmem:[%s4239_s29 + $0x578] sm:$0xff] %v547_v47  ;;  %v551_v49 = vld [vmem:[%s4234_s28 + $0x1098] sm:$0xff]  ;;  %v553_v50 = vld [vmem:[%s4234_s28 + $0x10a0] sm:$0xff] }
  0x6f   : > { %550 = vst [vmem:[%s4239_s29 + $0x580] sm:$0xff] %v549_v48  ;;  %v555_v51 = vld [vmem:[%s4234_s28 + $0x10a8] sm:$0xff]  ;;  %552 = vst [vmem:[%s4239_s29 + $0x588] sm:$0xff] %v551_v49  ;;  %v557_v52 = vld [vmem:[%s4234_s28 + $0x10e0] sm:$0xff] }
  0x70   : > { %554 = vst [vmem:[%s4239_s29 + $0x590] sm:$0xff] %v553_v50  ;;  %556 = vst [vmem:[%s4239_s29 + $0x598] sm:$0xff] %v555_v51  ;;  %v559_v53 = vld [vmem:[%s4234_s28 + $0x10e8] sm:$0xff]  ;;  %v561_v54 = vld [vmem:[%s4234_s28 + $0x10f0] sm:$0xff] }
  0x71   : > { %558 = vst [vmem:[%s4239_s29 + $0x5a0] sm:$0xff] %v557_v52  ;;  %560 = vst [vmem:[%s4239_s29 + $0x5a8] sm:$0xff] %v559_v53  ;;  %v563_v55 = vld [vmem:[%s4234_s28 + $0x1128] sm:$0xff]  ;;  %v565_v56 = vld [vmem:[%s4234_s28 + $0x1130] sm:$0xff] }
  0x72   : > { %562 = vst [vmem:[%s4239_s29 + $0x5b0] sm:$0xff] %v561_v54  ;;  %v567_v57 = vld [vmem:[%s4234_s28 + $0x1138] sm:$0xff]  ;;  %564 = vst [vmem:[%s4239_s29 + $0x5b8] sm:$0xff] %v563_v55  ;;  %v569_v58 = vld [vmem:[%s4234_s28 + $0x1170] sm:$0xff] }
  0x73   : > { %566 = vst [vmem:[%s4239_s29 + $0x5c0] sm:$0xff] %v565_v56  ;;  %568 = vst [vmem:[%s4239_s29 + $0x5c8] sm:$0xff] %v567_v57  ;;  %v571_v59 = vld [vmem:[%s4234_s28 + $0x1178] sm:$0xff]  ;;  %v573_v60 = vld [vmem:[%s4234_s28 + $0x1180] sm:$0xff] }
  0x74   : > { %570 = vst [vmem:[%s4239_s29 + $0x5d0] sm:$0xff] %v569_v58  ;;  %572 = vst [vmem:[%s4239_s29 + $0x5d8] sm:$0xff] %v571_v59  ;;  %v575_v61 = vld [vmem:[%s4234_s28 + $0x11b8] sm:$0xff]  ;;  %v577_v62 = vld [vmem:[%s4234_s28 + $0x11c0] sm:$0xff] }
  0x75   : > { %574 = vst [vmem:[%s4239_s29 + $0x5e0] sm:$0xff] %v573_v60  ;;  %v579_v63 = vld [vmem:[%s4234_s28 + $0x11c8] sm:$0xff]  ;;  %576 = vst [vmem:[%s4239_s29 + $0x5e8] sm:$0xff] %v575_v61  ;;  %v581_v0 = vld [vmem:[%s4234_s28 + $0x1200] sm:$0xff] }
  0x76   : > { %578 = vst [vmem:[%s4239_s29 + $0x5f0] sm:$0xff] %v577_v62  ;;  %580 = vst [vmem:[%s4239_s29 + $0x5f8] sm:$0xff] %v579_v63  ;;  %v583_v1 = vld [vmem:[%s4234_s28 + $0x1208] sm:$0xff]  ;;  %v585_v2 = vld [vmem:[%s4234_s28 + $0x1210] sm:$0xff] }
  0x77   : > { %582 = vst [vmem:[%s4239_s29 + $0x600] sm:$0xff] %v581_v0  ;;  %584 = vst [vmem:[%s4239_s29 + $0x608] sm:$0xff] %v583_v1  ;;  %v587_v3 = vld [vmem:[%s4234_s28 + $0x1248] sm:$0xff]  ;;  %v589_v4 = vld [vmem:[%s4234_s28 + $0x1250] sm:$0xff] }
  0x78   : > { %586 = vst [vmem:[%s4239_s29 + $0x610] sm:$0xff] %v585_v2  ;;  %v591_v5 = vld [vmem:[%s4234_s28 + $0x1258] sm:$0xff]  ;;  %588 = vst [vmem:[%s4239_s29 + $0x618] sm:$0xff] %v587_v3  ;;  %v593_v6 = vld [vmem:[%s4234_s28 + $0x1290] sm:$0xff] }
  0x79   : > { %590 = vst [vmem:[%s4239_s29 + $0x620] sm:$0xff] %v589_v4  ;;  %592 = vst [vmem:[%s4239_s29 + $0x628] sm:$0xff] %v591_v5  ;;  %v595_v7 = vld [vmem:[%s4234_s28 + $0x1298] sm:$0xff]  ;;  %v597_v8 = vld [vmem:[%s4234_s28 + $0x12a0] sm:$0xff] }
  0x7a   : > { %594 = vst [vmem:[%s4239_s29 + $0x630] sm:$0xff] %v593_v6  ;;  %596 = vst [vmem:[%s4239_s29 + $0x638] sm:$0xff] %v595_v7  ;;  %v599_v9 = vld [vmem:[%s4234_s28 + $0x12d8] sm:$0xff]  ;;  %v601_v10 = vld [vmem:[%s4234_s28 + $0x12e0] sm:$0xff] }
  0x7b   : > { %598 = vst [vmem:[%s4239_s29 + $0x640] sm:$0xff] %v597_v8  ;;  %v603_v11 = vld [vmem:[%s4234_s28 + $0x12e8] sm:$0xff]  ;;  %600 = vst [vmem:[%s4239_s29 + $0x648] sm:$0xff] %v599_v9  ;;  %v605_v12 = vld [vmem:[%s4234_s28 + $0x1320] sm:$0xff] }
  0x7c   : > { %602 = vst [vmem:[%s4239_s29 + $0x650] sm:$0xff] %v601_v10  ;;  %604 = vst [vmem:[%s4239_s29 + $0x658] sm:$0xff] %v603_v11  ;;  %v607_v13 = vld [vmem:[%s4234_s28 + $0x1328] sm:$0xff]  ;;  %v609_v14 = vld [vmem:[%s4234_s28 + $0x1330] sm:$0xff] }
  0x7d   : > { %606 = vst [vmem:[%s4239_s29 + $0x660] sm:$0xff] %v605_v12  ;;  %608 = vst [vmem:[%s4239_s29 + $0x668] sm:$0xff] %v607_v13  ;;  %v611_v15 = vld [vmem:[%s4234_s28 + $0x1368] sm:$0xff]  ;;  %v613_v16 = vld [vmem:[%s4234_s28 + $0x1370] sm:$0xff] }
  0x7e   : > { %610 = vst [vmem:[%s4239_s29 + $0x670] sm:$0xff] %v609_v14  ;;  %v615_v17 = vld [vmem:[%s4234_s28 + $0x1378] sm:$0xff]  ;;  %612 = vst [vmem:[%s4239_s29 + $0x678] sm:$0xff] %v611_v15  ;;  %v617_v18 = vld [vmem:[%s4234_s28 + $0x13b0] sm:$0xff] }
  0x7f   : > { %614 = vst [vmem:[%s4239_s29 + $0x680] sm:$0xff] %v613_v16  ;;  %616 = vst [vmem:[%s4239_s29 + $0x688] sm:$0xff] %v615_v17  ;;  %v619_v19 = vld [vmem:[%s4234_s28 + $0x13b8] sm:$0xff]  ;;  %v621_v20 = vld [vmem:[%s4234_s28 + $0x13c0] sm:$0xff] }
  0x80   : > { %618 = vst [vmem:[%s4239_s29 + $0x690] sm:$0xff] %v617_v18  ;;  %620 = vst [vmem:[%s4239_s29 + $0x698] sm:$0xff] %v619_v19  ;;  %v623_v21 = vld [vmem:[%s4234_s28 + $0x13f8] sm:$0xff]  ;;  %v625_v22 = vld [vmem:[%s4234_s28 + $0x1400] sm:$0xff] }
  0x81   : > { %622 = vst [vmem:[%s4239_s29 + $0x6a0] sm:$0xff] %v621_v20  ;;  %v627_v23 = vld [vmem:[%s4234_s28 + $0x1408] sm:$0xff]  ;;  %624 = vst [vmem:[%s4239_s29 + $0x6a8] sm:$0xff] %v623_v21  ;;  %v629_v24 = vld [vmem:[%s4234_s28 + $0x1440] sm:$0xff] }
  0x82   : > { %626 = vst [vmem:[%s4239_s29 + $0x6b0] sm:$0xff] %v625_v22  ;;  %628 = vst [vmem:[%s4239_s29 + $0x6b8] sm:$0xff] %v627_v23  ;;  %v631_v25 = vld [vmem:[%s4234_s28 + $0x1448] sm:$0xff]  ;;  %v633_v26 = vld [vmem:[%s4234_s28 + $0x1450] sm:$0xff] }
  0x83   : > { %630 = vst [vmem:[%s4239_s29 + $0x6c0] sm:$0xff] %v629_v24  ;;  %632 = vst [vmem:[%s4239_s29 + $0x6c8] sm:$0xff] %v631_v25  ;;  %v635_v27 = vld [vmem:[%s4234_s28 + $0x1488] sm:$0xff]  ;;  %v637_v28 = vld [vmem:[%s4234_s28 + $0x1490] sm:$0xff] }
  0x84   : > { %634 = vst [vmem:[%s4239_s29 + $0x6d0] sm:$0xff] %v633_v26  ;;  %v639_v29 = vld [vmem:[%s4234_s28 + $0x1498] sm:$0xff]  ;;  %636 = vst [vmem:[%s4239_s29 + $0x6d8] sm:$0xff] %v635_v27  ;;  %v641_v30 = vld [vmem:[%s4234_s28 + $0x14d0] sm:$0xff] }
  0x85   : > { %638 = vst [vmem:[%s4239_s29 + $0x6e0] sm:$0xff] %v637_v28  ;;  %640 = vst [vmem:[%s4239_s29 + $0x6e8] sm:$0xff] %v639_v29  ;;  %v643_v31 = vld [vmem:[%s4234_s28 + $0x14d8] sm:$0xff]  ;;  %v645_v32 = vld [vmem:[%s4234_s28 + $0x14e0] sm:$0xff] }
  0x86   : > { %642 = vst [vmem:[%s4239_s29 + $0x6f0] sm:$0xff] %v641_v30  ;;  %644 = vst [vmem:[%s4239_s29 + $0x6f8] sm:$0xff] %v643_v31  ;;  %v647_v33 = vld [vmem:[%s4234_s28 + $0x1518] sm:$0xff]  ;;  %v649_v34 = vld [vmem:[%s4234_s28 + $0x1520] sm:$0xff] }
  0x87   : > { %646 = vst [vmem:[%s4239_s29 + $0x700] sm:$0xff] %v645_v32  ;;  %v651_v35 = vld [vmem:[%s4234_s28 + $0x1528] sm:$0xff]  ;;  %648 = vst [vmem:[%s4239_s29 + $0x708] sm:$0xff] %v647_v33  ;;  %v653_v36 = vld [vmem:[%s4234_s28 + $0x1560] sm:$0xff] }
  0x88   : > { %650 = vst [vmem:[%s4239_s29 + $0x710] sm:$0xff] %v649_v34  ;;  %652 = vst [vmem:[%s4239_s29 + $0x718] sm:$0xff] %v651_v35  ;;  %v655_v37 = vld [vmem:[%s4234_s28 + $0x1568] sm:$0xff]  ;;  %v657_v38 = vld [vmem:[%s4234_s28 + $0x1570] sm:$0xff] }
  0x89   : > { %654 = vst [vmem:[%s4239_s29 + $0x720] sm:$0xff] %v653_v36  ;;  %656 = vst [vmem:[%s4239_s29 + $0x728] sm:$0xff] %v655_v37  ;;  %v659_v39 = vld [vmem:[%s4234_s28 + $0x15a8] sm:$0xff]  ;;  %v661_v40 = vld [vmem:[%s4234_s28 + $0x15b0] sm:$0xff] }
  0x8a   : > { %658 = vst [vmem:[%s4239_s29 + $0x730] sm:$0xff] %v657_v38  ;;  %v663_v41 = vld [vmem:[%s4234_s28 + $0x15b8] sm:$0xff]  ;;  %660 = vst [vmem:[%s4239_s29 + $0x738] sm:$0xff] %v659_v39  ;;  %v665_v42 = vld [vmem:[%s4234_s28 + $0x15f0] sm:$0xff] }
  0x8b   : > { %662 = vst [vmem:[%s4239_s29 + $0x740] sm:$0xff] %v661_v40  ;;  %664 = vst [vmem:[%s4239_s29 + $0x748] sm:$0xff] %v663_v41  ;;  %v667_v43 = vld [vmem:[%s4234_s28 + $0x15f8] sm:$0xff]  ;;  %v669_v44 = vld [vmem:[%s4234_s28 + $0x1600] sm:$0xff] }
  0x8c   : > { %666 = vst [vmem:[%s4239_s29 + $0x750] sm:$0xff] %v665_v42  ;;  %668 = vst [vmem:[%s4239_s29 + $0x758] sm:$0xff] %v667_v43  ;;  %v671_v45 = vld [vmem:[%s4234_s28 + $0x1638] sm:$0xff]  ;;  %v673_v46 = vld [vmem:[%s4234_s28 + $0x1640] sm:$0xff] }
  0x8d   : > { %670 = vst [vmem:[%s4239_s29 + $0x760] sm:$0xff] %v669_v44  ;;  %v675_v47 = vld [vmem:[%s4234_s28 + $0x1648] sm:$0xff]  ;;  %672 = vst [vmem:[%s4239_s29 + $0x768] sm:$0xff] %v671_v45  ;;  %v677_v48 = vld [vmem:[%s4234_s28 + $0x1680] sm:$0xff] }
  0x8e   : > { %674 = vst [vmem:[%s4239_s29 + $0x770] sm:$0xff] %v673_v46  ;;  %676 = vst [vmem:[%s4239_s29 + $0x778] sm:$0xff] %v675_v47  ;;  %v679_v49 = vld [vmem:[%s4234_s28 + $0x1688] sm:$0xff]  ;;  %v681_v50 = vld [vmem:[%s4234_s28 + $0x1690] sm:$0xff] }
  0x8f   : > { %678 = vst [vmem:[%s4239_s29 + $0x780] sm:$0xff] %v677_v48  ;;  %680 = vst [vmem:[%s4239_s29 + $0x788] sm:$0xff] %v679_v49  ;;  %v683_v51 = vld [vmem:[%s4234_s28 + $0x16c8] sm:$0xff]  ;;  %v685_v52 = vld [vmem:[%s4234_s28 + $0x16d0] sm:$0xff] }
  0x90   : > { %682 = vst [vmem:[%s4239_s29 + $0x790] sm:$0xff] %v681_v50  ;;  %v687_v53 = vld [vmem:[%s4234_s28 + $0x16d8] sm:$0xff]  ;;  %684 = vst [vmem:[%s4239_s29 + $0x798] sm:$0xff] %v683_v51  ;;  %v689_v54 = vld [vmem:[%s4234_s28 + $0x1710] sm:$0xff] }
  0x91   : > { %686 = vst [vmem:[%s4239_s29 + $0x7a0] sm:$0xff] %v685_v52  ;;  %688 = vst [vmem:[%s4239_s29 + $0x7a8] sm:$0xff] %v687_v53  ;;  %v691_v55 = vld [vmem:[%s4234_s28 + $0x1718] sm:$0xff]  ;;  %v693_v56 = vld [vmem:[%s4234_s28 + $0x1720] sm:$0xff] }
  0x92   : > { %690 = vst [vmem:[%s4239_s29 + $0x7b0] sm:$0xff] %v689_v54  ;;  %692 = vst [vmem:[%s4239_s29 + $0x7b8] sm:$0xff] %v691_v55  ;;  %v695_v57 = vld [vmem:[%s4234_s28 + $0x1758] sm:$0xff]  ;;  %v697_v58 = vld [vmem:[%s4234_s28 + $0x1760] sm:$0xff] }
  0x93   : > { %694 = vst [vmem:[%s4239_s29 + $0x7c0] sm:$0xff] %v693_v56  ;;  %v699_v59 = vld [vmem:[%s4234_s28 + $0x1768] sm:$0xff]  ;;  %696 = vst [vmem:[%s4239_s29 + $0x7c8] sm:$0xff] %v695_v57  ;;  %v701_v60 = vld [vmem:[%s4234_s28 + $0x17a0] sm:$0xff] }
  0x94   : > { %698 = vst [vmem:[%s4239_s29 + $0x7d0] sm:$0xff] %v697_v58  ;;  %700 = vst [vmem:[%s4239_s29 + $0x7d8] sm:$0xff] %v699_v59  ;;  %v703_v61 = vld [vmem:[%s4234_s28 + $0x17a8] sm:$0xff]  ;;  %v705_v62 = vld [vmem:[%s4234_s28 + $0x17b0] sm:$0xff] }
  0x95   : > { %702 = vst [vmem:[%s4239_s29 + $0x7e0] sm:$0xff] %v701_v60  ;;  %704 = vst [vmem:[%s4239_s29 + $0x7e8] sm:$0xff] %v703_v61  ;;  %v707_v63 = vld [vmem:[%s4234_s28 + $0x17e8] sm:$0xff]  ;;  %v709_v0 = vld [vmem:[%s4234_s28 + $0x17f0] sm:$0xff] }
  0x96   : > { %706 = vst [vmem:[%s4239_s29 + $0x7f0] sm:$0xff] %v705_v62  ;;  %v711_v1 = vld [vmem:[%s4234_s28 + $0x17f8] sm:$0xff]  ;;  %708 = vst [vmem:[%s4239_s29 + $0x7f8] sm:$0xff] %v707_v63  ;;  %v713_v2 = vld [vmem:[%s4234_s28 + $0x1830] sm:$0xff] }
  0x97   : > { %710 = vst [vmem:[%s4239_s29 + $0x800] sm:$0xff] %v709_v0  ;;  %712 = vst [vmem:[%s4239_s29 + $0x808] sm:$0xff] %v711_v1  ;;  %v715_v3 = vld [vmem:[%s4234_s28 + $0x1838] sm:$0xff]  ;;  %v717_v4 = vld [vmem:[%s4234_s28 + $0x1840] sm:$0xff] }
  0x98   : > { %714 = vst [vmem:[%s4239_s29 + $0x810] sm:$0xff] %v713_v2  ;;  %716 = vst [vmem:[%s4239_s29 + $0x818] sm:$0xff] %v715_v3  ;;  %v719_v5 = vld [vmem:[%s4234_s28 + $0x1878] sm:$0xff]  ;;  %v721_v6 = vld [vmem:[%s4234_s28 + $0x1880] sm:$0xff] }
  0x99   : > { %718 = vst [vmem:[%s4239_s29 + $0x820] sm:$0xff] %v717_v4  ;;  %v723_v7 = vld [vmem:[%s4234_s28 + $0x1888] sm:$0xff]  ;;  %720 = vst [vmem:[%s4239_s29 + $0x828] sm:$0xff] %v719_v5  ;;  %v725_v8 = vld [vmem:[%s4234_s28 + $0x18c0] sm:$0xff] }
  0x9a   : > { %722 = vst [vmem:[%s4239_s29 + $0x830] sm:$0xff] %v721_v6  ;;  %724 = vst [vmem:[%s4239_s29 + $0x838] sm:$0xff] %v723_v7  ;;  %v727_v9 = vld [vmem:[%s4234_s28 + $0x18c8] sm:$0xff]  ;;  %v729_v10 = vld [vmem:[%s4234_s28 + $0x18d0] sm:$0xff] }
  0x9b   : > { %726 = vst [vmem:[%s4239_s29 + $0x840] sm:$0xff] %v725_v8  ;;  %728 = vst [vmem:[%s4239_s29 + $0x848] sm:$0xff] %v727_v9  ;;  %v731_v11 = vld [vmem:[%s4234_s28 + $0x1908] sm:$0xff]  ;;  %v733_v12 = vld [vmem:[%s4234_s28 + $0x1910] sm:$0xff] }
  0x9c   : > { %730 = vst [vmem:[%s4239_s29 + $0x850] sm:$0xff] %v729_v10  ;;  %v735_v13 = vld [vmem:[%s4234_s28 + $0x1918] sm:$0xff]  ;;  %732 = vst [vmem:[%s4239_s29 + $0x858] sm:$0xff] %v731_v11  ;;  %v737_v14 = vld [vmem:[%s4234_s28 + $0x1950] sm:$0xff] }
  0x9d   : > { %734 = vst [vmem:[%s4239_s29 + $0x860] sm:$0xff] %v733_v12  ;;  %736 = vst [vmem:[%s4239_s29 + $0x868] sm:$0xff] %v735_v13  ;;  %v739_v15 = vld [vmem:[%s4234_s28 + $0x1958] sm:$0xff]  ;;  %v741_v16 = vld [vmem:[%s4234_s28 + $0x1960] sm:$0xff] }
  0x9e   : > { %738 = vst [vmem:[%s4239_s29 + $0x870] sm:$0xff] %v737_v14  ;;  %740 = vst [vmem:[%s4239_s29 + $0x878] sm:$0xff] %v739_v15  ;;  %v743_v17 = vld [vmem:[%s4234_s28 + $0x1998] sm:$0xff]  ;;  %v745_v18 = vld [vmem:[%s4234_s28 + $0x19a0] sm:$0xff] }
  0x9f   : > { %742 = vst [vmem:[%s4239_s29 + $0x880] sm:$0xff] %v741_v16  ;;  %v747_v19 = vld [vmem:[%s4234_s28 + $0x19a8] sm:$0xff]  ;;  %744 = vst [vmem:[%s4239_s29 + $0x888] sm:$0xff] %v743_v17  ;;  %v749_v20 = vld [vmem:[%s4234_s28 + $0x19e0] sm:$0xff] }
  0xa0   : > { %746 = vst [vmem:[%s4239_s29 + $0x890] sm:$0xff] %v745_v18  ;;  %748 = vst [vmem:[%s4239_s29 + $0x898] sm:$0xff] %v747_v19  ;;  %v751_v21 = vld [vmem:[%s4234_s28 + $0x19e8] sm:$0xff]  ;;  %v753_v22 = vld [vmem:[%s4234_s28 + $0x19f0] sm:$0xff] }
  0xa1   : > { %750 = vst [vmem:[%s4239_s29 + $0x8a0] sm:$0xff] %v749_v20  ;;  %752 = vst [vmem:[%s4239_s29 + $0x8a8] sm:$0xff] %v751_v21  ;;  %v755_v23 = vld [vmem:[%s4234_s28 + $0x1a28] sm:$0xff]  ;;  %v757_v24 = vld [vmem:[%s4234_s28 + $0x1a30] sm:$0xff] }
  0xa2   : > { %754 = vst [vmem:[%s4239_s29 + $0x8b0] sm:$0xff] %v753_v22  ;;  %v759_v25 = vld [vmem:[%s4234_s28 + $0x1a38] sm:$0xff]  ;;  %756 = vst [vmem:[%s4239_s29 + $0x8b8] sm:$0xff] %v755_v23  ;;  %v761_v26 = vld [vmem:[%s4234_s28 + $0x1a70] sm:$0xff] }
  0xa3   : > { %758 = vst [vmem:[%s4239_s29 + $0x8c0] sm:$0xff] %v757_v24  ;;  %760 = vst [vmem:[%s4239_s29 + $0x8c8] sm:$0xff] %v759_v25  ;;  %v763_v27 = vld [vmem:[%s4234_s28 + $0x1a78] sm:$0xff]  ;;  %v765_v28 = vld [vmem:[%s4234_s28 + $0x1a80] sm:$0xff] }
  0xa4   : > { %762 = vst [vmem:[%s4239_s29 + $0x8d0] sm:$0xff] %v761_v26  ;;  %764 = vst [vmem:[%s4239_s29 + $0x8d8] sm:$0xff] %v763_v27  ;;  %v767_v29 = vld [vmem:[%s4234_s28 + $0x1ab8] sm:$0xff]  ;;  %v769_v30 = vld [vmem:[%s4234_s28 + $0x1ac0] sm:$0xff] }
  0xa5   : > { %766 = vst [vmem:[%s4239_s29 + $0x8e0] sm:$0xff] %v765_v28  ;;  %v771_v31 = vld [vmem:[%s4234_s28 + $0x1ac8] sm:$0xff]  ;;  %768 = vst [vmem:[%s4239_s29 + $0x8e8] sm:$0xff] %v767_v29 }
  0xa6   : > { %770 = vst [vmem:[%s4239_s29 + $0x8f0] sm:$0xff] %v769_v30  ;;  %772 = vst [vmem:[%s4239_s29 + $0x8f8] sm:$0xff] %v771_v31 }
  0xa7 PF: > { %p3303_p8 = scmp.ge.s32.totalorder %s4164_s16, 1  ;;  %p785_p9 = scmp.lt.s32.totalorder %s4164_s16, 4 }
  0xa9   : > { %p786_p10 = pnand %p3303_p8, %p785_p9 }
  0xaa   : > { %s792_s30 = sand.u32 (!%p786_p10), 1, %s4148_s12   ;;  %v4820_v32 = vld [vmem:[%s5204_s0 + $0x4] ss:$24 sps:$4 sm:$0xff] (!%p786_p10)  }
  0xab   : > { %789 = sbr.rel (%p786_p10) target bundleno = 725 (0x2d5), region = 51  ;;  %v4827_v33 = vld [vmem:[%s5204_s0 + $0xc] ss:$24 sps:$4 sm:$0xff] (!%p786_p10)   ;;  %2673 = vmatprep.mubr.bf16.mxu1 (!%p786_p10), %v4820_v32 }
  0xac   : > { %s3640_s6 = smul.u32 (!%p786_p10), 2304, %s792_s30  ;;  %2716 = vmatprep.mubr.bf16.mxu0 (!%p786_p10), %v4827_v33 }
  0xae   : > { %s4831_s9 = scalar_lea.vmem (!%p786_p10), [#allocation3], %s3640_s6  ;;  %s842_s6 = smul.u32 (!%p786_p10), 6, %s4156_s14 }
  0xaf   : > { %v3682_v34 = vld [vmem:[%s4831_s9 + $0x4] ss:$24 sps:$4 sm:$0xff] (!%p786_p10)   ;;  %v3686_v36 = vld [vmem:[%s4831_s9] ss:$24 sps:$4 sm:$0xff] (!%p786_p10)   ;;  %v3688_v38 = vld [vmem:[%s4831_s9 + $0x34] ss:$24 sps:$4 sm:$0xff] (!%p786_p10)  }
  0xb0   : > { %v3684_v35 = vld [vmem:[%s4831_s9 + $0x304] ss:$24 sps:$4 sm:$0xff] (!%p786_p10)   ;;  %2641 = vmatprep.subr.bf16.mxu1 (!%p786_p10), %v3682_v34  ;;  %v3687_v37 = vld [vmem:[%s4831_s9 + $0x300] ss:$24 sps:$4 sm:$0xff] (!%p786_p10)   ;;  %v3690_v39 = vld [vmem:[%s4831_s9 + $0x334] ss:$24 sps:$4 sm:$0xff] (!%p786_p10)  }
  0xb1   : > { %2684 = vmatprep.subr.bf16.mxu0 (!%p786_p10), %v3684_v35  ;;  %2642 = vmatpush1.bf16.msra.mxu1 (!%p786_p10), %v3686_v36  ;;  %v3692_v40 = vld [vmem:[%s4831_s9 + $0x30] ss:$24 sps:$4 sm:$0xff] (!%p786_p10)   ;;  %v3694_v42 = vld [vmem:[%s4831_s9 + $0x64] ss:$24 sps:$4 sm:$0xff] (!%p786_p10)   ;;  %v3698_v44 = vld [vmem:[%s4831_s9 + $0x60] ss:$24 sps:$4 sm:$0xff] (!%p786_p10)  }
  0xb2   : > { %2685 = vmatpush1.bf16.msra.mxu0 %v3687_v37  ;;  %2643 = vmatprep.subr.bf16.mxu1 %v3688_v38  ;;  %v3693_v41 = vld [vmem:[%s4831_s9 + $0x330] ss:$24 sps:$4 sm:$0xff]   ;;  %v3696_v43 = vld [vmem:[%s4831_s9 + $0x364] ss:$24 sps:$4 sm:$0xff]   ;;  %v3699_v45 = vld [vmem:[%s4831_s9 + $0x360] ss:$24 sps:$4 sm:$0xff]  }
  0xb3   : > { %2686 = vmatprep.subr.bf16.mxu0 %v3690_v39  ;;  %v3700_v46 = vld [vmem:[%s4831_s9 + $0x94] ss:$24 sps:$4 sm:$0xff]   ;;  %v3704_v48 = vld [vmem:[%s4831_s9 + $0x90] ss:$24 sps:$4 sm:$0xff]   ;;  %v3706_v50 = vld [vmem:[%s4831_s9 + $0xc4] ss:$24 sps:$4 sm:$0xff]  }
  0xb4   : > { %v3702_v47 = vld [vmem:[%s4831_s9 + $0x394] ss:$24 sps:$4 sm:$0xff]   ;;  %v3705_v49 = vld [vmem:[%s4831_s9 + $0x390] ss:$24 sps:$4 sm:$0xff]   ;;  %v3708_v51 = vld [vmem:[%s4831_s9 + $0x3c4] ss:$24 sps:$4 sm:$0xff]  }
  0xb5   : > { %2644 = vmatpush1.bf16.msra.mxu1 %v3692_v40  ;;  %v3710_v52 = vld [vmem:[%s4831_s9 + $0xc0] ss:$24 sps:$4 sm:$0xff]   ;;  %v3712_v54 = vld [vmem:[%s4831_s9 + $0xf4] ss:$24 sps:$4 sm:$0xff]   ;;  %v3716_v56 = vld [vmem:[%s4831_s9 + $0xf0] ss:$24 sps:$4 sm:$0xff]  }
  0xb6   : > { %2687 = vmatpush1.bf16.msra.mxu0 %v3693_v41  ;;  %2645 = vmatprep.subr.bf16.mxu1 %v3694_v42  ;;  %v3711_v53 = vld [vmem:[%s4831_s9 + $0x3c0] ss:$24 sps:$4 sm:$0xff]   ;;  %v3714_v55 = vld [vmem:[%s4831_s9 + $0x3f4] ss:$24 sps:$4 sm:$0xff]   ;;  %v3717_v57 = vld [vmem:[%s4831_s9 + $0x3f0] ss:$24 sps:$4 sm:$0xff]  }
  0xb7   : > { %2688 = vmatprep.subr.bf16.mxu0 %v3696_v43  ;;  %v3718_v58 = vld [vmem:[%s4831_s9 + $0x124] ss:$24 sps:$4 sm:$0xff]   ;;  %v3722_v60 = vld [vmem:[%s4831_s9 + $0x120] ss:$24 sps:$4 sm:$0xff]   ;;  %v3724_v62 = vld [vmem:[%s4831_s9 + $0x154] ss:$24 sps:$4 sm:$0xff]  }
  0xb8   : > { %v3720_v59 = vld [vmem:[%s4831_s9 + $0x424] ss:$24 sps:$4 sm:$0xff]   ;;  %v3723_v61 = vld [vmem:[%s4831_s9 + $0x420] ss:$24 sps:$4 sm:$0xff]   ;;  %v3726_v63 = vld [vmem:[%s4831_s9 + $0x454] ss:$24 sps:$4 sm:$0xff]  }
  0xb9   : > { %2646 = vmatpush1.bf16.msra.mxu1 %v3698_v44  ;;  %v3728_v0 = vld [vmem:[%s4831_s9 + $0x150] ss:$24 sps:$4 sm:$0xff]   ;;  %v3730_v2 = vld [vmem:[%s4831_s9 + $0x184] ss:$24 sps:$4 sm:$0xff]   ;;  %v3734_v4 = vld [vmem:[%s4831_s9 + $0x180] ss:$24 sps:$4 sm:$0xff]  }
  0xba   : > { %2689 = vmatpush1.bf16.msra.mxu0 %v3699_v45  ;;  %2647 = vmatprep.subr.bf16.mxu1 %v3700_v46  ;;  %v3729_v1 = vld [vmem:[%s4831_s9 + $0x450] ss:$24 sps:$4 sm:$0xff]   ;;  %v3732_v3 = vld [vmem:[%s4831_s9 + $0x484] ss:$24 sps:$4 sm:$0xff]   ;;  %v3735_v5 = vld [vmem:[%s4831_s9 + $0x480] ss:$24 sps:$4 sm:$0xff]  }
  0xbb   : > { %2690 = vmatprep.subr.bf16.mxu0 %v3702_v47  ;;  %v3736_v6 = vld [vmem:[%s4831_s9 + $0x1b4] ss:$24 sps:$4 sm:$0xff]   ;;  %v3740_v8 = vld [vmem:[%s4831_s9 + $0x1b0] ss:$24 sps:$4 sm:$0xff]   ;;  %v3742_v10 = vld [vmem:[%s4831_s9 + $0x1e4] ss:$24 sps:$4 sm:$0xff]  }
  0xbc   : > { %v3738_v7 = vld [vmem:[%s4831_s9 + $0x4b4] ss:$24 sps:$4 sm:$0xff]   ;;  %v3741_v9 = vld [vmem:[%s4831_s9 + $0x4b0] ss:$24 sps:$4 sm:$0xff]   ;;  %v3744_v11 = vld [vmem:[%s4831_s9 + $0x4e4] ss:$24 sps:$4 sm:$0xff]  }
  0xbd   : > { %2648 = vmatpush1.bf16.msra.mxu1 %v3704_v48  ;;  %v3746_v12 = vld [vmem:[%s4831_s9 + $0x1e0] ss:$24 sps:$4 sm:$0xff]   ;;  %v3748_v14 = vld [vmem:[%s4831_s9 + $0x214] ss:$24 sps:$4 sm:$0xff]   ;;  %v3752_v16 = vld [vmem:[%s4831_s9 + $0x210] ss:$24 sps:$4 sm:$0xff]  }
  0xbe   : > { %2691 = vmatpush1.bf16.msra.mxu0 %v3705_v49  ;;  %2649 = vmatprep.subr.bf16.mxu1 %v3706_v50  ;;  %v3747_v13 = vld [vmem:[%s4831_s9 + $0x4e0] ss:$24 sps:$4 sm:$0xff]   ;;  %v3750_v15 = vld [vmem:[%s4831_s9 + $0x514] ss:$24 sps:$4 sm:$0xff]   ;;  %v3753_v17 = vld [vmem:[%s4831_s9 + $0x510] ss:$24 sps:$4 sm:$0xff]  }
  0xbf   : > { %2692 = vmatprep.subr.bf16.mxu0 %v3708_v51  ;;  %v3754_v18 = vld [vmem:[%s4831_s9 + $0x244] ss:$24 sps:$4 sm:$0xff]   ;;  %v3758_v20 = vld [vmem:[%s4831_s9 + $0x240] ss:$24 sps:$4 sm:$0xff]   ;;  %v3760_v22 = vld [vmem:[%s4831_s9 + $0x274] ss:$24 sps:$4 sm:$0xff]  }
  0xc0   : > { %v3756_v19 = vld [vmem:[%s4831_s9 + $0x544] ss:$24 sps:$4 sm:$0xff]   ;;  %v3759_v21 = vld [vmem:[%s4831_s9 + $0x540] ss:$24 sps:$4 sm:$0xff]   ;;  %v3762_v23 = vld [vmem:[%s4831_s9 + $0x574] ss:$24 sps:$4 sm:$0xff]  }
  0xc1   : > { %2650 = vmatpush1.bf16.msra.mxu1 %v3710_v52  ;;  %v3764_v24 = vld [vmem:[%s4831_s9 + $0x270] ss:$24 sps:$4 sm:$0xff]   ;;  %v3766_v26 = vld [vmem:[%s4831_s9 + $0x2a4] ss:$24 sps:$4 sm:$0xff]   ;;  %v3770_v28 = vld [vmem:[%s4831_s9 + $0x2a0] ss:$24 sps:$4 sm:$0xff]  }
  0xc2   : > { %2693 = vmatpush1.bf16.msra.mxu0 %v3711_v53  ;;  %2651 = vmatprep.subr.bf16.mxu1 %v3712_v54  ;;  %v3765_v25 = vld [vmem:[%s4831_s9 + $0x570] ss:$24 sps:$4 sm:$0xff]   ;;  %v3768_v27 = vld [vmem:[%s4831_s9 + $0x5a4] ss:$24 sps:$4 sm:$0xff]   ;;  %v3771_v29 = vld [vmem:[%s4831_s9 + $0x5a0] ss:$24 sps:$4 sm:$0xff]  }
  0xc3   : > { %2694 = vmatprep.subr.bf16.mxu0 %v3714_v55  ;;  %v3772_v30 = vld [vmem:[%s4831_s9 + $0x2d4] ss:$24 sps:$4 sm:$0xff]   ;;  %v3776_v34 = vld [vmem:[%s4831_s9 + $0x2d0] ss:$24 sps:$4 sm:$0xff]   ;;  %v3784_v36 = vld [vmem:[%s4831_s9 + $0x604] ss:$24 sps:$4 sm:$0xff]  }
  0xc4   : > { %v3774_v31 = vld [vmem:[%s4831_s9 + $0x5d4] ss:$24 sps:$4 sm:$0xff]   ;;  %v3777_v35 = vld [vmem:[%s4831_s9 + $0x5d0] ss:$24 sps:$4 sm:$0xff]   ;;  %v3782_v40 = vld [vmem:[%s4831_s9 + $0x600] ss:$24 sps:$4 sm:$0xff]  }
  0xc5   : > { %2652 = vmatpush1.bf16.msra.mxu1 %v3716_v56  ;;  %v3787_v37 = vld [vmem:[%s4831_s9 + $0xc] ss:$24 sps:$4 sm:$0xff]   ;;  %v4902_v38 = vld [vmem:[%s5204_s0] ss:$24 sps:$4 sm:$0xff]   ;;  %v3795_v43 = vld [vmem:[%s4831_s9 + $0x3c] ss:$24 sps:$4 sm:$0xff]  }
  0xc6   : > { %2695 = vmatpush1.bf16.msra.mxu0 %v3717_v57  ;;  %2653 = vmatprep.subr.bf16.mxu1 %v3718_v58  ;;  %v4907_v39 = vld [vmem:[%s5204_s0 + $0x8] ss:$24 sps:$4 sm:$0xff]   ;;  %v3792_v42 = vld [vmem:[%s4831_s9 + $0x634] ss:$24 sps:$4 sm:$0xff]   ;;  %v3798_v46 = vld [vmem:[%s4831_s9 + $0x664] ss:$24 sps:$4 sm:$0xff]  }
  0xc7   : > { %2696 = vmatprep.subr.bf16.mxu0 %v3720_v59  ;;  %v3785_v41 = vld [vmem:[%s4831_s9 + $0x8] ss:$24 sps:$4 sm:$0xff]   ;;  %v3793_v45 = vld [vmem:[%s4831_s9 + $0x38] ss:$24 sps:$4 sm:$0xff]   ;;  %v3801_v47 = vld [vmem:[%s4831_s9 + $0x6c] ss:$24 sps:$4 sm:$0xff]  }
  0xc8   : > { %v3790_v44 = vld [vmem:[%s4831_s9 + $0x630] ss:$24 sps:$4 sm:$0xff]   ;;  %v3796_v48 = vld [vmem:[%s4831_s9 + $0x660] ss:$24 sps:$4 sm:$0xff]   ;;  %v3804_v50 = vld [vmem:[%s4831_s9 + $0x694] ss:$24 sps:$4 sm:$0xff]  }
  0xc9   : > { %2654 = vmatpush1.bf16.msra.mxu1 %v3722_v60  ;;  %v3799_v49 = vld [vmem:[%s4831_s9 + $0x68] ss:$24 sps:$4 sm:$0xff]   ;;  %v3807_v51 = vld [vmem:[%s4831_s9 + $0x9c] ss:$24 sps:$4 sm:$0xff]   ;;  %v3805_v53 = vld [vmem:[%s4831_s9 + $0x98] ss:$24 sps:$4 sm:$0xff]  }
  0xca   : > { %2697 = vmatpush1.bf16.msra.mxu0 %v3723_v61  ;;  %2655 = vmatprep.subr.bf16.mxu1 %v3724_v62  ;;  %v3802_v52 = vld [vmem:[%s4831_s9 + $0x690] ss:$24 sps:$4 sm:$0xff]   ;;  %v3810_v54 = vld [vmem:[%s4831_s9 + $0x6c4] ss:$24 sps:$4 sm:$0xff]   ;;  %v3808_v56 = vld [vmem:[%s4831_s9 + $0x6c0] ss:$24 sps:$4 sm:$0xff]  }
  0xcb   : > { %2698 = vmatprep.subr.bf16.mxu0 %v3726_v63  ;;  %v3813_v55 = vld [vmem:[%s4831_s9 + $0xcc] ss:$24 sps:$4 sm:$0xff]   ;;  %v3811_v57 = vld [vmem:[%s4831_s9 + $0xc8] ss:$24 sps:$4 sm:$0xff]   ;;  %v3819_v59 = vld [vmem:[%s4831_s9 + $0xfc] ss:$24 sps:$4 sm:$0xff]  }
  0xcc   : > { %v3816_v58 = vld [vmem:[%s4831_s9 + $0x6f4] ss:$24 sps:$4 sm:$0xff]   ;;  %v3814_v60 = vld [vmem:[%s4831_s9 + $0x6f0] ss:$24 sps:$4 sm:$0xff]   ;;  %v3822_v62 = vld [vmem:[%s4831_s9 + $0x724] ss:$24 sps:$4 sm:$0xff]  }
  0xcd   : > { %2656 = vmatpush1.bf16.msra.mxu1 %v3728_v0  ;;  %v3817_v61 = vld [vmem:[%s4831_s9 + $0xf8] ss:$24 sps:$4 sm:$0xff]   ;;  %v3825_v63 = vld [vmem:[%s4831_s9 + $0x12c] ss:$24 sps:$4 sm:$0xff]   ;;  %v4939_v0 = vld [vmem:[%s5204_s0 + $0x14] ss:$24 sps:$4 sm:$0xff]  }
  0xce   : > { %2699 = vmatpush1.bf16.msra.mxu0 %v3729_v1  ;;  %2657 = vmatprep.subr.bf16.mxu1 %v3730_v2  ;;  %v3820_v1 = vld [vmem:[%s4831_s9 + $0x720] ss:$24 sps:$4 sm:$0xff]   ;;  %p843_p11 = scmp.lt.s32.totalorder %s842_s6, 17  ;;  %s3614_s12 = smul.u32 (%p4221_p6), 24, %s4156_s14 }
  0xcf   : > { %2700 = vmatprep.subr.bf16.mxu0 %v3732_v3  ;;  %v3823_v2 = vld [vmem:[%s4831_s9 + $0x128] ss:$24 sps:$4 sm:$0xff]   ;;  %v3828_v3 = vld [vmem:[%s4831_s9 + $0x754] ss:$24 sps:$4 sm:$0xff]  }
  0xd0   : > { %s5216_s6 = smov (!%p843_p11, %s842_s6), 17  ;;  %s3165_s19 = scalar_lea.vmem (%p4221_p6), %s5207_s3, %s3614_s12 }
  0xd1   : > { %2658 = vmatpush1.bf16.msra.mxu1 %v3734_v4  ;;  %v3831_v4 = vld [vmem:[%s4831_s9 + $0x15c] ss:$24 sps:$4 sm:$0xff]   ;;  %s845_s10 = scalar_lea.vmem %s5206_s2, %s5216_s6 }
  0xd2   : > { %2701 = vmatpush1.bf16.msra.mxu0 %v3735_v5  ;;  %2659 = vmatprep.subr.bf16.mxu1 %v3736_v6  ;;  %v3826_v5 = vld [vmem:[%s4831_s9 + $0x750] ss:$24 sps:$4 sm:$0xff]  }
  0xd3   : > { %2702 = vmatprep.subr.bf16.mxu0 %v3738_v7  ;;  %v3829_v6 = vld [vmem:[%s4831_s9 + $0x158] ss:$24 sps:$4 sm:$0xff]   ;;  %v3834_v7 = vld [vmem:[%s4831_s9 + $0x784] ss:$24 sps:$4 sm:$0xff]  }
  0xd5   : > { %2660 = vmatpush1.bf16.msra.mxu1 %v3740_v8  ;;  %v3837_v8 = vld [vmem:[%s4831_s9 + $0x18c] ss:$24 sps:$4 sm:$0xff]  }
  0xd6   : > { %2703 = vmatpush1.bf16.msra.mxu0 %v3741_v9  ;;  %2661 = vmatprep.subr.bf16.mxu1 %v3742_v10  ;;  %v3832_v9 = vld [vmem:[%s4831_s9 + $0x780] ss:$24 sps:$4 sm:$0xff]  }
  0xd7   : > { %2704 = vmatprep.subr.bf16.mxu0 %v3744_v11  ;;  %v3835_v10 = vld [vmem:[%s4831_s9 + $0x188] ss:$24 sps:$4 sm:$0xff]   ;;  %v3840_v11 = vld [vmem:[%s4831_s9 + $0x7b4] ss:$24 sps:$4 sm:$0xff]  }
  0xd9   : > { %2662 = vmatpush1.bf16.msra.mxu1 %v3746_v12  ;;  %v3843_v12 = vld [vmem:[%s4831_s9 + $0x1bc] ss:$24 sps:$4 sm:$0xff]  }
  0xda   : > { %2705 = vmatpush1.bf16.msra.mxu0 %v3747_v13  ;;  %2663 = vmatprep.subr.bf16.mxu1 %v3748_v14  ;;  %v3838_v13 = vld [vmem:[%s4831_s9 + $0x7b0] ss:$24 sps:$4 sm:$0xff]  }
  0xdb   : > { %2706 = vmatprep.subr.bf16.mxu0 %v3750_v15  ;;  %v3841_v14 = vld [vmem:[%s4831_s9 + $0x1b8] ss:$24 sps:$4 sm:$0xff]   ;;  %v3846_v15 = vld [vmem:[%s4831_s9 + $0x7e4] ss:$24 sps:$4 sm:$0xff]  }
  0xdd   : > { %2664 = vmatpush1.bf16.msra.mxu1 %v3752_v16  ;;  %v3849_v16 = vld [vmem:[%s4831_s9 + $0x1ec] ss:$24 sps:$4 sm:$0xff]  }
  0xde   : > { %2707 = vmatpush1.bf16.msra.mxu0 %v3753_v17  ;;  %2665 = vmatprep.subr.bf16.mxu1 %v3754_v18  ;;  %v3844_v17 = vld [vmem:[%s4831_s9 + $0x7e0] ss:$24 sps:$4 sm:$0xff]  }
  0xdf   : > { %2708 = vmatprep.subr.bf16.mxu0 %v3756_v19  ;;  %v3847_v18 = vld [vmem:[%s4831_s9 + $0x1e8] ss:$24 sps:$4 sm:$0xff]   ;;  %v3852_v19 = vld [vmem:[%s4831_s9 + $0x814] ss:$24 sps:$4 sm:$0xff]  }
  0xe1   : > { %2666 = vmatpush1.bf16.msra.mxu1 %v3758_v20  ;;  %v3855_v20 = vld [vmem:[%s4831_s9 + $0x21c] ss:$24 sps:$4 sm:$0xff]  }
  0xe2   : > { %2709 = vmatpush1.bf16.msra.mxu0 %v3759_v21  ;;  %2667 = vmatprep.subr.bf16.mxu1 %v3760_v22  ;;  %v3850_v21 = vld [vmem:[%s4831_s9 + $0x810] ss:$24 sps:$4 sm:$0xff]  }
  0xe3   : > { %2710 = vmatprep.subr.bf16.mxu0 %v3762_v23  ;;  %v3853_v22 = vld [vmem:[%s4831_s9 + $0x218] ss:$24 sps:$4 sm:$0xff]   ;;  %v3858_v23 = vld [vmem:[%s4831_s9 + $0x844] ss:$24 sps:$4 sm:$0xff]  }
  0xe5   : > { %2668 = vmatpush1.bf16.msra.mxu1 %v3764_v24  ;;  %v3861_v24 = vld [vmem:[%s4831_s9 + $0x24c] ss:$24 sps:$4 sm:$0xff]  }
  0xe6   : > { %2711 = vmatpush1.bf16.msra.mxu0 %v3765_v25  ;;  %2669 = vmatprep.subr.bf16.mxu1 %v3766_v26  ;;  %v3856_v25 = vld [vmem:[%s4831_s9 + $0x840] ss:$24 sps:$4 sm:$0xff]  }
  0xe7   : > { %2712 = vmatprep.subr.bf16.mxu0 %v3768_v27  ;;  %v3859_v26 = vld [vmem:[%s4831_s9 + $0x248] ss:$24 sps:$4 sm:$0xff]   ;;  %v3864_v27 = vld [vmem:[%s4831_s9 + $0x874] ss:$24 sps:$4 sm:$0xff]  }
  0xe9   : > { %2670 = vmatpush1.bf16.msra.mxu1 %v3770_v28  ;;  %v3867_v28 = vld [vmem:[%s4831_s9 + $0x27c] ss:$24 sps:$4 sm:$0xff]  }
  0xea   : > { %2713 = vmatpush1.bf16.msra.mxu0 %v3771_v29  ;;  %2671 = vmatprep.subr.bf16.mxu1 %v3772_v30  ;;  %v3862_v29 = vld [vmem:[%s4831_s9 + $0x870] ss:$24 sps:$4 sm:$0xff]  }
  0xeb   : > { %2714 = vmatprep.subr.bf16.mxu0 %v3774_v31  ;;  %v3865_v30 = vld [vmem:[%s4831_s9 + $0x278] ss:$24 sps:$4 sm:$0xff]   ;;  %v3870_v31 = vld [vmem:[%s4831_s9 + $0x8a4] ss:$24 sps:$4 sm:$0xff]  }
  0xed   : > { %2672 = vmatpush1.bf16.msra.mxu1 %v3776_v34  ;;  %v3873_v34 = vld [vmem:[%s4831_s9 + $0x2ac] ss:$24 sps:$4 sm:$0xff]  }
  0xee   : > { %2715 = vmatpush1.bf16.msra.mxu0 %v3777_v35  ;;  %2770 = vmatprep.subr.bf16.mxu1 %v3787_v37  ;;  %v3868_v35 = vld [vmem:[%s4831_s9 + $0x8a0] ss:$24 sps:$4 sm:$0xff]   ;;  %v3876_v37 = vld [vmem:[%s4831_s9 + $0x8d4] ss:$24 sps:$4 sm:$0xff]  }
  0xef   : > { %2727 = vmatprep.subr.bf16.mxu0 %v3784_v36  ;;  %v3871_v36 = vld [vmem:[%s4831_s9 + $0x2a8] ss:$24 sps:$4 sm:$0xff]  }
  0xf0   : > { %2674 = vmatmul.mubr.bf16.vlgmr.msra.gmra.mrb[0].mxu1 %v4902_v38 }
  0xf1   : > { %2717 = vmatmul.mubr.bf16.vlgmr.msra.gmra.mrb[0].mxu0 %v4907_v39  ;;  %2771 = vmatpush1.bf16.msra.mxu1 %v3785_v41  ;;  %v3874_v41 = vld [vmem:[%s4831_s9 + $0x8d0] ss:$24 sps:$4 sm:$0xff]  }
  0xf2   : > { %2728 = vmatpush1.bf16.msra.mxu0 %v3782_v40  ;;  %2772 = vmatprep.subr.bf16.mxu1 %v3795_v43  ;;  %v3879_v40 = vld [vmem:[%s4831_s9 + $0x2dc] ss:$24 sps:$4 sm:$0xff]   ;;  %v3885_v43 = vld [vmem:[%s4831_s9 + $0x30c] ss:$24 sps:$4 sm:$0xff]  }
  0xf3   : > { %2729 = vmatprep.subr.bf16.mxu0 %v3792_v42  ;;  %2802 = vmatprep.mubr.bf16.mxu1 %v4820_v32  ;;  %v3877_v42 = vld [vmem:[%s4831_s9 + $0x2d8] ss:$24 sps:$4 sm:$0xff]  }
  0xf4   : > { %2759 = vmatprep.mubr.bf16.mxu0 %v4939_v0 }
  0xf5   : > { %2773 = vmatpush1.bf16.msra.mxu1 %v3793_v45  ;;  %v4985_v45 = vld [vmem:[%s5204_s0 + $0x10] ss:$24 sps:$4 sm:$0xff]  }
  0xf6   : > { %2730 = vmatpush1.bf16.msra.mxu0 %v3790_v44  ;;  %2774 = vmatprep.subr.bf16.mxu1 %v3801_v47  ;;  %v3888_v44 = vld [vmem:[%s4831_s9 + $0x14] ss:$24 sps:$4 sm:$0xff]   ;;  %v3886_v47 = vld [vmem:[%s4831_s9 + $0x10] ss:$24 sps:$4 sm:$0xff]  }
  0xf7   : > { %2731 = vmatprep.subr.bf16.mxu0 %v3798_v46  ;;  %v3883_v46 = vld [vmem:[%s4831_s9 + $0x308] ss:$24 sps:$4 sm:$0xff]  }
  0xf9   : > { %2775 = vmatpush1.bf16.msra.mxu1 %v3799_v49  ;;  %v3894_v49 = vld [vmem:[%s4831_s9 + $0x44] ss:$24 sps:$4 sm:$0xff]  }
  0xfa   : > { %2732 = vmatpush1.bf16.msra.mxu0 %v3796_v48  ;;  %2776 = vmatprep.subr.bf16.mxu1 %v3807_v51  ;;  %v3891_v48 = vld [vmem:[%s4831_s9 + $0x33c] ss:$24 sps:$4 sm:$0xff]   ;;  %v3892_v51 = vld [vmem:[%s4831_s9 + $0x40] ss:$24 sps:$4 sm:$0xff]  }
  0xfb   : > { %2733 = vmatprep.subr.bf16.mxu0 %v3804_v50  ;;  %v3889_v50 = vld [vmem:[%s4831_s9 + $0x338] ss:$24 sps:$4 sm:$0xff]  }
  0xfd   : > { %2777 = vmatpush1.bf16.msra.mxu1 %v3805_v53  ;;  %v3900_v53 = vld [vmem:[%s4831_s9 + $0x74] ss:$24 sps:$4 sm:$0xff]  }
  0xfe   : > { %2734 = vmatpush1.bf16.msra.mxu0 %v3802_v52  ;;  %2778 = vmatprep.subr.bf16.mxu1 %v3813_v55  ;;  %v3897_v52 = vld [vmem:[%s4831_s9 + $0x36c] ss:$24 sps:$4 sm:$0xff]   ;;  %v3898_v55 = vld [vmem:[%s4831_s9 + $0x70] ss:$24 sps:$4 sm:$0xff]  }
  0xff   : > { %2735 = vmatprep.subr.bf16.mxu0 %v3810_v54  ;;  %v3895_v54 = vld [vmem:[%s4831_s9 + $0x368] ss:$24 sps:$4 sm:$0xff]  }
 0x101   : > { %2779 = vmatpush1.bf16.msra.mxu1 %v3811_v57  ;;  %v3906_v57 = vld [vmem:[%s4831_s9 + $0xa4] ss:$24 sps:$4 sm:$0xff]  }
 0x102   : > { %2736 = vmatpush1.bf16.msra.mxu0 %v3808_v56  ;;  %2780 = vmatprep.subr.bf16.mxu1 %v3819_v59  ;;  %v3903_v56 = vld [vmem:[%s4831_s9 + $0x39c] ss:$24 sps:$4 sm:$0xff]  }
 0x103   : > { %2737 = vmatprep.subr.bf16.mxu0 %v3816_v58  ;;  %v3901_v58 = vld [vmem:[%s4831_s9 + $0x398] ss:$24 sps:$4 sm:$0xff]   ;;  %v3912_v59 = vld [vmem:[%s4831_s9 + $0xd4] ss:$24 sps:$4 sm:$0xff]  }
 0x105   : > { %2781 = vmatpush1.bf16.msra.mxu1 %v3817_v61  ;;  %v3910_v61 = vld [vmem:[%s4831_s9 + $0xd0] ss:$24 sps:$4 sm:$0xff]  }
 0x106   : > { %2738 = vmatpush1.bf16.msra.mxu0 %v3814_v60  ;;  %2782 = vmatprep.subr.bf16.mxu1 %v3825_v63  ;;  %v3907_v60 = vld [vmem:[%s4831_s9 + $0x3c8] ss:$24 sps:$4 sm:$0xff]   ;;  %v3918_v63 = vld [vmem:[%s4831_s9 + $0x104] ss:$24 sps:$4 sm:$0xff]  }
 0x107   : > { %2739 = vmatprep.subr.bf16.mxu0 %v3822_v62  ;;  %v3915_v62 = vld [vmem:[%s4831_s9 + $0x3fc] ss:$24 sps:$4 sm:$0xff]  }
 0x109   : > { %2783 = vmatpush1.bf16.msra.mxu1 %v3823_v2  ;;  %v3916_v2 = vld [vmem:[%s4831_s9 + $0x100] ss:$24 sps:$4 sm:$0xff]  }
 0x10a   : > { %2740 = vmatpush1.bf16.msra.mxu0 %v3820_v1  ;;  %2784 = vmatprep.subr.bf16.mxu1 %v3831_v4  ;;  %v3913_v1 = vld [vmem:[%s4831_s9 + $0x3f8] ss:$24 sps:$4 sm:$0xff]   ;;  %v3924_v4 = vld [vmem:[%s4831_s9 + $0x134] ss:$24 sps:$4 sm:$0xff]  }
 0x10b   : > { %2741 = vmatprep.subr.bf16.mxu0 %v3828_v3  ;;  %v3921_v3 = vld [vmem:[%s4831_s9 + $0x42c] ss:$24 sps:$4 sm:$0xff]  }
 0x10d   : > { %2785 = vmatpush1.bf16.msra.mxu1 %v3829_v6  ;;  %v3922_v6 = vld [vmem:[%s4831_s9 + $0x130] ss:$24 sps:$4 sm:$0xff]  }
 0x10e   : > { %2742 = vmatpush1.bf16.msra.mxu0 %v3826_v5  ;;  %2786 = vmatprep.subr.bf16.mxu1 %v3837_v8  ;;  %v3919_v5 = vld [vmem:[%s4831_s9 + $0x428] ss:$24 sps:$4 sm:$0xff]   ;;  %v3930_v8 = vld [vmem:[%s4831_s9 + $0x164] ss:$24 sps:$4 sm:$0xff]  }
 0x10f   : > { %2743 = vmatprep.subr.bf16.mxu0 %v3834_v7  ;;  %v3927_v7 = vld [vmem:[%s4831_s9 + $0x45c] ss:$24 sps:$4 sm:$0xff]  }
 0x111   : > { %2787 = vmatpush1.bf16.msra.mxu1 %v3835_v10  ;;  %v3928_v10 = vld [vmem:[%s4831_s9 + $0x160] ss:$24 sps:$4 sm:$0xff]  }
 0x112   : > { %2744 = vmatpush1.bf16.msra.mxu0 %v3832_v9  ;;  %2788 = vmatprep.subr.bf16.mxu1 %v3843_v12  ;;  %v3925_v9 = vld [vmem:[%s4831_s9 + $0x458] ss:$24 sps:$4 sm:$0xff]   ;;  %v3936_v12 = vld [vmem:[%s4831_s9 + $0x194] ss:$24 sps:$4 sm:$0xff]  }
 0x113   : > { %2745 = vmatprep.subr.bf16.mxu0 %v3840_v11  ;;  %v3933_v11 = vld [vmem:[%s4831_s9 + $0x48c] ss:$24 sps:$4 sm:$0xff]  }
 0x115   : > { %2789 = vmatpush1.bf16.msra.mxu1 %v3841_v14  ;;  %v3934_v14 = vld [vmem:[%s4831_s9 + $0x190] ss:$24 sps:$4 sm:$0xff]  }
 0x116   : > { %2746 = vmatpush1.bf16.msra.mxu0 %v3838_v13  ;;  %2790 = vmatprep.subr.bf16.mxu1 %v3849_v16  ;;  %v3931_v13 = vld [vmem:[%s4831_s9 + $0x488] ss:$24 sps:$4 sm:$0xff]   ;;  %v3942_v16 = vld [vmem:[%s4831_s9 + $0x1c4] ss:$24 sps:$4 sm:$0xff]  }
 0x117   : > { %2747 = vmatprep.subr.bf16.mxu0 %v3846_v15  ;;  %v3939_v15 = vld [vmem:[%s4831_s9 + $0x4bc] ss:$24 sps:$4 sm:$0xff]  }
 0x119   : > { %2791 = vmatpush1.bf16.msra.mxu1 %v3847_v18  ;;  %v3940_v18 = vld [vmem:[%s4831_s9 + $0x1c0] ss:$24 sps:$4 sm:$0xff]  }
 0x11a   : > { %2748 = vmatpush1.bf16.msra.mxu0 %v3844_v17  ;;  %2792 = vmatprep.subr.bf16.mxu1 %v3855_v20  ;;  %v3937_v17 = vld [vmem:[%s4831_s9 + $0x4b8] ss:$24 sps:$4 sm:$0xff]   ;;  %v3948_v20 = vld [vmem:[%s4831_s9 + $0x1f4] ss:$24 sps:$4 sm:$0xff]  }
 0x11b   : > { %2749 = vmatprep.subr.bf16.mxu0 %v3852_v19  ;;  %v3945_v19 = vld [vmem:[%s4831_s9 + $0x4ec] ss:$24 sps:$4 sm:$0xff]  }
 0x11d   : > { %2793 = vmatpush1.bf16.msra.mxu1 %v3853_v22  ;;  %v3946_v22 = vld [vmem:[%s4831_s9 + $0x1f0] ss:$24 sps:$4 sm:$0xff]  }
 0x11e   : > { %2750 = vmatpush1.bf16.msra.mxu0 %v3850_v21  ;;  %2794 = vmatprep.subr.bf16.mxu1 %v3861_v24  ;;  %v3943_v21 = vld [vmem:[%s4831_s9 + $0x4e8] ss:$24 sps:$4 sm:$0xff]   ;;  %v3954_v24 = vld [vmem:[%s4831_s9 + $0x224] ss:$24 sps:$4 sm:$0xff]  }
 0x11f   : > { %2751 = vmatprep.subr.bf16.mxu0 %v3858_v23  ;;  %v3951_v23 = vld [vmem:[%s4831_s9 + $0x51c] ss:$24 sps:$4 sm:$0xff]  }
 0x121   : > { %2795 = vmatpush1.bf16.msra.mxu1 %v3859_v26  ;;  %v3952_v26 = vld [vmem:[%s4831_s9 + $0x220] ss:$24 sps:$4 sm:$0xff]  }
 0x122   : > { %2752 = vmatpush1.bf16.msra.mxu0 %v3856_v25  ;;  %2796 = vmatprep.subr.bf16.mxu1 %v3867_v28  ;;  %v3949_v25 = vld [vmem:[%s4831_s9 + $0x518] ss:$24 sps:$4 sm:$0xff]   ;;  %v3960_v28 = vld [vmem:[%s4831_s9 + $0x254] ss:$24 sps:$4 sm:$0xff]  }
 0x123   : > { %2753 = vmatprep.subr.bf16.mxu0 %v3864_v27  ;;  %v3957_v27 = vld [vmem:[%s4831_s9 + $0x54c] ss:$24 sps:$4 sm:$0xff]  }
 0x125   : > { %2797 = vmatpush1.bf16.msra.mxu1 %v3865_v30  ;;  %v3958_v30 = vld [vmem:[%s4831_s9 + $0x250] ss:$24 sps:$4 sm:$0xff]  }
 0x126   : > { %2754 = vmatpush1.bf16.msra.mxu0 %v3862_v29  ;;  %2798 = vmatprep.subr.bf16.mxu1 %v3873_v34  ;;  %v3955_v29 = vld [vmem:[%s4831_s9 + $0x548] ss:$24 sps:$4 sm:$0xff]   ;;  %v3966_v34 = vld [vmem:[%s4831_s9 + $0x284] ss:$24 sps:$4 sm:$0xff]  }
 0x127   : > { %2755 = vmatprep.subr.bf16.mxu0 %v3870_v31  ;;  %v3963_v31 = vld [vmem:[%s4831_s9 + $0x57c] ss:$24 sps:$4 sm:$0xff]  }
 0x129   : > { %2799 = vmatpush1.bf16.msra.mxu1 %v3871_v36  ;;  %v3964_v36 = vld [vmem:[%s4831_s9 + $0x280] ss:$24 sps:$4 sm:$0xff]  }
 0x12a   : > { %2756 = vmatpush1.bf16.msra.mxu0 %v3868_v35  ;;  %2800 = vmatprep.subr.bf16.mxu1 %v3879_v40  ;;  %v3961_v35 = vld [vmem:[%s4831_s9 + $0x578] ss:$24 sps:$4 sm:$0xff]   ;;  %v3972_v40 = vld [vmem:[%s4831_s9 + $0x2b4] ss:$24 sps:$4 sm:$0xff]  }
 0x12b   : > { %2757 = vmatprep.subr.bf16.mxu0 %v3876_v37  ;;  %v3969_v37 = vld [vmem:[%s4831_s9 + $0x5ac] ss:$24 sps:$4 sm:$0xff]  }
 0x12d   : > { %2801 = vmatpush1.bf16.msra.mxu1 %v3877_v42  ;;  %v3970_v42 = vld [vmem:[%s4831_s9 + $0x2b0] ss:$24 sps:$4 sm:$0xff]  }
 0x12e   : > { %2758 = vmatpush1.bf16.msra.mxu0 %v3874_v41  ;;  %2813 = vmatprep.subr.bf16.mxu1 %v3885_v43  ;;  %v3967_v41 = vld [vmem:[%s4831_s9 + $0x5a8] ss:$24 sps:$4 sm:$0xff]   ;;  %v3975_v43 = vld [vmem:[%s4831_s9 + $0x5dc] ss:$24 sps:$4 sm:$0xff]  }
 0x12f   : > { %2899 = vmatprep.subr.bf16.mxu0 %v3888_v44  ;;  %v3978_v44 = vld [vmem:[%s4831_s9 + $0x2e4] ss:$24 sps:$4 sm:$0xff]  }
 0x130   : > { %2803 = vmatmul.mubr.bf16.vlgmr.msra.gmra.mrb[4].mxu1 %v4902_v38 }
 0x131   : > { %2760 = vmatmul.mubr.bf16.vlgmr.msra.gmra.mrb[0].mxu0 %v4985_v45  ;;  %2814 = vmatpush1.bf16.msra.mxu1 %v3883_v46  ;;  %v3973_v46 = vld [vmem:[%s4831_s9 + $0x5d8] ss:$24 sps:$4 sm:$0xff]  }
 0x132   : > { %2900 = vmatpush1.bf16.msra.mxu0 %v3886_v47  ;;  %2815 = vmatprep.subr.bf16.mxu1 %v3891_v48  ;;  %v3976_v47 = vld [vmem:[%s4831_s9 + $0x2e0] ss:$24 sps:$4 sm:$0xff]   ;;  %v3981_v48 = vld [vmem:[%s4831_s9 + $0x60c] ss:$24 sps:$4 sm:$0xff]  }
 0x133   : > { %2901 = vmatprep.subr.bf16.mxu0 %v3894_v49  ;;  %2845 = vmatprep.mubr.bf16.mxu1 %v4827_v33  ;;  %v3904_v33 = vld [vmem:[%s4831_s9 + $0xa0] ss:$24 sps:$4 sm:$0xff]   ;;  %v3984_v49 = vld [vmem:[%s4831_s9 + $0x314] ss:$24 sps:$4 sm:$0xff]  }
 0x134   : > { %2931 = vmatprep.mubr.bf16.mxu0 %v4820_v32  ;;  %v3909_v32 = vld [vmem:[%s4831_s9 + $0x3cc] ss:$24 sps:$4 sm:$0xff]  }
 0x135   : > { %2816 = vmatpush1.bf16.msra.mxu1 %v3889_v50  ;;  %v3979_v50 = vld [vmem:[%s4831_s9 + $0x608] ss:$24 sps:$4 sm:$0xff]  }
 0x136   : > { %2902 = vmatpush1.bf16.msra.mxu0 %v3892_v51  ;;  %2817 = vmatprep.subr.bf16.mxu1 %v3897_v52  ;;  %v3982_v51 = vld [vmem:[%s4831_s9 + $0x310] ss:$24 sps:$4 sm:$0xff]   ;;  %v3987_v52 = vld [vmem:[%s4831_s9 + $0x63c] ss:$24 sps:$4 sm:$0xff]  }
 0x137   : > { %2903 = vmatprep.subr.bf16.mxu0 %v3900_v53  ;;  %v3990_v53 = vld [vmem:[%s4831_s9 + $0x344] ss:$24 sps:$4 sm:$0xff]  }
 0x139   : > { %2818 = vmatpush1.bf16.msra.mxu1 %v3895_v54  ;;  %v3985_v54 = vld [vmem:[%s4831_s9 + $0x638] ss:$24 sps:$4 sm:$0xff]  }
 0x13a   : > { %2904 = vmatpush1.bf16.msra.mxu0 %v3898_v55  ;;  %2819 = vmatprep.subr.bf16.mxu1 %v3903_v56  ;;  %v3988_v55 = vld [vmem:[%s4831_s9 + $0x340] ss:$24 sps:$4 sm:$0xff]   ;;  %v3993_v56 = vld [vmem:[%s4831_s9 + $0x66c] ss:$24 sps:$4 sm:$0xff]  }
 0x13b   : > { %2905 = vmatprep.subr.bf16.mxu0 %v3906_v57  ;;  %v3996_v57 = vld [vmem:[%s4831_s9 + $0x374] ss:$24 sps:$4 sm:$0xff]  }
 0x13d   : > { %2820 = vmatpush1.bf16.msra.mxu1 %v3901_v58  ;;  %v3994_v58 = vld [vmem:[%s4831_s9 + $0x370] ss:$24 sps:$4 sm:$0xff]  }
 0x13e   : > { %2906 = vmatpush1.bf16.msra.mxu0 %v3904_v33  ;;  %2821 = vmatprep.subr.bf16.mxu1 %v3909_v32  ;;  %v3999_v33 = vld [vmem:[%s4831_s9 + $0x69c] ss:$24 sps:$4 sm:$0xff]  }
 0x13f   : > { %2907 = vmatprep.subr.bf16.mxu0 %v3912_v59  ;;  %v4002_v32 = vld [vmem:[%s4831_s9 + $0x3a4] ss:$24 sps:$4 sm:$0xff]   ;;  %v4000_v59 = vld [vmem:[%s4831_s9 + $0x3a0] ss:$24 sps:$4 sm:$0xff]  }
 0x141   : > { %2822 = vmatpush1.bf16.msra.mxu1 %v3907_v60  ;;  %v4005_v60 = vld [vmem:[%s4831_s9 + $0x6cc] ss:$24 sps:$4 sm:$0xff]  }
 0x142   : > { %2908 = vmatpush1.bf16.msra.mxu0 %v3910_v61  ;;  %2823 = vmatprep.subr.bf16.mxu1 %v3915_v62  ;;  %v4008_v61 = vld [vmem:[%s4831_s9 + $0x3d4] ss:$24 sps:$4 sm:$0xff]   ;;  %v4003_v62 = vld [vmem:[%s4831_s9 + $0x6c8] ss:$24 sps:$4 sm:$0xff]  }
 0x143   : > { %2909 = vmatprep.subr.bf16.mxu0 %v3918_v63  ;;  %v4006_v63 = vld [vmem:[%s4831_s9 + $0x3d0] ss:$24 sps:$4 sm:$0xff]  }
 0x145   : > { %2824 = vmatpush1.bf16.msra.mxu1 %v3913_v1  ;;  %v4011_v1 = vld [vmem:[%s4831_s9 + $0x6fc] ss:$24 sps:$4 sm:$0xff]  }
 0x146   : > { %2910 = vmatpush1.bf16.msra.mxu0 %v3916_v2  ;;  %2825 = vmatprep.subr.bf16.mxu1 %v3921_v3  ;;  %v4014_v2 = vld [vmem:[%s4831_s9 + $0x404] ss:$24 sps:$4 sm:$0xff]   ;;  %v4009_v3 = vld [vmem:[%s4831_s9 + $0x6f8] ss:$24 sps:$4 sm:$0xff]  }
 0x147   : > { %2911 = vmatprep.subr.bf16.mxu0 %v3924_v4  ;;  %v4012_v4 = vld [vmem:[%s4831_s9 + $0x400] ss:$24 sps:$4 sm:$0xff]  }
 0x149   : > { %2826 = vmatpush1.bf16.msra.mxu1 %v3919_v5  ;;  %v4017_v5 = vld [vmem:[%s4831_s9 + $0x72c] ss:$24 sps:$4 sm:$0xff]  }
 0x14a   : > { %2912 = vmatpush1.bf16.msra.mxu0 %v3922_v6  ;;  %2827 = vmatprep.subr.bf16.mxu1 %v3927_v7  ;;  %v4020_v6 = vld [vmem:[%s4831_s9 + $0x434] ss:$24 sps:$4 sm:$0xff]   ;;  %v4015_v7 = vld [vmem:[%s4831_s9 + $0x728] ss:$24 sps:$4 sm:$0xff]  }
 0x14b   : > { %2913 = vmatprep.subr.bf16.mxu0 %v3930_v8  ;;  %v4018_v8 = vld [vmem:[%s4831_s9 + $0x430] ss:$24 sps:$4 sm:$0xff]  }
 0x14d   : > { %2828 = vmatpush1.bf16.msra.mxu1 %v3925_v9  ;;  %v4023_v9 = vld [vmem:[%s4831_s9 + $0x75c] ss:$24 sps:$4 sm:$0xff]  }
 0x14e   : > { %2914 = vmatpush1.bf16.msra.mxu0 %v3928_v10  ;;  %2829 = vmatprep.subr.bf16.mxu1 %v3933_v11  ;;  %v4026_v10 = vld [vmem:[%s4831_s9 + $0x464] ss:$24 sps:$4 sm:$0xff]   ;;  %v4021_v11 = vld [vmem:[%s4831_s9 + $0x758] ss:$24 sps:$4 sm:$0xff]  }
 0x14f   : > { %2915 = vmatprep.subr.bf16.mxu0 %v3936_v12  ;;  %v4024_v12 = vld [vmem:[%s4831_s9 + $0x460] ss:$24 sps:$4 sm:$0xff]  }
 0x151   : > { %2830 = vmatpush1.bf16.msra.mxu1 %v3931_v13  ;;  %v4029_v13 = vld [vmem:[%s4831_s9 + $0x78c] ss:$24 sps:$4 sm:$0xff]  }
 0x152   : > { %2916 = vmatpush1.bf16.msra.mxu0 %v3934_v14  ;;  %2831 = vmatprep.subr.bf16.mxu1 %v3939_v15  ;;  %v4032_v14 = vld [vmem:[%s4831_s9 + $0x494] ss:$24 sps:$4 sm:$0xff]   ;;  %v4027_v15 = vld [vmem:[%s4831_s9 + $0x788] ss:$24 sps:$4 sm:$0xff]  }
 0x153   : > { %2917 = vmatprep.subr.bf16.mxu0 %v3942_v16  ;;  %v4030_v16 = vld [vmem:[%s4831_s9 + $0x490] ss:$24 sps:$4 sm:$0xff]  }
 0x155   : > { %2832 = vmatpush1.bf16.msra.mxu1 %v3937_v17  ;;  %v4035_v17 = vld [vmem:[%s4831_s9 + $0x7bc] ss:$24 sps:$4 sm:$0xff]  }
 0x156   : > { %2918 = vmatpush1.bf16.msra.mxu0 %v3940_v18  ;;  %2833 = vmatprep.subr.bf16.mxu1 %v3945_v19  ;;  %v4038_v18 = vld [vmem:[%s4831_s9 + $0x4c4] ss:$24 sps:$4 sm:$0xff]   ;;  %v4033_v19 = vld [vmem:[%s4831_s9 + $0x7b8] ss:$24 sps:$4 sm:$0xff]  }
 0x157   : > { %2919 = vmatprep.subr.bf16.mxu0 %v3948_v20  ;;  %v4036_v20 = vld [vmem:[%s4831_s9 + $0x4c0] ss:$24 sps:$4 sm:$0xff]  }
 0x159   : > { %2834 = vmatpush1.bf16.msra.mxu1 %v3943_v21  ;;  %v4041_v21 = vld [vmem:[%s4831_s9 + $0x7ec] ss:$24 sps:$4 sm:$0xff]  }
 0x15a   : > { %2920 = vmatpush1.bf16.msra.mxu0 %v3946_v22  ;;  %2835 = vmatprep.subr.bf16.mxu1 %v3951_v23  ;;  %v4044_v22 = vld [vmem:[%s4831_s9 + $0x4f4] ss:$24 sps:$4 sm:$0xff]   ;;  %v4039_v23 = vld [vmem:[%s4831_s9 + $0x7e8] ss:$24 sps:$4 sm:$0xff]  }
 0x15b   : > { %2921 = vmatprep.subr.bf16.mxu0 %v3954_v24  ;;  %v4042_v24 = vld [vmem:[%s4831_s9 + $0x4f0] ss:$24 sps:$4 sm:$0xff]  }
 0x15d   : > { %2836 = vmatpush1.bf16.msra.mxu1 %v3949_v25  ;;  %v4047_v25 = vld [vmem:[%s4831_s9 + $0x81c] ss:$24 sps:$4 sm:$0xff]  }
 0x15e   : > { %2922 = vmatpush1.bf16.msra.mxu0 %v3952_v26  ;;  %2837 = vmatprep.subr.bf16.mxu1 %v3957_v27  ;;  %v4050_v26 = vld [vmem:[%s4831_s9 + $0x524] ss:$24 sps:$4 sm:$0xff]   ;;  %v4045_v27 = vld [vmem:[%s4831_s9 + $0x818] ss:$24 sps:$4 sm:$0xff]  }
 0x15f   : > { %2923 = vmatprep.subr.bf16.mxu0 %v3960_v28  ;;  %v4048_v28 = vld [vmem:[%s4831_s9 + $0x520] ss:$24 sps:$4 sm:$0xff]  }
 0x161   : > { %2838 = vmatpush1.bf16.msra.mxu1 %v3955_v29  ;;  %v4053_v29 = vld [vmem:[%s4831_s9 + $0x84c] ss:$24 sps:$4 sm:$0xff]  }
 0x162   : > { %2924 = vmatpush1.bf16.msra.mxu0 %v3958_v30  ;;  %2839 = vmatprep.subr.bf16.mxu1 %v3963_v31  ;;  %v4056_v30 = vld [vmem:[%s4831_s9 + $0x554] ss:$24 sps:$4 sm:$0xff]   ;;  %v4051_v31 = vld [vmem:[%s4831_s9 + $0x848] ss:$24 sps:$4 sm:$0xff]  }
 0x163   : > { %2925 = vmatprep.subr.bf16.mxu0 %v3966_v34  ;;  %v4054_v34 = vld [vmem:[%s4831_s9 + $0x550] ss:$24 sps:$4 sm:$0xff]  }
 0x165   : > { %2840 = vmatpush1.bf16.msra.mxu1 %v3961_v35  ;;  %v4059_v35 = vld [vmem:[%s4831_s9 + $0x87c] ss:$24 sps:$4 sm:$0xff]  }
 0x166   : > { %2926 = vmatpush1.bf16.msra.mxu0 %v3964_v36  ;;  %2841 = vmatprep.subr.bf16.mxu1 %v3969_v37  ;;  %v4062_v36 = vld [vmem:[%s4831_s9 + $0x584] ss:$24 sps:$4 sm:$0xff]   ;;  %v4057_v37 = vld [vmem:[%s4831_s9 + $0x878] ss:$24 sps:$4 sm:$0xff]  }
 0x167   : > { %2927 = vmatprep.subr.bf16.mxu0 %v3972_v40  ;;  %v4060_v40 = vld [vmem:[%s4831_s9 + $0x580] ss:$24 sps:$4 sm:$0xff]  }
 0x169   : > { %2842 = vmatpush1.bf16.msra.mxu1 %v3967_v41  ;;  %v4065_v41 = vld [vmem:[%s4831_s9 + $0x8ac] ss:$24 sps:$4 sm:$0xff]  }
 0x16a   : > { %2928 = vmatpush1.bf16.msra.mxu0 %v3970_v42  ;;  %2843 = vmatprep.subr.bf16.mxu1 %v3975_v43  ;;  %v4068_v42 = vld [vmem:[%s4831_s9 + $0x5b4] ss:$24 sps:$4 sm:$0xff]   ;;  %v4063_v43 = vld [vmem:[%s4831_s9 + $0x8a8] ss:$24 sps:$4 sm:$0xff]  }
 0x16b   : > { %2929 = vmatprep.subr.bf16.mxu0 %v3978_v44  ;;  %v4066_v44 = vld [vmem:[%s4831_s9 + $0x5b0] ss:$24 sps:$4 sm:$0xff]  }
 0x16d   : > { %2844 = vmatpush1.bf16.msra.mxu1 %v3973_v46  ;;  %v4071_v46 = vld [vmem:[%s4831_s9 + $0x8dc] ss:$24 sps:$4 sm:$0xff]  }
 0x16e   : > { %2930 = vmatpush1.bf16.msra.mxu0 %v3976_v47  ;;  %2856 = vmatprep.subr.bf16.mxu1 %v3981_v48  ;;  %v4074_v47 = vld [vmem:[%s4831_s9 + $0x5e4] ss:$24 sps:$4 sm:$0xff]   ;;  %v4069_v48 = vld [vmem:[%s4831_s9 + $0x8d8] ss:$24 sps:$4 sm:$0xff]  }
 0x16f   : > { %2942 = vmatprep.subr.bf16.mxu0 %v3984_v49  ;;  %v4072_v49 = vld [vmem:[%s4831_s9 + $0x5e0] ss:$24 sps:$4 sm:$0xff]  }
 0x170   : > { %2846 = vmatmul.mubr.bf16.vlgmr.msra.gmra.mrb[4].mxu1 %v4907_v39  ;;  %v4123_v39 = vld [vmem:[%s5204_s0 + $0xc] ss:$24 sps:$4 sm:$0xff]  }
 0x171   : > { %2932 = vmatmul.mubr.bf16.vlgmr.msra.gmra.mrb[4].mxu0 %v4902_v38  ;;  %2857 = vmatpush1.bf16.msra.mxu1 %v3979_v50  ;;  %v3991_v38 = vld [vmem:[%s4831_s9 + $0x668] ss:$24 sps:$4 sm:$0xff]   ;;  %v4077_v50 = vld [vmem:[%s4831_s9 + $0x614] ss:$24 sps:$4 sm:$0xff]  }
 0x172   : > { %2943 = vmatpush1.bf16.msra.mxu0 %v3982_v51  ;;  %2858 = vmatprep.subr.bf16.mxu1 %v3987_v52  ;;  %v4075_v51 = vld [vmem:[%s4831_s9 + $0x610] ss:$24 sps:$4 sm:$0xff]   ;;  %v4080_v52 = vld [vmem:[%s4831_s9 + $0x644] ss:$24 sps:$4 sm:$0xff]  }
 0x173   : > { %2944 = vmatprep.subr.bf16.mxu0 %v3990_v53  ;;  %2888 = vmatprep.mubr.bf16.mxu1 %v4939_v0  ;;  %v3997_v0 = vld [vmem:[%s4831_s9 + $0x698] ss:$24 sps:$4 sm:$0xff]  }
 0x174   : > { %2974 = vmatprep.mubr.bf16.mxu0 %v4123_v39  ;;  %v4124_v53 = vld [vmem:[%s5204_s0 + $0x8] ss:$24 sps:$4 sm:$0xff]   ;;  %v4086_v39 = vld [vmem:[%s4831_s9 + $0x6a4] ss:$24 sps:$4 sm:$0xff]  }
 0x175   : > { %2859 = vmatpush1.bf16.msra.mxu1 %v3985_v54  ;;  %v4078_v54 = vld [vmem:[%s4831_s9 + $0x640] ss:$24 sps:$4 sm:$0xff]  }
 0x176   : > { %2945 = vmatpush1.bf16.msra.mxu0 %v3988_v55  ;;  %2860 = vmatprep.subr.bf16.mxu1 %v3993_v56  ;;  %v4125_v55 = vld [vmem:[%s5204_s0 + $0x14] ss:$24 sps:$4 sm:$0xff]  }
 0x177   : > { %2946 = vmatprep.subr.bf16.mxu0 %v3996_v57  ;;  %v4083_v56 = vld [vmem:[%s4831_s9 + $0x674] ss:$24 sps:$4 sm:$0xff]   ;;  %v4081_v57 = vld [vmem:[%s4831_s9 + $0x670] ss:$24 sps:$4 sm:$0xff]  }
 0x179   : > { %2861 = vmatpush1.bf16.msra.mxu1 %v3991_v38  ;;  %v4084_v38 = vld [vmem:[%s4831_s9 + $0x6a0] ss:$24 sps:$4 sm:$0xff]  }
 0x17a   : > { %2947 = vmatpush1.bf16.msra.mxu0 %v3994_v58  ;;  %2862 = vmatprep.subr.bf16.mxu1 %v3999_v33  ;;  %v4089_v58 = vld [vmem:[%s4831_s9 + $0x6d4] ss:$24 sps:$4 sm:$0xff]   ;;  %v4087_v33 = vld [vmem:[%s4831_s9 + $0x6d0] ss:$24 sps:$4 sm:$0xff]  }
 0x17b   : > { %2948 = vmatprep.subr.bf16.mxu0 %v4002_v32  ;;  %v4092_v32 = vld [vmem:[%s4831_s9 + $0x704] ss:$24 sps:$4 sm:$0xff]  }
 0x17d   : > { %2863 = vmatpush1.bf16.msra.mxu1 %v3997_v0  ;;  %v4090_v0 = vld [vmem:[%s4831_s9 + $0x700] ss:$24 sps:$4 sm:$0xff]  }
 0x17e   : > { %2949 = vmatpush1.bf16.msra.mxu0 %v4000_v59  ;;  %2864 = vmatprep.subr.bf16.mxu1 %v4005_v60  ;;  %v4095_v59 = vld [vmem:[%s4831_s9 + $0x734] ss:$24 sps:$4 sm:$0xff]  }
 0x17f   : > { %2950 = vmatprep.subr.bf16.mxu0 %v4008_v61 }
 0x181   : > { %2865 = vmatpush1.bf16.msra.mxu1 %v4003_v62  ;;  %v4093_v62 = vld [vmem:[%s4831_s9 + $0x730] ss:$24 sps:$4 sm:$0xff]  }
 0x182   : > { %2951 = vmatpush1.bf16.msra.mxu0 %v4006_v63  ;;  %2866 = vmatprep.subr.bf16.mxu1 %v4011_v1  ;;  %v4098_v1 = vld [vmem:[%s4831_s9 + $0x764] ss:$24 sps:$4 sm:$0xff]  }
 0x183   : > { %2952 = vmatprep.subr.bf16.mxu0 %v4014_v2 }
 0x185   : > { %2867 = vmatpush1.bf16.msra.mxu1 %v4009_v3  ;;  %v4096_v3 = vld [vmem:[%s4831_s9 + $0x760] ss:$24 sps:$4 sm:$0xff]  }
 0x186   : > { %2953 = vmatpush1.bf16.msra.mxu0 %v4012_v4  ;;  %2868 = vmatprep.subr.bf16.mxu1 %v4017_v5  ;;  %v4101_v4 = vld [vmem:[%s4831_s9 + $0x794] ss:$24 sps:$4 sm:$0xff]   ;;  %v4099_v5 = vld [vmem:[%s4831_s9 + $0x790] ss:$24 sps:$4 sm:$0xff]  }
 0x187   : > { %2954 = vmatprep.subr.bf16.mxu0 %v4020_v6  ;;  %v4104_v6 = vld [vmem:[%s4831_s9 + $0x7c4] ss:$24 sps:$4 sm:$0xff]  }
 0x189   : > { %2869 = vmatpush1.bf16.msra.mxu1 %v4015_v7  ;;  %v4102_v7 = vld [vmem:[%s4831_s9 + $0x7c0] ss:$24 sps:$4 sm:$0xff]  }
 0x18a   : > { %2955 = vmatpush1.bf16.msra.mxu0 %v4018_v8  ;;  %2870 = vmatprep.subr.bf16.mxu1 %v4023_v9  ;;  %v4107_v8 = vld [vmem:[%s4831_s9 + $0x7f4] ss:$24 sps:$4 sm:$0xff]   ;;  %v4105_v9 = vld [vmem:[%s4831_s9 + $0x7f0] ss:$24 sps:$4 sm:$0xff]  }
 0x18b   : > { %2956 = vmatprep.subr.bf16.mxu0 %v4026_v10  ;;  %v4110_v10 = vld [vmem:[%s4831_s9 + $0x824] ss:$24 sps:$4 sm:$0xff]  }
 0x18d   : > { %2871 = vmatpush1.bf16.msra.mxu1 %v4021_v11  ;;  %v4108_v11 = vld [vmem:[%s4831_s9 + $0x820] ss:$24 sps:$4 sm:$0xff]  }
 0x18e   : > { %2957 = vmatpush1.bf16.msra.mxu0 %v4024_v12  ;;  %2872 = vmatprep.subr.bf16.mxu1 %v4029_v13  ;;  %v4113_v12 = vld [vmem:[%s4831_s9 + $0x854] ss:$24 sps:$4 sm:$0xff]   ;;  %v4111_v13 = vld [vmem:[%s4831_s9 + $0x850] ss:$24 sps:$4 sm:$0xff]  }
 0x18f   : > { %2958 = vmatprep.subr.bf16.mxu0 %v4032_v14  ;;  %v4116_v14 = vld [vmem:[%s4831_s9 + $0x884] ss:$24 sps:$4 sm:$0xff]  }
 0x191   : > { %2873 = vmatpush1.bf16.msra.mxu1 %v4027_v15  ;;  %v4114_v15 = vld [vmem:[%s4831_s9 + $0x880] ss:$24 sps:$4 sm:$0xff]  }
 0x192   : > { %2959 = vmatpush1.bf16.msra.mxu0 %v4030_v16  ;;  %2874 = vmatprep.subr.bf16.mxu1 %v4035_v17  ;;  %v4119_v16 = vld [vmem:[%s4831_s9 + $0x8b4] ss:$24 sps:$4 sm:$0xff]   ;;  %v4117_v17 = vld [vmem:[%s4831_s9 + $0x8b0] ss:$24 sps:$4 sm:$0xff]  }
 0x193   : > { %2960 = vmatprep.subr.bf16.mxu0 %v4038_v18  ;;  %v4122_v18 = vld [vmem:[%s4831_s9 + $0x8e4] ss:$24 sps:$4 sm:$0xff]  }
 0x195   : > { %2875 = vmatpush1.bf16.msra.mxu1 %v4033_v19  ;;  %v4120_v19 = vld [vmem:[%s4831_s9 + $0x8e0] ss:$24 sps:$4 sm:$0xff]   ;;  %s3641_s9 = smul.u32 48, %s792_s30 }
 0x196   : > { %2961 = vmatpush1.bf16.msra.mxu0 %v4036_v20  ;;  %2876 = vmatprep.subr.bf16.mxu1 %v4041_v21  ;;  %v3069_v20 = vlaneseq }
 0x197   : > { %2962 = vmatprep.subr.bf16.mxu0 %v4044_v22  ;;  %s5169_s11 = scalar_lea.vmem [#allocation4], %s3641_s9 }
 0x198   : > { %v3070_v21 = vshrl.u32 %v3069_v20, 7 }
 0x199   : > { %2877 = vmatpush1.bf16.msra.mxu1 %v4039_v23  ;;  %v3067_v23 = vld [vmem:[%s845_s10] sm:$0x3f] }
 0x19a   : > { %2963 = vmatpush1.bf16.msra.mxu0 %v4042_v24  ;;  %2878 = vmatprep.subr.bf16.mxu1 %v4047_v25  ;;  %v3071_v22 = vsub.s32 0, %v3070_v21  ;;  %v3075_v24 = vsub.s32 1, %v3070_v21 }
 0x19b   : > { %2964 = vmatprep.subr.bf16.mxu0 %v4050_v26 }
 0x19c   : > { %v3072_v25 = vrot.slane %v3067_v23, %v3071_v22 }
 0x19d   : > { %2879 = vmatpush1.bf16.msra.mxu1 %v4045_v27  ;;  %v3076_v27 = vrot.slane %v3067_v23, %v3075_v24 }
 0x19e   : > { %2965 = vmatpush1.bf16.msra.mxu0 %v4048_v28  ;;  %2880 = vmatprep.subr.bf16.mxu1 %v4053_v29 }
 0x19f   : > { %2966 = vmatprep.subr.bf16.mxu0 %v4056_v30 }
 0x1a1   : > { %2881 = vmatpush1.bf16.msra.mxu1 %v4051_v31 }
 0x1a2   : > { %2967 = vmatpush1.bf16.msra.mxu0 %v4054_v34  ;;  %2882 = vmatprep.subr.bf16.mxu1 %v4059_v35 }
 0x1a3   : > { %2968 = vmatprep.subr.bf16.mxu0 %v4062_v36 }
 0x1a5   : > { %2883 = vmatpush1.bf16.msra.mxu1 %v4057_v37 }
 0x1a6   : > { %2969 = vmatpush1.bf16.msra.mxu0 %v4060_v40  ;;  %2884 = vmatprep.subr.bf16.mxu1 %v4065_v41 }
 0x1a7   : > { %2970 = vmatprep.subr.bf16.mxu0 %v4068_v42 }
 0x1a9   : > { %2885 = vmatpush1.bf16.msra.mxu1 %v4063_v43 }
 0x1aa   : > { %2971 = vmatpush1.bf16.msra.mxu0 %v4066_v44  ;;  %2886 = vmatprep.subr.bf16.mxu1 %v4071_v46  ;;  %v3079_v44 = vsub.s32 2, %v3070_v21  ;;  %v3083_v46 = vsub.s32 3, %v3070_v21 }
 0x1ab   : > { %2972 = vmatprep.subr.bf16.mxu0 %v4074_v47 }
 0x1ac   : > { %v3080_v47 = vrot.slane %v3067_v23, %v3079_v44 }
 0x1ad   : > { %2887 = vmatpush1.bf16.msra.mxu1 %v4069_v48  ;;  %v3084_v48 = vrot.slane %v3067_v23, %v3083_v46 }
 0x1ae   : > { %2973 = vmatpush1.bf16.msra.mxu0 %v4072_v49 }
 0x1af   : > { %2985 = vmatprep.subr.bf16.mxu0 %v4077_v50 }
 0x1b0   : > { %2889 = vmatmul.mubr.bf16.vlgmr.msra.gmra.mrb[4].mxu1 %v4985_v45 }
 0x1b1   : > { %2975 = vmatmul.mubr.bf16.vlgmr.msra.gmra.mrb[4].mxu0 %v4124_v53 }
 0x1b2   : > { %2986 = vmatpush1.bf16.msra.mxu0 %v4075_v51  ;;  %3017 = vmatprep.mubr.bf16.mxu0 %v4125_v55 }
 0x1b3   : > { %2987 = vmatprep.subr.bf16.mxu0 %v4080_v52 }
 0x1b6   : > { %2988 = vmatpush1.bf16.msra.mxu0 %v4078_v54 }
 0x1b7   : > { %2989 = vmatprep.subr.bf16.mxu0 %v4083_v56 }
 0x1ba   : > { %2990 = vmatpush1.bf16.msra.mxu0 %v4081_v57 }
 0x1bb   : > { %2991 = vmatprep.subr.bf16.mxu0 %v4086_v39 }
 0x1be   : > { %2992 = vmatpush1.bf16.msra.mxu0 %v4084_v38  ;;  %v3087_v38 = vsub.s32 4, %v3070_v21 }
 0x1bf   : > { %2993 = vmatprep.subr.bf16.mxu0 %v4089_v58  ;;  %v3091_v58 = vsub.s32 5, %v3070_v21 }
 0x1c2   : > { %2994 = vmatpush1.bf16.msra.mxu0 %v4087_v33  ;;  %v3088_v33 = vrot.slane %v3067_v23, %v3087_v38 }
 0x1c3   : > { %2995 = vmatprep.subr.bf16.mxu0 %v4092_v32  ;;  %v2675_v60 = vpop.f32.mrb[0].mxu1  ;;  %v3092_v32 = vrot.slane %v3067_v23, %v3091_v58 }
 0x1c4   : > { %v2677_v61 = vpop.f32.mrb[1].mxu1 }
 0x1c5   : > { %v2679_v63 = vpop.f32.mrb[2].mxu1 }
 0x1c6   : > { %2996 = vmatpush1.bf16.msra.mxu0 %v4090_v0  ;;  %v2681_v2 = vpop.f32.mrb[3].mxu1 }
 0x1c7   : > { %2997 = vmatprep.subr.bf16.mxu0 %v4095_v59 }
 0x1ca   : > { %2998 = vmatpush1.bf16.msra.mxu0 %v4093_v62 }
 0x1cb   : > { %2999 = vmatprep.subr.bf16.mxu0 %v4098_v1 }
 0x1ce   : > { %3000 = vmatpush1.bf16.msra.mxu0 %v4096_v3 }
 0x1cf   : > { %3001 = vmatprep.subr.bf16.mxu0 %v4101_v4 }
 0x1d2   : > { %3002 = vmatpush1.bf16.msra.mxu0 %v4099_v5 }
 0x1d3   : > { %3003 = vmatprep.subr.bf16.mxu0 %v4104_v6 }
 0x1d6   : > { %3004 = vmatpush1.bf16.msra.mxu0 %v4102_v7 }
 0x1d7   : > { %3005 = vmatprep.subr.bf16.mxu0 %v4107_v8 }
 0x1da   : > { %3006 = vmatpush1.bf16.msra.mxu0 %v4105_v9 }
 0x1db   : > { %3007 = vmatprep.subr.bf16.mxu0 %v4110_v10 }
 0x1de   : > { %3008 = vmatpush1.bf16.msra.mxu0 %v4108_v11 }
 0x1df   : > { %3009 = vmatprep.subr.bf16.mxu0 %v4113_v12 }
 0x1e2   : > { %3010 = vmatpush1.bf16.msra.mxu0 %v4111_v13 }
 0x1e3   : > { %3011 = vmatprep.subr.bf16.mxu0 %v4116_v14 }
 0x1e6   : > { %3012 = vmatpush1.bf16.msra.mxu0 %v4114_v15 }
 0x1e7   : > { %3013 = vmatprep.subr.bf16.mxu0 %v4119_v16 }
 0x1ea   : > { %3014 = vmatpush1.bf16.msra.mxu0 %v4117_v17 }
 0x1eb   : > { %3015 = vmatprep.subr.bf16.mxu0 %v4122_v18 }
 0x1ee   : > { %3016 = vmatpush1.bf16.msra.mxu0 %v4120_v19 }
 0x1f1   : > { %3018 = vmatmul.mubr.bf16.vlgmr.msra.gmra.mrb[4].mxu0 %v4985_v45 }
 0x204   : > { %v2761_v26 = vpop.f32.mrb[0].mxu0 }
 0x205   : > { %v3615_v28 = vadd.f32 %v2761_v26, %v2675_v60  ;;  %v2763_v29 = vpop.f32.mrb[1].mxu0 }
 0x206   : > { %v3616_v45 = vadd.f32 %v2763_v29, %v2677_v61  ;;  %v2765_v30 = vpop.f32.mrb[2].mxu0 }
 0x207   : > { %v3099_v31 = vadd.f32 %v3615_v28, %v3072_v25  ;;  %v3617_v34 = vadd.f32 %v2765_v30, %v2679_v63  ;;  %v2767_v35 = vpop.f32.mrb[3].mxu0 }
 0x208   : > { %v3100_v36 = vadd.f32 %v3616_v45, %v3076_v27  ;;  %v3618_v37 = vadd.f32 %v2767_v35, %v2681_v2 }
 0x209   : > { %v3105_v40 = vadd.f32 %v3617_v34, %v3072_v25 }
 0x20a   : > { %v3608_v41 = vpack.c.bf16 %v3100_v36, %v3099_v31  ;;  %v3106_v42 = vadd.f32 %v3618_v37, %v3076_v27 }
 0x20c   : > { %3147 = vst [vmem:[%s5169_s11] sm:$0xff] %v3608_v41  ;;  %v3611_v43 = vpack.c.bf16 %v3106_v42, %v3105_v40 }
 0x20e   : > { %3150 = vst [vmem:[%s5169_s11 + $0x18] sm:$0xff] %v3611_v43 }
 0x213   : > { %v3178_v5 = vld [vmem:[%s5169_s11] sm:$0xff] (%p4221_p6) }
 0x214   : > { %3179 = vst [vmem:[%s3165_s19] sm:$0xff] (%p4221_p6), %v3178_v5 }
 0x215   : > { %v3184_v8 = vld [vmem:[%s5169_s11 + $0x18] sm:$0xff] (%p4221_p6) }
 0x216   : > { %3185 = vst [vmem:[%s3165_s19 + $0x48] sm:$0xff] (%p4221_p6), %v3184_v8 }
 0x283   : > { %v2890_v49 = vpop.f32.mrb[4].mxu1 }
 0x284   : > { %v3101_v50 = vadd.f32 %v3080_v47, %v2890_v49  ;;  %v2892_v51 = vpop.f32.mrb[5].mxu1 }
 0x285   : > { %v3102_v52 = vadd.f32 %v3084_v48, %v2892_v51  ;;  %v2894_v53 = vpop.f32.mrb[6].mxu1 }
 0x286   : > { %v3107_v54 = vadd.f32 %v3080_v47, %v2894_v53  ;;  %v2896_v55 = vpop.f32.mrb[7].mxu1 }
 0x287   : > { %v3609_v56 = vpack.c.bf16 %v3102_v52, %v3101_v50  ;;  %v3108_v57 = vadd.f32 %v3084_v48, %v2896_v55 }
 0x289   : > { %3148 = vst [vmem:[%s5169_s11 + $0x8] sm:$0xff] %v3609_v56  ;;  %v3612_v39 = vpack.c.bf16 %v3108_v57, %v3107_v54 }
 0x28b   : > { %3151 = vst [vmem:[%s5169_s11 + $0x20] sm:$0xff] %v3612_v39 }
 0x290   : > { %v3180_v6 = vld [vmem:[%s5169_s11 + $0x8] sm:$0xff] (%p4221_p6) }
 0x291   : > { %3181 = vst [vmem:[%s3165_s19 + $0x8] sm:$0xff] (%p4221_p6), %v3180_v6 }
 0x292   : > { %v3186_v9 = vld [vmem:[%s5169_s11 + $0x20] sm:$0xff] (%p4221_p6) }
 0x293   : > { %3187 = vst [vmem:[%s3165_s19 + $0x50] sm:$0xff] (%p4221_p6), %v3186_v9 }
 0x2c4   : > { %v3019_v0 = vpop.f32.mrb[4].mxu0 }
 0x2c5   : > { %v3103_v59 = vadd.f32 %v3088_v33, %v3019_v0  ;;  %v3021_v60 = vpop.f32.mrb[5].mxu0 }
 0x2c6   : > { %v3104_v61 = vadd.f32 %v3092_v32, %v3021_v60  ;;  %v3023_v62 = vpop.f32.mrb[6].mxu0  ;;  %3159 = sbr.rel (!%p4221_p6) target bundleno = 725 (0x2d5), region = 67 }
 0x2c7   : > { %v3109_v63 = vadd.f32 %v3088_v33, %v3023_v62  ;;  %v3025_v1 = vpop.f32.mrb[7].mxu0 }
 0x2c8   : > { %v3610_v2 = vpack.c.bf16 %v3104_v61, %v3103_v59  ;;  %v3110_v3 = vadd.f32 %v3092_v32, %v3025_v1 }
 0x2ca   : > { %3149 = vst [vmem:[%s5169_s11 + $0x10] sm:$0xff] %v3610_v2  ;;  %v3613_v4 = vpack.c.bf16 %v3110_v3, %v3109_v63 }
 0x2cc   : > { %3152 = vst [vmem:[%s5169_s11 + $0x28] sm:$0xff] %v3613_v4 }
 0x2d1   : > { %v3182_v7 = vld [vmem:[%s5169_s11 + $0x10] sm:$0xff] }
 0x2d2   : > { %3183 = vst [vmem:[%s3165_s19 + $0x10] sm:$0xff] %v3182_v7 }
 0x2d3   : > { %v3188_v10 = vld [vmem:[%s5169_s11 + $0x28] sm:$0xff] }
 0x2d4   : > { %3189 = vst [vmem:[%s3165_s19 + $0x58] sm:$0xff] %v3188_v10 }
 0x2d5 PF: > { %s13_s16 = sadd.s32 1, %s4164_s16   ;;  %s5209_s12 = smov %s4152_s13 }
 0x2d6   : > { %p10_p12 = scmp.ge.s32.totalorder %s13_s16, 5   ;;  %s5210_s13 = smov %s4226_s22 }
 0x2d7   : > { %s5211_s14 = smov %s4160_s15  ;;  %s5212_s15 = smov %s5214_s17 }
 0x2d8   :  { %12 = sbr.rel (!%p10_p12) target bundleno = 3 (0x3), region = 127 }

// kernel: model_forward.171
= control target key start
LH: loop header
LB: loop body
LE: loop exit
PB: predicated region body
PF: predicated region fallthrough
CT: control target
= control target key end

     0   :  { %s959_s1 = inlined_call_operand.vmem [shape: bf16[768,128], index: 1, kind: input, shape index: {}]   ;;  %s960_s0 = inlined_call_operand.vmem [shape: bf16[16,768], index: 0, kind: input, shape index: {}]   ;;  %s961_s2 = inlined_call_operand.vmem [shape: f32[1,128], index: 2, kind: input, shape index: {}]   ;;  %s962_s3 = inlined_call_operand.vmem [shape: f32[16,128], index: 3, kind: output, shape index: {}]  }
   0x1   :  { %v711_v0 = vld [vmem:[%s959_s1 + $0x40] sm:$0xff]   ;;  %v715_v4 = vld [vmem:[%s959_s1 + $0x48] sm:$0xff]   ;;  %v719_v8 = vld [vmem:[%s959_s1 + $0x50] sm:$0xff]  }
   0x2   :  { %v712_v1 = vld [vmem:[%s959_s1 + $0xc0] sm:$0xff]   ;;  %645 = vmatprep.subr.bf16.mxu0 %v711_v0  ;;  %v716_v5 = vld [vmem:[%s959_s1 + $0xc8] sm:$0xff]   ;;  %v720_v9 = vld [vmem:[%s959_s1 + $0xd0] sm:$0xff]  }
   0x3   :  { %v713_v2 = vld [vmem:[%s959_s1] sm:$0xff]   ;;  %667 = vmatprep.subr.bf16.mxu1 %v712_v1  ;;  %v717_v6 = vld [vmem:[%s959_s1 + $0x8] sm:$0xff]   ;;  %v721_v10 = vld [vmem:[%s959_s1 + $0x10] sm:$0xff]  }
   0x4   :  { %v714_v3 = vld [vmem:[%s959_s1 + $0x80] sm:$0xff]   ;;  %646 = vmatpush3.bf16.msra.mxu0 %v713_v2  ;;  %v718_v7 = vld [vmem:[%s959_s1 + $0x88] sm:$0xff]   ;;  %v722_v11 = vld [vmem:[%s959_s1 + $0x90] sm:$0xff]  }
   0x5   :  { %668 = vmatpush3.bf16.msra.mxu1 %v714_v3  ;;  %647 = vmatprep.subr.bf16.mxu0 %v715_v4  ;;  %v723_v12 = vld [vmem:[%s959_s1 + $0x58] sm:$0xff]   ;;  %v727_v16 = vld [vmem:[%s959_s1 + $0x60] sm:$0xff]   ;;  %v731_v20 = vld [vmem:[%s959_s1 + $0x68] sm:$0xff]  }
   0x6   :  { %669 = vmatprep.subr.bf16.mxu1 %v716_v5  ;;  %v724_v13 = vld [vmem:[%s959_s1 + $0xd8] sm:$0xff]   ;;  %v728_v17 = vld [vmem:[%s959_s1 + $0xe0] sm:$0xff]   ;;  %v732_v21 = vld [vmem:[%s959_s1 + $0xe8] sm:$0xff]  }
   0x7   :  { %v725_v14 = vld [vmem:[%s959_s1 + $0x18] sm:$0xff]   ;;  %v729_v18 = vld [vmem:[%s959_s1 + $0x20] sm:$0xff]   ;;  %v733_v22 = vld [vmem:[%s959_s1 + $0x28] sm:$0xff]  }
   0x8   :  { %648 = vmatpush3.bf16.msra.mxu0 %v717_v6  ;;  %v726_v15 = vld [vmem:[%s959_s1 + $0x98] sm:$0xff]   ;;  %v730_v19 = vld [vmem:[%s959_s1 + $0xa0] sm:$0xff]   ;;  %v734_v23 = vld [vmem:[%s959_s1 + $0xa8] sm:$0xff]  }
   0x9   :  { %670 = vmatpush3.bf16.msra.mxu1 %v718_v7  ;;  %649 = vmatprep.subr.bf16.mxu0 %v719_v8  ;;  %v735_v24 = vld [vmem:[%s959_s1 + $0x70] sm:$0xff]   ;;  %v739_v28 = vld [vmem:[%s959_s1 + $0x78] sm:$0xff]   ;;  %v746_v34 = vld [vmem:[%s960_s0 + $0x8] ss:$24 sps:$4 sm:$0xff]  }
   0xa   :  { %671 = vmatprep.subr.bf16.mxu1 %v720_v9  ;;  %v736_v25 = vld [vmem:[%s959_s1 + $0xf0] sm:$0xff]   ;;  %v740_v29 = vld [vmem:[%s959_s1 + $0xf8] sm:$0xff]   ;;  %v748_v35 = vld [vmem:[%s960_s0 + $0xc] ss:$24 sps:$4 sm:$0xff]  }
   0xb   :  { %v737_v26 = vld [vmem:[%s959_s1 + $0x30] sm:$0xff]   ;;  %v741_v30 = vld [vmem:[%s959_s1 + $0x38] sm:$0xff]   ;;  %v749_v36 = vld [vmem:[%s959_s1 + $0x140] sm:$0xff]   ;;  %516 = vmatprep.mubr.bf16.mxu1 %v748_v35 }
   0xc   :  { %650 = vmatpush3.bf16.msra.mxu0 %v721_v10  ;;  %v738_v27 = vld [vmem:[%s959_s1 + $0xb0] sm:$0xff]   ;;  %v742_v31 = vld [vmem:[%s959_s1 + $0xb8] sm:$0xff]   ;;  %v750_v37 = vld [vmem:[%s959_s1 + $0x100] sm:$0xff]  }
   0xd   :  { %672 = vmatpush3.bf16.msra.mxu1 %v722_v11  ;;  %651 = vmatprep.subr.bf16.mxu0 %v723_v12  ;;  %v743_v32 = vld [vmem:[%s960_s0] ss:$24 sps:$4 sm:$0xff]   ;;  %v745_v33 = vld [vmem:[%s960_s0 + $0x4] ss:$24 sps:$4 sm:$0xff]   ;;  %v751_v38 = vld [vmem:[%s959_s1 + $0x148] sm:$0xff]  }
   0xe   :  { %673 = vmatprep.subr.bf16.mxu1 %v724_v13  ;;  %475 = vmatprep.mubr.bf16.mxu0 %v745_v33  ;;  %v752_v39 = vld [vmem:[%s959_s1 + $0x108] sm:$0xff]   ;;  %v753_v40 = vld [vmem:[%s959_s1 + $0x150] sm:$0xff]   ;;  %v755_v42 = vld [vmem:[%s959_s1 + $0x158] sm:$0xff]  }
   0xf   :  { %v754_v41 = vld [vmem:[%s959_s1 + $0x110] sm:$0xff]   ;;  %v756_v43 = vld [vmem:[%s959_s1 + $0x118] sm:$0xff]   ;;  %v757_v44 = vld [vmem:[%s959_s1 + $0x160] sm:$0xff]  }
  0x10   :  { %652 = vmatpush3.bf16.msra.mxu0 %v725_v14  ;;  %v758_v45 = vld [vmem:[%s959_s1 + $0x120] sm:$0xff]   ;;  %v759_v46 = vld [vmem:[%s959_s1 + $0x168] sm:$0xff]   ;;  %v761_v49 = vld [vmem:[%s959_s1 + $0x170] sm:$0xff]  }
  0x11   :  { %674 = vmatpush3.bf16.msra.mxu1 %v726_v15  ;;  %653 = vmatprep.subr.bf16.mxu0 %v727_v16  ;;  %v767_v47 = vld [vmem:[%s960_s0 + $0x14] ss:$24 sps:$4 sm:$0xff]   ;;  %v763_v51 = vld [vmem:[%s959_s1 + $0x178] sm:$0xff]   ;;  %v765_v53 = vld [vmem:[%s960_s0 + $0x10] ss:$24 sps:$4 sm:$0xff]  }
  0x12   :  { %675 = vmatprep.subr.bf16.mxu1 %v728_v17  ;;  %v760_v48 = vld [vmem:[%s959_s1 + $0x128] sm:$0xff]   ;;  %v762_v50 = vld [vmem:[%s959_s1 + $0x130] sm:$0xff]   ;;  %v764_v52 = vld [vmem:[%s959_s1 + $0x138] sm:$0xff]  }
  0x13   :  { %v644_v8 = vld [vmem:[%s961_s2] ss:$0 sm:$0xff] }
  0x14   :  { %654 = vmatpush3.bf16.msra.mxu0 %v729_v18 }
  0x15   :  { %676 = vmatpush3.bf16.msra.mxu1 %v730_v19  ;;  %655 = vmatprep.subr.bf16.mxu0 %v731_v20 }
  0x16   :  { %677 = vmatprep.subr.bf16.mxu1 %v732_v21 }
  0x18   :  { %656 = vmatpush3.bf16.msra.mxu0 %v733_v22 }
  0x19   :  { %678 = vmatpush3.bf16.msra.mxu1 %v734_v23  ;;  %657 = vmatprep.subr.bf16.mxu0 %v735_v24 }
  0x1a   :  { %679 = vmatprep.subr.bf16.mxu1 %v736_v25 }
  0x1c   :  { %658 = vmatpush3.bf16.msra.mxu0 %v737_v26 }
  0x1d   :  { %680 = vmatpush3.bf16.msra.mxu1 %v738_v27  ;;  %659 = vmatprep.subr.bf16.mxu0 %v739_v28 }
  0x1e   :  { %681 = vmatprep.subr.bf16.mxu1 %v740_v29 }
  0x20   :  { %660 = vmatpush3.bf16.msra.mxu0 %v741_v30 }
  0x21   :  { %682 = vmatpush3.bf16.msra.mxu1 %v742_v31  ;;  %689 = vmatprep.subr.bf16.mxu0 %v749_v36 }
  0x23   :  { %476 = vmatmul.mubr.bf16.vlgmr.msra.gmra.mrb[0].mxu0 %v743_v32 }
  0x24   :  { %517 = vmatmul.mubr.bf16.vlgmr.msra.gmra.mrb[0].mxu1 %v746_v34  ;;  %690 = vmatpush3.bf16.msra.mxu0 %v750_v37 }
  0x25   :  { %691 = vmatprep.subr.bf16.mxu0 %v751_v38  ;;  %557 = vmatprep.mubr.bf16.mxu0 %v767_v47 }
  0x28   :  { %692 = vmatpush3.bf16.msra.mxu0 %v752_v39 }
  0x29   :  { %693 = vmatprep.subr.bf16.mxu0 %v753_v40 }
  0x2c   :  { %694 = vmatpush3.bf16.msra.mxu0 %v754_v41 }
  0x2d   :  { %695 = vmatprep.subr.bf16.mxu0 %v755_v42 }
  0x30   :  { %696 = vmatpush3.bf16.msra.mxu0 %v756_v43 }
  0x31   :  { %697 = vmatprep.subr.bf16.mxu0 %v757_v44 }
  0x34   :  { %698 = vmatpush3.bf16.msra.mxu0 %v758_v45 }
  0x35   :  { %699 = vmatprep.subr.bf16.mxu0 %v759_v46 }
  0x38   :  { %700 = vmatpush3.bf16.msra.mxu0 %v760_v48 }
  0x39   :  { %701 = vmatprep.subr.bf16.mxu0 %v761_v49 }
  0x3c   :  { %702 = vmatpush3.bf16.msra.mxu0 %v762_v50 }
  0x3d   :  { %703 = vmatprep.subr.bf16.mxu0 %v763_v51 }
  0x40   :  { %704 = vmatpush3.bf16.msra.mxu0 %v764_v52 }
  0x43   :  { %558 = vmatmul.mubr.bf16.vlgmr.msra.gmra.mrb[4].mxu0 %v765_v53 }
  0xf6   :  { %v661_v54 = vpop.f32.mrb[0].mxu0 }
  0xf7   :  { %v683_v55 = vpop.f32.mrb[0].mxu1  ;;  %v662_v56 = vpop.f32.mrb[1].mxu0 }
  0xf8   :  { %v663_v57 = vadd.f32 %v662_v56, %v661_v54  ;;  %v684_v58 = vpop.f32.mrb[1].mxu1  ;;  %v664_v59 = vpop.f32.mrb[2].mxu0 }
  0xf9   :  { %v685_v60 = vadd.f32 %v684_v58, %v683_v55  ;;  %v686_v61 = vpop.f32.mrb[2].mxu1  ;;  %v665_v62 = vpop.f32.mrb[3].mxu0 }
  0xfa   :  { %v666_v63 = vadd.f32 %v665_v62, %v664_v59  ;;  %v687_v0 = vpop.f32.mrb[3].mxu1 }
  0xfb   :  { %v519_v1 = vadd.f32 %v685_v60, %v663_v57  ;;  %v688_v2 = vadd.f32 %v687_v0, %v686_v61 }
  0xfd   :  { %v522_v3 = vadd.f32 %v688_v2, %v666_v63 }
 0x116   :  { %v705_v4 = vpop.f32.mrb[4].mxu0 }
 0x117   :  { %v706_v5 = vpop.f32.mrb[5].mxu0 }
 0x118   :  { %v707_v6 = vadd.f32 %v706_v5, %v705_v4  ;;  %v708_v7 = vpop.f32.mrb[6].mxu0 }
 0x119   :  { %v709_v9 = vpop.f32.mrb[7].mxu0 }
 0x11a   :  { %v560_v10 = vadd.f32 %v707_v6, %v519_v1  ;;  %v710_v11 = vadd.f32 %v709_v9, %v708_v7 }
 0x11c   :  { %v582_v12 = vadd.f32 %v644_v8, %v560_v10  ;;  %v563_v13 = vadd.f32 %v710_v11, %v522_v3 }
 0x11e   :  { %584 = vst [vmem:[%s962_s3] sm:$0xff] %v582_v12  ;;  %v583_v14 = vadd.f32 %v644_v8, %v563_v13 }
 0x120   :  { %585 = vst [vmem:[%s962_s3 + $0x8] sm:$0xff] %v583_v14 }

</bundles_post_ra>
